<compile_context>
chip_gen: v7x
topology: tpu7x:2x2x1
jax: 0.10.0
libtpu: 0.0.40
codegen_flags: <defaults>
</compile_context>

<pallas_src>
import jax
import jax.numpy as jnp
from jax.experimental import pallas as pl
from jax.experimental.pallas import tpu as pltpu

NUM_C = 32          # number of concepts/questions
HIDDEN = 32         # hidden_dim
EMB = 32            # emb_size
HE = HIDDEN + EMB   # MLP input dim (64)
H3 = 3 * HIDDEN     # fused MLP width (96)
G4 = 4 * HIDDEN     # fused GRU gate width (128)
BATCH = 2
SEQ = 8
N_ROWS = BATCH * NUM_C
BN_EPS = 1e-5

# Row offsets inside the packed weight operand (256 rows x 128 lanes).
_R_W1 = 0                       # fc1 (h-dependent rows)        : rows   0..63
_R_W2 = 2 * HIDDEN              # fc2 block-diag (BN folded)    : rows  64..159
_R_EA = _R_W2 + H3              # erase|add                     : rows 160..191
_R_GRU = _R_EA + HIDDEN         # fused GRU gates               : rows 192..255
_R_END = _R_GRU + 2 * HIDDEN


# ---------------------------------------------------------------------------
# Pallas kernel: the whole sequence recurrence in one invocation.
# ---------------------------------------------------------------------------
def gkt_seq_kernel(sel_ref, base_ref, w_ref, b_ref, hout_ref):
  S = sel_ref.shape[0]
  dot = lambda a, b: jnp.dot(a, b, preferred_element_type=jnp.float32)

  # Weights / bias broadcasts hoisted once, reused across all timesteps.
  w1 = w_ref[_R_W1:_R_W2, 0:H3]              # (64, 96)  fc1, h-dependent rows
  w2 = w_ref[_R_W2:_R_EA, 0:H3]              # (96, 96)  block-diag fc2
  w_ea = w_ref[_R_EA:_R_GRU, 0:2 * HIDDEN]   # (32, 64)  erase|add
  w_gru = w_ref[_R_GRU:_R_END, :]            # (64, 128) fused GRU gates
  b2 = jnp.broadcast_to(b_ref[0:1, 0:H3], (N_ROWS, H3))
  bea = jnp.broadcast_to(b_ref[1:2, 0:2 * HIDDEN], (N_ROWS, 2 * HIDDEN))
  bgru = jnp.broadcast_to(b_ref[2:3, :], (N_ROWS, G4))

  def step(t, h):
    sel = sel_ref[t]                         # (64, 64) per-student selector
    base = base_ref[t]                       # (64, 128) pre1_base | side cols
    pre1_base = base[:, 0:H3]
    adj = base[:, H3 + 0:H3 + 1]
    radj = base[:, H3 + 1:H3 + 2]
    qoh = base[:, H3 + 2:H3 + 3]
    mask = base[:, H3 + 3:H3 + 4]
    eaw = base[:, H3 + 4:H3 + 5]

    # Broadcast self hidden state to every concept row of the same student.
    sb_h = dot(sel, h)                                   # (64, 32)
    # Fused fc1 of f_self / f_neighbor[0] / f_neighbor[1] (h-dependent half;
    # the ce-dependent half + b1 was precomputed in XLA as pre1_base).
    x1 = jnp.concatenate([sb_h, h], axis=1)              # (64, 64)
    h1 = jnp.maximum(dot(x1, w1) + pre1_base, 0.0)
    # Fused fc2 (block-diagonal), eval-mode BN scale folded into w2 / b2.
    feat = jnp.maximum(dot(h1, w2) + b2, 0.0)            # (64, 96)

    self_feat = feat[:, 0:HIDDEN]
    nf0 = feat[:, HIDDEN:2 * HIDDEN]
    nf1 = feat[:, 2 * HIDDEN:3 * HIDDEN]
    m = qoh * self_feat + (1.0 - qoh) * (adj * nf0 + radj * nf1)

    # Erase & add gate (erase|add fused into one 32x64 GEMM).
    ea = dot(m, w_ea) + bea
    eg = jax.nn.sigmoid(ea[:, 0:HIDDEN])
    af = jnp.tanh(ea[:, HIDDEN:2 * HIDDEN])
    m2 = m - eaw * eg * m + eaw * af

    # GRU cell: one fused dot -> [r_pre | z_pre | gi_n | gh_n] (torch order).
    x2 = jnp.concatenate([m2, h], axis=1)                # (64, 64)
    g = dot(x2, w_gru) + bgru                            # (64, 128)
    r = jax.nn.sigmoid(g[:, 0:HIDDEN])
    z = jax.nn.sigmoid(g[:, HIDDEN:2 * HIDDEN])
    n = jnp.tanh(g[:, 2 * HIDDEN:3 * HIDDEN] + r * g[:, 3 * HIDDEN:4 * HIDDEN])
    hp = (1.0 - z) * n + z * h

    h_next = mask * hp + (1.0 - mask) * h     # padded students keep old h
    hout_ref[t, :, :] = h_next
    return h_next

  h0 = jnp.zeros((N_ROWS, HIDDEN), jnp.float32)
  jax.lax.fori_loop(0, S, step, h0, unroll=True)


def gkt_seq_pallas(sel_mat, base, wpack, bpack):
  S = sel_mat.shape[0]
  return pl.pallas_call(
      gkt_seq_kernel,
      out_shape=jax.ShapeDtypeStruct((S, N_ROWS, HIDDEN), jnp.float32),
      in_specs=[
          pl.BlockSpec(memory_space=pltpu.MemorySpace.VMEM),
          pl.BlockSpec(memory_space=pltpu.MemorySpace.VMEM),
          pl.BlockSpec(memory_space=pltpu.MemorySpace.VMEM),
          pl.BlockSpec(memory_space=pltpu.MemorySpace.VMEM),
      ],
      out_specs=pl.BlockSpec(memory_space=pltpu.MemorySpace.VMEM),
  )(sel_mat, base, wpack, bpack)


# ---------------------------------------------------------------------------
# Weight packing / per-sequence glue precompute (plain JAX / XLA).
# ---------------------------------------------------------------------------
def pack_weights(params):
  (fs_w1, fs_b1, fs_w2, fs_b2, fs_s, fs_t,
   n0_w1a, n0_w1b, n0_b1, n0_w2, n0_b2, n0_s, n0_t,
   n1_w1a, n1_w1b, n1_b1, n1_w2, n1_b2, n1_s, n1_t,
   er_w, er_b, ad_w, ad_b,
   w_ir, w_hr, w_iz, w_hz, w_in, w_hn, b_r, b_z, b_in, b_hn,
   w_p, b_p) = params["kernel_weights"]
  H = HIDDEN
  Z = lambda rr, cc: jnp.zeros((rr, cc), jnp.float32)

  # fc1 of the 3 MLPs, split into h-dependent rows (kernel) and ce-dependent
  # rows (precomputed in XLA).
  w1_h = jnp.concatenate([
      jnp.concatenate([fs_w1[:H], n0_w1a[:H], n1_w1a[:H]], axis=1),  # sb_h rows
      jnp.concatenate([Z(H, H), n0_w1b[:H], n1_w1b[:H]], axis=1),    # h rows
  ], axis=0)                                                          # (64, 96)
  w1_ce_self = jnp.concatenate([fs_w1[H:], n0_w1a[H:], n1_w1a[H:]], axis=1)
  w1_ce_tmp = jnp.concatenate([Z(EMB, H), n0_w1b[H:], n1_w1b[H:]], axis=1)
  b1 = jnp.concatenate([fs_b1, n0_b1, n1_b1], axis=1)                 # (1, 96)

  # fc2 block-diagonal with eval-mode BN scale folded in (scale > 0 so
  # relu(x)*s == relu(x*s); BN shift is 0 with fresh running stats).
  w2 = jnp.zeros((H3, H3), jnp.float32)
  w2 = w2.at[0:H, 0:H].set(fs_w2 * fs_s)
  w2 = w2.at[H:2 * H, H:2 * H].set(n0_w2 * n0_s)
  w2 = w2.at[2 * H:, 2 * H:].set(n1_w2 * n1_s)
  b2 = jnp.concatenate([fs_b2 * fs_s, n0_b2 * n0_s, n1_b2 * n1_s], axis=1)

  w_ea = jnp.concatenate([er_w, ad_w], axis=1)                        # (32, 64)
  bea = jnp.concatenate([er_b, ad_b], axis=1)                         # (1, 64)

  # GRU gates: x2=[m2|h] @ w_gru -> [r_pre | z_pre | gi_n | gh_n] (128 lanes).
  w_gru = jnp.concatenate([
      jnp.concatenate([w_ir, w_iz, w_in, Z(H, H)], axis=1),
      jnp.concatenate([w_hr, w_hz, Z(H, H), w_hn], axis=1),
  ], axis=0)                                                          # (64, 128)
  bgru = jnp.concatenate([b_r, b_z, b_in, b_hn], axis=1)              # (1, 128)

  pad = lambda x: jnp.pad(x, ((0, 0), (0, 128 - x.shape[1])))
  wpack = jnp.concatenate([pad(w1_h), pad(w2), pad(w_ea), w_gru], axis=0)
  bpack = jnp.concatenate(
      [pad(b2), pad(bea), bgru, jnp.zeros((5, 128), jnp.float32)], axis=0)
  return wpack, bpack, w1_ce_self, w1_ce_tmp, b1, w_p, b_p


def precompute_glue(params, q, r, w1_ce_self, w1_ce_tmp, b1):
  B, S = q.shape
  feat_idx = q * 2 + r
  mask = (q != -1)                                        # [B, S]
  maskf = mask.astype(jnp.float32)
  qt_c = jnp.clip(q, 0, NUM_C - 1)
  xt_c = jnp.clip(feat_idx, 0, 2 * NUM_C - 1)

  res_emb = params["interaction_emb"][xt_c]               # [B, S, E]
  qoh = jax.nn.one_hot(qt_c, NUM_C, dtype=jnp.float32)    # [B, S, C]
  base_ce = maskf[..., None, None] * params["emb_c"][:NUM_C][None, None]
  selq = (qoh * maskf[..., None])[..., None]              # [B, S, C, 1]
  ce = selq * res_emb[:, :, None, :] + (1.0 - selq) * base_ce

  graph = params["graph"]
  adj = graph[qt_c]                                       # [B, S, C]
  radj = jnp.transpose(graph[:, qt_c], (1, 2, 0))         # [B, S, C]

  # Block-diagonal per-student selector: row (b,c) picks column (b, qt[b]).
  qoh_sbc = jnp.transpose(qoh, (1, 0, 2))                 # [S, B, C]
  eyeB = jnp.eye(B, dtype=jnp.float32)
  sel5 = eyeB[None, :, None, :, None] * qoh_sbc[:, None, None, :, :]
  sel_mat = jnp.broadcast_to(
      sel5, (S, B, NUM_C, B, NUM_C)).reshape(S, N_ROWS, N_ROWS)

  ce_k = jnp.transpose(ce, (1, 0, 2, 3)).reshape(S, N_ROWS, EMB)

  # h-independent half of the fused fc1, computed once (lane-dense) in XLA.
  sb_ce = jnp.einsum('sij,sje->sie', sel_mat, ce_k)                   # [S,64,32]
  pre1_base = (jnp.einsum('sie,en->sin', sb_ce, w1_ce_self) +
               jnp.einsum('sie,en->sin', ce_k, w1_ce_tmp) + b1)       # [S,64,96]

  to_rows = lambda x: jnp.transpose(x, (1, 0, 2)).reshape(S, N_ROWS)
  adj_f, radj_f, qoh_f = to_rows(adj), to_rows(radj), to_rows(qoh)
  mask_f = to_rows(jnp.broadcast_to(maskf[..., None], (B, S, NUM_C)))
  eaw_f = jnp.broadcast_to(params["ea_weight"][None, None, :],
                           (S, B, NUM_C)).reshape(S, N_ROWS)
  side = jnp.stack([adj_f, radj_f, qoh_f, mask_f, eaw_f], axis=-1)    # [S,64,5]
  base = jnp.concatenate(
      [pre1_base, side,
       jnp.zeros((S, N_ROWS, 128 - H3 - 5), jnp.float32)], axis=-1)   # [S,64,128]
  return sel_mat, base, mask


def gkt_forward_pallas(params, q, r):
  B, S = q.shape
  (wpack, bpack, w1_ce_self, w1_ce_tmp, b1, w_p, b_p) = pack_weights(params)
  sel_mat, base, mask = precompute_glue(params, q, r, w1_ce_self, w1_ce_tmp, b1)
  h_traj = gkt_seq_pallas(sel_mat, base, wpack, bpack)    # [S, N_ROWS, HIDDEN]
  h_traj = h_traj.reshape(S, B, NUM_C, HIDDEN)

  # Prediction head (HIDDEN -> 1) outside the kernel: lane-dense in XLA.
  y = jnp.einsum('sbch,hk->sbck', h_traj, w_p)[..., 0] + b_p[0, 0]    # [S,B,C]
  mask_sb = jnp.transpose(mask, (1, 0))
  y = jnp.where(mask_sb[..., None], jax.nn.sigmoid(y), y)

  qn = q[:, 1:]
  qn_c = jnp.clip(qn, 0, NUM_C - 1)
  y_bt = jnp.transpose(y[:S - 1], (1, 0, 2))                          # [B,S-1,C]
  pred = jnp.take_along_axis(y_bt, qn_c[..., None], axis=-1)[..., 0]
  return jnp.where(qn != -1, pred, 0.0)


# ---------------------------------------------------------------------------
# Pure-JAX per-step reference (unpacked weights) for numerical validation.
# ---------------------------------------------------------------------------
def _gkt_core(tmp, sb, h, adj, radj, qoh, mask, eaw,
              fs_w1, fs_b1, fs_w2, fs_b2, fs_s, fs_t,
              n0_w1a, n0_w1b, n0_b1, n0_w2, n0_b2, n0_s, n0_t,
              n1_w1a, n1_w1b, n1_b1, n1_w2, n1_b2, n1_s, n1_t,
              er_w, er_b, ad_w, ad_b,
              w_ir, w_hr, w_iz, w_hz, w_in, w_hn, b_r, b_z, b_in, b_hn,
              w_p, b_p):
  dot = lambda a, b: jnp.dot(a, b, preferred_element_type=jnp.float32)

  def mlp_tail(pre, w2, b2, s, t):
    h1 = jnp.maximum(pre, 0.0)
    h2 = jnp.maximum(dot(h1, w2) + b2, 0.0)
    return h2 * s + t                       # eval-mode BatchNorm (affine)

  self_feat = mlp_tail(dot(sb, fs_w1) + fs_b1, fs_w2, fs_b2, fs_s, fs_t)
  nf0 = mlp_tail(dot(sb, n0_w1a) + dot(tmp, n0_w1b) + n0_b1,
                 n0_w2, n0_b2, n0_s, n0_t)
  nf1 = mlp_tail(dot(sb, n1_w1a) + dot(tmp, n1_w1b) + n1_b1,
                 n1_w2, n1_b2, n1_s, n1_t)
  neigh = adj * nf0 + radj * nf1
  m = qoh * self_feat + (1.0 - qoh) * neigh

  eg = jax.nn.sigmoid(dot(m, er_w) + er_b)
  af = jnp.tanh(dot(m, ad_w) + ad_b)
  m2 = m - eaw * eg * m + eaw * af

  r = jax.nn.sigmoid(dot(m2, w_ir) + dot(h, w_hr) + b_r)
  z = jax.nn.sigmoid(dot(m2, w_iz) + dot(h, w_hz) + b_z)
  n = jnp.tanh(dot(m2, w_in) + b_in + r * (dot(h, w_hn) + b_hn))
  hp = (1.0 - z) * n + z * h

  h_next = mask * hp + (1.0 - mask) * h
  y = dot(h_next, w_p) + b_p
  y = mask * jax.nn.sigmoid(y) + (1.0 - mask) * y
  return h_next, y


def make_step_ref(params):
  weights = params["kernel_weights"]
  inter_emb = params["interaction_emb"]
  emb_c = params["emb_c"]
  graph = params["graph"]
  ea_w = params["ea_weight"]

  def step(ht, xt, qt):
    B = ht.shape[0]
    maskf = (qt != -1).astype(jnp.float32)
    xt_c = jnp.clip(xt, 0, 2 * NUM_C - 1)
    qt_c = jnp.clip(qt, 0, NUM_C - 1)

    res_emb = inter_emb[xt_c]
    base_ce = maskf[:, None, None] * jnp.broadcast_to(
        emb_c[:NUM_C][None], (B, NUM_C, EMB))
    qoh = jax.nn.one_hot(qt_c, NUM_C, dtype=jnp.float32)
    sel = (qoh * maskf[:, None])[..., None]
    ce = sel * res_emb[:, None, :] + (1.0 - sel) * base_ce
    tmp_ht = jnp.concatenate([ht, ce], axis=-1)
    self_ht = tmp_ht[jnp.arange(B), qt_c]
    selfb = jnp.broadcast_to(self_ht[:, None, :], (B, NUM_C, HE))
    adj = graph[qt_c]
    radj = graph[:, qt_c].T

    data = (
        tmp_ht.reshape(N_ROWS, HE),
        selfb.reshape(N_ROWS, HE),
        ht.reshape(N_ROWS, HIDDEN),
        adj.reshape(N_ROWS, 1),
        radj.reshape(N_ROWS, 1),
        qoh.reshape(N_ROWS, 1),
        jnp.broadcast_to(maskf[:, None], (B, NUM_C)).reshape(N_ROWS, 1),
        jnp.broadcast_to(ea_w[None, :], (B, NUM_C)).reshape(N_ROWS, 1),
    )
    h_next_f, y_f = _gkt_core(*(data + tuple(weights)))
    return h_next_f.reshape(B, NUM_C, HIDDEN), y_f.reshape(B, NUM_C)

  return jax.jit(step)


def gkt_forward_ref(params, q, r):
  step = make_step_ref(params)
  B, S = q.shape
  features = q * 2 + r
  ht = jnp.zeros((B, NUM_C, HIDDEN), jnp.float32)
  preds = []
  for i in range(S):
    ht, y = step(ht, features[:, i], q[:, i])
    if i < S - 1:
      qn = q[:, i + 1]
      qn_c = jnp.clip(qn, 0, NUM_C - 1)
      preds.append(jnp.where(qn != -1, y[jnp.arange(B), qn_c], 0.0))
  return jnp.stack(preds, axis=1)


# ---------------------------------------------------------------------------
# Deterministic parameter init (shapes follow GKT.__init__).
# ---------------------------------------------------------------------------
def init_params(key):
  keys = jax.random.split(key, 20)
  nrm = lambda k, s, std=1.0: std * jax.random.normal(k, s, jnp.float32)
  uni = lambda k, s, a: jax.random.uniform(k, s, jnp.float32, -a, a)

  params = {}
  params["interaction_emb"] = nrm(keys[0], (2 * NUM_C, EMB))
  emb_c = nrm(keys[1], (NUM_C + 1, EMB))
  params["emb_c"] = emb_c.at[NUM_C].set(0.0)       # padding_idx row
  params["graph"] = jax.random.uniform(keys[2], (NUM_C, NUM_C), jnp.float32)
  params["ea_weight"] = uni(keys[3], (NUM_C,), 1.0 / NUM_C ** 0.5)

  def mlp_params(k, in_dim):
    k1, k2 = jax.random.split(k)
    w1 = nrm(k1, (in_dim, HIDDEN), (2.0 / (in_dim + HIDDEN)) ** 0.5)
    b1 = jnp.full((1, HIDDEN), 0.1, jnp.float32)
    w2 = nrm(k2, (HIDDEN, HIDDEN), (2.0 / (2 * HIDDEN)) ** 0.5)
    b2 = jnp.full((1, HIDDEN), 0.1, jnp.float32)
    bn_s = jnp.full((1, HIDDEN), 1.0 / (1.0 + BN_EPS) ** 0.5, jnp.float32)
    bn_t = jnp.zeros((1, HIDDEN), jnp.float32)
    return (w1, b1, w2, b2, bn_s, bn_t)

  fs = mlp_params(keys[4], HE)
  fn0_full = mlp_params(keys[5], 2 * HE)
  fn1_full = mlp_params(keys[6], 2 * HE)
  split_n = lambda mp: (mp[0][:HE], mp[0][HE:], mp[1], mp[2], mp[3], mp[4], mp[5])
  fn0, fn1 = split_n(fn0_full), split_n(fn1_full)

  a = 1.0 / HIDDEN ** 0.5
  er_w, er_b = uni(keys[7], (HIDDEN, HIDDEN), a), uni(keys[8], (1, HIDDEN), a)
  ad_w, ad_b = uni(keys[9], (HIDDEN, HIDDEN), a), uni(keys[10], (1, HIDDEN), a)

  w_ih = uni(keys[11], (HIDDEN, 3 * HIDDEN), a)
  w_hh = uni(keys[12], (HIDDEN, 3 * HIDDEN), a)
  b_ih = uni(keys[13], (1, 3 * HIDDEN), a)
  b_hh = uni(keys[14], (1, 3 * HIDDEN), a)
  H = HIDDEN
  w_ir, w_iz, w_in = w_ih[:, :H], w_ih[:, H:2 * H], w_ih[:, 2 * H:]
  w_hr, w_hz, w_hn = w_hh[:, :H], w_hh[:, H:2 * H], w_hh[:, 2 * H:]
  b_r = b_ih[:, :H] + b_hh[:, :H]
  b_z = b_ih[:, H:2 * H] + b_hh[:, H:2 * H]
  b_in, b_hn = b_ih[:, 2 * H:], b_hh[:, 2 * H:]

  w_p, b_p = uni(keys[15], (HIDDEN, 1), a), uni(keys[16], (1, 1), a)

  params["kernel_weights"] = (fs + fn0 + fn1 +
                              (er_w, er_b, ad_w, ad_b,
                               w_ir, w_hr, w_iz, w_hz, w_in, w_hn,
                               b_r, b_z, b_in, b_hn, w_p, b_p))
  return params


if __name__ == "__main__":
  key = jax.random.PRNGKey(0)
  pkey, qkey, rkey = jax.random.split(key, 3)
  params = init_params(pkey)

  q = jax.random.randint(qkey, (BATCH, SEQ), 0, NUM_C, dtype=jnp.int32)
  q = q.at[0, SEQ - 2:].set(-1)   # padded positions exercise the mask path
  q = q.at[1, SEQ - 1].set(-1)
  r = jax.random.randint(rkey, (BATCH, SEQ), 0, 2, dtype=jnp.int32)
  r = jnp.where(q == -1, 0, r)

  fwd = jax.jit(gkt_forward_pallas)
  out = jax.block_until_ready(fwd(params, q, r))
  ref = jax.block_until_ready(gkt_forward_ref(params, q, r))

  assert out.shape == (BATCH, SEQ - 1)
  assert bool(jnp.all(jnp.isfinite(out)))
  assert bool(jnp.allclose(out, ref, atol=2e-3, rtol=2e-3)), (out, ref)
  print("KERNEL_OK")
</pallas_src>

<mosaic_0001>
module attributes {stable_mosaic.version = 11 : i64} {
  func.func @gkt_seq_kernel(%arg0: memref<8x64x64xf32, #tpu.memory_space<vmem>>, %arg1: memref<8x64x128xf32, #tpu.memory_space<vmem>>, %arg2: memref<256x128xf32, #tpu.memory_space<vmem>>, %arg3: memref<8x128xf32, #tpu.memory_space<vmem>>, %arg4: memref<8x64x32xf32, #tpu.memory_space<vmem>>) attributes {dimension_semantics = [], scalar_prefetch = 0 : i64, scratch_operands = 0 : i64, tpu.core_type = #tpu.core_type<tc>} {
    %c0 = arith.constant 0 : index
    %c0_0 = arith.constant 0 : index
    %0 = vector.load %arg2[%c0, %c0_0] : memref<256x128xf32, #tpu.memory_space<vmem>>, vector<64x96xf32>
    %c64 = arith.constant 64 : index
    %c0_1 = arith.constant 0 : index
    %1 = vector.load %arg2[%c64, %c0_1] : memref<256x128xf32, #tpu.memory_space<vmem>>, vector<96x96xf32>
    %c160 = arith.constant 160 : index
    %c0_2 = arith.constant 0 : index
    %2 = vector.load %arg2[%c160, %c0_2] : memref<256x128xf32, #tpu.memory_space<vmem>>, vector<32x64xf32>
    %c192 = arith.constant 192 : index
    %c0_3 = arith.constant 0 : index
    %3 = vector.load %arg2[%c192, %c0_3] : memref<256x128xf32, #tpu.memory_space<vmem>>, vector<64x128xf32>
    %c0_4 = arith.constant 0 : index
    %c0_5 = arith.constant 0 : index
    %4 = vector.load %arg3[%c0_4, %c0_5] : memref<8x128xf32, #tpu.memory_space<vmem>>, vector<1x96xf32>
    %5 = vector.shape_cast %4 : vector<1x96xf32> to vector<1x96xf32>
    %6 = vector.broadcast %5 : vector<1x96xf32> to vector<64x96xf32>
    %c1 = arith.constant 1 : index
    %c0_6 = arith.constant 0 : index
    %7 = vector.load %arg3[%c1, %c0_6] : memref<8x128xf32, #tpu.memory_space<vmem>>, vector<1x64xf32>
    %8 = vector.shape_cast %7 : vector<1x64xf32> to vector<1x64xf32>
    %9 = vector.broadcast %8 : vector<1x64xf32> to vector<64x64xf32>
    %c2 = arith.constant 2 : index
    %c0_7 = arith.constant 0 : index
    %10 = vector.load %arg3[%c2, %c0_7] : memref<8x128xf32, #tpu.memory_space<vmem>>, vector<1x128xf32>
    %11 = vector.shape_cast %10 : vector<1x128xf32> to vector<1x128xf32>
    %12 = vector.broadcast %11 : vector<1x128xf32> to vector<64x128xf32>
    %cst = arith.constant 0.000000e+00 : f32
    %13 = vector.broadcast %cst : f32 to vector<64x32xf32>
    %c0_i32 = arith.constant 0 : i32
    %14 = arith.index_cast %c0_i32 : i32 to index
    %c0_8 = arith.constant 0 : index
    %c0_9 = arith.constant 0 : index
    %15 = vector.load %arg0[%14, %c0_8, %c0_9] : memref<8x64x64xf32, #tpu.memory_space<vmem>>, vector<1x64x64xf32>
    %16 = vector.shape_cast %15 : vector<1x64x64xf32> to vector<64x64xf32>
    %17 = arith.index_cast %c0_i32 : i32 to index
    %c0_10 = arith.constant 0 : index
    %c0_11 = arith.constant 0 : index
    %18 = vector.load %arg1[%17, %c0_10, %c0_11] : memref<8x64x128xf32, #tpu.memory_space<vmem>>, vector<1x64x128xf32>
    %19 = vector.shape_cast %18 : vector<1x64x128xf32> to vector<64x128xf32>
    %20 = vector.extract_strided_slice %19 {offsets = [0, 0], sizes = [64, 96], strides = [1, 1]} : vector<64x128xf32> to vector<64x96xf32>
    %21 = vector.extract_strided_slice %19 {offsets = [0, 96], sizes = [64, 1], strides = [1, 1]} : vector<64x128xf32> to vector<64x1xf32>
    %22 = vector.extract_strided_slice %19 {offsets = [0, 97], sizes = [64, 1], strides = [1, 1]} : vector<64x128xf32> to vector<64x1xf32>
    %23 = vector.extract_strided_slice %19 {offsets = [0, 98], sizes = [64, 1], strides = [1, 1]} : vector<64x128xf32> to vector<64x1xf32>
    %24 = vector.extract_strided_slice %19 {offsets = [0, 99], sizes = [64, 1], strides = [1, 1]} : vector<64x128xf32> to vector<64x1xf32>
    %25 = vector.extract_strided_slice %19 {offsets = [0, 100], sizes = [64, 1], strides = [1, 1]} : vector<64x128xf32> to vector<64x1xf32>
    %cst_12 = arith.constant dense<0.000000e+00> : vector<64x32xf32>
    %26 = tpu.matmul %16, %13, %cst_12 {dimension_numbers = #tpu.dot_dimension_numbers<[1], [0], [0], [1], [0, 0, 1, 1], [], []>} : vector<64x64xf32>, vector<64x32xf32>, vector<64x32xf32> -> vector<64x32xf32>
    %27 = tpu.concatenate %26, %13 in 1 : vector<64x32xf32>, vector<64x32xf32> -> vector<64x64xf32>
    %cst_13 = arith.constant dense<0.000000e+00> : vector<64x96xf32>
    %28 = tpu.matmul %27, %0, %cst_13 {dimension_numbers = #tpu.dot_dimension_numbers<[1], [0], [0], [1], [0, 0, 1, 1], [], []>} : vector<64x64xf32>, vector<64x96xf32>, vector<64x96xf32> -> vector<64x96xf32>
    %29 = arith.addf %28, %20 : vector<64x96xf32>
    %cst_14 = arith.constant 0.000000e+00 : f32
    %30 = vector.broadcast %cst_14 : f32 to vector<64x96xf32>
    %31 = arith.maximumf %29, %30 : vector<64x96xf32>
    %cst_15 = arith.constant dense<0.000000e+00> : vector<64x96xf32>
    %32 = tpu.matmul %31, %1, %cst_15 {dimension_numbers = #tpu.dot_dimension_numbers<[1], [0], [0], [1], [0, 0, 1, 1], [], []>} : vector<64x96xf32>, vector<96x96xf32>, vector<64x96xf32> -> vector<64x96xf32>
    %33 = arith.addf %32, %6 : vector<64x96xf32>
    %cst_16 = arith.constant 0.000000e+00 : f32
    %34 = vector.broadcast %cst_16 : f32 to vector<64x96xf32>
    %35 = arith.maximumf %33, %34 : vector<64x96xf32>
    %36 = vector.extract_strided_slice %35 {offsets = [0, 0], sizes = [64, 32], strides = [1, 1]} : vector<64x96xf32> to vector<64x32xf32>
    %37 = vector.extract_strided_slice %35 {offsets = [0, 32], sizes = [64, 32], strides = [1, 1]} : vector<64x96xf32> to vector<64x32xf32>
    %38 = vector.extract_strided_slice %35 {offsets = [0, 64], sizes = [64, 32], strides = [1, 1]} : vector<64x96xf32> to vector<64x32xf32>
    %39 = vector.broadcast %23 : vector<64x1xf32> to vector<64x32xf32>
    %40 = arith.mulf %39, %36 : vector<64x32xf32>
    %cst_17 = arith.constant 1.000000e+00 : f32
    %41 = vector.broadcast %cst_17 : f32 to vector<64x1xf32>
    %42 = arith.subf %41, %23 : vector<64x1xf32>
    %43 = vector.broadcast %21 : vector<64x1xf32> to vector<64x32xf32>
    %44 = arith.mulf %43, %37 : vector<64x32xf32>
    %45 = vector.broadcast %22 : vector<64x1xf32> to vector<64x32xf32>
    %46 = arith.mulf %45, %38 : vector<64x32xf32>
    %47 = arith.addf %44, %46 : vector<64x32xf32>
    %48 = vector.broadcast %42 : vector<64x1xf32> to vector<64x32xf32>
    %49 = arith.mulf %48, %47 : vector<64x32xf32>
    %50 = arith.addf %40, %49 : vector<64x32xf32>
    %cst_18 = arith.constant dense<0.000000e+00> : vector<64x64xf32>
    %51 = tpu.matmul %50, %2, %cst_18 {dimension_numbers = #tpu.dot_dimension_numbers<[1], [0], [0], [1], [0, 0, 1, 1], [], []>} : vector<64x32xf32>, vector<32x64xf32>, vector<64x64xf32> -> vector<64x64xf32>
    %52 = arith.addf %51, %9 : vector<64x64xf32>
    %53 = vector.extract_strided_slice %52 {offsets = [0, 0], sizes = [64, 32], strides = [1, 1]} : vector<64x64xf32> to vector<64x32xf32>
    %54 = arith.negf %53 : vector<64x32xf32>
    %55 = math.exp %54 : vector<64x32xf32>
    %cst_19 = arith.constant 1.000000e+00 : f32
    %56 = vector.broadcast %cst_19 : f32 to vector<64x32xf32>
    %57 = arith.addf %56, %55 : vector<64x32xf32>
    %58 = arith.divf %56, %57 : vector<64x32xf32>
    %59 = vector.extract_strided_slice %52 {offsets = [0, 32], sizes = [64, 32], strides = [1, 1]} : vector<64x64xf32> to vector<64x32xf32>
    %60 = math.tanh %59 : vector<64x32xf32>
    %61 = vector.broadcast %25 : vector<64x1xf32> to vector<64x32xf32>
    %62 = arith.mulf %61, %58 : vector<64x32xf32>
    %63 = arith.mulf %62, %50 : vector<64x32xf32>
    %64 = arith.subf %50, %63 : vector<64x32xf32>
    %65 = vector.broadcast %25 : vector<64x1xf32> to vector<64x32xf32>
    %66 = arith.mulf %65, %60 : vector<64x32xf32>
    %67 = arith.addf %64, %66 : vector<64x32xf32>
    %68 = tpu.concatenate %67, %13 in 1 : vector<64x32xf32>, vector<64x32xf32> -> vector<64x64xf32>
    %cst_20 = arith.constant dense<0.000000e+00> : vector<64x128xf32>
    %69 = tpu.matmul %68, %3, %cst_20 {dimension_numbers = #tpu.dot_dimension_numbers<[1], [0], [0], [1], [0, 0, 1, 1], [], []>} : vector<64x64xf32>, vector<64x128xf32>, vector<64x128xf32> -> vector<64x128xf32>
    %70 = arith.addf %69, %12 : vector<64x128xf32>
    %71 = vector.extract_strided_slice %70 {offsets = [0, 0], sizes = [64, 32], strides = [1, 1]} : vector<64x128xf32> to vector<64x32xf32>
    %72 = arith.negf %71 : vector<64x32xf32>
    %73 = math.exp %72 : vector<64x32xf32>
    %cst_21 = arith.constant 1.000000e+00 : f32
    %74 = vector.broadcast %cst_21 : f32 to vector<64x32xf32>
    %75 = arith.addf %74, %73 : vector<64x32xf32>
    %76 = arith.divf %74, %75 : vector<64x32xf32>
    %77 = vector.extract_strided_slice %70 {offsets = [0, 32], sizes = [64, 32], strides = [1, 1]} : vector<64x128xf32> to vector<64x32xf32>
    %78 = arith.negf %77 : vector<64x32xf32>
    %79 = math.exp %78 : vector<64x32xf32>
    %cst_22 = arith.constant 1.000000e+00 : f32
    %80 = vector.broadcast %cst_22 : f32 to vector<64x32xf32>
    %81 = arith.addf %80, %79 : vector<64x32xf32>
    %82 = arith.divf %80, %81 : vector<64x32xf32>
    %83 = vector.extract_strided_slice %70 {offsets = [0, 64], sizes = [64, 32], strides = [1, 1]} : vector<64x128xf32> to vector<64x32xf32>
    %84 = vector.extract_strided_slice %70 {offsets = [0, 96], sizes = [64, 32], strides = [1, 1]} : vector<64x128xf32> to vector<64x32xf32>
    %85 = arith.mulf %76, %84 : vector<64x32xf32>
    %86 = arith.addf %83, %85 : vector<64x32xf32>
    %87 = math.tanh %86 : vector<64x32xf32>
    %cst_23 = arith.constant 1.000000e+00 : f32
    %88 = vector.broadcast %cst_23 : f32 to vector<64x32xf32>
    %89 = arith.subf %88, %82 : vector<64x32xf32>
    %90 = arith.mulf %89, %87 : vector<64x32xf32>
    %91 = arith.mulf %82, %13 : vector<64x32xf32>
    %92 = arith.addf %90, %91 : vector<64x32xf32>
    %93 = vector.broadcast %24 : vector<64x1xf32> to vector<64x32xf32>
    %94 = arith.mulf %93, %92 : vector<64x32xf32>
    %cst_24 = arith.constant 1.000000e+00 : f32
    %95 = vector.broadcast %cst_24 : f32 to vector<64x1xf32>
    %96 = arith.subf %95, %24 : vector<64x1xf32>
    %97 = vector.broadcast %96 : vector<64x1xf32> to vector<64x32xf32>
    %98 = arith.mulf %97, %13 : vector<64x32xf32>
    %99 = arith.addf %94, %98 : vector<64x32xf32>
    %100 = arith.index_cast %c0_i32 : i32 to index
    %c0_25 = arith.constant 0 : index
    %c0_26 = arith.constant 0 : index
    %101 = vector.load %arg4[%100, %c0_25, %c0_26] : memref<8x64x32xf32, #tpu.memory_space<vmem>>, vector<1x64x32xf32>
    %102 = vector.shape_cast %101 : vector<1x64x32xf32> to vector<64x32xf32>
    %103 = vector.shape_cast %99 : vector<64x32xf32> to vector<1x64x32xf32>
    tpu.vector_store %arg4[%100, %c0_25, %c0_26], %103 {strides = array<i32>} : memref<8x64x32xf32, #tpu.memory_space<vmem>>, vector<1x64x32xf32>,
    %c1_i32 = arith.constant 1 : i32
    %104 = arith.index_cast %c1_i32 : i32 to index
    %c0_27 = arith.constant 0 : index
    %c0_28 = arith.constant 0 : index
    %105 = vector.load %arg0[%104, %c0_27, %c0_28] : memref<8x64x64xf32, #tpu.memory_space<vmem>>, vector<1x64x64xf32>
    %106 = vector.shape_cast %105 : vector<1x64x64xf32> to vector<64x64xf32>
    %107 = arith.index_cast %c1_i32 : i32 to index
    %c0_29 = arith.constant 0 : index
    %c0_30 = arith.constant 0 : index
    %108 = vector.load %arg1[%107, %c0_29, %c0_30] : memref<8x64x128xf32, #tpu.memory_space<vmem>>, vector<1x64x128xf32>
    %109 = vector.shape_cast %108 : vector<1x64x128xf32> to vector<64x128xf32>
    %110 = vector.extract_strided_slice %109 {offsets = [0, 0], sizes = [64, 96], strides = [1, 1]} : vector<64x128xf32> to vector<64x96xf32>
    %111 = vector.extract_strided_slice %109 {offsets = [0, 96], sizes = [64, 1], strides = [1, 1]} : vector<64x128xf32> to vector<64x1xf32>
    %112 = vector.extract_strided_slice %109 {offsets = [0, 97], sizes = [64, 1], strides = [1, 1]} : vector<64x128xf32> to vector<64x1xf32>
    %113 = vector.extract_strided_slice %109 {offsets = [0, 98], sizes = [64, 1], strides = [1, 1]} : vector<64x128xf32> to vector<64x1xf32>
    %114 = vector.extract_strided_slice %109 {offsets = [0, 99], sizes = [64, 1], strides = [1, 1]} : vector<64x128xf32> to vector<64x1xf32>
    %115 = vector.extract_strided_slice %109 {offsets = [0, 100], sizes = [64, 1], strides = [1, 1]} : vector<64x128xf32> to vector<64x1xf32>
    %cst_31 = arith.constant dense<0.000000e+00> : vector<64x32xf32>
    %116 = tpu.matmul %106, %99, %cst_31 {dimension_numbers = #tpu.dot_dimension_numbers<[1], [0], [0], [1], [0, 0, 1, 1], [], []>} : vector<64x64xf32>, vector<64x32xf32>, vector<64x32xf32> -> vector<64x32xf32>
    %117 = tpu.concatenate %116, %99 in 1 : vector<64x32xf32>, vector<64x32xf32> -> vector<64x64xf32>
    %cst_32 = arith.constant dense<0.000000e+00> : vector<64x96xf32>
    %118 = tpu.matmul %117, %0, %cst_32 {dimension_numbers = #tpu.dot_dimension_numbers<[1], [0], [0], [1], [0, 0, 1, 1], [], []>} : vector<64x64xf32>, vector<64x96xf32>, vector<64x96xf32> -> vector<64x96xf32>
    %119 = arith.addf %118, %110 : vector<64x96xf32>
    %cst_33 = arith.constant 0.000000e+00 : f32
    %120 = vector.broadcast %cst_33 : f32 to vector<64x96xf32>
    %121 = arith.maximumf %119, %120 : vector<64x96xf32>
    %cst_34 = arith.constant dense<0.000000e+00> : vector<64x96xf32>
    %122 = tpu.matmul %121, %1, %cst_34 {dimension_numbers = #tpu.dot_dimension_numbers<[1], [0], [0], [1], [0, 0, 1, 1], [], []>} : vector<64x96xf32>, vector<96x96xf32>, vector<64x96xf32> -> vector<64x96xf32>
    %123 = arith.addf %122, %6 : vector<64x96xf32>
    %cst_35 = arith.constant 0.000000e+00 : f32
    %124 = vector.broadcast %cst_35 : f32 to vector<64x96xf32>
    %125 = arith.maximumf %123, %124 : vector<64x96xf32>
    %126 = vector.extract_strided_slice %125 {offsets = [0, 0], sizes = [64, 32], strides = [1, 1]} : vector<64x96xf32> to vector<64x32xf32>
    %127 = vector.extract_strided_slice %125 {offsets = [0, 32], sizes = [64, 32], strides = [1, 1]} : vector<64x96xf32> to vector<64x32xf32>
    %128 = vector.extract_strided_slice %125 {offsets = [0, 64], sizes = [64, 32], strides = [1, 1]} : vector<64x96xf32> to vector<64x32xf32>
    %129 = vector.broadcast %113 : vector<64x1xf32> to vector<64x32xf32>
    %130 = arith.mulf %129, %126 : vector<64x32xf32>
    %cst_36 = arith.constant 1.000000e+00 : f32
    %131 = vector.broadcast %cst_36 : f32 to vector<64x1xf32>
    %132 = arith.subf %131, %113 : vector<64x1xf32>
    %133 = vector.broadcast %111 : vector<64x1xf32> to vector<64x32xf32>
    %134 = arith.mulf %133, %127 : vector<64x32xf32>
    %135 = vector.broadcast %112 : vector<64x1xf32> to vector<64x32xf32>
    %136 = arith.mulf %135, %128 : vector<64x32xf32>
    %137 = arith.addf %134, %136 : vector<64x32xf32>
    %138 = vector.broadcast %132 : vector<64x1xf32> to vector<64x32xf32>
    %139 = arith.mulf %138, %137 : vector<64x32xf32>
    %140 = arith.addf %130, %139 : vector<64x32xf32>
    %cst_37 = arith.constant dense<0.000000e+00> : vector<64x64xf32>
    %141 = tpu.matmul %140, %2, %cst_37 {dimension_numbers = #tpu.dot_dimension_numbers<[1], [0], [0], [1], [0, 0, 1, 1], [], []>} : vector<64x32xf32>, vector<32x64xf32>, vector<64x64xf32> -> vector<64x64xf32>
    %142 = arith.addf %141, %9 : vector<64x64xf32>
    %143 = vector.extract_strided_slice %142 {offsets = [0, 0], sizes = [64, 32], strides = [1, 1]} : vector<64x64xf32> to vector<64x32xf32>
    %144 = arith.negf %143 : vector<64x32xf32>
    %145 = math.exp %144 : vector<64x32xf32>
    %cst_38 = arith.constant 1.000000e+00 : f32
    %146 = vector.broadcast %cst_38 : f32 to vector<64x32xf32>
    %147 = arith.addf %146, %145 : vector<64x32xf32>
    %148 = arith.divf %146, %147 : vector<64x32xf32>
    %149 = vector.extract_strided_slice %142 {offsets = [0, 32], sizes = [64, 32], strides = [1, 1]} : vector<64x64xf32> to vector<64x32xf32>
    %150 = math.tanh %149 : vector<64x32xf32>
    %151 = vector.broadcast %115 : vector<64x1xf32> to vector<64x32xf32>
    %152 = arith.mulf %151, %148 : vector<64x32xf32>
    %153 = arith.mulf %152, %140 : vector<64x32xf32>
    %154 = arith.subf %140, %153 : vector<64x32xf32>
    %155 = vector.broadcast %115 : vector<64x1xf32> to vector<64x32xf32>
    %156 = arith.mulf %155, %150 : vector<64x32xf32>
    %157 = arith.addf %154, %156 : vector<64x32xf32>
    %158 = tpu.concatenate %157, %99 in 1 : vector<64x32xf32>, vector<64x32xf32> -> vector<64x64xf32>
    %cst_39 = arith.constant dense<0.000000e+00> : vector<64x128xf32>
    %159 = tpu.matmul %158, %3, %cst_39 {dimension_numbers = #tpu.dot_dimension_numbers<[1], [0], [0], [1], [0, 0, 1, 1], [], []>} : vector<64x64xf32>, vector<64x128xf32>, vector<64x128xf32> -> vector<64x128xf32>
    %160 = arith.addf %159, %12 : vector<64x128xf32>
    %161 = vector.extract_strided_slice %160 {offsets = [0, 0], sizes = [64, 32], strides = [1, 1]} : vector<64x128xf32> to vector<64x32xf32>
    %162 = arith.negf %161 : vector<64x32xf32>
    %163 = math.exp %162 : vector<64x32xf32>
    %cst_40 = arith.constant 1.000000e+00 : f32
    %164 = vector.broadcast %cst_40 : f32 to vector<64x32xf32>
    %165 = arith.addf %164, %163 : vector<64x32xf32>
    %166 = arith.divf %164, %165 : vector<64x32xf32>
    %167 = vector.extract_strided_slice %160 {offsets = [0, 32], sizes = [64, 32], strides = [1, 1]} : vector<64x128xf32> to vector<64x32xf32>
    %168 = arith.negf %167 : vector<64x32xf32>
    %169 = math.exp %168 : vector<64x32xf32>
    %cst_41 = arith.constant 1.000000e+00 : f32
    %170 = vector.broadcast %cst_41 : f32 to vector<64x32xf32>
    %171 = arith.addf %170, %169 : vector<64x32xf32>
    %172 = arith.divf %170, %171 : vector<64x32xf32>
    %173 = vector.extract_strided_slice %160 {offsets = [0, 64], sizes = [64, 32], strides = [1, 1]} : vector<64x128xf32> to vector<64x32xf32>
    %174 = vector.extract_strided_slice %160 {offsets = [0, 96], sizes = [64, 32], strides = [1, 1]} : vector<64x128xf32> to vector<64x32xf32>
    %175 = arith.mulf %166, %174 : vector<64x32xf32>
    %176 = arith.addf %173, %175 : vector<64x32xf32>
    %177 = math.tanh %176 : vector<64x32xf32>
    %cst_42 = arith.constant 1.000000e+00 : f32
    %178 = vector.broadcast %cst_42 : f32 to vector<64x32xf32>
    %179 = arith.subf %178, %172 : vector<64x32xf32>
    %180 = arith.mulf %179, %177 : vector<64x32xf32>
    %181 = arith.mulf %172, %99 : vector<64x32xf32>
    %182 = arith.addf %180, %181 : vector<64x32xf32>
    %183 = vector.broadcast %114 : vector<64x1xf32> to vector<64x32xf32>
    %184 = arith.mulf %183, %182 : vector<64x32xf32>
    %cst_43 = arith.constant 1.000000e+00 : f32
    %185 = vector.broadcast %cst_43 : f32 to vector<64x1xf32>
    %186 = arith.subf %185, %114 : vector<64x1xf32>
    %187 = vector.broadcast %186 : vector<64x1xf32> to vector<64x32xf32>
    %188 = arith.mulf %187, %99 : vector<64x32xf32>
    %189 = arith.addf %184, %188 : vector<64x32xf32>
    %190 = arith.index_cast %c1_i32 : i32 to index
    %c0_44 = arith.constant 0 : index
    %c0_45 = arith.constant 0 : index
    %191 = vector.load %arg4[%190, %c0_44, %c0_45] : memref<8x64x32xf32, #tpu.memory_space<vmem>>, vector<1x64x32xf32>
    %192 = vector.shape_cast %191 : vector<1x64x32xf32> to vector<64x32xf32>
    %193 = vector.shape_cast %189 : vector<64x32xf32> to vector<1x64x32xf32>
    tpu.vector_store %arg4[%190, %c0_44, %c0_45], %193 {strides = array<i32>} : memref<8x64x32xf32, #tpu.memory_space<vmem>>, vector<1x64x32xf32>,
    %c2_i32 = arith.constant 2 : i32
    %194 = arith.index_cast %c2_i32 : i32 to index
    %c0_46 = arith.constant 0 : index
    %c0_47 = arith.constant 0 : index
    %195 = vector.load %arg0[%194, %c0_46, %c0_47] : memref<8x64x64xf32, #tpu.memory_space<vmem>>, vector<1x64x64xf32>
    %196 = vector.shape_cast %195 : vector<1x64x64xf32> to vector<64x64xf32>
    %197 = arith.index_cast %c2_i32 : i32 to index
    %c0_48 = arith.constant 0 : index
    %c0_49 = arith.constant 0 : index
    %198 = vector.load %arg1[%197, %c0_48, %c0_49] : memref<8x64x128xf32, #tpu.memory_space<vmem>>, vector<1x64x128xf32>
    %199 = vector.shape_cast %198 : vector<1x64x128xf32> to vector<64x128xf32>
    %200 = vector.extract_strided_slice %199 {offsets = [0, 0], sizes = [64, 96], strides = [1, 1]} : vector<64x128xf32> to vector<64x96xf32>
    %201 = vector.extract_strided_slice %199 {offsets = [0, 96], sizes = [64, 1], strides = [1, 1]} : vector<64x128xf32> to vector<64x1xf32>
    %202 = vector.extract_strided_slice %199 {offsets = [0, 97], sizes = [64, 1], strides = [1, 1]} : vector<64x128xf32> to vector<64x1xf32>
    %203 = vector.extract_strided_slice %199 {offsets = [0, 98], sizes = [64, 1], strides = [1, 1]} : vector<64x128xf32> to vector<64x1xf32>
    %204 = vector.extract_strided_slice %199 {offsets = [0, 99], sizes = [64, 1], strides = [1, 1]} : vector<64x128xf32> to vector<64x1xf32>
    %205 = vector.extract_strided_slice %199 {offsets = [0, 100], sizes = [64, 1], strides = [1, 1]} : vector<64x128xf32> to vector<64x1xf32>
    %cst_50 = arith.constant dense<0.000000e+00> : vector<64x32xf32>
    %206 = tpu.matmul %196, %189, %cst_50 {dimension_numbers = #tpu.dot_dimension_numbers<[1], [0], [0], [1], [0, 0, 1, 1], [], []>} : vector<64x64xf32>, vector<64x32xf32>, vector<64x32xf32> -> vector<64x32xf32>
    %207 = tpu.concatenate %206, %189 in 1 : vector<64x32xf32>, vector<64x32xf32> -> vector<64x64xf32>
    %cst_51 = arith.constant dense<0.000000e+00> : vector<64x96xf32>
    %208 = tpu.matmul %207, %0, %cst_51 {dimension_numbers = #tpu.dot_dimension_numbers<[1], [0], [0], [1], [0, 0, 1, 1], [], []>} : vector<64x64xf32>, vector<64x96xf32>, vector<64x96xf32> -> vector<64x96xf32>
    %209 = arith.addf %208, %200 : vector<64x96xf32>
    %cst_52 = arith.constant 0.000000e+00 : f32
    %210 = vector.broadcast %cst_52 : f32 to vector<64x96xf32>
    %211 = arith.maximumf %209, %210 : vector<64x96xf32>
    %cst_53 = arith.constant dense<0.000000e+00> : vector<64x96xf32>
    %212 = tpu.matmul %211, %1, %cst_53 {dimension_numbers = #tpu.dot_dimension_numbers<[1], [0], [0], [1], [0, 0, 1, 1], [], []>} : vector<64x96xf32>, vector<96x96xf32>, vector<64x96xf32> -> vector<64x96xf32>
    %213 = arith.addf %212, %6 : vector<64x96xf32>
    %cst_54 = arith.constant 0.000000e+00 : f32
    %214 = vector.broadcast %cst_54 : f32 to vector<64x96xf32>
    %215 = arith.maximumf %213, %214 : vector<64x96xf32>
    %216 = vector.extract_strided_slice %215 {offsets = [0, 0], sizes = [64, 32], strides = [1, 1]} : vector<64x96xf32> to vector<64x32xf32>
    %217 = vector.extract_strided_slice %215 {offsets = [0, 32], sizes = [64, 32], strides = [1, 1]} : vector<64x96xf32> to vector<64x32xf32>
    %218 = vector.extract_strided_slice %215 {offsets = [0, 64], sizes = [64, 32], strides = [1, 1]} : vector<64x96xf32> to vector<64x32xf32>
    %219 = vector.broadcast %203 : vector<64x1xf32> to vector<64x32xf32>
    %220 = arith.mulf %219, %216 : vector<64x32xf32>
    %cst_55 = arith.constant 1.000000e+00 : f32
    %221 = vector.broadcast %cst_55 : f32 to vector<64x1xf32>
    %222 = arith.subf %221, %203 : vector<64x1xf32>
    %223 = vector.broadcast %201 : vector<64x1xf32> to vector<64x32xf32>
    %224 = arith.mulf %223, %217 : vector<64x32xf32>
    %225 = vector.broadcast %202 : vector<64x1xf32> to vector<64x32xf32>
    %226 = arith.mulf %225, %218 : vector<64x32xf32>
    %227 = arith.addf %224, %226 : vector<64x32xf32>
    %228 = vector.broadcast %222 : vector<64x1xf32> to vector<64x32xf32>
    %229 = arith.mulf %228, %227 : vector<64x32xf32>
    %230 = arith.addf %220, %229 : vector<64x32xf32>
    %cst_56 = arith.constant dense<0.000000e+00> : vector<64x64xf32>
    %231 = tpu.matmul %230, %2, %cst_56 {dimension_numbers = #tpu.dot_dimension_numbers<[1], [0], [0], [1], [0, 0, 1, 1], [], []>} : vector<64x32xf32>, vector<32x64xf32>, vector<64x64xf32> -> vector<64x64xf32>
    %232 = arith.addf %231, %9 : vector<64x64xf32>
    %233 = vector.extract_strided_slice %232 {offsets = [0, 0], sizes = [64, 32], strides = [1, 1]} : vector<64x64xf32> to vector<64x32xf32>
    %234 = arith.negf %233 : vector<64x32xf32>
    %235 = math.exp %234 : vector<64x32xf32>
    %cst_57 = arith.constant 1.000000e+00 : f32
    %236 = vector.broadcast %cst_57 : f32 to vector<64x32xf32>
    %237 = arith.addf %236, %235 : vector<64x32xf32>
    %238 = arith.divf %236, %237 : vector<64x32xf32>
    %239 = vector.extract_strided_slice %232 {offsets = [0, 32], sizes = [64, 32], strides = [1, 1]} : vector<64x64xf32> to vector<64x32xf32>
    %240 = math.tanh %239 : vector<64x32xf32>
    %241 = vector.broadcast %205 : vector<64x1xf32> to vector<64x32xf32>
    %242 = arith.mulf %241, %238 : vector<64x32xf32>
    %243 = arith.mulf %242, %230 : vector<64x32xf32>
    %244 = arith.subf %230, %243 : vector<64x32xf32>
    %245 = vector.broadcast %205 : vector<64x1xf32> to vector<64x32xf32>
    %246 = arith.mulf %245, %240 : vector<64x32xf32>
    %247 = arith.addf %244, %246 : vector<64x32xf32>
    %248 = tpu.concatenate %247, %189 in 1 : vector<64x32xf32>, vector<64x32xf32> -> vector<64x64xf32>
    %cst_58 = arith.constant dense<0.000000e+00> : vector<64x128xf32>
    %249 = tpu.matmul %248, %3, %cst_58 {dimension_numbers = #tpu.dot_dimension_numbers<[1], [0], [0], [1], [0, 0, 1, 1], [], []>} : vector<64x64xf32>, vector<64x128xf32>, vector<64x128xf32> -> vector<64x128xf32>
    %250 = arith.addf %249, %12 : vector<64x128xf32>
    %251 = vector.extract_strided_slice %250 {offsets = [0, 0], sizes = [64, 32], strides = [1, 1]} : vector<64x128xf32> to vector<64x32xf32>
    %252 = arith.negf %251 : vector<64x32xf32>
    %253 = math.exp %252 : vector<64x32xf32>
    %cst_59 = arith.constant 1.000000e+00 : f32
    %254 = vector.broadcast %cst_59 : f32 to vector<64x32xf32>
    %255 = arith.addf %254, %253 : vector<64x32xf32>
    %256 = arith.divf %254, %255 : vector<64x32xf32>
    %257 = vector.extract_strided_slice %250 {offsets = [0, 32], sizes = [64, 32], strides = [1, 1]} : vector<64x128xf32> to vector<64x32xf32>
    %258 = arith.negf %257 : vector<64x32xf32>
    %259 = math.exp %258 : vector<64x32xf32>
    %cst_60 = arith.constant 1.000000e+00 : f32
    %260 = vector.broadcast %cst_60 : f32 to vector<64x32xf32>
    %261 = arith.addf %260, %259 : vector<64x32xf32>
    %262 = arith.divf %260, %261 : vector<64x32xf32>
    %263 = vector.extract_strided_slice %250 {offsets = [0, 64], sizes = [64, 32], strides = [1, 1]} : vector<64x128xf32> to vector<64x32xf32>
    %264 = vector.extract_strided_slice %250 {offsets = [0, 96], sizes = [64, 32], strides = [1, 1]} : vector<64x128xf32> to vector<64x32xf32>
    %265 = arith.mulf %256, %264 : vector<64x32xf32>
    %266 = arith.addf %263, %265 : vector<64x32xf32>
    %267 = math.tanh %266 : vector<64x32xf32>
    %cst_61 = arith.constant 1.000000e+00 : f32
    %268 = vector.broadcast %cst_61 : f32 to vector<64x32xf32>
    %269 = arith.subf %268, %262 : vector<64x32xf32>
    %270 = arith.mulf %269, %267 : vector<64x32xf32>
    %271 = arith.mulf %262, %189 : vector<64x32xf32>
    %272 = arith.addf %270, %271 : vector<64x32xf32>
    %273 = vector.broadcast %204 : vector<64x1xf32> to vector<64x32xf32>
    %274 = arith.mulf %273, %272 : vector<64x32xf32>
    %cst_62 = arith.constant 1.000000e+00 : f32
    %275 = vector.broadcast %cst_62 : f32 to vector<64x1xf32>
    %276 = arith.subf %275, %204 : vector<64x1xf32>
    %277 = vector.broadcast %276 : vector<64x1xf32> to vector<64x32xf32>
    %278 = arith.mulf %277, %189 : vector<64x32xf32>
    %279 = arith.addf %274, %278 : vector<64x32xf32>
    %280 = arith.index_cast %c2_i32 : i32 to index
    %c0_63 = arith.constant 0 : index
    %c0_64 = arith.constant 0 : index
    %281 = vector.load %arg4[%280, %c0_63, %c0_64] : memref<8x64x32xf32, #tpu.memory_space<vmem>>, vector<1x64x32xf32>
    %282 = vector.shape_cast %281 : vector<1x64x32xf32> to vector<64x32xf32>
    %283 = vector.shape_cast %279 : vector<64x32xf32> to vector<1x64x32xf32>
    tpu.vector_store %arg4[%280, %c0_63, %c0_64], %283 {strides = array<i32>} : memref<8x64x32xf32, #tpu.memory_space<vmem>>, vector<1x64x32xf32>,
    %c3_i32 = arith.constant 3 : i32
    %284 = arith.index_cast %c3_i32 : i32 to index
    %c0_65 = arith.constant 0 : index
    %c0_66 = arith.constant 0 : index
    %285 = vector.load %arg0[%284, %c0_65, %c0_66] : memref<8x64x64xf32, #tpu.memory_space<vmem>>, vector<1x64x64xf32>
    %286 = vector.shape_cast %285 : vector<1x64x64xf32> to vector<64x64xf32>
    %287 = arith.index_cast %c3_i32 : i32 to index
    %c0_67 = arith.constant 0 : index
    %c0_68 = arith.constant 0 : index
    %288 = vector.load %arg1[%287, %c0_67, %c0_68] : memref<8x64x128xf32, #tpu.memory_space<vmem>>, vector<1x64x128xf32>
    %289 = vector.shape_cast %288 : vector<1x64x128xf32> to vector<64x128xf32>
    %290 = vector.extract_strided_slice %289 {offsets = [0, 0], sizes = [64, 96], strides = [1, 1]} : vector<64x128xf32> to vector<64x96xf32>
    %291 = vector.extract_strided_slice %289 {offsets = [0, 96], sizes = [64, 1], strides = [1, 1]} : vector<64x128xf32> to vector<64x1xf32>
    %292 = vector.extract_strided_slice %289 {offsets = [0, 97], sizes = [64, 1], strides = [1, 1]} : vector<64x128xf32> to vector<64x1xf32>
    %293 = vector.extract_strided_slice %289 {offsets = [0, 98], sizes = [64, 1], strides = [1, 1]} : vector<64x128xf32> to vector<64x1xf32>
    %294 = vector.extract_strided_slice %289 {offsets = [0, 99], sizes = [64, 1], strides = [1, 1]} : vector<64x128xf32> to vector<64x1xf32>
    %295 = vector.extract_strided_slice %289 {offsets = [0, 100], sizes = [64, 1], strides = [1, 1]} : vector<64x128xf32> to vector<64x1xf32>
    %cst_69 = arith.constant dense<0.000000e+00> : vector<64x32xf32>
    %296 = tpu.matmul %286, %279, %cst_69 {dimension_numbers = #tpu.dot_dimension_numbers<[1], [0], [0], [1], [0, 0, 1, 1], [], []>} : vector<64x64xf32>, vector<64x32xf32>, vector<64x32xf32> -> vector<64x32xf32>
    %297 = tpu.concatenate %296, %279 in 1 : vector<64x32xf32>, vector<64x32xf32> -> vector<64x64xf32>
    %cst_70 = arith.constant dense<0.000000e+00> : vector<64x96xf32>
    %298 = tpu.matmul %297, %0, %cst_70 {dimension_numbers = #tpu.dot_dimension_numbers<[1], [0], [0], [1], [0, 0, 1, 1], [], []>} : vector<64x64xf32>, vector<64x96xf32>, vector<64x96xf32> -> vector<64x96xf32>
    %299 = arith.addf %298, %290 : vector<64x96xf32>
    %cst_71 = arith.constant 0.000000e+00 : f32
    %300 = vector.broadcast %cst_71 : f32 to vector<64x96xf32>
    %301 = arith.maximumf %299, %300 : vector<64x96xf32>
    %cst_72 = arith.constant dense<0.000000e+00> : vector<64x96xf32>
    %302 = tpu.matmul %301, %1, %cst_72 {dimension_numbers = #tpu.dot_dimension_numbers<[1], [0], [0], [1], [0, 0, 1, 1], [], []>} : vector<64x96xf32>, vector<96x96xf32>, vector<64x96xf32> -> vector<64x96xf32>
    %303 = arith.addf %302, %6 : vector<64x96xf32>
    %cst_73 = arith.constant 0.000000e+00 : f32
    %304 = vector.broadcast %cst_73 : f32 to vector<64x96xf32>
    %305 = arith.maximumf %303, %304 : vector<64x96xf32>
    %306 = vector.extract_strided_slice %305 {offsets = [0, 0], sizes = [64, 32], strides = [1, 1]} : vector<64x96xf32> to vector<64x32xf32>
    %307 = vector.extract_strided_slice %305 {offsets = [0, 32], sizes = [64, 32], strides = [1, 1]} : vector<64x96xf32> to vector<64x32xf32>
    %308 = vector.extract_strided_slice %305 {offsets = [0, 64], sizes = [64, 32], strides = [1, 1]} : vector<64x96xf32> to vector<64x32xf32>
    %309 = vector.broadcast %293 : vector<64x1xf32> to vector<64x32xf32>
    %310 = arith.mulf %309, %306 : vector<64x32xf32>
    %cst_74 = arith.constant 1.000000e+00 : f32
    %311 = vector.broadcast %cst_74 : f32 to vector<64x1xf32>
    %312 = arith.subf %311, %293 : vector<64x1xf32>
    %313 = vector.broadcast %291 : vector<64x1xf32> to vector<64x32xf32>
    %314 = arith.mulf %313, %307 : vector<64x32xf32>
    %315 = vector.broadcast %292 : vector<64x1xf32> to vector<64x32xf32>
    %316 = arith.mulf %315, %308 : vector<64x32xf32>
    %317 = arith.addf %314, %316 : vector<64x32xf32>
    %318 = vector.broadcast %312 : vector<64x1xf32> to vector<64x32xf32>
    %319 = arith.mulf %318, %317 : vector<64x32xf32>
    %320 = arith.addf %310, %319 : vector<64x32xf32>
    %cst_75 = arith.constant dense<0.000000e+00> : vector<64x64xf32>
    %321 = tpu.matmul %320, %2, %cst_75 {dimension_numbers = #tpu.dot_dimension_numbers<[1], [0], [0], [1], [0, 0, 1, 1], [], []>} : vector<64x32xf32>, vector<32x64xf32>, vector<64x64xf32> -> vector<64x64xf32>
    %322 = arith.addf %321, %9 : vector<64x64xf32>
    %323 = vector.extract_strided_slice %322 {offsets = [0, 0], sizes = [64, 32], strides = [1, 1]} : vector<64x64xf32> to vector<64x32xf32>
    %324 = arith.negf %323 : vector<64x32xf32>
    %325 = math.exp %324 : vector<64x32xf32>
    %cst_76 = arith.constant 1.000000e+00 : f32
    %326 = vector.broadcast %cst_76 : f32 to vector<64x32xf32>
    %327 = arith.addf %326, %325 : vector<64x32xf32>
    %328 = arith.divf %326, %327 : vector<64x32xf32>
    %329 = vector.extract_strided_slice %322 {offsets = [0, 32], sizes = [64, 32], strides = [1, 1]} : vector<64x64xf32> to vector<64x32xf32>
    %330 = math.tanh %329 : vector<64x32xf32>
    %331 = vector.broadcast %295 : vector<64x1xf32> to vector<64x32xf32>
    %332 = arith.mulf %331, %328 : vector<64x32xf32>
    %333 = arith.mulf %332, %320 : vector<64x32xf32>
    %334 = arith.subf %320, %333 : vector<64x32xf32>
    %335 = vector.broadcast %295 : vector<64x1xf32> to vector<64x32xf32>
    %336 = arith.mulf %335, %330 : vector<64x32xf32>
    %337 = arith.addf %334, %336 : vector<64x32xf32>
    %338 = tpu.concatenate %337, %279 in 1 : vector<64x32xf32>, vector<64x32xf32> -> vector<64x64xf32>
    %cst_77 = arith.constant dense<0.000000e+00> : vector<64x128xf32>
    %339 = tpu.matmul %338, %3, %cst_77 {dimension_numbers = #tpu.dot_dimension_numbers<[1], [0], [0], [1], [0, 0, 1, 1], [], []>} : vector<64x64xf32>, vector<64x128xf32>, vector<64x128xf32> -> vector<64x128xf32>
    %340 = arith.addf %339, %12 : vector<64x128xf32>
    %341 = vector.extract_strided_slice %340 {offsets = [0, 0], sizes = [64, 32], strides = [1, 1]} : vector<64x128xf32> to vector<64x32xf32>
    %342 = arith.negf %341 : vector<64x32xf32>
    %343 = math.exp %342 : vector<64x32xf32>
    %cst_78 = arith.constant 1.000000e+00 : f32
    %344 = vector.broadcast %cst_78 : f32 to vector<64x32xf32>
    %345 = arith.addf %344, %343 : vector<64x32xf32>
    %346 = arith.divf %344, %345 : vector<64x32xf32>
    %347 = vector.extract_strided_slice %340 {offsets = [0, 32], sizes = [64, 32], strides = [1, 1]} : vector<64x128xf32> to vector<64x32xf32>
    %348 = arith.negf %347 : vector<64x32xf32>
    %349 = math.exp %348 : vector<64x32xf32>
    %cst_79 = arith.constant 1.000000e+00 : f32
    %350 = vector.broadcast %cst_79 : f32 to vector<64x32xf32>
    %351 = arith.addf %350, %349 : vector<64x32xf32>
    %352 = arith.divf %350, %351 : vector<64x32xf32>
    %353 = vector.extract_strided_slice %340 {offsets = [0, 64], sizes = [64, 32], strides = [1, 1]} : vector<64x128xf32> to vector<64x32xf32>
    %354 = vector.extract_strided_slice %340 {offsets = [0, 96], sizes = [64, 32], strides = [1, 1]} : vector<64x128xf32> to vector<64x32xf32>
    %355 = arith.mulf %346, %354 : vector<64x32xf32>
    %356 = arith.addf %353, %355 : vector<64x32xf32>
    %357 = math.tanh %356 : vector<64x32xf32>
    %cst_80 = arith.constant 1.000000e+00 : f32
    %358 = vector.broadcast %cst_80 : f32 to vector<64x32xf32>
    %359 = arith.subf %358, %352 : vector<64x32xf32>
    %360 = arith.mulf %359, %357 : vector<64x32xf32>
    %361 = arith.mulf %352, %279 : vector<64x32xf32>
    %362 = arith.addf %360, %361 : vector<64x32xf32>
    %363 = vector.broadcast %294 : vector<64x1xf32> to vector<64x32xf32>
    %364 = arith.mulf %363, %362 : vector<64x32xf32>
    %cst_81 = arith.constant 1.000000e+00 : f32
    %365 = vector.broadcast %cst_81 : f32 to vector<64x1xf32>
    %366 = arith.subf %365, %294 : vector<64x1xf32>
    %367 = vector.broadcast %366 : vector<64x1xf32> to vector<64x32xf32>
    %368 = arith.mulf %367, %279 : vector<64x32xf32>
    %369 = arith.addf %364, %368 : vector<64x32xf32>
    %370 = arith.index_cast %c3_i32 : i32 to index
    %c0_82 = arith.constant 0 : index
    %c0_83 = arith.constant 0 : index
    %371 = vector.load %arg4[%370, %c0_82, %c0_83] : memref<8x64x32xf32, #tpu.memory_space<vmem>>, vector<1x64x32xf32>
    %372 = vector.shape_cast %371 : vector<1x64x32xf32> to vector<64x32xf32>
    %373 = vector.shape_cast %369 : vector<64x32xf32> to vector<1x64x32xf32>
    tpu.vector_store %arg4[%370, %c0_82, %c0_83], %373 {strides = array<i32>} : memref<8x64x32xf32, #tpu.memory_space<vmem>>, vector<1x64x32xf32>,
    %c4_i32 = arith.constant 4 : i32
    %374 = arith.index_cast %c4_i32 : i32 to index
    %c0_84 = arith.constant 0 : index
    %c0_85 = arith.constant 0 : index
    %375 = vector.load %arg0[%374, %c0_84, %c0_85] : memref<8x64x64xf32, #tpu.memory_space<vmem>>, vector<1x64x64xf32>
    %376 = vector.shape_cast %375 : vector<1x64x64xf32> to vector<64x64xf32>
    %377 = arith.index_cast %c4_i32 : i32 to index
    %c0_86 = arith.constant 0 : index
    %c0_87 = arith.constant 0 : index
    %378 = vector.load %arg1[%377, %c0_86, %c0_87] : memref<8x64x128xf32, #tpu.memory_space<vmem>>, vector<1x64x128xf32>
    %379 = vector.shape_cast %378 : vector<1x64x128xf32> to vector<64x128xf32>
    %380 = vector.extract_strided_slice %379 {offsets = [0, 0], sizes = [64, 96], strides = [1, 1]} : vector<64x128xf32> to vector<64x96xf32>
    %381 = vector.extract_strided_slice %379 {offsets = [0, 96], sizes = [64, 1], strides = [1, 1]} : vector<64x128xf32> to vector<64x1xf32>
    %382 = vector.extract_strided_slice %379 {offsets = [0, 97], sizes = [64, 1], strides = [1, 1]} : vector<64x128xf32> to vector<64x1xf32>
    %383 = vector.extract_strided_slice %379 {offsets = [0, 98], sizes = [64, 1], strides = [1, 1]} : vector<64x128xf32> to vector<64x1xf32>
    %384 = vector.extract_strided_slice %379 {offsets = [0, 99], sizes = [64, 1], strides = [1, 1]} : vector<64x128xf32> to vector<64x1xf32>
    %385 = vector.extract_strided_slice %379 {offsets = [0, 100], sizes = [64, 1], strides = [1, 1]} : vector<64x128xf32> to vector<64x1xf32>
    %cst_88 = arith.constant dense<0.000000e+00> : vector<64x32xf32>
    %386 = tpu.matmul %376, %369, %cst_88 {dimension_numbers = #tpu.dot_dimension_numbers<[1], [0], [0], [1], [0, 0, 1, 1], [], []>} : vector<64x64xf32>, vector<64x32xf32>, vector<64x32xf32> -> vector<64x32xf32>
    %387 = tpu.concatenate %386, %369 in 1 : vector<64x32xf32>, vector<64x32xf32> -> vector<64x64xf32>
    %cst_89 = arith.constant dense<0.000000e+00> : vector<64x96xf32>
    %388 = tpu.matmul %387, %0, %cst_89 {dimension_numbers = #tpu.dot_dimension_numbers<[1], [0], [0], [1], [0, 0, 1, 1], [], []>} : vector<64x64xf32>, vector<64x96xf32>, vector<64x96xf32> -> vector<64x96xf32>
    %389 = arith.addf %388, %380 : vector<64x96xf32>
    %cst_90 = arith.constant 0.000000e+00 : f32
    %390 = vector.broadcast %cst_90 : f32 to vector<64x96xf32>
    %391 = arith.maximumf %389, %390 : vector<64x96xf32>
    %cst_91 = arith.constant dense<0.000000e+00> : vector<64x96xf32>
    %392 = tpu.matmul %391, %1, %cst_91 {dimension_numbers = #tpu.dot_dimension_numbers<[1], [0], [0], [1], [0, 0, 1, 1], [], []>} : vector<64x96xf32>, vector<96x96xf32>, vector<64x96xf32> -> vector<64x96xf32>
    %393 = arith.addf %392, %6 : vector<64x96xf32>
    %cst_92 = arith.constant 0.000000e+00 : f32
    %394 = vector.broadcast %cst_92 : f32 to vector<64x96xf32>
    %395 = arith.maximumf %393, %394 : vector<64x96xf32>
    %396 = vector.extract_strided_slice %395 {offsets = [0, 0], sizes = [64, 32], strides = [1, 1]} : vector<64x96xf32> to vector<64x32xf32>
    %397 = vector.extract_strided_slice %395 {offsets = [0, 32], sizes = [64, 32], strides = [1, 1]} : vector<64x96xf32> to vector<64x32xf32>
    %398 = vector.extract_strided_slice %395 {offsets = [0, 64], sizes = [64, 32], strides = [1, 1]} : vector<64x96xf32> to vector<64x32xf32>
    %399 = vector.broadcast %383 : vector<64x1xf32> to vector<64x32xf32>
    %400 = arith.mulf %399, %396 : vector<64x32xf32>
    %cst_93 = arith.constant 1.000000e+00 : f32
    %401 = vector.broadcast %cst_93 : f32 to vector<64x1xf32>
    %402 = arith.subf %401, %383 : vector<64x1xf32>
    %403 = vector.broadcast %381 : vector<64x1xf32> to vector<64x32xf32>
    %404 = arith.mulf %403, %397 : vector<64x32xf32>
    %405 = vector.broadcast %382 : vector<64x1xf32> to vector<64x32xf32>
    %406 = arith.mulf %405, %398 : vector<64x32xf32>
    %407 = arith.addf %404, %406 : vector<64x32xf32>
    %408 = vector.broadcast %402 : vector<64x1xf32> to vector<64x32xf32>
    %409 = arith.mulf %408, %407 : vector<64x32xf32>
    %410 = arith.addf %400, %409 : vector<64x32xf32>
    %cst_94 = arith.constant dense<0.000000e+00> : vector<64x64xf32>
    %411 = tpu.matmul %410, %2, %cst_94 {dimension_numbers = #tpu.dot_dimension_numbers<[1], [0], [0], [1], [0, 0, 1, 1], [], []>} : vector<64x32xf32>, vector<32x64xf32>, vector<64x64xf32> -> vector<64x64xf32>
    %412 = arith.addf %411, %9 : vector<64x64xf32>
    %413 = vector.extract_strided_slice %412 {offsets = [0, 0], sizes = [64, 32], strides = [1, 1]} : vector<64x64xf32> to vector<64x32xf32>
    %414 = arith.negf %413 : vector<64x32xf32>
    %415 = math.exp %414 : vector<64x32xf32>
    %cst_95 = arith.constant 1.000000e+00 : f32
    %416 = vector.broadcast %cst_95 : f32 to vector<64x32xf32>
    %417 = arith.addf %416, %415 : vector<64x32xf32>
    %418 = arith.divf %416, %417 : vector<64x32xf32>
    %419 = vector.extract_strided_slice %412 {offsets = [0, 32], sizes = [64, 32], strides = [1, 1]} : vector<64x64xf32> to vector<64x32xf32>
    %420 = math.tanh %419 : vector<64x32xf32>
    %421 = vector.broadcast %385 : vector<64x1xf32> to vector<64x32xf32>
    %422 = arith.mulf %421, %418 : vector<64x32xf32>
    %423 = arith.mulf %422, %410 : vector<64x32xf32>
    %424 = arith.subf %410, %423 : vector<64x32xf32>
    %425 = vector.broadcast %385 : vector<64x1xf32> to vector<64x32xf32>
    %426 = arith.mulf %425, %420 : vector<64x32xf32>
    %427 = arith.addf %424, %426 : vector<64x32xf32>
    %428 = tpu.concatenate %427, %369 in 1 : vector<64x32xf32>, vector<64x32xf32> -> vector<64x64xf32>
    %cst_96 = arith.constant dense<0.000000e+00> : vector<64x128xf32>
    %429 = tpu.matmul %428, %3, %cst_96 {dimension_numbers = #tpu.dot_dimension_numbers<[1], [0], [0], [1], [0, 0, 1, 1], [], []>} : vector<64x64xf32>, vector<64x128xf32>, vector<64x128xf32> -> vector<64x128xf32>
    %430 = arith.addf %429, %12 : vector<64x128xf32>
    %431 = vector.extract_strided_slice %430 {offsets = [0, 0], sizes = [64, 32], strides = [1, 1]} : vector<64x128xf32> to vector<64x32xf32>
    %432 = arith.negf %431 : vector<64x32xf32>
    %433 = math.exp %432 : vector<64x32xf32>
    %cst_97 = arith.constant 1.000000e+00 : f32
    %434 = vector.broadcast %cst_97 : f32 to vector<64x32xf32>
    %435 = arith.addf %434, %433 : vector<64x32xf32>
    %436 = arith.divf %434, %435 : vector<64x32xf32>
    %437 = vector.extract_strided_slice %430 {offsets = [0, 32], sizes = [64, 32], strides = [1, 1]} : vector<64x128xf32> to vector<64x32xf32>
    %438 = arith.negf %437 : vector<64x32xf32>
    %439 = math.exp %438 : vector<64x32xf32>
    %cst_98 = arith.constant 1.000000e+00 : f32
    %440 = vector.broadcast %cst_98 : f32 to vector<64x32xf32>
    %441 = arith.addf %440, %439 : vector<64x32xf32>
    %442 = arith.divf %440, %441 : vector<64x32xf32>
    %443 = vector.extract_strided_slice %430 {offsets = [0, 64], sizes = [64, 32], strides = [1, 1]} : vector<64x128xf32> to vector<64x32xf32>
    %444 = vector.extract_strided_slice %430 {offsets = [0, 96], sizes = [64, 32], strides = [1, 1]} : vector<64x128xf32> to vector<64x32xf32>
    %445 = arith.mulf %436, %444 : vector<64x32xf32>
    %446 = arith.addf %443, %445 : vector<64x32xf32>
    %447 = math.tanh %446 : vector<64x32xf32>
    %cst_99 = arith.constant 1.000000e+00 : f32
    %448 = vector.broadcast %cst_99 : f32 to vector<64x32xf32>
    %449 = arith.subf %448, %442 : vector<64x32xf32>
    %450 = arith.mulf %449, %447 : vector<64x32xf32>
    %451 = arith.mulf %442, %369 : vector<64x32xf32>
    %452 = arith.addf %450, %451 : vector<64x32xf32>
    %453 = vector.broadcast %384 : vector<64x1xf32> to vector<64x32xf32>
    %454 = arith.mulf %453, %452 : vector<64x32xf32>
    %cst_100 = arith.constant 1.000000e+00 : f32
    %455 = vector.broadcast %cst_100 : f32 to vector<64x1xf32>
    %456 = arith.subf %455, %384 : vector<64x1xf32>
    %457 = vector.broadcast %456 : vector<64x1xf32> to vector<64x32xf32>
    %458 = arith.mulf %457, %369 : vector<64x32xf32>
    %459 = arith.addf %454, %458 : vector<64x32xf32>
    %460 = arith.index_cast %c4_i32 : i32 to index
    %c0_101 = arith.constant 0 : index
    %c0_102 = arith.constant 0 : index
    %461 = vector.load %arg4[%460, %c0_101, %c0_102] : memref<8x64x32xf32, #tpu.memory_space<vmem>>, vector<1x64x32xf32>
    %462 = vector.shape_cast %461 : vector<1x64x32xf32> to vector<64x32xf32>
    %463 = vector.shape_cast %459 : vector<64x32xf32> to vector<1x64x32xf32>
    tpu.vector_store %arg4[%460, %c0_101, %c0_102], %463 {strides = array<i32>} : memref<8x64x32xf32, #tpu.memory_space<vmem>>, vector<1x64x32xf32>,
    %c5_i32 = arith.constant 5 : i32
    %464 = arith.index_cast %c5_i32 : i32 to index
    %c0_103 = arith.constant 0 : index
    %c0_104 = arith.constant 0 : index
    %465 = vector.load %arg0[%464, %c0_103, %c0_104] : memref<8x64x64xf32, #tpu.memory_space<vmem>>, vector<1x64x64xf32>
    %466 = vector.shape_cast %465 : vector<1x64x64xf32> to vector<64x64xf32>
    %467 = arith.index_cast %c5_i32 : i32 to index
    %c0_105 = arith.constant 0 : index
    %c0_106 = arith.constant 0 : index
    %468 = vector.load %arg1[%467, %c0_105, %c0_106] : memref<8x64x128xf32, #tpu.memory_space<vmem>>, vector<1x64x128xf32>
    %469 = vector.shape_cast %468 : vector<1x64x128xf32> to vector<64x128xf32>
    %470 = vector.extract_strided_slice %469 {offsets = [0, 0], sizes = [64, 96], strides = [1, 1]} : vector<64x128xf32> to vector<64x96xf32>
    %471 = vector.extract_strided_slice %469 {offsets = [0, 96], sizes = [64, 1], strides = [1, 1]} : vector<64x128xf32> to vector<64x1xf32>
    %472 = vector.extract_strided_slice %469 {offsets = [0, 97], sizes = [64, 1], strides = [1, 1]} : vector<64x128xf32> to vector<64x1xf32>
    %473 = vector.extract_strided_slice %469 {offsets = [0, 98], sizes = [64, 1], strides = [1, 1]} : vector<64x128xf32> to vector<64x1xf32>
    %474 = vector.extract_strided_slice %469 {offsets = [0, 99], sizes = [64, 1], strides = [1, 1]} : vector<64x128xf32> to vector<64x1xf32>
    %475 = vector.extract_strided_slice %469 {offsets = [0, 100], sizes = [64, 1], strides = [1, 1]} : vector<64x128xf32> to vector<64x1xf32>
    %cst_107 = arith.constant dense<0.000000e+00> : vector<64x32xf32>
    %476 = tpu.matmul %466, %459, %cst_107 {dimension_numbers = #tpu.dot_dimension_numbers<[1], [0], [0], [1], [0, 0, 1, 1], [], []>} : vector<64x64xf32>, vector<64x32xf32>, vector<64x32xf32> -> vector<64x32xf32>
    %477 = tpu.concatenate %476, %459 in 1 : vector<64x32xf32>, vector<64x32xf32> -> vector<64x64xf32>
    %cst_108 = arith.constant dense<0.000000e+00> : vector<64x96xf32>
    %478 = tpu.matmul %477, %0, %cst_108 {dimension_numbers = #tpu.dot_dimension_numbers<[1], [0], [0], [1], [0, 0, 1, 1], [], []>} : vector<64x64xf32>, vector<64x96xf32>, vector<64x96xf32> -> vector<64x96xf32>
    %479 = arith.addf %478, %470 : vector<64x96xf32>
    %cst_109 = arith.constant 0.000000e+00 : f32
    %480 = vector.broadcast %cst_109 : f32 to vector<64x96xf32>
    %481 = arith.maximumf %479, %480 : vector<64x96xf32>
    %cst_110 = arith.constant dense<0.000000e+00> : vector<64x96xf32>
    %482 = tpu.matmul %481, %1, %cst_110 {dimension_numbers = #tpu.dot_dimension_numbers<[1], [0], [0], [1], [0, 0, 1, 1], [], []>} : vector<64x96xf32>, vector<96x96xf32>, vector<64x96xf32> -> vector<64x96xf32>
    %483 = arith.addf %482, %6 : vector<64x96xf32>
    %cst_111 = arith.constant 0.000000e+00 : f32
    %484 = vector.broadcast %cst_111 : f32 to vector<64x96xf32>
    %485 = arith.maximumf %483, %484 : vector<64x96xf32>
    %486 = vector.extract_strided_slice %485 {offsets = [0, 0], sizes = [64, 32], strides = [1, 1]} : vector<64x96xf32> to vector<64x32xf32>
    %487 = vector.extract_strided_slice %485 {offsets = [0, 32], sizes = [64, 32], strides = [1, 1]} : vector<64x96xf32> to vector<64x32xf32>
    %488 = vector.extract_strided_slice %485 {offsets = [0, 64], sizes = [64, 32], strides = [1, 1]} : vector<64x96xf32> to vector<64x32xf32>
    %489 = vector.broadcast %473 : vector<64x1xf32> to vector<64x32xf32>
    %490 = arith.mulf %489, %486 : vector<64x32xf32>
    %cst_112 = arith.constant 1.000000e+00 : f32
    %491 = vector.broadcast %cst_112 : f32 to vector<64x1xf32>
    %492 = arith.subf %491, %473 : vector<64x1xf32>
    %493 = vector.broadcast %471 : vector<64x1xf32> to vector<64x32xf32>
    %494 = arith.mulf %493, %487 : vector<64x32xf32>
    %495 = vector.broadcast %472 : vector<64x1xf32> to vector<64x32xf32>
    %496 = arith.mulf %495, %488 : vector<64x32xf32>
    %497 = arith.addf %494, %496 : vector<64x32xf32>
    %498 = vector.broadcast %492 : vector<64x1xf32> to vector<64x32xf32>
    %499 = arith.mulf %498, %497 : vector<64x32xf32>
    %500 = arith.addf %490, %499 : vector<64x32xf32>
    %cst_113 = arith.constant dense<0.000000e+00> : vector<64x64xf32>
    %501 = tpu.matmul %500, %2, %cst_113 {dimension_numbers = #tpu.dot_dimension_numbers<[1], [0], [0], [1], [0, 0, 1, 1], [], []>} : vector<64x32xf32>, vector<32x64xf32>, vector<64x64xf32> -> vector<64x64xf32>
    %502 = arith.addf %501, %9 : vector<64x64xf32>
    %503 = vector.extract_strided_slice %502 {offsets = [0, 0], sizes = [64, 32], strides = [1, 1]} : vector<64x64xf32> to vector<64x32xf32>
    %504 = arith.negf %503 : vector<64x32xf32>
    %505 = math.exp %504 : vector<64x32xf32>
    %cst_114 = arith.constant 1.000000e+00 : f32
    %506 = vector.broadcast %cst_114 : f32 to vector<64x32xf32>
    %507 = arith.addf %506, %505 : vector<64x32xf32>
    %508 = arith.divf %506, %507 : vector<64x32xf32>
    %509 = vector.extract_strided_slice %502 {offsets = [0, 32], sizes = [64, 32], strides = [1, 1]} : vector<64x64xf32> to vector<64x32xf32>
    %510 = math.tanh %509 : vector<64x32xf32>
    %511 = vector.broadcast %475 : vector<64x1xf32> to vector<64x32xf32>
    %512 = arith.mulf %511, %508 : vector<64x32xf32>
    %513 = arith.mulf %512, %500 : vector<64x32xf32>
    %514 = arith.subf %500, %513 : vector<64x32xf32>
    %515 = vector.broadcast %475 : vector<64x1xf32> to vector<64x32xf32>
    %516 = arith.mulf %515, %510 : vector<64x32xf32>
    %517 = arith.addf %514, %516 : vector<64x32xf32>
    %518 = tpu.concatenate %517, %459 in 1 : vector<64x32xf32>, vector<64x32xf32> -> vector<64x64xf32>
    %cst_115 = arith.constant dense<0.000000e+00> : vector<64x128xf32>
    %519 = tpu.matmul %518, %3, %cst_115 {dimension_numbers = #tpu.dot_dimension_numbers<[1], [0], [0], [1], [0, 0, 1, 1], [], []>} : vector<64x64xf32>, vector<64x128xf32>, vector<64x128xf32> -> vector<64x128xf32>
    %520 = arith.addf %519, %12 : vector<64x128xf32>
    %521 = vector.extract_strided_slice %520 {offsets = [0, 0], sizes = [64, 32], strides = [1, 1]} : vector<64x128xf32> to vector<64x32xf32>
    %522 = arith.negf %521 : vector<64x32xf32>
    %523 = math.exp %522 : vector<64x32xf32>
    %cst_116 = arith.constant 1.000000e+00 : f32
    %524 = vector.broadcast %cst_116 : f32 to vector<64x32xf32>
    %525 = arith.addf %524, %523 : vector<64x32xf32>
    %526 = arith.divf %524, %525 : vector<64x32xf32>
    %527 = vector.extract_strided_slice %520 {offsets = [0, 32], sizes = [64, 32], strides = [1, 1]} : vector<64x128xf32> to vector<64x32xf32>
    %528 = arith.negf %527 : vector<64x32xf32>
    %529 = math.exp %528 : vector<64x32xf32>
    %cst_117 = arith.constant 1.000000e+00 : f32
    %530 = vector.broadcast %cst_117 : f32 to vector<64x32xf32>
    %531 = arith.addf %530, %529 : vector<64x32xf32>
    %532 = arith.divf %530, %531 : vector<64x32xf32>
    %533 = vector.extract_strided_slice %520 {offsets = [0, 64], sizes = [64, 32], strides = [1, 1]} : vector<64x128xf32> to vector<64x32xf32>
    %534 = vector.extract_strided_slice %520 {offsets = [0, 96], sizes = [64, 32], strides = [1, 1]} : vector<64x128xf32> to vector<64x32xf32>
    %535 = arith.mulf %526, %534 : vector<64x32xf32>
    %536 = arith.addf %533, %535 : vector<64x32xf32>
    %537 = math.tanh %536 : vector<64x32xf32>
    %cst_118 = arith.constant 1.000000e+00 : f32
    %538 = vector.broadcast %cst_118 : f32 to vector<64x32xf32>
    %539 = arith.subf %538, %532 : vector<64x32xf32>
    %540 = arith.mulf %539, %537 : vector<64x32xf32>
    %541 = arith.mulf %532, %459 : vector<64x32xf32>
    %542 = arith.addf %540, %541 : vector<64x32xf32>
    %543 = vector.broadcast %474 : vector<64x1xf32> to vector<64x32xf32>
    %544 = arith.mulf %543, %542 : vector<64x32xf32>
    %cst_119 = arith.constant 1.000000e+00 : f32
    %545 = vector.broadcast %cst_119 : f32 to vector<64x1xf32>
    %546 = arith.subf %545, %474 : vector<64x1xf32>
    %547 = vector.broadcast %546 : vector<64x1xf32> to vector<64x32xf32>
    %548 = arith.mulf %547, %459 : vector<64x32xf32>
    %549 = arith.addf %544, %548 : vector<64x32xf32>
    %550 = arith.index_cast %c5_i32 : i32 to index
    %c0_120 = arith.constant 0 : index
    %c0_121 = arith.constant 0 : index
    %551 = vector.load %arg4[%550, %c0_120, %c0_121] : memref<8x64x32xf32, #tpu.memory_space<vmem>>, vector<1x64x32xf32>
    %552 = vector.shape_cast %551 : vector<1x64x32xf32> to vector<64x32xf32>
    %553 = vector.shape_cast %549 : vector<64x32xf32> to vector<1x64x32xf32>
    tpu.vector_store %arg4[%550, %c0_120, %c0_121], %553 {strides = array<i32>} : memref<8x64x32xf32, #tpu.memory_space<vmem>>, vector<1x64x32xf32>,
    %c6_i32 = arith.constant 6 : i32
    %554 = arith.index_cast %c6_i32 : i32 to index
    %c0_122 = arith.constant 0 : index
    %c0_123 = arith.constant 0 : index
    %555 = vector.load %arg0[%554, %c0_122, %c0_123] : memref<8x64x64xf32, #tpu.memory_space<vmem>>, vector<1x64x64xf32>
    %556 = vector.shape_cast %555 : vector<1x64x64xf32> to vector<64x64xf32>
    %557 = arith.index_cast %c6_i32 : i32 to index
    %c0_124 = arith.constant 0 : index
    %c0_125 = arith.constant 0 : index
    %558 = vector.load %arg1[%557, %c0_124, %c0_125] : memref<8x64x128xf32, #tpu.memory_space<vmem>>, vector<1x64x128xf32>
    %559 = vector.shape_cast %558 : vector<1x64x128xf32> to vector<64x128xf32>
    %560 = vector.extract_strided_slice %559 {offsets = [0, 0], sizes = [64, 96], strides = [1, 1]} : vector<64x128xf32> to vector<64x96xf32>
    %561 = vector.extract_strided_slice %559 {offsets = [0, 96], sizes = [64, 1], strides = [1, 1]} : vector<64x128xf32> to vector<64x1xf32>
    %562 = vector.extract_strided_slice %559 {offsets = [0, 97], sizes = [64, 1], strides = [1, 1]} : vector<64x128xf32> to vector<64x1xf32>
    %563 = vector.extract_strided_slice %559 {offsets = [0, 98], sizes = [64, 1], strides = [1, 1]} : vector<64x128xf32> to vector<64x1xf32>
    %564 = vector.extract_strided_slice %559 {offsets = [0, 99], sizes = [64, 1], strides = [1, 1]} : vector<64x128xf32> to vector<64x1xf32>
    %565 = vector.extract_strided_slice %559 {offsets = [0, 100], sizes = [64, 1], strides = [1, 1]} : vector<64x128xf32> to vector<64x1xf32>
    %cst_126 = arith.constant dense<0.000000e+00> : vector<64x32xf32>
    %566 = tpu.matmul %556, %549, %cst_126 {dimension_numbers = #tpu.dot_dimension_numbers<[1], [0], [0], [1], [0, 0, 1, 1], [], []>} : vector<64x64xf32>, vector<64x32xf32>, vector<64x32xf32> -> vector<64x32xf32>
    %567 = tpu.concatenate %566, %549 in 1 : vector<64x32xf32>, vector<64x32xf32> -> vector<64x64xf32>
    %cst_127 = arith.constant dense<0.000000e+00> : vector<64x96xf32>
    %568 = tpu.matmul %567, %0, %cst_127 {dimension_numbers = #tpu.dot_dimension_numbers<[1], [0], [0], [1], [0, 0, 1, 1], [], []>} : vector<64x64xf32>, vector<64x96xf32>, vector<64x96xf32> -> vector<64x96xf32>
    %569 = arith.addf %568, %560 : vector<64x96xf32>
    %cst_128 = arith.constant 0.000000e+00 : f32
    %570 = vector.broadcast %cst_128 : f32 to vector<64x96xf32>
    %571 = arith.maximumf %569, %570 : vector<64x96xf32>
    %cst_129 = arith.constant dense<0.000000e+00> : vector<64x96xf32>
    %572 = tpu.matmul %571, %1, %cst_129 {dimension_numbers = #tpu.dot_dimension_numbers<[1], [0], [0], [1], [0, 0, 1, 1], [], []>} : vector<64x96xf32>, vector<96x96xf32>, vector<64x96xf32> -> vector<64x96xf32>
    %573 = arith.addf %572, %6 : vector<64x96xf32>
    %cst_130 = arith.constant 0.000000e+00 : f32
    %574 = vector.broadcast %cst_130 : f32 to vector<64x96xf32>
    %575 = arith.maximumf %573, %574 : vector<64x96xf32>
    %576 = vector.extract_strided_slice %575 {offsets = [0, 0], sizes = [64, 32], strides = [1, 1]} : vector<64x96xf32> to vector<64x32xf32>
    %577 = vector.extract_strided_slice %575 {offsets = [0, 32], sizes = [64, 32], strides = [1, 1]} : vector<64x96xf32> to vector<64x32xf32>
    %578 = vector.extract_strided_slice %575 {offsets = [0, 64], sizes = [64, 32], strides = [1, 1]} : vector<64x96xf32> to vector<64x32xf32>
    %579 = vector.broadcast %563 : vector<64x1xf32> to vector<64x32xf32>
    %580 = arith.mulf %579, %576 : vector<64x32xf32>
    %cst_131 = arith.constant 1.000000e+00 : f32
    %581 = vector.broadcast %cst_131 : f32 to vector<64x1xf32>
    %582 = arith.subf %581, %563 : vector<64x1xf32>
    %583 = vector.broadcast %561 : vector<64x1xf32> to vector<64x32xf32>
    %584 = arith.mulf %583, %577 : vector<64x32xf32>
    %585 = vector.broadcast %562 : vector<64x1xf32> to vector<64x32xf32>
    %586 = arith.mulf %585, %578 : vector<64x32xf32>
    %587 = arith.addf %584, %586 : vector<64x32xf32>
    %588 = vector.broadcast %582 : vector<64x1xf32> to vector<64x32xf32>
    %589 = arith.mulf %588, %587 : vector<64x32xf32>
    %590 = arith.addf %580, %589 : vector<64x32xf32>
    %cst_132 = arith.constant dense<0.000000e+00> : vector<64x64xf32>
    %591 = tpu.matmul %590, %2, %cst_132 {dimension_numbers = #tpu.dot_dimension_numbers<[1], [0], [0], [1], [0, 0, 1, 1], [], []>} : vector<64x32xf32>, vector<32x64xf32>, vector<64x64xf32> -> vector<64x64xf32>
    %592 = arith.addf %591, %9 : vector<64x64xf32>
    %593 = vector.extract_strided_slice %592 {offsets = [0, 0], sizes = [64, 32], strides = [1, 1]} : vector<64x64xf32> to vector<64x32xf32>
    %594 = arith.negf %593 : vector<64x32xf32>
    %595 = math.exp %594 : vector<64x32xf32>
    %cst_133 = arith.constant 1.000000e+00 : f32
    %596 = vector.broadcast %cst_133 : f32 to vector<64x32xf32>
    %597 = arith.addf %596, %595 : vector<64x32xf32>
    %598 = arith.divf %596, %597 : vector<64x32xf32>
    %599 = vector.extract_strided_slice %592 {offsets = [0, 32], sizes = [64, 32], strides = [1, 1]} : vector<64x64xf32> to vector<64x32xf32>
    %600 = math.tanh %599 : vector<64x32xf32>
    %601 = vector.broadcast %565 : vector<64x1xf32> to vector<64x32xf32>
    %602 = arith.mulf %601, %598 : vector<64x32xf32>
    %603 = arith.mulf %602, %590 : vector<64x32xf32>
    %604 = arith.subf %590, %603 : vector<64x32xf32>
    %605 = vector.broadcast %565 : vector<64x1xf32> to vector<64x32xf32>
    %606 = arith.mulf %605, %600 : vector<64x32xf32>
    %607 = arith.addf %604, %606 : vector<64x32xf32>
    %608 = tpu.concatenate %607, %549 in 1 : vector<64x32xf32>, vector<64x32xf32> -> vector<64x64xf32>
    %cst_134 = arith.constant dense<0.000000e+00> : vector<64x128xf32>
    %609 = tpu.matmul %608, %3, %cst_134 {dimension_numbers = #tpu.dot_dimension_numbers<[1], [0], [0], [1], [0, 0, 1, 1], [], []>} : vector<64x64xf32>, vector<64x128xf32>, vector<64x128xf32> -> vector<64x128xf32>
    %610 = arith.addf %609, %12 : vector<64x128xf32>
    %611 = vector.extract_strided_slice %610 {offsets = [0, 0], sizes = [64, 32], strides = [1, 1]} : vector<64x128xf32> to vector<64x32xf32>
    %612 = arith.negf %611 : vector<64x32xf32>
    %613 = math.exp %612 : vector<64x32xf32>
    %cst_135 = arith.constant 1.000000e+00 : f32
    %614 = vector.broadcast %cst_135 : f32 to vector<64x32xf32>
    %615 = arith.addf %614, %613 : vector<64x32xf32>
    %616 = arith.divf %614, %615 : vector<64x32xf32>
    %617 = vector.extract_strided_slice %610 {offsets = [0, 32], sizes = [64, 32], strides = [1, 1]} : vector<64x128xf32> to vector<64x32xf32>
    %618 = arith.negf %617 : vector<64x32xf32>
    %619 = math.exp %618 : vector<64x32xf32>
    %cst_136 = arith.constant 1.000000e+00 : f32
    %620 = vector.broadcast %cst_136 : f32 to vector<64x32xf32>
    %621 = arith.addf %620, %619 : vector<64x32xf32>
    %622 = arith.divf %620, %621 : vector<64x32xf32>
    %623 = vector.extract_strided_slice %610 {offsets = [0, 64], sizes = [64, 32], strides = [1, 1]} : vector<64x128xf32> to vector<64x32xf32>
    %624 = vector.extract_strided_slice %610 {offsets = [0, 96], sizes = [64, 32], strides = [1, 1]} : vector<64x128xf32> to vector<64x32xf32>
    %625 = arith.mulf %616, %624 : vector<64x32xf32>
    %626 = arith.addf %623, %625 : vector<64x32xf32>
    %627 = math.tanh %626 : vector<64x32xf32>
    %cst_137 = arith.constant 1.000000e+00 : f32
    %628 = vector.broadcast %cst_137 : f32 to vector<64x32xf32>
    %629 = arith.subf %628, %622 : vector<64x32xf32>
    %630 = arith.mulf %629, %627 : vector<64x32xf32>
    %631 = arith.mulf %622, %549 : vector<64x32xf32>
    %632 = arith.addf %630, %631 : vector<64x32xf32>
    %633 = vector.broadcast %564 : vector<64x1xf32> to vector<64x32xf32>
    %634 = arith.mulf %633, %632 : vector<64x32xf32>
    %cst_138 = arith.constant 1.000000e+00 : f32
    %635 = vector.broadcast %cst_138 : f32 to vector<64x1xf32>
    %636 = arith.subf %635, %564 : vector<64x1xf32>
    %637 = vector.broadcast %636 : vector<64x1xf32> to vector<64x32xf32>
    %638 = arith.mulf %637, %549 : vector<64x32xf32>
    %639 = arith.addf %634, %638 : vector<64x32xf32>
    %640 = arith.index_cast %c6_i32 : i32 to index
    %c0_139 = arith.constant 0 : index
    %c0_140 = arith.constant 0 : index
    %641 = vector.load %arg4[%640, %c0_139, %c0_140] : memref<8x64x32xf32, #tpu.memory_space<vmem>>, vector<1x64x32xf32>
    %642 = vector.shape_cast %641 : vector<1x64x32xf32> to vector<64x32xf32>
    %643 = vector.shape_cast %639 : vector<64x32xf32> to vector<1x64x32xf32>
    tpu.vector_store %arg4[%640, %c0_139, %c0_140], %643 {strides = array<i32>} : memref<8x64x32xf32, #tpu.memory_space<vmem>>, vector<1x64x32xf32>,
    %c7_i32 = arith.constant 7 : i32
    %644 = arith.index_cast %c7_i32 : i32 to index
    %c0_141 = arith.constant 0 : index
    %c0_142 = arith.constant 0 : index
    %645 = vector.load %arg0[%644, %c0_141, %c0_142] : memref<8x64x64xf32, #tpu.memory_space<vmem>>, vector<1x64x64xf32>
    %646 = vector.shape_cast %645 : vector<1x64x64xf32> to vector<64x64xf32>
    %647 = arith.index_cast %c7_i32 : i32 to index
    %c0_143 = arith.constant 0 : index
    %c0_144 = arith.constant 0 : index
    %648 = vector.load %arg1[%647, %c0_143, %c0_144] : memref<8x64x128xf32, #tpu.memory_space<vmem>>, vector<1x64x128xf32>
    %649 = vector.shape_cast %648 : vector<1x64x128xf32> to vector<64x128xf32>
    %650 = vector.extract_strided_slice %649 {offsets = [0, 0], sizes = [64, 96], strides = [1, 1]} : vector<64x128xf32> to vector<64x96xf32>
    %651 = vector.extract_strided_slice %649 {offsets = [0, 96], sizes = [64, 1], strides = [1, 1]} : vector<64x128xf32> to vector<64x1xf32>
    %652 = vector.extract_strided_slice %649 {offsets = [0, 97], sizes = [64, 1], strides = [1, 1]} : vector<64x128xf32> to vector<64x1xf32>
    %653 = vector.extract_strided_slice %649 {offsets = [0, 98], sizes = [64, 1], strides = [1, 1]} : vector<64x128xf32> to vector<64x1xf32>
    %654 = vector.extract_strided_slice %649 {offsets = [0, 99], sizes = [64, 1], strides = [1, 1]} : vector<64x128xf32> to vector<64x1xf32>
    %655 = vector.extract_strided_slice %649 {offsets = [0, 100], sizes = [64, 1], strides = [1, 1]} : vector<64x128xf32> to vector<64x1xf32>
    %cst_145 = arith.constant dense<0.000000e+00> : vector<64x32xf32>
    %656 = tpu.matmul %646, %639, %cst_145 {dimension_numbers = #tpu.dot_dimension_numbers<[1], [0], [0], [1], [0, 0, 1, 1], [], []>} : vector<64x64xf32>, vector<64x32xf32>, vector<64x32xf32> -> vector<64x32xf32>
    %657 = tpu.concatenate %656, %639 in 1 : vector<64x32xf32>, vector<64x32xf32> -> vector<64x64xf32>
    %cst_146 = arith.constant dense<0.000000e+00> : vector<64x96xf32>
    %658 = tpu.matmul %657, %0, %cst_146 {dimension_numbers = #tpu.dot_dimension_numbers<[1], [0], [0], [1], [0, 0, 1, 1], [], []>} : vector<64x64xf32>, vector<64x96xf32>, vector<64x96xf32> -> vector<64x96xf32>
    %659 = arith.addf %658, %650 : vector<64x96xf32>
    %cst_147 = arith.constant 0.000000e+00 : f32
    %660 = vector.broadcast %cst_147 : f32 to vector<64x96xf32>
    %661 = arith.maximumf %659, %660 : vector<64x96xf32>
    %cst_148 = arith.constant dense<0.000000e+00> : vector<64x96xf32>
    %662 = tpu.matmul %661, %1, %cst_148 {dimension_numbers = #tpu.dot_dimension_numbers<[1], [0], [0], [1], [0, 0, 1, 1], [], []>} : vector<64x96xf32>, vector<96x96xf32>, vector<64x96xf32> -> vector<64x96xf32>
    %663 = arith.addf %662, %6 : vector<64x96xf32>
    %cst_149 = arith.constant 0.000000e+00 : f32
    %664 = vector.broadcast %cst_149 : f32 to vector<64x96xf32>
    %665 = arith.maximumf %663, %664 : vector<64x96xf32>
    %666 = vector.extract_strided_slice %665 {offsets = [0, 0], sizes = [64, 32], strides = [1, 1]} : vector<64x96xf32> to vector<64x32xf32>
    %667 = vector.extract_strided_slice %665 {offsets = [0, 32], sizes = [64, 32], strides = [1, 1]} : vector<64x96xf32> to vector<64x32xf32>
    %668 = vector.extract_strided_slice %665 {offsets = [0, 64], sizes = [64, 32], strides = [1, 1]} : vector<64x96xf32> to vector<64x32xf32>
    %669 = vector.broadcast %653 : vector<64x1xf32> to vector<64x32xf32>
    %670 = arith.mulf %669, %666 : vector<64x32xf32>
    %cst_150 = arith.constant 1.000000e+00 : f32
    %671 = vector.broadcast %cst_150 : f32 to vector<64x1xf32>
    %672 = arith.subf %671, %653 : vector<64x1xf32>
    %673 = vector.broadcast %651 : vector<64x1xf32> to vector<64x32xf32>
    %674 = arith.mulf %673, %667 : vector<64x32xf32>
    %675 = vector.broadcast %652 : vector<64x1xf32> to vector<64x32xf32>
    %676 = arith.mulf %675, %668 : vector<64x32xf32>
    %677 = arith.addf %674, %676 : vector<64x32xf32>
    %678 = vector.broadcast %672 : vector<64x1xf32> to vector<64x32xf32>
    %679 = arith.mulf %678, %677 : vector<64x32xf32>
    %680 = arith.addf %670, %679 : vector<64x32xf32>
    %cst_151 = arith.constant dense<0.000000e+00> : vector<64x64xf32>
    %681 = tpu.matmul %680, %2, %cst_151 {dimension_numbers = #tpu.dot_dimension_numbers<[1], [0], [0], [1], [0, 0, 1, 1], [], []>} : vector<64x32xf32>, vector<32x64xf32>, vector<64x64xf32> -> vector<64x64xf32>
    %682 = arith.addf %681, %9 : vector<64x64xf32>
    %683 = vector.extract_strided_slice %682 {offsets = [0, 0], sizes = [64, 32], strides = [1, 1]} : vector<64x64xf32> to vector<64x32xf32>
    %684 = arith.negf %683 : vector<64x32xf32>
    %685 = math.exp %684 : vector<64x32xf32>
    %cst_152 = arith.constant 1.000000e+00 : f32
    %686 = vector.broadcast %cst_152 : f32 to vector<64x32xf32>
    %687 = arith.addf %686, %685 : vector<64x32xf32>
    %688 = arith.divf %686, %687 : vector<64x32xf32>
    %689 = vector.extract_strided_slice %682 {offsets = [0, 32], sizes = [64, 32], strides = [1, 1]} : vector<64x64xf32> to vector<64x32xf32>
    %690 = math.tanh %689 : vector<64x32xf32>
    %691 = vector.broadcast %655 : vector<64x1xf32> to vector<64x32xf32>
    %692 = arith.mulf %691, %688 : vector<64x32xf32>
    %693 = arith.mulf %692, %680 : vector<64x32xf32>
    %694 = arith.subf %680, %693 : vector<64x32xf32>
    %695 = vector.broadcast %655 : vector<64x1xf32> to vector<64x32xf32>
    %696 = arith.mulf %695, %690 : vector<64x32xf32>
    %697 = arith.addf %694, %696 : vector<64x32xf32>
    %698 = tpu.concatenate %697, %639 in 1 : vector<64x32xf32>, vector<64x32xf32> -> vector<64x64xf32>
    %cst_153 = arith.constant dense<0.000000e+00> : vector<64x128xf32>
    %699 = tpu.matmul %698, %3, %cst_153 {dimension_numbers = #tpu.dot_dimension_numbers<[1], [0], [0], [1], [0, 0, 1, 1], [], []>} : vector<64x64xf32>, vector<64x128xf32>, vector<64x128xf32> -> vector<64x128xf32>
    %700 = arith.addf %699, %12 : vector<64x128xf32>
    %701 = vector.extract_strided_slice %700 {offsets = [0, 0], sizes = [64, 32], strides = [1, 1]} : vector<64x128xf32> to vector<64x32xf32>
    %702 = arith.negf %701 : vector<64x32xf32>
    %703 = math.exp %702 : vector<64x32xf32>
    %cst_154 = arith.constant 1.000000e+00 : f32
    %704 = vector.broadcast %cst_154 : f32 to vector<64x32xf32>
    %705 = arith.addf %704, %703 : vector<64x32xf32>
    %706 = arith.divf %704, %705 : vector<64x32xf32>
    %707 = vector.extract_strided_slice %700 {offsets = [0, 32], sizes = [64, 32], strides = [1, 1]} : vector<64x128xf32> to vector<64x32xf32>
    %708 = arith.negf %707 : vector<64x32xf32>
    %709 = math.exp %708 : vector<64x32xf32>
    %cst_155 = arith.constant 1.000000e+00 : f32
    %710 = vector.broadcast %cst_155 : f32 to vector<64x32xf32>
    %711 = arith.addf %710, %709 : vector<64x32xf32>
    %712 = arith.divf %710, %711 : vector<64x32xf32>
    %713 = vector.extract_strided_slice %700 {offsets = [0, 64], sizes = [64, 32], strides = [1, 1]} : vector<64x128xf32> to vector<64x32xf32>
    %714 = vector.extract_strided_slice %700 {offsets = [0, 96], sizes = [64, 32], strides = [1, 1]} : vector<64x128xf32> to vector<64x32xf32>
    %715 = arith.mulf %706, %714 : vector<64x32xf32>
    %716 = arith.addf %713, %715 : vector<64x32xf32>
    %717 = math.tanh %716 : vector<64x32xf32>
    %cst_156 = arith.constant 1.000000e+00 : f32
    %718 = vector.broadcast %cst_156 : f32 to vector<64x32xf32>
    %719 = arith.subf %718, %712 : vector<64x32xf32>
    %720 = arith.mulf %719, %717 : vector<64x32xf32>
    %721 = arith.mulf %712, %639 : vector<64x32xf32>
    %722 = arith.addf %720, %721 : vector<64x32xf32>
    %723 = vector.broadcast %654 : vector<64x1xf32> to vector<64x32xf32>
    %724 = arith.mulf %723, %722 : vector<64x32xf32>
    %cst_157 = arith.constant 1.000000e+00 : f32
    %725 = vector.broadcast %cst_157 : f32 to vector<64x1xf32>
    %726 = arith.subf %725, %654 : vector<64x1xf32>
    %727 = vector.broadcast %726 : vector<64x1xf32> to vector<64x32xf32>
    %728 = arith.mulf %727, %639 : vector<64x32xf32>
    %729 = arith.addf %724, %728 : vector<64x32xf32>
    %730 = arith.index_cast %c7_i32 : i32 to index
    %c0_158 = arith.constant 0 : index
    %c0_159 = arith.constant 0 : index
    %731 = vector.load %arg4[%730, %c0_158, %c0_159] : memref<8x64x32xf32, #tpu.memory_space<vmem>>, vector<1x64x32xf32>
    %732 = vector.shape_cast %731 : vector<1x64x32xf32> to vector<64x32xf32>
    %733 = vector.shape_cast %729 : vector<64x32xf32> to vector<1x64x32xf32>
    tpu.vector_store %arg4[%730, %c0_158, %c0_159], %733 {strides = array<i32>} : memref<8x64x32xf32, #tpu.memory_space<vmem>>, vector<1x64x32xf32>,
    %c8_i32 = arith.constant 8 : i32
    return
  }
}

</mosaic_0001>

<bundles_post_ra>
// kernel: mul.57
= control target key start
LH: loop header
LB: loop body
LE: loop exit
PB: predicated region body
PF: predicated region fallthrough
CT: control target
= control target key end

     0   :  { %s34_s0 = inlined_call_operand.vmem [shape: f32[1,32], index: 0, kind: input, shape index: {}]   ;;  %s35_s1 = inlined_call_operand.vmem [shape: f32[1,32], index: 1, kind: input, shape index: {}]   ;;  %s36_s2 = inlined_call_operand.vmem [shape: f32[1,32], index: 2, kind: output, shape index: {}]  }
   0x1   :  { %v3_v0 = vld [vmem:[%s34_s0] sm:$0x1] }
   0x2   :  { %v4_v1 = vld [vmem:[%s35_s1] sm:$0x1] }
   0x3   :  { %v7_v2 = vmul.f32 %v4_v1, %v3_v0 }
   0x5   :  { %9 = vst [vmem:[%s36_s2] sm:$0x1] %v7_v2 }

// kernel: gkt_forward_pallas.1
= control target key start
LH: loop header
LB: loop body
LE: loop exit
PB: predicated region body
PF: predicated region fallthrough
CT: control target
= control target key end

     0   :  { %vm80_vm0 = vcmask 523264   ;;  %v15601_v0 = vmov 0.0   ;;  %vm210_vm1 = vcmask 261120   ;;  %v20721_v57 = vmov 97   ;;  %s15605_s11 = smov 96   ;;  %s15607_s14 = smov 32   ;;  %s20709_s0 = inlined_call_operand.vmem [shape: f32[8,64,64], index: 0, kind: input, shape index: {}]   ;;  %s20710_s2 = inlined_call_operand.vmem [shape: f32[256,128], index: 2, kind: input, shape index: {}]   ;;  %s20711_s1 = inlined_call_operand.vmem [shape: f32[8,64,128], index: 1, kind: input, shape index: {}]   ;;  %s20712_s3 = inlined_call_operand.vmem [shape: f32[8,128], index: 3, kind: input, shape index: {}]   ;;  %s20713_s4 = inlined_call_operand.vmem [shape: f32[8,64,32], index: 4, kind: output, shape index: {}]  }
   0x1   :  { %12904 = vmatprep.subr.mxu0 %v15601_v0  ;;  %v64_v1 = vld [vmem:[%s20709_s0] sm:$0xff]  ;;  %v65_v2 = vld [vmem:[%s20709_s0 + $0x8] sm:$0xff]  ;;  %v66_v3 = vld [vmem:[%s20709_s0 + $0x10] sm:$0xff]  ;;  %14652 = vset.pattern.permute.xlu1 %v20721_v57  ;;  %vm356_vm2 = vcmask 785408   ;;  %s15609_s15 = smov 64  }
   0x2   :  { %12905 = vmatpush3.msra.mxu0 %v15601_v0  ;;  %12906 = vmatprep.mubr.msk.f32.mxu0 %vm80_vm0, %v64_v1  ;;  %v67_v4 = vld [vmem:[%s20709_s0 + $0x18] sm:$0xff]  ;;  %v17_v5 = vld [vmem:[%s20710_s2] sm:$0xff]  ;;  %v18_v6 = vld [vmem:[%s20710_s2 + $0x8] sm:$0xff]  ;;  %v20716_v0 = vmov 96  }
   0x3   :  { %12907 = vmatmul.mubr.msk.f32.vlgmr.msra.gmra.mrb[0].mxu0 %vm80_vm0, %v65_v2  ;;  %v19_v7 = vld [vmem:[%s20710_s2 + $0x10] sm:$0xff]  ;;  %v20_v8 = vld [vmem:[%s20710_s2 + $0x18] sm:$0xff]  ;;  %v68_v9 = vld [vmem:[%s20709_s0 + $0x20] sm:$0xff]  ;;  %v15665_v10 = vpack.c.bf16 %v18_v6, %v17_v5  ;;  %14651 = vset.pattern.permute.xlu0 %v20721_v57  ;;  %v20714_v2 = vmov 98  }
   0x4   :  { %12909 = vmatprep.mubr.msk.f32.mxu0 %vm80_vm0, %v66_v3  ;;  %v15667_v11 = vpack.c.bf16 %v20_v8, %v19_v7  ;;  %v21_v12 = vld [vmem:[%s20710_s2 + $0x20] sm:$0xff]  ;;  %v22_v13 = vld [vmem:[%s20710_s2 + $0x28] sm:$0xff]  ;;  %v70_v15 = vld [vmem:[%s20709_s0 + $0x30] sm:$0xff] }
   0x5   :  { %14011 = vmatprep.subr.bf16.mxu1 %v15665_v10  ;;  %v69_v14 = vld [vmem:[%s20709_s0 + $0x28] sm:$0xff]  ;;  %v15686_v16 = vpack.c.bf16 %v22_v13, %v21_v12  ;;  %v71_v17 = vld [vmem:[%s20709_s0 + $0x38] sm:$0xff]  ;;  %v23_v18 = vld [vmem:[%s20710_s2 + $0x30] sm:$0xff] }
   0x6   :  { %14013 = vmatpush3.bf16.msra.mxu1 %v15665_v10  ;;  %v24_v19 = vld [vmem:[%s20710_s2 + $0x38] sm:$0xff]  ;;  %v25_v21 = vld [vmem:[%s20710_s2 + $0x40] sm:$0xff]  ;;  %v26_v22 = vld [vmem:[%s20710_s2 + $0x48] sm:$0xff] }
   0x7   :  { %12910 = vmatmul.mubr.msk.f32.gmra.mrb[2].mxu0 %vm80_vm0, %v67_v4  ;;  %14015 = vmatprep.subr.bf16.mxu1 %v15667_v11  ;;  %v15703_v20 = vpack.c.bf16 %v24_v19, %v23_v18  ;;  %v27_v23 = vld [vmem:[%s20710_s2 + $0x50] sm:$0xff]  ;;  %v15716_v24 = vpack.c.bf16 %v26_v22, %v25_v21  ;;  %v28_v25 = vld [vmem:[%s20710_s2 + $0x58] sm:$0xff]  ;;  %v29_v27 = vld [vmem:[%s20710_s2 + $0x60] sm:$0xff] }
   0x8   :  { %12912 = vmatprep.mubr.msk.f32.mxu0 %vm80_vm0, %v68_v9  ;;  %v15721_v26 = vpack.c.bf16 %v28_v25, %v27_v23  ;;  %v30_v28 = vld [vmem:[%s20710_s2 + $0x68] sm:$0xff]  ;;  %v31_v30 = vld [vmem:[%s20710_s2 + $0x70] sm:$0xff]  ;;  %v32_v31 = vld [vmem:[%s20710_s2 + $0x78] sm:$0xff] }
   0x9   :  { %14027 = vmatprep.subr.bf16.mxu0 %v15716_v24  ;;  %v15732_v29 = vpack.c.bf16 %v30_v28, %v29_v27  ;;  %v15742_v32 = vpack.c.bf16 %v32_v31, %v31_v30  ;;  %v33_v33 = vld [vmem:[%s20710_s2 + $0x80] sm:$0xff]  ;;  %v34_v34 = vld [vmem:[%s20710_s2 + $0x88] sm:$0xff]  ;;  %v35_v52 = vld [vmem:[%s20710_s2 + $0x90] sm:$0xff] }
   0xa   :  { %14017 = vmatpush3.bf16.msra.mxu1 %v15667_v11  ;;  %14029 = vmatpush3.bf16.msra.mxu0 %v15716_v24  ;;  %v15752_v35 = vpack.c.bf16 %v34_v34, %v33_v33  ;;  %v36_v53 = vld [vmem:[%s20710_s2 + $0x98] sm:$0xff]  ;;  %v15786_v55 = vld [vmem:[%s20711_s1] sm:$0xff]  ;;  %v15791_v56 = vld [vmem:[%s20711_s1 + $0x10] sm:$0xff] }
   0xb   :  { %12913 = vmatmul.mubr.msk.f32.gmra.mrb[4].mxu0 %vm80_vm0, %v69_v14  ;;  %14019 = vmatprep.subr.bf16.mxu1 %v15686_v16  ;;  %v15779_v54 = vpack.c.bf16 %v36_v53, %v35_v52  ;;  %v15800_v58 = vld [vmem:[%s20711_s1 + $0x8] sm:$0xff]  ;;  %v15805_v59 = vld [vmem:[%s20711_s1 + $0x18] sm:$0xff]  ;;  %v15817_v61 = vld [vmem:[%s20711_s1 + $0x20] sm:$0xff]  ;;  %v542_v1 = vsub.f32 1.0, %v15786_v55  ;;  %v544_v5 = vsub.f32 1.0, %v15791_v56 }
   0xc   :  { %12915 = vmatprep.mubr.msk.f32.mxu0 %vm80_vm0, %v70_v15  ;;  %14031 = vmatprep.subr.bf16.mxu0 %v15721_v26  ;;  %v15812_v60 = vld [vmem:[%s20711_s1 + $0x28] sm:$0xff]  ;;  %v15824_v62 = vld [vmem:[%s20711_s1 + $0x38] sm:$0xff]  ;;  %v15829_v63 = vld [vmem:[%s20711_s1 + $0x30] sm:$0xff]  ;;  %v543_v3 = vsub.f32 1.0, %v15800_v58  ;;  %v20726_v4 = vsub.f32 1.0, %v15817_v61  ;;  %v20725_v7 = vsub.f32 1.0, %v15805_v59 }
   0xd   :  { %20843 = vst [vmem:[#allocation2_spill] sm:$0xff] %v15779_v54  ;;  %599 = vperm.xlu1 %14652, %v15791_v56   ;;  %591 = vperm.xlu0 %14651, %v15786_v55   ;;  %v20723_v6 = vsub.f32 1.0, %v15812_v60 }
   0xe   :  { %14021 = vmatpush3.bf16.msra.mxu1 %v15686_v16  ;;  %14033 = vmatpush3.bf16.msra.mxu0 %v15721_v26 }
   0xf   :  { %12916 = vmatmul.mubr.msk.f32.gmra.mrb[6].mxu0 %vm80_vm0, %v71_v17  ;;  %14023 = vmatprep.subr.bf16.mxu1 %v15703_v20 }
  0x10   :  { %14035 = vmatprep.subr.bf16.mxu0 %v15732_v29 }
  0x11   :  { %603 = vperm.xlu1 %14652, %v15805_v59   ;;  %595 = vperm.xlu0 %14651, %v15800_v58  }
  0x12   :  { %14025 = vmatpush3.bf16.msra.mxu1 %v15703_v20  ;;  %14037 = vmatpush3.bf16.msra.mxu0 %v15732_v29 }
  0x13   :  { %14039 = vmatprep.subr.bf16.mxu0 %v15742_v32 }
  0x15   :  { %611 = vperm.xlu1 %14652, %v15812_v60   ;;  %607 = vperm.xlu0 %14651, %v15817_v61  }
  0x16   :  { %14041 = vmatpush3.bf16.msra.mxu0 %v15742_v32 }
  0x17   :  { %14043 = vmatprep.subr.bf16.mxu0 %v15752_v35 }
  0x19   :  { %619 = vperm.xlu1 %14652, %v15824_v62   ;;  %615 = vperm.xlu0 %14651, %v15829_v63  }
  0x1a   :  { %14045 = vmatpush3.bf16.msra.mxu0 %v15752_v35 }
  0x1b   :  { %14047 = vmatprep.subr.bf16.mxu0 %v15779_v54 }
  0x1d   :  { %14654 = vset.pattern.permute.xlu1 %v20716_v0  ;;  %14653 = vset.pattern.permute.xlu0 %v20716_v0 }
  0x1e   :  { %14049 = vmatpush3.bf16.msra.mxu0 %v15779_v54  ;;  %555 = vperm.xlu1 %14654, %v15800_v58  }
  0x1f   :  { %551 = vperm.xlu0 %14653, %v15786_v55  }
  0x22   :  { %559 = vperm.xlu1 %14654, %v15791_v56  }
  0x23   :  { %567 = vperm.xlu0 %14653, %v15817_v61  }
  0x26   :  { %563 = vperm.xlu1 %14654, %v15805_v59  }
  0x27   :  { %14656 = vset.pattern.permute.xlu0 %v20714_v2 }
  0x28   :  { %672 = vperm.xlu0 %14656, %v542_v1  }
  0x2a   :  { %14655 = vset.pattern.permute.xlu1 %v20714_v2 }
  0x2b   :  { %677 = vperm.xlu1 %14655, %v543_v3  }
  0x2c   :  { %692 = vperm.xlu0 %14656, %v20726_v4  }
  0x2f   :  { %682 = vperm.xlu1 %14655, %v544_v5  }
  0x30   :  { %697 = vperm.xlu0 %14656, %v20723_v6  }
  0x33   :  { %14657 = vset.pattern.permute.xlu1 %v20716_v0 }
  0x34   :  { %571 = vperm.xlu1 %14657, %v15812_v60  }
  0x38   :  { %14658 = vset.pattern.permute.xlu1 %v20714_v2 }
  0x39   :  { %687 = vperm.xlu1 %14658, %v20725_v7  }
  0x3d   :  { %14659 = vset.pattern.permute.xlu1 %v20716_v0 }
  0x3e   :  { %575 = vperm.xlu1 %14659, %v15829_v63  }
  0x42   :  { %579 = vperm.xlu1 %14659, %v15824_v62  }
  0x46   :  { %14660 = vset.pattern.permute.xlu1 %v20714_v2 }
  0xd6   :  { %v12908_v36 = vpop.f32.mrb[0].mxu0 }
  0xd7   :  { %v171_v37 = vpop.f32.mrb[1].mxu0  ;;  %v212_v39 = vsel %vm210_vm1, %v12908_v36, 0.0 }
  0xd8   :  { %v211_v38 = vsel %vm210_vm1, %v171_v37, 0.0 }
  0xd9   :  { %12934 = vmatprep.mubr.msk.f32.mxu1 %vm80_vm0, %v211_v38 }
  0xda   :  { %v12911_v40 = vpop.f32.mrb[2].mxu0  ;;  %12935 = vmatmul.mubr.msk.f32.vlgmr.msra.gmra.mrb[0].mxu1 %vm80_vm0, %v212_v39 }
  0xdb   :  { %v214_v41 = vsel %vm210_vm1, %v12911_v40, 0.0  ;;  %v181_v42 = vpop.f32.mrb[3].mxu0 }
  0xdc   :  { %v213_v43 = vsel %vm210_vm1, %v181_v42, 0.0  ;;  %v11652_v42 = vld [vmem:[%s20712_s3] ss:$0 sm:$0xff] }
  0xdd   :  { %12937 = vmatprep.mubr.msk.f32.mxu1 %vm80_vm0, %v213_v43 }
  0xde   :  { %v12914_v44 = vpop.f32.mrb[4].mxu0  ;;  %12938 = vmatmul.mubr.msk.f32.gmra.mrb[2].mxu1 %vm80_vm0, %v214_v41  ;;  %v592_v41 = vpop.permute.xlu0 %591 }
  0xdf   :  { %v216_v45 = vsel %vm210_vm1, %v12914_v44, 0.0  ;;  %v191_v46 = vpop.f32.mrb[5].mxu0 }
  0xe0   :  { %v215_v47 = vsel %vm210_vm1, %v191_v46, 0.0  ;;  %v600_v46 = vpop.permute.xlu1 %599 }
  0xe1   :  { %12940 = vmatprep.mubr.msk.f32.mxu1 %vm80_vm0, %v215_v47 }
  0xe2   :  { %v12917_v48 = vpop.f32.mrb[6].mxu0  ;;  %12941 = vmatmul.mubr.msk.f32.gmra.mrb[4].mxu1 %vm80_vm0, %v216_v45 }
  0xe3   :  { %v218_v49 = vsel %vm210_vm1, %v12917_v48, 0.0  ;;  %v201_v50 = vpop.f32.mrb[7].mxu0 }
  0xe4   :  { %v217_v51 = vsel %vm210_vm1, %v201_v50, 0.0 }
  0xe5   :  { %12943 = vmatprep.mubr.msk.f32.mxu1 %vm80_vm0, %v217_v51 }
  0xe6   :  { %12944 = vmatmul.mubr.msk.f32.gmra.mrb[6].mxu1 %vm80_vm0, %v218_v49  ;;  %v596_v49 = vpop.permute.xlu0 %595 }
 0x1ad   :  { %v12936_v8 = vpop.f32.mrb[0].mxu1 }
 0x1ae   :  { %v315_v9 = vadd.f32 %v12936_v8, %v15800_v58  ;;  %v309_v12 = vpop.f32.mrb[1].mxu1 }
 0x1af   :  { %v310_v13 = vadd.f32 %v309_v12, %v15786_v55 }
 0x1b0   :  { %v349_v17 = vmax.f32 %v315_v9, 0.0 }
 0x1b1   :  { %v348_v14 = vmax.f32 %v310_v13, 0.0  ;;  %v12939_v15 = vpop.f32.mrb[2].mxu1  ;;  %v604_v13 = vpop.permute.xlu1 %603 }
 0x1b2   :  { %v325_v18 = vadd.f32 %v12939_v15, %v15805_v59  ;;  %v319_v19 = vpop.f32.mrb[3].mxu1 }
 0x1b3   :  { %v320_v21 = vadd.f32 %v319_v19, %v15791_v56  ;;  %12970 = vmatprep.mubr.msk.f32.mxu0 %vm356_vm2, %v348_v14 }
 0x1b4   :  { %v351_v22 = vmax.f32 %v325_v18, 0.0  ;;  %12971 = vmatmul.mubr.msk.f32.vlgmr.msra.gmra.mrb[8].mxu0 %vm356_vm2, %v349_v17 }
 0x1b5   :  { %v350_v23 = vmax.f32 %v320_v21, 0.0  ;;  %v12942_v25 = vpop.f32.mrb[4].mxu1 }
 0x1b6   :  { %v335_v27 = vadd.f32 %v12942_v25, %v15812_v60  ;;  %v329_v28 = vpop.f32.mrb[5].mxu1 }
 0x1b7   :  { %v330_v30 = vadd.f32 %v329_v28, %v15817_v61  ;;  %12973 = vmatprep.mubr.msk.f32.mxu0 %vm356_vm2, %v350_v23  ;;  %v20724_v23 = vsub.f32 1.0, %v15829_v63 }
 0x1b8   :  { %v353_v31 = vmax.f32 %v335_v27, 0.0  ;;  %12974 = vmatmul.mubr.msk.f32.gmra.mrb[10].mxu0 %vm356_vm2, %v351_v22 }
 0x1b9   :  { %v352_v33 = vmax.f32 %v330_v30, 0.0  ;;  %v12945_v34 = vpop.f32.mrb[6].mxu1 }
 0x1ba   :  { %v345_v36 = vadd.f32 %v12945_v34, %v15824_v62  ;;  %v339_v37 = vpop.f32.mrb[7].mxu1  ;;  %v20718_v34 = vsub.f32 1.0, %v15824_v62 }
 0x1bb   :  { %v340_v38 = vadd.f32 %v339_v37, %v15829_v63  ;;  %12976 = vmatprep.mubr.msk.f32.mxu0 %vm356_vm2, %v352_v33 }
 0x1bc   :  { %v355_v39 = vmax.f32 %v345_v36, 0.0  ;;  %12977 = vmatmul.mubr.msk.f32.gmra.mrb[12].mxu0 %vm356_vm2, %v353_v31  ;;  %v608_v31 = vpop.permute.xlu0 %607 }
 0x1bd   :  { %v354_v40 = vmax.f32 %v340_v38, 0.0 }
 0x1bf   :  { %12979 = vmatprep.mubr.msk.f32.mxu0 %vm356_vm2, %v354_v40  ;;  %v612_v40 = vpop.permute.xlu1 %611 }
 0x1c0   :  { %12980 = vmatmul.mubr.msk.f32.gmra.mrb[14].mxu0 %vm356_vm2, %v355_v39 }
 0x287   :  { %v12972_v43 = vpop.f32.mrb[8].mxu0 }
 0x288   :  { %v453_v44 = vadd.f32 %v12972_v43, %v11652_v42  ;;  %v447_v45 = vpop.f32.mrb[9].mxu0 }
 0x289   :  { %v448_v47 = vadd.f32 %v11652_v42, %v447_v45 }
 0x28a   :  { %v15886_v48 = vmax.f32 %v453_v44, 0.0 }
 0x28b   :  { %v12975_v50 = vpop.f32.mrb[10].mxu0  ;;  %v15888_v51 = vmax.f32 %v448_v47, 0.0  ;;  %v37_v47 = vld [vmem:[%s20710_s2 + $0xa0] sm:$0xff] }
 0x28c   :  { %v463_v52 = vadd.f32 %v12975_v50, %v11652_v42  ;;  %v623_v53 = vmul.f32 %v596_v49, %v15886_v48  ;;  %v457_v8 = vpop.f32.mrb[11].mxu0  ;;  %v38_v49 = vld [vmem:[%s20710_s2 + $0xa8] sm:$0xff] }
 0x28d   :  { %v458_v9 = vadd.f32 %v11652_v42, %v457_v8  ;;  %v622_v19 = vmul.f32 %v592_v41, %v15888_v51  ;;  %v616_v41 = vpop.permute.xlu0 %615  ;;  %v15938_v50 = vpack.c.bf16 %v38_v49, %v37_v47 }
 0x28e   :  { %v15891_v12 = vmax.f32 %v463_v52, 0.0  ;;  %640 = vrot.lane.b32.xlu0 %v623_v53, %s15605_s11 }
 0x28f   :  { %v15894_v14 = vmax.f32 %v458_v9, 0.0  ;;  %v12978_v15 = vpop.f32.mrb[12].mxu0  ;;  %14051 = vmatprep.subr.bf16.mxu1 %v15938_v50 }
 0x290   :  { %v467_v17 = vpop.f32.mrb[13].mxu0  ;;  %v625_v18 = vmul.f32 %v604_v13, %v15891_v12  ;;  %v473_v27 = vadd.f32 %v12978_v15, %v11652_v42  ;;  %14053 = vmatpush3.bf16.msra.mxu1 %v15938_v50 }
 0x291   :  { %v468_v21 = vadd.f32 %v11652_v42, %v467_v17  ;;  %v624_v22 = vmul.f32 %v600_v46, %v15894_v14  ;;  %v552_v13 = vpop.permute.xlu0 %551 }
 0x292   :  { %644 = vrot.lane.b32.xlu1 %v625_v18, %s15605_s11  ;;  %638 = vrot.lane.b32.xlu0 %v622_v19, %s15605_s11  ;;  %v15908_v36 = vmax.f32 %v473_v27, 0.0  ;;  %v40_v27 = vld [vmem:[%s20710_s2 + $0xb8] sm:$0xff] }
 0x293   :  { %v12981_v25 = vpop.f32.mrb[14].mxu0  ;;  %v15902_v28 = vmax.f32 %v468_v21, 0.0 }
 0x294   :  { %v477_v30 = vpop.f32.mrb[15].mxu0  ;;  %v483_v37 = vadd.f32 %v12981_v25, %v11652_v42  ;;  %v627_v44 = vmul.f32 %v612_v40, %v15908_v36  ;;  %v39_v25 = vld [vmem:[%s20710_s2 + $0xb0] sm:$0xff] }
 0x295   :  { %v478_v33 = vadd.f32 %v11652_v42, %v477_v30  ;;  %v626_v39 = vmul.f32 %v608_v31, %v15902_v28  ;;  %v620_v42 = vpop.permute.xlu1 %619  ;;  %v568_v17 = vpop.permute.xlu0 %567  ;;  %v15948_v30 = vpack.c.bf16 %v40_v27, %v39_v25 }
 0x296   :  { %642 = vrot.lane.b32.xlu1 %v624_v22, %s15605_s11  ;;  %702 = vperm.xlu0 %14656, %v20724_v23   ;;  %v15916_v43 = vmax.f32 %v483_v37, 0.0 }
 0x297   :  { %v15910_v38 = vmax.f32 %v478_v33, 0.0  ;;  %20844 = vst [vmem:[#allocation3_spill] sm:$0xff] %v15948_v30  ;;  %14055 = vmatprep.subr.bf16.mxu1 %v15948_v30 }
 0x298   :  { %v629_v46 = vmul.f32 %v620_v42, %v15916_v43  ;;  %14057 = vmatpush3.bf16.msra.mxu1 %v15948_v30 }
 0x299   :  { %v628_v45 = vmul.f32 %v616_v41, %v15910_v38  ;;  %v556_v52 = vpop.permute.xlu1 %555  ;;  %v673_v19 = vpop.permute.xlu0 %672 }
 0x29a   :  { %646 = vrot.lane.b32.xlu1 %v626_v39, %s15605_s11  ;;  %707 = vperm.xlu0 %14656, %v20718_v34   ;;  %v583_v37 = vmul.f32 %v556_v52, %v15886_v48 }
 0x29d   :  { %v560_v53 = vpop.permute.xlu1 %559  ;;  %v693_v22 = vpop.permute.xlu0 %692 }
 0x29e   :  { %648 = vrot.lane.b32.xlu1 %v627_v44, %s15605_s11  ;;  %650 = vrot.lane.b32.xlu0 %v628_v45, %s15605_s11  ;;  %v582_v44 = vmul.f32 %v552_v13, %v15888_v51  ;;  %v584_v0 = vmul.f32 %v560_v53, %v15894_v14 }
 0x2a1   :  { %v564_v8 = vpop.permute.xlu1 %563  ;;  %v698_v33 = vpop.permute.xlu0 %697 }
 0x2a2   :  { %652 = vrot.lane.b32.xlu1 %v629_v46, %s15605_s11  ;;  %496 = vperm.xlu0 %14656, %v15786_v55   ;;  %v585_v42 = vmul.f32 %v564_v8, %v15891_v12 }
 0x2a5   :  { %v678_v9 = vpop.permute.xlu1 %677 }
 0x2a6   :  { %501 = vperm.xlu1 %14660, %v15800_v58   ;;  %506 = vperm.xlu0 %14656, %v15791_v56  }
 0x2a9   :  { %v683_v15 = vpop.permute.xlu1 %682 }
 0x2aa   :  { %511 = vperm.xlu1 %14660, %v15805_v59   ;;  %516 = vperm.xlu0 %14656, %v15817_v61  }
 0x2ad   :  { %v572_v18 = vpop.permute.xlu1 %571 }
 0x2ae   :  { %521 = vperm.xlu1 %14660, %v15812_v60   ;;  %526 = vperm.xlu0 %14656, %v15829_v63  }
 0x2b1   :  { %v688_v21 = vpop.permute.xlu1 %687 }
 0x2b2   :  { %531 = vperm.xlu1 %14660, %v15824_v62  }
 0x2b5   :  { %v576_v31 = vpop.permute.xlu1 %575 }
 0x2b9   :  { %v580_v39 = vpop.permute.xlu1 %579 }
 0x300   :  { %v641_v40 = vpop.permute.xlu0 %640 }
 0x301   :  { %v663_v41 = vadd.f32 %v641_v40, %v583_v37  ;;  %v587_v40 = vmul.f32 %v572_v18, %v15908_v36 }
 0x303   :  { %v711_v45 = vmul.f32 %v678_v9, %v663_v41  ;;  %v586_v9 = vmul.f32 %v568_v17, %v15902_v28 }
 0x304   :  { %v645_v46 = vpop.permute.xlu1 %644  ;;  %v639_v47 = vpop.permute.xlu0 %638 }
 0x305   :  { %v665_v49 = vadd.f32 %v645_v46, %v585_v42  ;;  %v662_v25 = vadd.f32 %v639_v47, %v582_v44  ;;  %728 = vrot.lane.b32.xlu1 %v711_v45, %s15605_s11  ;;  %v20719_v44 = vmov 100  }
 0x306   :  { %14662 = vset.pattern.permute.xlu1 %v20719_v44  ;;  %14661 = vset.pattern.permute.xlu0 %v20719_v44 }
 0x307   :  { %v713_v27 = vmul.f32 %v688_v21, %v665_v49  ;;  %v710_v2 = vmul.f32 %v673_v19, %v662_v25 }
 0x308   :  { %v643_v34 = vpop.permute.xlu1 %642 }
 0x309   :  { %v664_v52 = vadd.f32 %v643_v34, %v584_v0  ;;  %732 = vrot.lane.b32.xlu1 %v713_v27, %s15605_s11  ;;  %726 = vrot.lane.b32.xlu0 %v710_v2, %s15605_s11  ;;  %v589_v2 = vmul.f32 %v580_v39, %v15916_v43 }
 0x30b   :  { %v712_v13 = vmul.f32 %v683_v15, %v664_v52 }
 0x30c   :  { %v647_v8 = vpop.permute.xlu1 %646 }
 0x30d   :  { %v666_v37 = vadd.f32 %v647_v8, %v586_v9  ;;  %730 = vrot.lane.b32.xlu0 %v712_v13, %s15605_s11 }
 0x30f   :  { %v714_v41 = vmul.f32 %v693_v22, %v666_v37  ;;  %v588_v22 = vmul.f32 %v576_v31, %v15910_v38 }
 0x310   :  { %v649_v21 = vpop.permute.xlu1 %648 }
 0x311   :  { %v667_v19 = vadd.f32 %v649_v21, %v587_v40  ;;  %734 = vrot.lane.b32.xlu0 %v714_v41, %s15605_s11 }
 0x313   :  { %v715_v53 = vmul.f32 %v698_v33, %v667_v19 }
 0x314   :  { %v653_v0 = vpop.permute.xlu1 %652 }
 0x315   :  { %v703_v34 = vpop.permute.xlu0 %702  ;;  %736 = vrot.lane.b32.xlu1 %v715_v53, %s15605_s11  ;;  %v669_v17 = vadd.f32 %v653_v0, %v589_v2 }
 0x319   :  { %v708_v15 = vpop.permute.xlu0 %707 }
 0x31a   :  { %v717_v18 = vmul.f32 %v708_v15, %v669_v17 }
 0x31c   :  { %740 = vrot.lane.b32.xlu1 %v717_v18, %s15605_s11 }
 0x31d   :  { %v651_v45 = vpop.permute.xlu0 %650 }
 0x31e   :  { %v668_v33 = vadd.f32 %v651_v45, %v588_v22 }
 0x320   :  { %v716_v42 = vmul.f32 %v703_v34, %v668_v33  ;;  %948 = vperm.xlu1 %14662, %v15800_v58   ;;  %v15529_v58 = vld [vmem:[%s20711_s1 + $0x28] sm:$0xff] }
 0x321   :  { %v497_v39 = vpop.permute.xlu0 %496 }
 0x322   :  { %738 = vrot.lane.b32.xlu0 %v716_v42, %s15605_s11  ;;  %v534_v13 = vmul.f32 %v497_v39, %v15888_v51  ;;  %v44_v39 = vld [vmem:[%s20710_s2 + $0xd8] sm:$0xff] }
 0x324   :  { %952 = vperm.xlu1 %14662, %v15791_v56   ;;  %v15528_v56 = vld [vmem:[%s20711_s1 + $0x30] sm:$0xff] }
 0x325   :  { %v502_v31 = vpop.permute.xlu1 %501  ;;  %v507_v47 = vpop.permute.xlu0 %506 }
 0x326   :  { %944 = vperm.xlu0 %14661, %v15786_v55   ;;  %v535_v8 = vmul.f32 %v502_v31, %v15886_v48  ;;  %v536_v21 = vmul.f32 %v507_v47, %v15894_v14  ;;  %v45_v47 = vld [vmem:[%s20710_s2 + $0xe0] sm:$0xff]  ;;  %v20850_v55 = vsub.f32 1.0, %v15805_v59 }
 0x328   :  { %960 = vperm.xlu1 %14662, %v15817_v61  }
 0x329   :  { %v512_v46 = vpop.permute.xlu1 %511  ;;  %v517_v25 = vpop.permute.xlu0 %516 }
 0x32a   :  { %956 = vperm.xlu0 %14661, %v15805_v59   ;;  %v537_v53 = vmul.f32 %v512_v46, %v15891_v12  ;;  %v538_v34 = vmul.f32 %v517_v25, %v15902_v28  ;;  %v15530_v59 = vld [vmem:[%s20711_s1 + $0x38] sm:$0xff] }
 0x32c   :  { %968 = vperm.xlu1 %14662, %v15829_v63  }
 0x32d   :  { %v522_v49 = vpop.permute.xlu1 %521  ;;  %v527_v52 = vpop.permute.xlu0 %526 }
 0x32e   :  { %964 = vperm.xlu0 %14661, %v15812_v60   ;;  %v539_v12 = vmul.f32 %v522_v49, %v15908_v36  ;;  %v540_v28 = vmul.f32 %v527_v52, %v15910_v38  ;;  %v41_v36 = vld [vmem:[%s20710_s2 + $0xc0] sm:$0xff]  ;;  %v42_v38 = vld [vmem:[%s20710_s2 + $0xc8] sm:$0xff] }
 0x32f   :  { %v16027_v31 = vpack.c.bf16 %v42_v38, %v41_v36  ;;  %v46_v49 = vld [vmem:[%s20710_s2 + $0xe8] sm:$0xff] }
 0x330   :  { %v16043_v25 = vpack.c.bf16 %v46_v49, %v45_v47 }
 0x331   :  { %v532_v27 = vpop.permute.xlu1 %531  ;;  %20845 = vst [vmem:[#allocation4_spill] sm:$0xff] %v16027_v31  ;;  %14059 = vmatprep.subr.bf16.mxu0 %v16027_v31 }
 0x332   :  { %972 = vperm.xlu0 %14661, %v15824_v62   ;;  %v541_v22 = vmul.f32 %v532_v27, %v15916_v43  ;;  %v43_v43 = vld [vmem:[%s20710_s2 + $0xd0] sm:$0xff]  ;;  %14061 = vmatpush3.bf16.msra.mxu0 %v16027_v31  ;;  %20847 = vst [vmem:[#allocation6_spill] sm:$0xff] %v16043_v25  ;;  %v11653_v27 = vld [vmem:[%s20712_s3 + $0x1] ss:$0 sm:$0xff] }
 0x333   :  { %v16032_v46 = vpack.c.bf16 %v44_v39, %v43_v43 }
 0x335   :  { %20846 = vst [vmem:[#allocation5_spill] sm:$0xff] %v16032_v46  ;;  %14063 = vmatprep.subr.bf16.mxu0 %v16032_v46 }
 0x336   :  { %14065 = vmatpush3.bf16.msra.mxu0 %v16032_v46 }
 0x337   :  { %14067 = vmatprep.subr.bf16.mxu0 %v16043_v25 }
 0x33a   :  { %14069 = vmatpush3.bf16.msra.mxu0 %v16043_v25 }
 0x377   :  { %v729_v9 = vpop.permute.xlu1 %728 }
 0x378   :  { %v15982_v41 = vadd.f32 %v729_v9, %v535_v8 }
 0x37b   :  { %v727_v37 = vpop.permute.xlu0 %726  ;;  %v733_v19 = vpop.permute.xlu1 %732 }
 0x37c   :  { %v15980_v40 = vadd.f32 %v727_v37, %v534_v13  ;;  %v15992_v48 = vadd.f32 %v733_v19, %v537_v53  ;;  %v47_v53 = vld [vmem:[%s20710_s2 + $0xf0] sm:$0xff] }
 0x37e   :  { %12990 = vmatprep.mubr.msk.f32.mxu1 %vm210_vm1, %v15980_v40 }
 0x37f   :  { %12991 = vmatmul.mubr.msk.f32.vlgmr.msra.gmra.mrb[8].mxu1 %vm210_vm1, %v15982_v41  ;;  %v731_v0 = vpop.permute.xlu0 %730 }
 0x380   :  { %v15990_v51 = vadd.f32 %v731_v0, %v536_v21  ;;  %v48_v0 = vld [vmem:[%s20710_s2 + $0xf8] sm:$0xff] }
 0x382   :  { %12993 = vmatprep.mubr.msk.f32.mxu1 %vm210_vm1, %v15990_v51 }
 0x383   :  { %12994 = vmatmul.mubr.msk.f32.gmra.mrb[10].mxu1 %vm210_vm1, %v15992_v48  ;;  %v735_v14 = vpop.permute.xlu0 %734 }
 0x384   :  { %v15999_v2 = vadd.f32 %v735_v14, %v538_v34  ;;  %v16057_v14 = vpack.c.bf16 %v48_v0, %v47_v53 }
 0x386   :  { %12996 = vmatprep.mubr.msk.f32.mxu1 %vm210_vm1, %v15999_v2  ;;  %20848 = vst [vmem:[#allocation7_spill] sm:$0xff] %v16057_v14  ;;  %14071 = vmatprep.subr.bf16.mxu0 %v16057_v14 }
 0x387   :  { %v737_v17 = vpop.permute.xlu1 %736  ;;  %14073 = vmatpush3.bf16.msra.mxu0 %v16057_v14 }
 0x388   :  { %v16004_v15 = vadd.f32 %v737_v17, %v539_v12  ;;  %14091 = vmatprep.subr.bf16.mxu0 %v15665_v10 }
 0x38a   :  { %12997 = vmatmul.mubr.msk.f32.gmra.mrb[12].mxu1 %vm210_vm1, %v16004_v15 }
 0x38e   :  { %v741_v18 = vpop.permute.xlu1 %740 }
 0x38f   :  { %v16012_v42 = vadd.f32 %v741_v18, %v541_v22 }
 0x394   :  { %v739_v45 = vpop.permute.xlu0 %738 }
 0x395   :  { %v16010_v33 = vadd.f32 %v739_v45, %v540_v28 }
 0x397   :  { %12999 = vmatprep.mubr.msk.f32.mxu1 %vm210_vm1, %v16010_v33 }
 0x398   :  { %13000 = vmatmul.mubr.msk.f32.gmra.mrb[14].mxu1 %vm210_vm1, %v16012_v42 }
 0x39f   :  { %v16063_v17 = vpop.permute.xlu1 %948 }
 0x3a3   :  { %v16071_v49 = vpop.permute.xlu1 %952 }
 0x3a5   :  { %v16060_v12 = vpop.permute.xlu0 %944 }
 0x3a9   :  { %v16068_v47 = vpop.permute.xlu0 %956 }
 0x3ad   :  { %v16078_v53 = vpop.permute.xlu0 %964 }
 0x452   :  { %v12992_v52 = vpop.f32.mrb[8].mxu1 }
 0x453   :  { %v854_v9 = vadd.f32 %v12992_v52, %v11653_v27  ;;  %v848_v13 = vpop.f32.mrb[9].mxu1 }
 0x454   :  { %v849_v8 = vadd.f32 %v11653_v27, %v848_v13 }
 0x455   :  { %14755 = vtanh.f32 %v854_v9 }
 0x456   :  { %14757 = vtanh.f32 %v849_v8  ;;  %v12995_v37 = vpop.f32.mrb[10].mxu1 }
 0x457   :  { %v864_v21 = vadd.f32 %v12995_v37, %v11653_v27  ;;  %v858_v19 = vpop.f32.mrb[11].mxu1 }
 0x458   :  { %v859_v34 = vadd.f32 %v11653_v27, %v858_v19 }
 0x459   :  { %14759 = vtanh.f32 %v864_v21 }
 0x45a   :  { %14761 = vtanh.f32 %v859_v34 }
 0x45d   :  { %v12998_v28 = vpop.f32.mrb[12].mxu1 }
 0x45e   :  { %v874_v18 = vadd.f32 %v12998_v28, %v11653_v27  ;;  %v868_v22 = vpop.f32.mrb[13].mxu1 }
 0x45f   :  { %v14756_v45 = vpop.eup %14755  ;;  %v869_v36 = vadd.f32 %v11653_v27, %v868_v22  ;;  %v16080_v22 = vpop.permute.xlu1 %960 }
 0x460   :  { %v14758_v38 = vpop.eup %14757  ;;  %14763 = vtanh.f32 %v874_v18  ;;  %v1000_v43 = vmul.f32 %v14756_v45, %v16063_v17 }
 0x461   :  { %14765 = vtanh.f32 %v869_v36  ;;  %v999_v39 = vmul.f32 %v14758_v38, %v16060_v12  ;;  %v11691_v6 = vmul.f32 -1.442695, %v869_v36 }
 0x462   :  { %1017 = vrot.lane.b32.xlu0 %v1000_v43, %s15605_s11 }
 0x463   :  { %v14760_v52 = vpop.eup %14759  ;;  %1015 = vrot.lane.b32.xlu1 %v999_v39, %s15605_s11  ;;  %v16090_v57 = vpop.permute.xlu1 %968 }
 0x464   :  { %v14762_v13 = vpop.eup %14761  ;;  %v1002_v37 = vmul.f32 %v14760_v52, %v16068_v47 }
 0x465   :  { %v1001_v19 = vmul.f32 %v14762_v13, %v16071_v49 }
 0x466   :  { %1021 = vrot.lane.b32.xlu0 %v1002_v37, %s15605_s11  ;;  %v16086_v37 = vpop.permute.xlu0 %972 }
 0x467   :  { %1019 = vrot.lane.b32.xlu1 %v1001_v19, %s15605_s11 }
 0x46a   :  { %v14764_v0 = vpop.eup %14763 }
 0x46b   :  { %v14766_v28 = vpop.eup %14765  ;;  %v1004_v45 = vmul.f32 %v14764_v0, %v16078_v53  ;;  %v13001_v38 = vpop.f32.mrb[14].mxu1 }
 0x46c   :  { %v1003_v43 = vmul.f32 %v14766_v28, %v16080_v22  ;;  %v884_v39 = vadd.f32 %v13001_v38, %v11653_v27  ;;  %v878_v44 = vpop.f32.mrb[15].mxu1  ;;  %v11687_v38 = vmul.f32 -1.442695, %v849_v8 }
 0x46d   :  { %1025 = vrot.lane.b32.xlu0 %v1004_v45, %s15605_s11  ;;  %v879_v52 = vadd.f32 %v11653_v27, %v878_v44  ;;  %v11688_v45 = vmul.f32 -1.442695, %v854_v9  ;;  %v11689_v44 = vmul.f32 -1.442695, %v859_v34  ;;  %v11692_v27 = vmul.f32 -1.442695, %v874_v18 }
 0x46e   :  { %14767 = vtanh.f32 %v884_v39  ;;  %1023 = vrot.lane.b32.xlu1 %v1003_v43, %s15605_s11  ;;  %v11690_v43 = vmul.f32 -1.442695, %v864_v21  ;;  %v11694_v18 = vmul.f32 -1.442695, %v884_v39 }
 0x46f   :  { %14769 = vtanh.f32 %v879_v52  ;;  %v11693_v36 = vmul.f32 -1.442695, %v879_v52 }
 0x470   :  { %14771 = vpow2.f32 %v11688_v45 }
 0x471   :  { %14773 = vpow2.f32 %v11687_v38 }
 0x472   :  { %14775 = vpow2.f32 %v11690_v43 }
 0x473   :  { %14777 = vpow2.f32 %v11689_v44 }
 0x474   :  { %14779 = vpow2.f32 %v11692_v27 }
 0x475   :  { %14781 = vpow2.f32 %v11691_v6 }
 0x478   :  { %v14768_v13 = vpop.eup %14767 }
 0x479   :  { %v1006_v19 = vmul.f32 %v14768_v13, %v16086_v37  ;;  %v14770_v0 = vpop.eup %14769 }
 0x47a   :  { %v1005_v28 = vmul.f32 %v14770_v0, %v16090_v57  ;;  %v14772_v13 = vpop.eup %14771 }
 0x47b   :  { %1029 = vrot.lane.b32.xlu0 %v1006_v19, %s15605_s11  ;;  %v14774_v19 = vpop.eup %14773  ;;  %v912_v23 = vadd.f32 1.0, %v14772_v13 }
 0x47c   :  { %1027 = vrot.lane.b32.xlu1 %v1005_v28, %s15605_s11  ;;  %v14776_v7 = vpop.eup %14775  ;;  %v911_v4 = vadd.f32 1.0, %v14774_v19 }
 0x47d   :  { %v14778_v0 = vpop.eup %14777  ;;  %14783 = vrcp.f32 %v912_v23  ;;  %v914_v28 = vadd.f32 1.0, %v14776_v7 }
 0x47e   :  { %14785 = vrcp.f32 %v911_v4  ;;  %v913_v9 = vadd.f32 1.0, %v14778_v0  ;;  %v14780_v8 = vpop.eup %14779 }
 0x47f   :  { %v14782_v21 = vpop.eup %14781  ;;  %14787 = vrcp.f32 %v914_v28  ;;  %v916_v34 = vadd.f32 1.0, %v14780_v8 }
 0x480   :  { %14789 = vrcp.f32 %v913_v9  ;;  %v915_v45 = vadd.f32 1.0, %v14782_v21 }
 0x481   :  { %14791 = vrcp.f32 %v916_v34 }
 0x482   :  { %14793 = vrcp.f32 %v915_v45 }
 0x483   :  { %14795 = vpow2.f32 %v11694_v18 }
 0x484   :  { %14797 = vpow2.f32 %v11693_v36 }
 0x487   :  { %v14784_v38 = vpop.eup %14783 }
 0x488   :  { %v14786_v43 = vpop.eup %14785  ;;  %v976_v6 = vmul.f32 %v14784_v38, %v16063_v17 }
 0x489   :  { %v14788_v23 = vpop.eup %14787  ;;  %v975_v4 = vmul.f32 %v14786_v43, %v16060_v12 }
 0x48a   :  { %v14790_v7 = vpop.eup %14789  ;;  %v984_v44 = vmul.f32 %v976_v6, %v15982_v41  ;;  %v978_v27 = vmul.f32 %v14788_v23, %v16068_v47 }
 0x48b   :  { %v983_v13 = vmul.f32 %v975_v4, %v15980_v40  ;;  %v977_v39 = vmul.f32 %v14790_v7, %v16071_v49  ;;  %v14792_v52 = vpop.eup %14791 }
 0x48c   :  { %v14794_v19 = vpop.eup %14793  ;;  %v986_v0 = vmul.f32 %v978_v27, %v15992_v48  ;;  %v992_v28 = vsub.f32 %v15982_v41, %v984_v44  ;;  %v980_v47 = vmul.f32 %v14792_v52, %v16078_v53 }
 0x48d   :  { %v14796_v17 = vpop.eup %14795  ;;  %v985_v9 = vmul.f32 %v977_v39, %v15990_v51  ;;  %v991_v12 = vsub.f32 %v15980_v40, %v983_v13  ;;  %v979_v49 = vmul.f32 %v14794_v19, %v16080_v22 }
 0x48e   :  { %v14798_v21 = vpop.eup %14797  ;;  %v918_v36 = vadd.f32 1.0, %v14796_v17  ;;  %v994_v38 = vsub.f32 %v15992_v48, %v986_v0  ;;  %v988_v53 = vmul.f32 %v980_v47, %v16004_v15 }
 0x48f   :  { %v917_v43 = vadd.f32 1.0, %v14798_v21  ;;  %v993_v41 = vsub.f32 %v15990_v51, %v985_v9  ;;  %v987_v22 = vmul.f32 %v979_v49, %v15999_v2 }
 0x490   :  { %14799 = vrcp.f32 %v918_v36  ;;  %v996_v27 = vsub.f32 %v16004_v15, %v988_v53 }
 0x491   :  { %14801 = vrcp.f32 %v917_v43  ;;  %v995_v39 = vsub.f32 %v15999_v2, %v987_v22 }
 0x49a   :  { %v14800_v15 = vpop.eup %14799 }
 0x49b   :  { %v14802_v2 = vpop.eup %14801  ;;  %v982_v9 = vmul.f32 %v14800_v15, %v16086_v37 }
 0x4d4   :  { %v1018_v8 = vpop.permute.xlu0 %1017 }
 0x4d5   :  { %v1040_v34 = vadd.f32 %v1018_v8, %v992_v28  ;;  %v1016_v45 = vpop.permute.xlu1 %1015  ;;  %v981_v8 = vmul.f32 %v14802_v2, %v16090_v57  ;;  %v11654_v57 = vld [vmem:[%s20712_s3 + $0x2] ss:$0 sm:$0xff] }
 0x4d6   :  { %v1039_v18 = vadd.f32 %v1016_v45, %v991_v12  ;;  %v990_v12 = vmul.f32 %v982_v9, %v16012_v42 }
 0x4d7   :  { %v1048_v4 = vsel %vm210_vm1, %v1040_v34, 0.0  ;;  %v989_v21 = vmul.f32 %v981_v8, %v16010_v33 }
 0x4d8   :  { %v1022_v6 = vpop.permute.xlu0 %1021  ;;  %v1047_v23 = vsel %vm210_vm1, %v1039_v18, 0.0  ;;  %v998_v45 = vsub.f32 %v16012_v42, %v990_v12 }
 0x4d9   :  { %v1042_v40 = vadd.f32 %v1022_v6, %v994_v38  ;;  %v1020_v7 = vpop.permute.xlu1 %1019  ;;  %13018 = vmatprep.mubr.msk.f32.mxu0 %vm80_vm0, %v1047_v23  ;;  %v997_v47 = vsub.f32 %v16010_v33, %v989_v21 }
 0x4da   :  { %v1041_v44 = vadd.f32 %v1020_v7, %v993_v41  ;;  %13019 = vmatmul.mubr.msk.f32.vlgmr.msra.gmra.mrb[16].mxu0 %vm80_vm0, %v1048_v4 }
 0x4db   :  { %14093 = vmatpush3.bf16.msra.mxu0 %v15665_v10  ;;  %v1050_v48 = vsel %vm210_vm1, %v1042_v40, 0.0 }
 0x4dc   :  { %v1049_v51 = vsel %vm210_vm1, %v1041_v44, 0.0  ;;  %14095 = vmatprep.subr.bf16.mxu0 %v15667_v11 }
 0x4dd   :  { %13021 = vmatprep.mubr.msk.f32.mxu0 %vm80_vm0, %v1049_v51  ;;  %v20735_v51 = vmov 99  }
 0x4de   :  { %13022 = vmatmul.mubr.msk.f32.gmra.mrb[18].mxu0 %vm80_vm0, %v1050_v48  ;;  %14663 = vset.pattern.permute.xlu1 %v20735_v51 }
 0x4df   :  { %v1026_v13 = vpop.permute.xlu0 %1025  ;;  %14097 = vmatpush3.bf16.msra.mxu0 %v15667_v11  ;;  %14664 = vset.pattern.permute.xlu0 %v20735_v51 }
 0x4e0   :  { %v1044_v52 = vadd.f32 %v1026_v13, %v996_v27  ;;  %v1024_v19 = vpop.permute.xlu1 %1023  ;;  %14099 = vmatprep.subr.bf16.mxu0 %v15686_v16 }
 0x4e1   :  { %v1043_v0 = vadd.f32 %v1024_v19, %v995_v39 }
 0x4e2   :  { %v1052_v17 = vsel %vm210_vm1, %v1044_v52, 0.0 }
 0x4e3   :  { %v1051_v28 = vsel %vm210_vm1, %v1043_v0, 0.0  ;;  %14101 = vmatpush3.bf16.msra.mxu0 %v15686_v16 }
 0x4e4   :  { %13024 = vmatprep.mubr.msk.f32.mxu0 %vm80_vm0, %v1051_v28  ;;  %14103 = vmatprep.subr.bf16.mxu0 %v15703_v20 }
 0x4e5   :  { %13025 = vmatmul.mubr.msk.f32.gmra.mrb[20].mxu0 %vm80_vm0, %v1052_v17 }
 0x4e7   :  { %14105 = vmatpush3.bf16.msra.mxu0 %v15703_v20 }
 0x4e8   :  { %14131 = vmatprep.subr.bf16.mxu0 %v15938_v50 }
 0x4ed   :  { %v1030_v34 = vpop.permute.xlu0 %1029 }
 0x4ee   :  { %v1046_v18 = vadd.f32 %v1030_v34, %v998_v45  ;;  %v1028_v49 = vpop.permute.xlu1 %1027 }
 0x4ef   :  { %v1045_v36 = vadd.f32 %v1028_v49, %v997_v47 }
 0x4f0   :  { %v1054_v37 = vsel %vm210_vm1, %v1046_v18, 0.0 }
 0x4f1   :  { %v1053_v38 = vsel %vm210_vm1, %v1045_v36, 0.0 }
 0x4f2   :  { %13027 = vmatprep.mubr.msk.f32.mxu0 %vm80_vm0, %v1053_v38 }
 0x4f3   :  { %13028 = vmatmul.mubr.msk.f32.gmra.mrb[22].mxu0 %vm80_vm0, %v1054_v37 }
 0x5ad   :  { %v13020_v43 = vpop.f32.mrb[16].mxu0 }
 0x5ae   :  { %v16145_v6 = vadd.f32 %v13020_v43, %v11654_v57  ;;  %v1145_v42 = vpop.f32.mrb[17].mxu0 }
 0x5af   :  { %v16147_v33 = vadd.f32 %v11654_v57, %v1145_v42 }
 0x5b0   :  { %1242 = vrot.lane.b32.xlu0 %v16145_v6, %s15607_s14  ;;  %v11704_v52 = vmul.f32 -1.442695, %v16145_v6 }
 0x5b1   :  { %1240 = vrot.lane.b32.xlu1 %v16147_v33, %s15607_s14  ;;  %v13023_v41 = vpop.f32.mrb[18].mxu0  ;;  %v11703_v19 = vmul.f32 -1.442695, %v16147_v33 }
 0x5b2   :  { %v16153_v23 = vadd.f32 %v13023_v41, %v11654_v57  ;;  %v1155_v4 = vpop.f32.mrb[19].mxu0  ;;  %14803 = vpow2.f32 %v11704_v52 }
 0x5b3   :  { %v16155_v40 = vadd.f32 %v11654_v57, %v1155_v4  ;;  %14805 = vpow2.f32 %v11703_v19 }
 0x5b4   :  { %1246 = vrot.lane.b32.xlu0 %v16153_v23, %s15607_s14  ;;  %v11706_v0 = vmul.f32 -1.442695, %v16153_v23 }
 0x5b5   :  { %1244 = vrot.lane.b32.xlu1 %v16155_v40, %s15607_s14  ;;  %v11705_v28 = vmul.f32 -1.442695, %v16155_v40 }
 0x5b6   :  { %14807 = vpow2.f32 %v11706_v0 }
 0x5b7   :  { %14809 = vpow2.f32 %v11705_v28 }
 0x5b8   :  { %v13026_v7 = vpop.f32.mrb[20].mxu0 }
 0x5b9   :  { %v16161_v53 = vadd.f32 %v13026_v7, %v11654_v57  ;;  %v1165_v44 = vpop.f32.mrb[21].mxu0 }
 0x5ba   :  { %v16163_v22 = vadd.f32 %v11654_v57, %v1165_v44 }
 0x5bb   :  { %1250 = vrot.lane.b32.xlu0 %v16161_v53, %s15607_s14  ;;  %v11708_v17 = vmul.f32 -1.442695, %v16161_v53 }
 0x5bc   :  { %1248 = vrot.lane.b32.xlu1 %v16163_v22, %s15607_s14  ;;  %v11707_v15 = vmul.f32 -1.442695, %v16163_v22  ;;  %v14804_v2 = vpop.eup %14803 }
 0x5bd   :  { %14811 = vpow2.f32 %v11708_v17  ;;  %v14806_v9 = vpop.eup %14805  ;;  %v1209_v8 = vadd.f32 1.0, %v14804_v2 }
 0x5be   :  { %14813 = vpow2.f32 %v11707_v15  ;;  %v1208_v21 = vadd.f32 1.0, %v14806_v9 }
 0x5bf   :  { %14815 = vrcp.f32 %v1209_v8 }
 0x5c0   :  { %v14808_v12 = vpop.eup %14807  ;;  %14817 = vrcp.f32 %v1208_v21 }
 0x5c1   :  { %v14810_v34 = vpop.eup %14809  ;;  %v1211_v45 = vadd.f32 1.0, %v14808_v12 }
 0x5c2   :  { %v1210_v47 = vadd.f32 1.0, %v14810_v34 }
 0x5c3   :  { %14819 = vrcp.f32 %v1211_v45 }
 0x5c4   :  { %14821 = vrcp.f32 %v1210_v47 }
 0x5c6   :  { %v13029_v48 = vpop.f32.mrb[22].mxu0 }
 0x5c7   :  { %v16171_v27 = vadd.f32 %v13029_v48, %v11654_v57  ;;  %v1175_v13 = vpop.f32.mrb[23].mxu0  ;;  %v14812_v18 = vpop.eup %14811 }
 0x5c8   :  { %v16173_v39 = vadd.f32 %v11654_v57, %v1175_v13  ;;  %v14814_v49 = vpop.eup %14813  ;;  %v1213_v36 = vadd.f32 1.0, %v14812_v18 }
 0x5c9   :  { %1254 = vrot.lane.b32.xlu0 %v16171_v27, %s15607_s14  ;;  %v1212_v38 = vadd.f32 1.0, %v14814_v49  ;;  %v11710_v37 = vmul.f32 -1.442695, %v16171_v27  ;;  %v16187_v43 = vpop.eup %14815 }
 0x5ca   :  { %1252 = vrot.lane.b32.xlu1 %v16173_v39, %s15607_s14  ;;  %v11709_v57 = vmul.f32 -1.442695, %v16173_v39  ;;  %14823 = vrcp.f32 %v1213_v36  ;;  %v16189_v41 = vpop.eup %14817 }
 0x5cb   :  { %14825 = vrcp.f32 %v1212_v38 }
 0x5cc   :  { %14827 = vpow2.f32 %v11710_v37 }
 0x5cd   :  { %14829 = vpow2.f32 %v11709_v57  ;;  %v16194_v48 = vpop.eup %14819 }
 0x5ce   :  { %v16197_v52 = vpop.eup %14821 }
 0x5d4   :  { %v16203_v17 = vpop.eup %14823 }
 0x5d5   :  { %v16205_v15 = vpop.eup %14825 }
 0x5d6   :  { %v14828_v9 = vpop.eup %14827 }
 0x5d7   :  { %v14830_v21 = vpop.eup %14829  ;;  %v1215_v45 = vadd.f32 1.0, %v14828_v9 }
 0x5d8   :  { %v1214_v47 = vadd.f32 1.0, %v14830_v21 }
 0x5d9   :  { %14831 = vrcp.f32 %v1215_v45 }
 0x5da   :  { %14833 = vrcp.f32 %v1214_v47 }
 0x5e3   :  { %v16211_v18 = vpop.eup %14831 }
 0x5e4   :  { %v16213_v36 = vpop.eup %14833 }
 0x622   :  { %v1243_v42 = vpop.permute.xlu0 %1242 }
 0x623   :  { %v1265_v4 = vmul.f32 %v16187_v43, %v1243_v42  ;;  %v1241_v7 = vpop.permute.xlu1 %1240  ;;  %v15523_v42 = vld [vmem:[%s20711_s1 + $0x8] sm:$0xff] }
 0x624   :  { %v1264_v44 = vmul.f32 %v16189_v41, %v1241_v7  ;;  %v15525_v7 = vld [vmem:[%s20711_s1 + $0x10] sm:$0xff] }
 0x625   :  { %1282 = vrot.lane.b32.xlu0 %v1265_v4, %s15609_s15  ;;  %v15524_v4 = vld [vmem:[%s20711_s1] sm:$0xff] }
 0x626   :  { %1280 = vrot.lane.b32.xlu1 %v1264_v44, %s15609_s15  ;;  %v1247_v13 = vpop.permute.xlu0 %1246  ;;  %v15526_v44 = vld [vmem:[%s20711_s1 + $0x20] sm:$0xff] }
 0x627   :  { %v1267_v19 = vmul.f32 %v16194_v48, %v1247_v13  ;;  %v1245_v0 = vpop.permute.xlu1 %1244  ;;  %v15527_v13 = vld [vmem:[%s20711_s1 + $0x18] sm:$0xff] }
 0x628   :  { %v1266_v28 = vmul.f32 %v16197_v52, %v1245_v0 }
 0x629   :  { %1286 = vrot.lane.b32.xlu0 %v1267_v19, %s15609_s15  ;;  %v20849_v19 = vsub.f32 1.0, %v15817_v61  ;;  %v20853_v61 = vmov 97  }
 0x62a   :  { %1284 = vrot.lane.b32.xlu1 %v1266_v28, %s15609_s15 }
 0x62d   :  { %v1251_v2 = vpop.permute.xlu0 %1250 }
 0x62e   :  { %v1269_v8 = vmul.f32 %v16203_v17, %v1251_v2  ;;  %v1249_v12 = vpop.permute.xlu1 %1248 }
 0x62f   :  { %v1268_v34 = vmul.f32 %v16205_v15, %v1249_v12 }
 0x630   :  { %1290 = vrot.lane.b32.xlu0 %v1269_v8, %s15609_s15 }
 0x631   :  { %1288 = vrot.lane.b32.xlu1 %v1268_v34, %s15609_s15 }
 0x63b   :  { %v1255_v49 = vpop.permute.xlu0 %1254 }
 0x63c   :  { %v1271_v38 = vmul.f32 %v16211_v18, %v1255_v49  ;;  %v1253_v37 = vpop.permute.xlu1 %1252 }
 0x63d   :  { %v1270_v57 = vmul.f32 %v16213_v36, %v1253_v37 }
 0x63e   :  { %1294 = vrot.lane.b32.xlu0 %v1271_v38, %s15609_s15 }
 0x63f   :  { %1292 = vrot.lane.b32.xlu1 %v1270_v57, %s15609_s15 }
 0x642   :  { %1389 = vperm.xlu0 %14664, %v15523_v42  }
 0x643   :  { %1385 = vperm.xlu1 %14663, %v15524_v4  }
 0x646   :  { %1393 = vperm.xlu0 %14664, %v15525_v7  }
 0x647   :  { %1425 = vperm.xlu1 %14663, %v542_v1   ;;  %v20851_v1 = vsub.f32 1.0, %v15829_v63 }
 0x64a   :  { %1433 = vperm.xlu0 %14664, %v544_v5   ;;  %v20854_v5 = vsub.f32 1.0, %v15824_v62 }
 0x64b   :  { %1429 = vperm.xlu1 %14663, %v543_v3   ;;  %v20852_v3 = vsub.f32 1.0, %v15812_v60 }
 0x64e   :  { %1401 = vperm.xlu0 %14664, %v15526_v44  }
 0x64f   :  { %1397 = vperm.xlu1 %14663, %v15527_v13  }
 0x652   :  { %1441 = vperm.xlu0 %14664, %v20849_v19  }
 0x653   :  { %1437 = vperm.xlu1 %14663, %v20850_v55  }
 0x656   :  { %1409 = vperm.xlu0 %14664, %v15528_v56  }
 0x657   :  { %1405 = vperm.xlu1 %14663, %v15529_v58  }
 0x65a   :  { %1449 = vperm.xlu0 %14664, %v20851_v1  }
 0x65b   :  { %1445 = vperm.xlu1 %14663, %v20852_v3  }
 0x65e   :  { %14665 = vset.pattern.permute.xlu0 %v20853_v61 }
 0x65f   :  { %1413 = vperm.xlu1 %14663, %v15530_v59  }
 0x663   :  { %1453 = vperm.xlu1 %14663, %v20854_v5  }
 0x667   :  { %14666 = vset.pattern.permute.xlu1 %v20853_v61 }
 0x697   :  { %v1283_v0 = vpop.permute.xlu0 %1282 }
 0x698   :  { %v1305_v28 = vadd.f32 %v1283_v0, %v16145_v6  ;;  %v1281_v63 = vpop.permute.xlu1 %1280 }
 0x699   :  { %v1304_v2 = vadd.f32 %v1281_v63, %v16147_v33  ;;  %v1321_v63 = vsub.f32 1.0, %v16187_v43 }
 0x69a   :  { %14835 = vtanh.f32 %v1305_v28 }
 0x69b   :  { %14837 = vtanh.f32 %v1304_v2  ;;  %v1287_v60 = vpop.permute.xlu0 %1286 }
 0x69c   :  { %v1307_v9 = vadd.f32 %v1287_v60, %v16153_v23  ;;  %v1285_v8 = vpop.permute.xlu1 %1284  ;;  %v1320_v60 = vsub.f32 1.0, %v16189_v41 }
 0x69d   :  { %v1306_v12 = vadd.f32 %v1285_v8, %v16155_v40 }
 0x69e   :  { %14839 = vtanh.f32 %v1307_v9  ;;  %v1369_v9 = vmul.f32 0.0, %v16187_v43 }
 0x69f   :  { %14841 = vtanh.f32 %v1306_v12 }
 0x6a2   :  { %v1291_v62 = vpop.permute.xlu0 %1290 }
 0x6a3   :  { %v1309_v21 = vadd.f32 %v1291_v62, %v16161_v53  ;;  %v1289_v34 = vpop.permute.xlu1 %1288  ;;  %v1368_v62 = vmul.f32 0.0, %v16189_v41 }
 0x6a4   :  { %v14836_v45 = vpop.eup %14835  ;;  %v1308_v6 = vadd.f32 %v1289_v34, %v16163_v22 }
 0x6a5   :  { %v14838_v47 = vpop.eup %14837  ;;  %14843 = vtanh.f32 %v1309_v21  ;;  %1338 = vrot.lane.b32.xlu1 %v14836_v45, %s15605_s11  ;;  %v1323_v45 = vsub.f32 1.0, %v16194_v48 }
 0x6a6   :  { %14845 = vtanh.f32 %v1308_v6  ;;  %1336 = vrot.lane.b32.xlu0 %v14838_v47, %s15605_s11 }
 0x6a8   :  { %v14840_v33 = vpop.eup %14839 }
 0x6a9   :  { %v14842_v23 = vpop.eup %14841  ;;  %1342 = vrot.lane.b32.xlu1 %v14840_v33, %s15605_s11  ;;  %v1322_v33 = vsub.f32 1.0, %v16197_v52 }
 0x6aa   :  { %1340 = vrot.lane.b32.xlu0 %v14842_v23, %s15605_s11 }
 0x6af   :  { %v14844_v40 = vpop.eup %14843 }
 0x6b0   :  { %v14846_v49 = vpop.eup %14845  ;;  %1346 = vrot.lane.b32.xlu1 %v14844_v40, %s15605_s11  ;;  %v1295_v53 = vpop.permute.xlu0 %1294 }
 0x6b1   :  { %1344 = vrot.lane.b32.xlu0 %v14846_v49, %s15605_s11  ;;  %v1311_v22 = vadd.f32 %v1295_v53, %v16171_v27  ;;  %v1293_v38 = vpop.permute.xlu1 %1292  ;;  %v1371_v49 = vmul.f32 0.0, %v16194_v48 }
 0x6b2   :  { %v1310_v37 = vadd.f32 %v1293_v38, %v16173_v39 }
 0x6b3   :  { %14847 = vtanh.f32 %v1311_v22 }
 0x6b4   :  { %14849 = vtanh.f32 %v1310_v37  ;;  %v1370_v37 = vmul.f32 0.0, %v16197_v52 }
 0x6bd   :  { %v14848_v57 = vpop.eup %14847 }
 0x6be   :  { %v14850_v42 = vpop.eup %14849  ;;  %1350 = vrot.lane.b32.xlu1 %v14848_v57, %s15605_s11 }
 0x6bf   :  { %1348 = vrot.lane.b32.xlu0 %v14850_v42, %s15605_s11 }
 0x6c1   :  { %v1390_v13 = vpop.permute.xlu0 %1389 }
 0x6c2   :  { %v1386_v4 = vpop.permute.xlu1 %1385 }
 0x6c5   :  { %v1394_v55 = vpop.permute.xlu0 %1393 }
 0x6c6   :  { %v1426_v7 = vpop.permute.xlu1 %1425 }
 0x6c7   :  { %v1456_v38 = vmul.f32 0.0, %v1426_v7 }
 0x6c9   :  { %v1434_v58 = vpop.permute.xlu0 %1433 }
 0x6ca   :  { %v1430_v44 = vpop.permute.xlu1 %1429 }
 0x6cb   :  { %v1457_v23 = vmul.f32 0.0, %v1430_v44  ;;  %v1458_v44 = vmul.f32 0.0, %v1434_v58 }
 0x6cd   :  { %v1402_v1 = vpop.permute.xlu0 %1401 }
 0x6ce   :  { %v1398_v19 = vpop.permute.xlu1 %1397 }
 0x6d1   :  { %v1442_v39 = vpop.permute.xlu0 %1441 }
 0x6d2   :  { %v1438_v56 = vpop.permute.xlu1 %1437 }
 0x6d5   :  { %v16279_v5 = vpop.permute.xlu0 %1409 }
 0x6d6   :  { %v1406_v27 = vpop.permute.xlu1 %1405 }
 0x6d9   :  { %v16283_v28 = vpop.permute.xlu0 %1449 }
 0x6da   :  { %v1446_v3 = vpop.permute.xlu1 %1445 }
 0x6de   :  { %v16277_v59 = vpop.permute.xlu1 %1413 }
 0x6e2   :  { %v16281_v0 = vpop.permute.xlu1 %1453 }
 0x717   :  { %v1339_v2 = vpop.permute.xlu1 %1338 }
 0x718   :  { %v1361_v8 = vmul.f32 %v1339_v2, %v1321_v63  ;;  %v1337_v12 = vpop.permute.xlu0 %1336 }
 0x719   :  { %v1360_v21 = vmul.f32 %v1337_v12, %v1320_v60  ;;  %v1459_v60 = vmul.f32 0.0, %v1438_v56  ;;  %v1373_v56 = vmul.f32 0.0, %v16203_v17 }
 0x71a   :  { %v1377_v34 = vadd.f32 %v1369_v9, %v1361_v8 }
 0x71b   :  { %v1376_v6 = vadd.f32 %v1368_v62, %v1360_v21  ;;  %v1343_v47 = vpop.permute.xlu1 %1342  ;;  %v1372_v62 = vmul.f32 0.0, %v16205_v15 }
 0x71c   :  { %v1417_v40 = vmul.f32 %v1390_v13, %v1377_v34  ;;  %v1363_v53 = vmul.f32 %v1343_v47, %v1323_v45  ;;  %v1341_v22 = vpop.permute.xlu0 %1340  ;;  %v1324_v13 = vsub.f32 1.0, %v16205_v15  ;;  %v1461_v34 = vmul.f32 0.0, %v1446_v3 }
 0x71d   :  { %v1416_v43 = vmul.f32 %v1386_v4, %v1376_v6  ;;  %v1362_v57 = vmul.f32 %v1341_v22, %v1322_v33  ;;  %v1325_v4 = vsub.f32 1.0, %v16203_v17  ;;  %v1460_v6 = vmul.f32 0.0, %v1442_v39 }
 0x71e   :  { %v16293_v41 = vadd.f32 %v1457_v23, %v1417_v40  ;;  %v1379_v42 = vadd.f32 %v1371_v49, %v1363_v53  ;;  %v1327_v15 = vsub.f32 1.0, %v16211_v18  ;;  %v1326_v40 = vsub.f32 1.0, %v16213_v36 }
 0x71f   :  { %v16295_v63 = vadd.f32 %v1456_v38, %v1416_v43  ;;  %v1378_v2 = vadd.f32 %v1370_v37, %v1362_v57  ;;  %v1374_v49 = vmul.f32 0.0, %v16213_v36  ;;  %v1463_v43 = vmul.f32 0.0, %v16281_v0 }
 0x720   :  { %v1419_v9 = vmul.f32 %v1398_v19, %v1379_v42  ;;  %1482 = vrot.lane.b32.xlu1 %v16293_v41, %s15605_s11  ;;  %v1462_v57 = vmul.f32 0.0, %v16283_v28 }
 0x721   :  { %v1418_v48 = vmul.f32 %v1394_v55, %v1378_v2  ;;  %1480 = vrot.lane.b32.xlu0 %v16295_v63, %s15605_s11 }
 0x722   :  { %v16302_v52 = vadd.f32 %v1459_v60, %v1419_v9  ;;  %v1347_v7 = vpop.permute.xlu1 %1346 }
 0x723   :  { %v16305_v8 = vadd.f32 %v1458_v44, %v1418_v48  ;;  %v1365_v19 = vmul.f32 %v1347_v7, %v1325_v4  ;;  %v1345_v12 = vpop.permute.xlu0 %1344 }
 0x724   :  { %v1364_v58 = vmul.f32 %v1345_v12, %v1324_v13  ;;  %1486 = vrot.lane.b32.xlu1 %v16302_v52, %s15605_s11  ;;  %v11714_v12 = vld [vmem:[%s20709_s0 + $0x58] sm:$0xff] }
 0x725   :  { %v1381_v55 = vadd.f32 %v1373_v56, %v1365_v19  ;;  %1484 = vrot.lane.b32.xlu0 %v16305_v8, %s15605_s11  ;;  %v11712_v56 = vld [vmem:[%s20709_s0 + $0x48] sm:$0xff]  ;;  %v11713_v19 = vld [vmem:[%s20709_s0 + $0x50] sm:$0xff] }
 0x726   :  { %v1380_v21 = vadd.f32 %v1372_v62, %v1364_v58  ;;  %v11715_v62 = vld [vmem:[%s20709_s0 + $0x60] sm:$0xff]  ;;  %v11716_v58 = vld [vmem:[%s20709_s0 + $0x68] sm:$0xff] }
 0x727   :  { %v1421_v45 = vmul.f32 %v1406_v27, %v1381_v55  ;;  %v11711_v27 = vld [vmem:[%s20709_s0 + $0x40] sm:$0xff]  ;;  %v11717_v55 = vld [vmem:[%s20709_s0 + $0x70] sm:$0xff] }
 0x728   :  { %v1420_v47 = vmul.f32 %v1402_v1, %v1380_v21  ;;  %v1375_v1 = vmul.f32 0.0, %v16211_v18  ;;  %13046 = vmatprep.mubr.msk.f32.mxu1 %vm80_vm0, %v11711_v27  ;;  %v11718_v21 = vld [vmem:[%s20709_s0 + $0x78] sm:$0xff] }
 0x729   :  { %v16313_v33 = vadd.f32 %v1461_v34, %v1421_v45  ;;  %v16417_v34 = vld [vmem:[%s20711_s1 + $0x48] sm:$0xff] }
 0x72a   :  { %v16315_v17 = vadd.f32 %v1460_v6, %v1420_v47 }
 0x72b   :  { %1490 = vrot.lane.b32.xlu1 %v16313_v33, %s15605_s11 }
 0x72c   :  { %1488 = vrot.lane.b32.xlu0 %v16315_v17, %s15605_s11 }
 0x730   :  { %v1351_v23 = vpop.permute.xlu1 %1350 }
 0x731   :  { %v1367_v3 = vmul.f32 %v1351_v23, %v1327_v15  ;;  %v1349_v39 = vpop.permute.xlu0 %1348 }
 0x732   :  { %v1366_v53 = vmul.f32 %v1349_v39, %v1326_v40 }
 0x733   :  { %v1383_v22 = vadd.f32 %v1375_v1, %v1367_v3 }
 0x734   :  { %v1382_v38 = vadd.f32 %v1374_v49, %v1366_v53 }
 0x735   :  { %v1423_v37 = vmul.f32 %v16277_v59, %v1383_v22 }
 0x736   :  { %v1422_v42 = vmul.f32 %v16279_v5, %v1382_v38 }
 0x737   :  { %v16333_v2 = vadd.f32 %v1463_v43, %v1423_v37 }
 0x738   :  { %v16335_v18 = vadd.f32 %v1462_v57, %v1422_v42  ;;  %v16450_v57 = vld [vmem:[%s20711_s1 + $0x40] sm:$0xff]  ;;  %v16456_v42 = vld [vmem:[%s20711_s1 + $0x58] sm:$0xff] }
 0x739   :  { %1494 = vrot.lane.b32.xlu1 %v16333_v2, %s15605_s11 }
 0x73a   :  { %1492 = vrot.lane.b32.xlu0 %v16335_v18, %s15605_s11 }
 0x73d   :  { %2042 = vperm.xlu1 %14666, %v16417_v34  }
 0x73e   :  { %2038 = vperm.xlu0 %14665, %v16450_v57  }
 0x742   :  { %2050 = vperm.xlu0 %14665, %v16456_v42  }
 0x792   :  { %v1483_v36 = vpop.permute.xlu1 %1482 }
 0x793   :  { %1505 = vst.msk [vmem:[%s20713_s4 + $0x8] sm:$0xff] %vm210_vm1, %v1483_v36  ;;  %v1481_v59 = vpop.permute.xlu0 %1480 }
 0x794   :  { %1504 = vst.msk [vmem:[%s20713_s4] sm:$0xff] %vm210_vm1, %v1481_v59  ;;  %v14074_v5 = vpack.c.bf16 %v1483_v36, %v1481_v59  ;;  %v16461_v36 = vld [vmem:[%s20711_s1 + $0x50] sm:$0xff]  ;;  %v16468_v59 = vld [vmem:[%s20711_s1 + $0x68] sm:$0xff] }
 0x795   :  { %2046 = vperm.xlu1 %14666, %v16461_v36   ;;  %2058 = vperm.xlu0 %14665, %v16468_v59  }
 0x796   :  { %v1487_v0 = vpop.permute.xlu1 %1486  ;;  %14075 = vmatprep.subr.bf16.mxu1 %v14074_v5 }
 0x797   :  { %1507 = vst.msk [vmem:[%s20713_s4 + $0x18] sm:$0xff] %vm210_vm1, %v1487_v0  ;;  %14077 = vmatpush3.bf16.msra.mxu1 %v14074_v5  ;;  %v1485_v28 = vpop.permute.xlu0 %1484  ;;  %v16473_v5 = vld [vmem:[%s20711_s1 + $0x60] sm:$0xff] }
 0x798   :  { %1506 = vst.msk [vmem:[%s20713_s4 + $0x10] sm:$0xff] %vm210_vm1, %v1485_v28  ;;  %v14078_v60 = vpack.c.bf16 %v1487_v0, %v1485_v28  ;;  %v16480_v0 = vld [vmem:[%s20711_s1 + $0x78] sm:$0xff]  ;;  %v16485_v28 = vld [vmem:[%s20711_s1 + $0x70] sm:$0xff] }
 0x799   :  { %2054 = vperm.xlu1 %14666, %v16473_v5   ;;  %2066 = vperm.xlu0 %14665, %v16480_v0  }
 0x79a   :  { %14079 = vmatprep.subr.bf16.mxu1 %v14078_v60 }
 0x79b   :  { %14081 = vmatpush3.bf16.msra.mxu1 %v14078_v60  ;;  %v20855_v60 = vmov 96  }
 0x79d   :  { %v1491_v9 = vpop.permute.xlu1 %1490  ;;  %2062 = vperm.xlu1 %14666, %v16485_v28   ;;  %14668 = vset.pattern.permute.xlu0 %v20855_v60 }
 0x79e   :  { %1509 = vst.msk [vmem:[%s20713_s4 + $0x28] sm:$0xff] %vm210_vm1, %v1491_v9  ;;  %v1489_v44 = vpop.permute.xlu0 %1488  ;;  %2002 = vperm.xlu0 %14668, %v16417_v34  }
 0x79f   :  { %1508 = vst.msk [vmem:[%s20713_s4 + $0x20] sm:$0xff] %vm210_vm1, %v1489_v44  ;;  %v14082_v48 = vpack.c.bf16 %v1491_v9, %v1489_v44  ;;  %v20734_v9 = vsub.f32 1.0, %v16450_v57  ;;  %v20856_v44 = vmov 98  }
 0x7a1   :  { %14083 = vmatprep.subr.bf16.mxu1 %v14082_v48  ;;  %14667 = vset.pattern.permute.xlu1 %v20855_v60 }
 0x7a2   :  { %14085 = vmatpush3.bf16.msra.mxu1 %v14082_v48  ;;  %1998 = vperm.xlu1 %14667, %v16450_v57   ;;  %v20733_v48 = vsub.f32 1.0, %v16417_v34 }
 0x7a3   :  { %2010 = vperm.xlu0 %14668, %v16456_v42  }
 0x7a6   :  { %2006 = vperm.xlu1 %14667, %v16461_v36  }
 0x7a7   :  { %2014 = vperm.xlu0 %14668, %v16473_v5  }
 0x7aa   :  { %14669 = vset.pattern.permute.xlu1 %v20856_v44 }
 0x7ab   :  { %v1495_v4 = vpop.permute.xlu1 %1494  ;;  %2119 = vperm.xlu1 %14669, %v20734_v9   ;;  %2018 = vperm.xlu0 %14668, %v16468_v59  }
 0x7ac   :  { %1511 = vst.msk [vmem:[%s20713_s4 + $0x38] sm:$0xff] %vm210_vm1, %v1495_v4  ;;  %v1493_v7 = vpop.permute.xlu0 %1492 }
 0x7ad   :  { %1510 = vst.msk [vmem:[%s20713_s4 + $0x30] sm:$0xff] %vm210_vm1, %v1493_v7  ;;  %v14086_v13 = vpack.c.bf16 %v1495_v4, %v1493_v7  ;;  %v20732_v4 = vsub.f32 1.0, %v16461_v36  ;;  %v20731_v7 = vsub.f32 1.0, %v16456_v42 }
 0x7af   :  { %14087 = vmatprep.subr.bf16.mxu1 %v14086_v13  ;;  %2124 = vperm.xlu1 %14669, %v20733_v48  }
 0x7b0   :  { %14089 = vmatpush3.bf16.msra.mxu1 %v14086_v13  ;;  %14670 = vset.pattern.permute.xlu0 %v20856_v44  ;;  %v20730_v13 = vsub.f32 1.0, %v16473_v5 }
 0x7b1   :  { %14107 = vmatprep.subr.bf16.mxu1 %v15716_v24  ;;  %2134 = vperm.xlu0 %14670, %v20731_v7  }
 0x7b3   :  { %13047 = vmatmul.mubr.msk.f32.vlgmr.msra.gmra.mrb[16].mxu1 %vm80_vm0, %v11712_v56  ;;  %2129 = vperm.xlu1 %14669, %v20732_v4   ;;  %v20729_v56 = vsub.f32 1.0, %v16468_v59 }
 0x7b4   :  { %13049 = vmatprep.mubr.msk.f32.mxu1 %vm80_vm0, %v11713_v19  ;;  %14109 = vmatpush3.bf16.msra.mxu1 %v15716_v24 }
 0x7b5   :  { %14111 = vmatprep.subr.bf16.mxu1 %v15721_v26  ;;  %2139 = vperm.xlu0 %14670, %v20730_v13  }
 0x7b7   :  { %13050 = vmatmul.mubr.msk.f32.gmra.mrb[18].mxu1 %vm80_vm0, %v11714_v12  ;;  %14671 = vset.pattern.permute.xlu1 %v20855_v60 }
 0x7b8   :  { %13052 = vmatprep.mubr.msk.f32.mxu1 %vm80_vm0, %v11715_v62  ;;  %14113 = vmatpush3.bf16.msra.mxu1 %v15721_v26 }
 0x7b9   :  { %14115 = vmatprep.subr.bf16.mxu1 %v15732_v29  ;;  %2022 = vperm.xlu1 %14671, %v16485_v28  }
 0x7bb   :  { %13053 = vmatmul.mubr.msk.f32.gmra.mrb[20].mxu1 %vm80_vm0, %v11716_v58 }
 0x7bc   :  { %13055 = vmatprep.mubr.msk.f32.mxu1 %vm80_vm0, %v11717_v55  ;;  %14117 = vmatpush3.bf16.msra.mxu1 %v15732_v29 }
 0x7bd   :  { %14119 = vmatprep.subr.bf16.mxu1 %v15742_v32  ;;  %2026 = vperm.xlu1 %14671, %v16480_v0  }
 0x7bf   :  { %13056 = vmatmul.mubr.msk.f32.gmra.mrb[22].mxu1 %vm80_vm0, %v11718_v21 }
 0x7c0   :  { %14121 = vmatpush3.bf16.msra.mxu1 %v15742_v32 }
 0x7c1   :  { %14123 = vmatprep.subr.bf16.mxu1 %v15752_v35  ;;  %14672 = vset.pattern.permute.xlu1 %v20856_v44 }
 0x7c2   :  { %2144 = vperm.xlu1 %14672, %v20729_v56  }
 0x7c4   :  { %14125 = vmatpush3.bf16.msra.mxu1 %v15752_v35 }
 0x7c5   :  { %14127 = vmatprep.subr.bf16.mxu1 %v15779_v54 }
 0x7c8   :  { %14129 = vmatpush3.bf16.msra.mxu1 %v15779_v54 }
 0x7c9   :  { %14139 = vmatprep.subr.bf16.mxu1 %v16027_v31 }
 0x886   :  { %v13048_v45 = vpop.f32.mrb[16].mxu1 }
 0x887   :  { %v1620_v6 = vpop.f32.mrb[17].mxu1  ;;  %v1660_v15 = vsel %vm210_vm1, %v13048_v45, %v16293_v41 }
 0x888   :  { %v1659_v47 = vsel %vm210_vm1, %v1620_v6, %v16295_v63 }
 0x889   :  { %13074 = vmatprep.mubr.msk.f32.mxu0 %vm80_vm0, %v1659_v47 }
 0x88a   :  { %v13051_v23 = vpop.f32.mrb[18].mxu1  ;;  %13075 = vmatmul.mubr.msk.f32.vlgmr.msra.gmra.mrb[24].mxu0 %vm80_vm0, %v1660_v15 }
 0x88b   :  { %v1630_v40 = vpop.f32.mrb[19].mxu1  ;;  %14133 = vmatpush3.bf16.msra.mxu0 %v15938_v50  ;;  %v1662_v1 = vsel %vm210_vm1, %v13051_v23, %v16302_v52 }
 0x88c   :  { %v1661_v27 = vsel %vm210_vm1, %v1630_v40, %v16305_v8  ;;  %14135 = vmatprep.subr.bf16.mxu0 %v15948_v30 }
 0x88d   :  { %13077 = vmatprep.mubr.msk.f32.mxu0 %vm80_vm0, %v1661_v27 }
 0x88e   :  { %v13054_v3 = vpop.f32.mrb[20].mxu1  ;;  %13078 = vmatmul.mubr.msk.f32.gmra.mrb[26].mxu0 %vm80_vm0, %v1662_v1 }
 0x88f   :  { %v1640_v39 = vpop.f32.mrb[21].mxu1  ;;  %14137 = vmatpush3.bf16.msra.mxu0 %v15948_v30  ;;  %v1664_v53 = vsel %vm210_vm1, %v13054_v3, %v16313_v33 }
 0x890   :  { %v1663_v49 = vsel %vm210_vm1, %v1640_v39, %v16315_v17 }
 0x891   :  { %13080 = vmatprep.mubr.msk.f32.mxu0 %vm80_vm0, %v1663_v49 }
 0x892   :  { %v13057_v22 = vpop.f32.mrb[22].mxu1  ;;  %13081 = vmatmul.mubr.msk.f32.gmra.mrb[28].mxu0 %vm80_vm0, %v1664_v53 }
 0x893   :  { %v1650_v38 = vpop.f32.mrb[23].mxu1  ;;  %v1666_v37 = vsel %vm210_vm1, %v13057_v22, %v16333_v2 }
 0x894   :  { %v1665_v43 = vsel %vm210_vm1, %v1650_v38, %v16335_v18 }
 0x895   :  { %13083 = vmatprep.mubr.msk.f32.mxu0 %vm80_vm0, %v1665_v43 }
 0x896   :  { %13084 = vmatmul.mubr.msk.f32.gmra.mrb[30].mxu0 %vm80_vm0, %v1666_v37 }
 0x95d   :  { %v13076_v19 = vpop.f32.mrb[24].mxu0 }
 0x95e   :  { %v1763_v12 = vadd.f32 %v13076_v19, %v16417_v34  ;;  %v1757_v62 = vpop.f32.mrb[25].mxu0 }
 0x95f   :  { %v1758_v58 = vadd.f32 %v16450_v57, %v1757_v62 }
 0x960   :  { %v1797_v45 = vmax.f32 %v1763_v12, 0.0 }
 0x961   :  { %v1796_v55 = vmax.f32 %v1758_v58, 0.0  ;;  %v13079_v21 = vpop.f32.mrb[26].mxu0  ;;  %v2043_v58 = vpop.permute.xlu1 %2042 }
 0x962   :  { %v1773_v6 = vadd.f32 %v13079_v21, %v16456_v42  ;;  %v1767_v47 = vpop.f32.mrb[27].mxu0 }
 0x963   :  { %v1768_v15 = vadd.f32 %v16461_v36, %v1767_v47  ;;  %13110 = vmatprep.mubr.msk.f32.mxu1 %vm356_vm2, %v1796_v55  ;;  %v15531_v55 = vld [vmem:[%s20712_s3] ss:$0 sm:$0xff] }
 0x964   :  { %13111 = vmatmul.mubr.msk.f32.vlgmr.msra.gmra.mrb[24].mxu1 %vm356_vm2, %v1797_v45  ;;  %v1799_v27 = vmax.f32 %v1773_v6, 0.0  ;;  %v2039_v6 = vpop.permute.xlu0 %2038 }
 0x965   :  { %v1798_v23 = vmax.f32 %v1768_v15, 0.0  ;;  %v13082_v40 = vpop.f32.mrb[28].mxu0  ;;  %14141 = vmatpush3.bf16.msra.mxu1 %v16027_v31 }
 0x966   :  { %v1783_v1 = vadd.f32 %v13082_v40, %v16468_v59  ;;  %v1777_v3 = vpop.f32.mrb[29].mxu0  ;;  %14143 = vmatprep.subr.bf16.mxu1 %v16032_v46 }
 0x967   :  { %v1778_v39 = vadd.f32 %v16473_v5, %v1777_v3  ;;  %13113 = vmatprep.mubr.msk.f32.mxu1 %vm356_vm2, %v1798_v23 }
 0x968   :  { %13114 = vmatmul.mubr.msk.f32.gmra.mrb[26].mxu1 %vm356_vm2, %v1799_v27  ;;  %v1801_v22 = vmax.f32 %v1783_v1, 0.0 }
 0x969   :  { %v1800_v49 = vmax.f32 %v1778_v39, 0.0  ;;  %v13085_v53 = vpop.f32.mrb[30].mxu0  ;;  %14145 = vmatpush3.bf16.msra.mxu1 %v16032_v46 }
 0x96a   :  { %v1793_v38 = vadd.f32 %v13085_v53, %v16480_v0  ;;  %v1787_v43 = vpop.f32.mrb[31].mxu0  ;;  %14147 = vmatprep.subr.bf16.mxu1 %v16043_v25 }
 0x96b   :  { %v1788_v37 = vadd.f32 %v16485_v28, %v1787_v43  ;;  %13116 = vmatprep.mubr.msk.f32.mxu1 %vm356_vm2, %v1800_v49  ;;  %v2047_v49 = vpop.permute.xlu1 %2046 }
 0x96c   :  { %13117 = vmatmul.mubr.msk.f32.gmra.mrb[28].mxu1 %vm356_vm2, %v1801_v22  ;;  %v1803_v12 = vmax.f32 %v1793_v38, 0.0  ;;  %v2051_v22 = vpop.permute.xlu0 %2050 }
 0x96d   :  { %v1802_v19 = vmax.f32 %v1788_v37, 0.0  ;;  %14149 = vmatpush3.bf16.msra.mxu1 %v16043_v25 }
 0x96e   :  { %14151 = vmatprep.subr.bf16.mxu1 %v16057_v14 }
 0x96f   :  { %13119 = vmatprep.mubr.msk.f32.mxu1 %vm356_vm2, %v1802_v19 }
 0x970   :  { %13120 = vmatmul.mubr.msk.f32.gmra.mrb[30].mxu1 %vm356_vm2, %v1803_v12 }
 0x971   :  { %14153 = vmatpush3.bf16.msra.mxu1 %v16057_v14 }
 0x972   :  { %14171 = vmatprep.subr.bf16.mxu1 %v15665_v10 }
 0xa37   :  { %v13112_v62 = vpop.f32.mrb[24].mxu1 }
 0xa38   :  { %v1900_v21 = vadd.f32 %v15531_v55, %v13112_v62  ;;  %v1894_v45 = vpop.f32.mrb[25].mxu1 }
 0xa39   :  { %v1895_v47 = vadd.f32 %v15531_v55, %v1894_v45 }
 0xa3a   :  { %v16548_v15 = vmax.f32 %v1900_v21, 0.0 }
 0xa3b   :  { %v13115_v23 = vpop.f32.mrb[26].mxu1  ;;  %v16551_v27 = vmax.f32 %v1895_v47, 0.0 }
 0xa3c   :  { %v2070_v40 = vmul.f32 %v2043_v58, %v16548_v15  ;;  %v1910_v1 = vadd.f32 %v15531_v55, %v13115_v23  ;;  %v1904_v3 = vpop.f32.mrb[27].mxu1  ;;  %v20728_v58 = vsub.f32 1.0, %v16485_v28 }
 0xa3d   :  { %v1905_v39 = vadd.f32 %v15531_v55, %v1904_v3  ;;  %v2069_v43 = vmul.f32 %v2039_v6, %v16551_v27  ;;  %v2055_v6 = vpop.permute.xlu1 %2054  ;;  %v20727_v3 = vsub.f32 1.0, %v16480_v0 }
 0xa3e   :  { %v16553_v53 = vmax.f32 %v1910_v1, 0.0  ;;  %2087 = vrot.lane.b32.xlu1 %v2070_v40, %s15605_s11 }
 0xa3f   :  { %v13118_v38 = vpop.f32.mrb[28].mxu1  ;;  %v16558_v19 = vmax.f32 %v1905_v39, 0.0 }
 0xa40   :  { %v2072_v37 = vmul.f32 %v2051_v22, %v16553_v53  ;;  %v1914_v12 = vpop.f32.mrb[29].mxu1  ;;  %v1920_v47 = vadd.f32 %v15531_v55, %v13118_v38 }
 0xa41   :  { %v1915_v62 = vadd.f32 %v15531_v55, %v1914_v12  ;;  %v2071_v45 = vmul.f32 %v2047_v49, %v16558_v19  ;;  %v2059_v49 = vpop.permute.xlu0 %2058  ;;  %v2063_v38 = vpop.permute.xlu1 %2062 }
 0xa42   :  { %2085 = vrot.lane.b32.xlu1 %v2069_v43, %s15605_s11  ;;  %2091 = vrot.lane.b32.xlu0 %v2072_v37, %s15605_s11  ;;  %v16570_v39 = vmax.f32 %v1920_v47, 0.0  ;;  %v20857_v47 = vmov 100  }
 0xa43   :  { %v13121_v21 = vpop.f32.mrb[30].mxu1  ;;  %v16564_v23 = vmax.f32 %v1915_v62, 0.0 }
 0xa44   :  { %v1924_v40 = vpop.f32.mrb[31].mxu1  ;;  %v1930_v43 = vadd.f32 %v15531_v55, %v13121_v21  ;;  %v2074_v12 = vmul.f32 %v2059_v49, %v16570_v39 }
 0xa45   :  { %v1925_v1 = vadd.f32 %v15531_v55, %v1924_v40  ;;  %v2073_v22 = vmul.f32 %v2055_v6, %v16564_v23  ;;  %v2067_v55 = vpop.permute.xlu0 %2066  ;;  %v1999_v40 = vpop.permute.xlu1 %1998 }
 0xa46   :  { %2149 = vperm.xlu1 %14672, %v20728_v58   ;;  %2089 = vrot.lane.b32.xlu0 %v2071_v45, %s15605_s11  ;;  %v16579_v62 = vmax.f32 %v1930_v43, 0.0  ;;  %v2029_v51 = vmul.f32 %v1999_v40, %v16551_v27 }
 0xa47   :  { %v16573_v37 = vmax.f32 %v1925_v1, 0.0 }
 0xa48   :  { %v2076_v21 = vmul.f32 %v2067_v55, %v16579_v62 }
 0xa49   :  { %v2075_v45 = vmul.f32 %v2063_v38, %v16573_v37  ;;  %v2007_v6 = vpop.permute.xlu1 %2006 }
 0xa4a   :  { %2154 = vperm.xlu1 %14672, %v20727_v3   ;;  %2093 = vrot.lane.b32.xlu0 %v2073_v22, %s15605_s11  ;;  %v2003_v22 = vpop.permute.xlu0 %2002  ;;  %v2031_v30 = vmul.f32 %v2007_v6, %v16558_v19 }
 0xa4b   :  { %v2030_v13 = vmul.f32 %v2003_v22, %v16548_v15 }
 0xa4d   :  { %v2120_v1 = vpop.permute.xlu1 %2119 }
 0xa4e   :  { %2097 = vrot.lane.b32.xlu1 %v2075_v45, %s15605_s11  ;;  %2095 = vrot.lane.b32.xlu0 %v2074_v12, %s15605_s11  ;;  %v2011_v49 = vpop.permute.xlu0 %2010 }
 0xa4f   :  { %v2032_v48 = vmul.f32 %v2011_v49, %v16553_v53 }
 0xa51   :  { %v2125_v43 = vpop.permute.xlu1 %2124 }
 0xa52   :  { %1943 = vperm.xlu1 %14672, %v16450_v57   ;;  %2099 = vrot.lane.b32.xlu0 %v2076_v21, %s15605_s11  ;;  %v2015_v12 = vpop.permute.xlu0 %2014 }
 0xa55   :  { %v2130_v38 = vpop.permute.xlu1 %2129 }
 0xa56   :  { %1953 = vperm.xlu1 %14672, %v16461_v36   ;;  %1948 = vperm.xlu0 %14670, %v16417_v34   ;;  %v2019_v55 = vpop.permute.xlu0 %2018 }
 0xa59   :  { %v2023_v45 = vpop.permute.xlu1 %2022 }
 0xa5a   :  { %1963 = vperm.xlu1 %14672, %v16473_v5   ;;  %1958 = vperm.xlu0 %14670, %v16456_v42   ;;  %v2135_v3 = vpop.permute.xlu0 %2134 }
 0xa5d   :  { %v2027_v21 = vpop.permute.xlu1 %2026 }
 0xa5e   :  { %1973 = vperm.xlu1 %14672, %v16485_v28   ;;  %1968 = vperm.xlu0 %14670, %v16468_v59   ;;  %v2140_v56 = vpop.permute.xlu0 %2139 }
 0xa61   :  { %v2145_v58 = vpop.permute.xlu1 %2144 }
 0xa62   :  { %1978 = vperm.xlu0 %14670, %v16480_v0   ;;  %14673 = vset.pattern.permute.xlu1 %v20857_v47 }
 0xa66   :  { %14674 = vset.pattern.permute.xlu0 %v20857_v47 }
 0xab0   :  { %v2088_v7 = vpop.permute.xlu1 %2087 }
 0xab1   :  { %v2110_v4 = vadd.f32 %v2088_v7, %v2030_v13 }
 0xab3   :  { %v2158_v9 = vmul.f32 %v2125_v43, %v2110_v4  ;;  %v2033_v4 = vmul.f32 %v2015_v12, %v16564_v23 }
 0xab4   :  { %v2086_v47 = vpop.permute.xlu1 %2085  ;;  %v2092_v14 = vpop.permute.xlu0 %2091 }
 0xab5   :  { %v2109_v25 = vadd.f32 %v2086_v47, %v2029_v51  ;;  %v2112_v46 = vadd.f32 %v2092_v14, %v2032_v48  ;;  %2175 = vrot.lane.b32.xlu0 %v2158_v9, %s15605_s11  ;;  %v2034_v14 = vmul.f32 %v2019_v55, %v16570_v39 }
 0xab7   :  { %v2157_v44 = vmul.f32 %v2120_v1, %v2109_v25  ;;  %v2160_v60 = vmul.f32 %v2135_v3, %v2112_v46  ;;  %v2035_v3 = vmul.f32 %v2023_v45, %v16573_v37 }
 0xab8   :  { %v2090_v31 = vpop.permute.xlu0 %2089 }
 0xab9   :  { %v2111_v54 = vadd.f32 %v2090_v31, %v2031_v30  ;;  %2173 = vrot.lane.b32.xlu1 %v2157_v44, %s15605_s11  ;;  %2179 = vrot.lane.b32.xlu0 %v2160_v60, %s15605_s11 }
 0xabb   :  { %v2159_v7 = vmul.f32 %v2130_v38, %v2111_v54  ;;  %v2036_v54 = vmul.f32 %v2027_v21, %v16579_v62 }
 0xabc   :  { %v2094_v13 = vpop.permute.xlu0 %2093 }
 0xabd   :  { %v2113_v40 = vadd.f32 %v2094_v13, %v2033_v4  ;;  %2177 = vrot.lane.b32.xlu1 %v2159_v7, %s15605_s11 }
 0xabf   :  { %v2161_v51 = vmul.f32 %v2140_v56, %v2113_v40 }
 0xac0   :  { %v2096_v25 = vpop.permute.xlu0 %2095 }
 0xac1   :  { %v2114_v46 = vadd.f32 %v2096_v25, %v2034_v14  ;;  %2181 = vrot.lane.b32.xlu1 %v2161_v51, %s15605_s11 }
 0xac3   :  { %v2162_v9 = vmul.f32 %v2145_v58, %v2114_v46  ;;  %v20858_v58 = vmov 99  }
 0xac4   :  { %v2100_v30 = vpop.permute.xlu0 %2099 }
 0xac5   :  { %v2150_v31 = vpop.permute.xlu1 %2149  ;;  %2183 = vrot.lane.b32.xlu0 %v2162_v9, %s15605_s11  ;;  %v2116_v60 = vadd.f32 %v2100_v30, %v2036_v54 }
 0xac9   :  { %v2155_v44 = vpop.permute.xlu1 %2154 }
 0xaca   :  { %v2164_v48 = vmul.f32 %v2155_v44, %v2116_v60 }
 0xacc   :  { %2187 = vrot.lane.b32.xlu0 %v2164_v48, %s15605_s11 }
 0xacd   :  { %v2098_v47 = vpop.permute.xlu1 %2097 }
 0xace   :  { %v2115_v56 = vadd.f32 %v2098_v47, %v2035_v3 }
 0xad0   :  { %v2163_v6 = vmul.f32 %v2150_v31, %v2115_v56  ;;  %2395 = vperm.xlu0 %14674, %v16417_v34  }
 0xad1   :  { %v1944_v22 = vpop.permute.xlu1 %1943 }
 0xad2   :  { %2185 = vrot.lane.b32.xlu1 %v2163_v6, %s15605_s11  ;;  %v1981_v7 = vmul.f32 %v1944_v22, %v16551_v27  ;;  %v15532_v6 = vld [vmem:[%s20712_s3 + $0x1] ss:$0 sm:$0xff] }
 0xad4   :  { %2407 = vperm.xlu0 %14674, %v16473_v5  }
 0xad5   :  { %v1949_v1 = vpop.permute.xlu0 %1948  ;;  %v1954_v49 = vpop.permute.xlu1 %1953 }
 0xad6   :  { %2391 = vperm.xlu1 %14673, %v16450_v57   ;;  %v1982_v4 = vmul.f32 %v1949_v1, %v16548_v15  ;;  %v1983_v51 = vmul.f32 %v1954_v49, %v16558_v19 }
 0xad8   :  { %2415 = vperm.xlu0 %14674, %v16485_v28  }
 0xad9   :  { %v1959_v43 = vpop.permute.xlu0 %1958  ;;  %v1964_v12 = vpop.permute.xlu1 %1963 }
 0xada   :  { %2399 = vperm.xlu1 %14673, %v16461_v36   ;;  %v1984_v46 = vmul.f32 %v1959_v43, %v16553_v53  ;;  %v1985_v30 = vmul.f32 %v1964_v12, %v16564_v23 }
 0xadc   :  { %14675 = vset.pattern.permute.xlu0 %v20858_v58 }
 0xadd   :  { %v1969_v38 = vpop.permute.xlu0 %1968  ;;  %v1974_v55 = vpop.permute.xlu1 %1973 }
 0xade   :  { %2403 = vperm.xlu1 %14673, %v16456_v42   ;;  %v1986_v53 = vmul.f32 %v1969_v38, %v16570_v39  ;;  %v1987_v23 = vmul.f32 %v1974_v55, %v16573_v37 }
 0xae1   :  { %v1979_v45 = vpop.permute.xlu0 %1978 }
 0xae2   :  { %2411 = vperm.xlu1 %14673, %v16468_v59   ;;  %v1988_v48 = vmul.f32 %v1979_v45, %v16579_v62 }
 0xae6   :  { %2419 = vperm.xlu1 %14673, %v16480_v0  }
 0xaea   :  { %14676 = vset.pattern.permute.xlu1 %v20858_v58 }
 0xb27   :  { %v2176_v21 = vpop.permute.xlu0 %2175 }
 0xb28   :  { %v16626_v14 = vadd.f32 %v2176_v21, %v1982_v4 }
 0xb2b   :  { %v2174_v13 = vpop.permute.xlu1 %2173  ;;  %v2180_v25 = vpop.permute.xlu0 %2179 }
 0xb2c   :  { %v16624_v40 = vadd.f32 %v2174_v13, %v1981_v7  ;;  %v16636_v15 = vadd.f32 %v2180_v25, %v1984_v46 }
 0xb2e   :  { %13130 = vmatprep.mubr.msk.f32.mxu0 %vm210_vm1, %v16624_v40 }
 0xb2f   :  { %v2178_v9 = vpop.permute.xlu1 %2177  ;;  %13131 = vmatmul.mubr.msk.f32.vlgmr.msra.gmra.mrb[32].mxu0 %vm210_vm1, %v16626_v14 }
 0xb30   :  { %v16634_v27 = vadd.f32 %v2178_v9, %v1983_v51 }
 0xb32   :  { %13133 = vmatprep.mubr.msk.f32.mxu0 %vm210_vm1, %v16634_v27 }
 0xb33   :  { %v2182_v19 = vpop.permute.xlu1 %2181  ;;  %13134 = vmatmul.mubr.msk.f32.gmra.mrb[34].mxu0 %vm210_vm1, %v16636_v15 }
 0xb34   :  { %v16643_v31 = vadd.f32 %v2182_v19, %v1985_v30 }
 0xb36   :  { %13136 = vmatprep.mubr.msk.f32.mxu0 %vm210_vm1, %v16643_v31 }
 0xb37   :  { %v2184_v54 = vpop.permute.xlu0 %2183 }
 0xb38   :  { %v16648_v60 = vadd.f32 %v2184_v54, %v1986_v53 }
 0xb3a   :  { %13137 = vmatmul.mubr.msk.f32.gmra.mrb[36].mxu0 %vm210_vm1, %v16648_v60 }
 0xb3e   :  { %v2188_v44 = vpop.permute.xlu0 %2187 }
 0xb3f   :  { %v16656_v56 = vadd.f32 %v2188_v44, %v1988_v48 }
 0xb44   :  { %v2186_v3 = vpop.permute.xlu1 %2185 }
 0xb45   :  { %v16654_v47 = vadd.f32 %v2186_v3, %v1987_v23 }
 0xb47   :  { %13139 = vmatprep.mubr.msk.f32.mxu0 %vm210_vm1, %v16654_v47 }
 0xb48   :  { %13140 = vmatmul.mubr.msk.f32.gmra.mrb[38].mxu0 %vm210_vm1, %v16656_v56 }
 0xb4f   :  { %v16669_v21 = vpop.permute.xlu0 %2395 }
 0xb53   :  { %v16681_v44 = vpop.permute.xlu0 %2407 }
 0xb55   :  { %v16665_v62 = vpop.permute.xlu1 %2391 }
 0xb59   :  { %v16667_v45 = vpop.permute.xlu1 %2399 }
 0xb5d   :  { %v16673_v30 = vpop.permute.xlu1 %2403 }
 0xb61   :  { %v16683_v3 = vpop.permute.xlu1 %2411 }
 0xc02   :  { %v13132_v39 = vpop.f32.mrb[32].mxu0 }
 0xc03   :  { %v2301_v37 = vadd.f32 %v15532_v6, %v13132_v39  ;;  %v2295_v1 = vpop.f32.mrb[33].mxu0 }
 0xc04   :  { %v2296_v22 = vadd.f32 %v15532_v6, %v2295_v1 }
 0xc05   :  { %14851 = vtanh.f32 %v2301_v37 }
 0xc06   :  { %14853 = vtanh.f32 %v2296_v22  ;;  %v13135_v43 = vpop.f32.mrb[34].mxu0 }
 0xc07   :  { %v2311_v49 = vadd.f32 %v15532_v6, %v13135_v43  ;;  %v2305_v38 = vpop.f32.mrb[35].mxu0 }
 0xc08   :  { %v2306_v12 = vadd.f32 %v15532_v6, %v2305_v38 }
 0xc09   :  { %14855 = vtanh.f32 %v2311_v49 }
 0xc0a   :  { %14857 = vtanh.f32 %v2306_v12 }
 0xc0d   :  { %v13138_v55 = vpop.f32.mrb[36].mxu0 }
 0xc0e   :  { %v2321_v7 = vadd.f32 %v15532_v6, %v13138_v55  ;;  %v2315_v4 = vpop.f32.mrb[37].mxu0 }
 0xc0f   :  { %v14852_v13 = vpop.eup %14851  ;;  %v2316_v51 = vadd.f32 %v15532_v6, %v2315_v4 }
 0xc10   :  { %v14854_v25 = vpop.eup %14853  ;;  %14859 = vtanh.f32 %v2321_v7  ;;  %v2447_v46 = vmul.f32 %v14852_v13, %v16669_v21 }
 0xc11   :  { %v2446_v9 = vmul.f32 %v14854_v25, %v16665_v62  ;;  %14861 = vtanh.f32 %v2316_v51 }
 0xc12   :  { %2464 = vrot.lane.b32.xlu1 %v2447_v46, %s15605_s11  ;;  %v16689_v46 = vpop.permute.xlu1 %2419 }
 0xc13   :  { %v14856_v19 = vpop.eup %14855  ;;  %2462 = vrot.lane.b32.xlu0 %v2446_v9, %s15605_s11 }
 0xc14   :  { %v14858_v53 = vpop.eup %14857  ;;  %v2449_v54 = vmul.f32 %v14856_v19, %v16673_v30 }
 0xc15   :  { %v2448_v23 = vmul.f32 %v14858_v53, %v16667_v45  ;;  %v16693_v53 = vpop.permute.xlu0 %2415 }
 0xc16   :  { %2468 = vrot.lane.b32.xlu1 %v2449_v54, %s15605_s11 }
 0xc17   :  { %2466 = vrot.lane.b32.xlu0 %v2448_v23, %s15605_s11  ;;  %v11760_v23 = vmul.f32 -1.442695, %v2301_v37 }
 0xc1a   :  { %v14860_v48 = vpop.eup %14859 }
 0xc1b   :  { %v14862_v39 = vpop.eup %14861  ;;  %v2451_v1 = vmul.f32 %v14860_v48, %v16683_v3  ;;  %v13141_v43 = vpop.f32.mrb[38].mxu0  ;;  %v11759_v48 = vmul.f32 -1.442695, %v2296_v22 }
 0xc1c   :  { %v2450_v38 = vmul.f32 %v14862_v39, %v16681_v44  ;;  %v2331_v55 = vadd.f32 %v15532_v6, %v13141_v43  ;;  %v2325_v4 = vpop.f32.mrb[39].mxu0  ;;  %v11762_v39 = vmul.f32 -1.442695, %v2311_v49  ;;  %v11763_v43 = vmul.f32 -1.442695, %v2316_v51 }
 0xc1d   :  { %2472 = vrot.lane.b32.xlu1 %v2451_v1, %s15605_s11  ;;  %v2326_v13 = vadd.f32 %v15532_v6, %v2325_v4  ;;  %v11761_v6 = vmul.f32 -1.442695, %v2306_v12  ;;  %v11764_v1 = vmul.f32 -1.442695, %v2321_v7 }
 0xc1e   :  { %14863 = vtanh.f32 %v2331_v55  ;;  %2470 = vrot.lane.b32.xlu0 %v2450_v38, %s15605_s11  ;;  %v11766_v7 = vmul.f32 -1.442695, %v2331_v55 }
 0xc1f   :  { %14865 = vtanh.f32 %v2326_v13  ;;  %v11765_v51 = vmul.f32 -1.442695, %v2326_v13 }
 0xc20   :  { %14867 = vpow2.f32 %v11760_v23 }
 0xc21   :  { %14869 = vpow2.f32 %v11759_v48 }
 0xc22   :  { %14871 = vpow2.f32 %v11762_v39 }
 0xc23   :  { %14873 = vpow2.f32 %v11761_v6 }
 0xc24   :  { %14875 = vpow2.f32 %v11764_v1 }
 0xc25   :  { %14877 = vpow2.f32 %v11763_v43 }
 0xc28   :  { %v14864_v25 = vpop.eup %14863 }
 0xc29   :  { %v2453_v9 = vmul.f32 %v14864_v25, %v16689_v46  ;;  %v14866_v19 = vpop.eup %14865 }
 0xc2a   :  { %v2452_v54 = vmul.f32 %v14866_v19, %v16693_v53  ;;  %v14868_v38 = vpop.eup %14867 }
 0xc2b   :  { %2476 = vrot.lane.b32.xlu1 %v2453_v9, %s15605_s11  ;;  %v14870_v4 = vpop.eup %14869  ;;  %v2359_v25 = vadd.f32 1.0, %v14868_v38 }
 0xc2c   :  { %2474 = vrot.lane.b32.xlu0 %v2452_v54, %s15605_s11  ;;  %v14872_v9 = vpop.eup %14871  ;;  %v2358_v58 = vadd.f32 1.0, %v14870_v4 }
 0xc2d   :  { %v14874_v19 = vpop.eup %14873  ;;  %14879 = vrcp.f32 %v2359_v25  ;;  %v2361_v54 = vadd.f32 1.0, %v14872_v9 }
 0xc2e   :  { %14881 = vrcp.f32 %v2358_v58  ;;  %v2360_v37 = vadd.f32 1.0, %v14874_v19  ;;  %v14876_v22 = vpop.eup %14875 }
 0xc2f   :  { %v14878_v49 = vpop.eup %14877  ;;  %14883 = vrcp.f32 %v2361_v54  ;;  %v2363_v12 = vadd.f32 1.0, %v14876_v22 }
 0xc30   :  { %14885 = vrcp.f32 %v2360_v37  ;;  %v2362_v23 = vadd.f32 1.0, %v14878_v49 }
 0xc31   :  { %14887 = vrcp.f32 %v2363_v12 }
 0xc32   :  { %14889 = vrcp.f32 %v2362_v23 }
 0xc33   :  { %14891 = vpow2.f32 %v11766_v7 }
 0xc34   :  { %14893 = vpow2.f32 %v11765_v51 }
 0xc37   :  { %v14880_v48 = vpop.eup %14879 }
 0xc38   :  { %v14882_v39 = vpop.eup %14881  ;;  %v2423_v6 = vmul.f32 %v14880_v48, %v16669_v21 }
 0xc39   :  { %v14884_v1 = vpop.eup %14883  ;;  %v2422_v58 = vmul.f32 %v14882_v39, %v16665_v62 }
 0xc3a   :  { %v14886_v43 = vpop.eup %14885  ;;  %v2431_v38 = vmul.f32 %v2423_v6, %v16626_v14  ;;  %v2425_v4 = vmul.f32 %v14884_v1, %v16673_v30 }
 0xc3b   :  { %v2430_v25 = vmul.f32 %v2422_v58, %v16624_v40  ;;  %v2424_v55 = vmul.f32 %v14886_v43, %v16667_v45  ;;  %v14888_v13 = vpop.eup %14887 }
 0xc3c   :  { %v14890_v9 = vpop.eup %14889  ;;  %v2433_v19 = vmul.f32 %v2425_v4, %v16636_v15  ;;  %v2439_v54 = vsub.f32 %v16626_v14, %v2431_v38  ;;  %v2427_v30 = vmul.f32 %v14888_v13, %v16683_v3 }
 0xc3d   :  { %v14892_v21 = vpop.eup %14891  ;;  %v2432_v37 = vmul.f32 %v2424_v55, %v16634_v27  ;;  %v2438_v62 = vsub.f32 %v16624_v40, %v2430_v25  ;;  %v2426_v45 = vmul.f32 %v14890_v9, %v16681_v44 }
 0xc3e   :  { %v14894_v49 = vpop.eup %14893  ;;  %v2365_v51 = vadd.f32 1.0, %v14892_v21  ;;  %v2441_v48 = vsub.f32 %v16636_v15, %v2433_v19  ;;  %v2435_v43 = vmul.f32 %v2427_v30, %v16648_v60 }
 0xc3f   :  { %v2364_v39 = vadd.f32 1.0, %v14894_v49  ;;  %v2440_v1 = vsub.f32 %v16634_v27, %v2432_v37  ;;  %v2434_v15 = vmul.f32 %v2426_v45, %v16643_v31 }
 0xc40   :  { %14895 = vrcp.f32 %v2365_v51  ;;  %v2443_v4 = vsub.f32 %v16648_v60, %v2435_v43 }
 0xc41   :  { %14897 = vrcp.f32 %v2364_v39  ;;  %v2442_v55 = vsub.f32 %v16643_v31, %v2434_v15 }
 0xc4a   :  { %v14896_v31 = vpop.eup %14895 }
 0xc4b   :  { %v14898_v21 = vpop.eup %14897  ;;  %v2429_v37 = vmul.f32 %v14896_v31, %v16689_v46 }
 0xc84   :  { %v2465_v22 = vpop.permute.xlu1 %2464 }
 0xc85   :  { %v2487_v12 = vadd.f32 %v2465_v22, %v2439_v54  ;;  %v2463_v23 = vpop.permute.xlu0 %2462  ;;  %v2428_v22 = vmul.f32 %v14898_v21, %v16693_v53 }
 0xc86   :  { %v2486_v7 = vadd.f32 %v2463_v23, %v2438_v62  ;;  %v2437_v62 = vmul.f32 %v2429_v37, %v16656_v56 }
 0xc87   :  { %v2495_v40 = vsel %vm210_vm1, %v2487_v12, %v16293_v41  ;;  %v2436_v49 = vmul.f32 %v2428_v22, %v16654_v47 }
 0xc88   :  { %v2469_v6 = vpop.permute.xlu1 %2468  ;;  %v2494_v14 = vsel %vm210_vm1, %v2486_v7, %v16295_v63  ;;  %v2445_v23 = vsub.f32 %v16656_v56, %v2437_v62  ;;  %v15533_v56 = vld [vmem:[%s20712_s3 + $0x2] ss:$0 sm:$0xff] }
 0xc89   :  { %v2489_v58 = vadd.f32 %v2469_v6, %v2441_v48  ;;  %13158 = vmatprep.mubr.msk.f32.mxu1 %vm80_vm0, %v2494_v14  ;;  %v2467_v3 = vpop.permute.xlu0 %2466  ;;  %v2444_v30 = vsub.f32 %v16654_v47, %v2436_v49 }
 0xc8a   :  { %v2488_v44 = vadd.f32 %v2467_v3, %v2440_v1  ;;  %13159 = vmatmul.mubr.msk.f32.vlgmr.msra.gmra.mrb[32].mxu1 %vm80_vm0, %v2495_v40 }
 0xc8b   :  { %14173 = vmatpush3.bf16.msra.mxu1 %v15665_v10  ;;  %v2497_v38 = vsel %vm210_vm1, %v2489_v58, %v16302_v52 }
 0xc8c   :  { %v2496_v27 = vsel %vm210_vm1, %v2488_v44, %v16305_v8  ;;  %14175 = vmatprep.subr.bf16.mxu1 %v15667_v11 }
 0xc8d   :  { %13161 = vmatprep.mubr.msk.f32.mxu1 %vm80_vm0, %v2496_v27 }
 0xc8e   :  { %13162 = vmatmul.mubr.msk.f32.gmra.mrb[34].mxu1 %vm80_vm0, %v2497_v38 }
 0xc8f   :  { %v2473_v25 = vpop.permute.xlu1 %2472  ;;  %14177 = vmatpush3.bf16.msra.mxu1 %v15667_v11 }
 0xc90   :  { %v2491_v13 = vadd.f32 %v2473_v25, %v2443_v4  ;;  %v2471_v9 = vpop.permute.xlu0 %2470  ;;  %14179 = vmatprep.subr.bf16.mxu1 %v15686_v16 }
 0xc91   :  { %v2490_v19 = vadd.f32 %v2471_v9, %v2442_v55 }
 0xc92   :  { %v2499_v60 = vsel %vm210_vm1, %v2491_v13, %v16313_v33 }
 0xc93   :  { %v2498_v54 = vsel %vm210_vm1, %v2490_v19, %v16315_v17  ;;  %14181 = vmatpush3.bf16.msra.mxu1 %v15686_v16 }
 0xc94   :  { %13164 = vmatprep.mubr.msk.f32.mxu1 %vm80_vm0, %v2498_v54  ;;  %14183 = vmatprep.subr.bf16.mxu1 %v15703_v20 }
 0xc95   :  { %13165 = vmatmul.mubr.msk.f32.gmra.mrb[36].mxu1 %vm80_vm0, %v2499_v60 }
 0xc97   :  { %14185 = vmatpush3.bf16.msra.mxu1 %v15703_v20 }
 0xc98   :  { %14211 = vmatprep.subr.bf16.mxu1 %v15938_v50 }
 0xc9d   :  { %v2477_v12 = vpop.permute.xlu1 %2476 }
 0xc9e   :  { %v2493_v7 = vadd.f32 %v2477_v12, %v2445_v23  ;;  %v2475_v45 = vpop.permute.xlu0 %2474 }
 0xc9f   :  { %v2492_v51 = vadd.f32 %v2475_v45, %v2444_v30 }
 0xca0   :  { %v2501_v46 = vsel %vm210_vm1, %v2493_v7, %v16333_v2 }
 0xca1   :  { %v2500_v48 = vsel %vm210_vm1, %v2492_v51, %v16335_v18 }
 0xca2   :  { %13167 = vmatprep.mubr.msk.f32.mxu1 %vm80_vm0, %v2500_v48 }
 0xca3   :  { %13168 = vmatmul.mubr.msk.f32.gmra.mrb[38].mxu1 %vm80_vm0, %v2501_v46 }
 0xd5d   :  { %v13160_v53 = vpop.f32.mrb[32].mxu1 }
 0xd5e   :  { %v16756_v39 = vadd.f32 %v15533_v56, %v13160_v53  ;;  %v2592_v47 = vpop.f32.mrb[33].mxu1 }
 0xd5f   :  { %v16758_v6 = vadd.f32 %v15533_v56, %v2592_v47 }
 0xd60   :  { %2689 = vrot.lane.b32.xlu1 %v16756_v39, %s15607_s14  ;;  %v11776_v55 = vmul.f32 -1.442695, %v16756_v39 }
 0xd61   :  { %2687 = vrot.lane.b32.xlu0 %v16758_v6, %s15607_s14  ;;  %v13163_v14 = vpop.f32.mrb[34].mxu1  ;;  %v11775_v13 = vmul.f32 -1.442695, %v16758_v6 }
 0xd62   :  { %v16764_v1 = vadd.f32 %v15533_v56, %v13163_v14  ;;  %v2602_v40 = vpop.f32.mrb[35].mxu1  ;;  %14899 = vpow2.f32 %v11776_v55 }
 0xd63   :  { %v16766_v58 = vadd.f32 %v15533_v56, %v2602_v40  ;;  %14901 = vpow2.f32 %v11775_v13 }
 0xd64   :  { %2693 = vrot.lane.b32.xlu1 %v16764_v1, %s15607_s14  ;;  %v11778_v9 = vmul.f32 -1.442695, %v16764_v1 }
 0xd65   :  { %2691 = vrot.lane.b32.xlu0 %v16766_v58, %s15607_s14  ;;  %v11777_v19 = vmul.f32 -1.442695, %v16766_v58 }
 0xd66   :  { %14903 = vpow2.f32 %v11778_v9 }
 0xd67   :  { %14905 = vpow2.f32 %v11777_v19 }
 0xd68   :  { %v13166_v3 = vpop.f32.mrb[36].mxu1 }
 0xd69   :  { %v16772_v43 = vadd.f32 %v15533_v56, %v13166_v3  ;;  %v2612_v44 = vpop.f32.mrb[37].mxu1 }
 0xd6a   :  { %v16774_v15 = vadd.f32 %v15533_v56, %v2612_v44 }
 0xd6b   :  { %2697 = vrot.lane.b32.xlu1 %v16772_v43, %s15607_s14  ;;  %v11780_v54 = vmul.f32 -1.442695, %v16772_v43 }
 0xd6c   :  { %2695 = vrot.lane.b32.xlu0 %v16774_v15, %s15607_s14  ;;  %v11779_v60 = vmul.f32 -1.442695, %v16774_v15  ;;  %v14900_v31 = vpop.eup %14899 }
 0xd6d   :  { %14907 = vpow2.f32 %v11780_v54  ;;  %v14902_v21 = vpop.eup %14901  ;;  %v2656_v37 = vadd.f32 1.0, %v14900_v31 }
 0xd6e   :  { %14909 = vpow2.f32 %v11779_v60  ;;  %v2655_v62 = vadd.f32 1.0, %v14902_v21 }
 0xd6f   :  { %14911 = vrcp.f32 %v2656_v37 }
 0xd70   :  { %v14904_v22 = vpop.eup %14903  ;;  %14913 = vrcp.f32 %v2655_v62 }
 0xd71   :  { %v14906_v49 = vpop.eup %14905  ;;  %v2658_v12 = vadd.f32 1.0, %v14904_v22 }
 0xd72   :  { %v2657_v23 = vadd.f32 1.0, %v14906_v49 }
 0xd73   :  { %14915 = vrcp.f32 %v2658_v12 }
 0xd74   :  { %14917 = vrcp.f32 %v2657_v23 }
 0xd76   :  { %v13169_v27 = vpop.f32.mrb[38].mxu1 }
 0xd77   :  { %v16780_v38 = vadd.f32 %v15533_v56, %v13169_v27  ;;  %v2622_v4 = vpop.f32.mrb[39].mxu1  ;;  %v14908_v30 = vpop.eup %14907 }
 0xd78   :  { %v16782_v25 = vadd.f32 %v15533_v56, %v2622_v4  ;;  %v14910_v7 = vpop.eup %14909  ;;  %v2660_v45 = vadd.f32 1.0, %v14908_v30 }
 0xd79   :  { %2701 = vrot.lane.b32.xlu1 %v16780_v38, %s15607_s14  ;;  %v2659_v51 = vadd.f32 1.0, %v14910_v7  ;;  %v11782_v48 = vmul.f32 -1.442695, %v16780_v38  ;;  %v16796_v53 = vpop.eup %14911 }
 0xd7a   :  { %2699 = vrot.lane.b32.xlu0 %v16782_v25, %s15607_s14  ;;  %v11781_v46 = vmul.f32 -1.442695, %v16782_v25  ;;  %14919 = vrcp.f32 %v2660_v45  ;;  %v16798_v47 = vpop.eup %14913 }
 0xd7b   :  { %14921 = vrcp.f32 %v2659_v51 }
 0xd7c   :  { %14923 = vpow2.f32 %v11782_v48 }
 0xd7d   :  { %14925 = vpow2.f32 %v11781_v46  ;;  %v16803_v44 = vpop.eup %14915  ;;  %v15534_v46 = vld [vmem:[%s20711_s1 + $0x48] sm:$0xff] }
 0xd7e   :  { %v16806_v4 = vpop.eup %14917 }
 0xd84   :  { %v16812_v19 = vpop.eup %14919 }
 0xd85   :  { %v16814_v54 = vpop.eup %14921 }
 0xd86   :  { %v14924_v31 = vpop.eup %14923 }
 0xd87   :  { %v14926_v22 = vpop.eup %14925  ;;  %v2662_v49 = vadd.f32 1.0, %v14924_v31  ;;  %v20865_v31 = vsub.f32 1.0, %v16485_v28 }
 0xd88   :  { %v2661_v12 = vadd.f32 1.0, %v14926_v22 }
 0xd89   :  { %14927 = vrcp.f32 %v2662_v49 }
 0xd8a   :  { %14929 = vrcp.f32 %v2661_v12 }
 0xd93   :  { %v16820_v23 = vpop.eup %14927 }
 0xd94   :  { %v16822_v7 = vpop.eup %14929 }
 0xdd2   :  { %v2690_v56 = vpop.permute.xlu1 %2689 }
 0xdd3   :  { %v2712_v14 = vmul.f32 %v16796_v53, %v2690_v56  ;;  %v2688_v40 = vpop.permute.xlu0 %2687  ;;  %v15535_v56 = vld [vmem:[%s20711_s1 + $0x40] sm:$0xff] }
 0xdd4   :  { %v2711_v3 = vmul.f32 %v16798_v47, %v2688_v40  ;;  %v20860_v40 = vsub.f32 1.0, %v16417_v34  ;;  %v15538_v34 = vld [vmem:[%s20711_s1 + $0x60] sm:$0xff] }
 0xdd5   :  { %2729 = vrot.lane.b32.xlu1 %v2712_v14, %s15609_s15  ;;  %v20859_v14 = vsub.f32 1.0, %v16450_v57  ;;  %v15539_v57 = vld [vmem:[%s20711_s1 + $0x68] sm:$0xff] }
 0xdd6   :  { %v2694_v27 = vpop.permute.xlu1 %2693  ;;  %2727 = vrot.lane.b32.xlu0 %v2711_v3, %s15609_s15  ;;  %v15536_v3 = vld [vmem:[%s20711_s1 + $0x50] sm:$0xff] }
 0xdd7   :  { %v2714_v55 = vmul.f32 %v16803_v44, %v2694_v27  ;;  %v2692_v13 = vpop.permute.xlu0 %2691  ;;  %v15537_v27 = vld [vmem:[%s20711_s1 + $0x58] sm:$0xff] }
 0xdd8   :  { %v2713_v9 = vmul.f32 %v16806_v4, %v2692_v13  ;;  %v20862_v13 = vsub.f32 1.0, %v16456_v42  ;;  %v15540_v42 = vld [vmem:[%s20711_s1 + $0x70] sm:$0xff] }
 0xdd9   :  { %2733 = vrot.lane.b32.xlu1 %v2714_v55, %s15609_s15  ;;  %v20861_v55 = vsub.f32 1.0, %v16461_v36  ;;  %v15541_v36 = vld [vmem:[%s20711_s1 + $0x78] sm:$0xff] }
 0xdda   :  { %2731 = vrot.lane.b32.xlu0 %v2713_v9, %s15609_s15  ;;  %v20863_v9 = vsub.f32 1.0, %v16473_v5 }
 0xddd   :  { %v2698_v60 = vpop.permute.xlu1 %2697 }
 0xdde   :  { %v2716_v21 = vmul.f32 %v16812_v19, %v2698_v60  ;;  %v2696_v37 = vpop.permute.xlu0 %2695  ;;  %v20864_v60 = vsub.f32 1.0, %v16468_v59 }
 0xddf   :  { %v2715_v62 = vmul.f32 %v16814_v54, %v2696_v37 }
 0xde0   :  { %2737 = vrot.lane.b32.xlu1 %v2716_v21, %s15609_s15  ;;  %v20866_v21 = vsub.f32 1.0, %v16480_v0 }
 0xde1   :  { %2735 = vrot.lane.b32.xlu0 %v2715_v62, %s15609_s15 }
 0xdeb   :  { %v2702_v30 = vpop.permute.xlu1 %2701 }
 0xdec   :  { %v2718_v45 = vmul.f32 %v16820_v23, %v2702_v30  ;;  %v2700_v51 = vpop.permute.xlu0 %2699 }
 0xded   :  { %v2717_v48 = vmul.f32 %v16822_v7, %v2700_v51 }
 0xdee   :  { %2741 = vrot.lane.b32.xlu1 %v2718_v45, %s15609_s15 }
 0xdef   :  { %2739 = vrot.lane.b32.xlu0 %v2717_v48, %s15609_s15 }
 0xdf2   :  { %2836 = vperm.xlu1 %14676, %v15534_v46  }
 0xdf3   :  { %2832 = vperm.xlu0 %14675, %v15535_v56  }
 0xdf6   :  { %2872 = vperm.xlu1 %14676, %v20859_v14  }
 0xdf7   :  { %2876 = vperm.xlu0 %14675, %v20860_v40  }
 0xdfa   :  { %2840 = vperm.xlu1 %14676, %v15536_v3  }
 0xdfb   :  { %2844 = vperm.xlu0 %14675, %v15537_v27  }
 0xdfe   :  { %2880 = vperm.xlu1 %14676, %v20861_v55  }
 0xdff   :  { %2884 = vperm.xlu0 %14675, %v20862_v13  }
 0xe02   :  { %2848 = vperm.xlu1 %14676, %v15538_v34  }
 0xe03   :  { %2852 = vperm.xlu0 %14675, %v15539_v57  }
 0xe06   :  { %2888 = vperm.xlu1 %14676, %v20863_v9  }
 0xe07   :  { %2892 = vperm.xlu0 %14675, %v20864_v60  }
 0xe0a   :  { %2856 = vperm.xlu1 %14676, %v15540_v42  }
 0xe0b   :  { %2860 = vperm.xlu0 %14675, %v15541_v36  }
 0xe0e   :  { %2896 = vperm.xlu1 %14676, %v20865_v31  }
 0xe0f   :  { %2900 = vperm.xlu0 %14675, %v20866_v21  }
 0xe12   :  { %14677 = vset.pattern.permute.xlu1 %v20853_v61 }
 0xe13   :  { %14678 = vset.pattern.permute.xlu0 %v20853_v61 }
 0xe47   :  { %v2730_v59 = vpop.permute.xlu1 %2729 }
 0xe48   :  { %v2752_v5 = vadd.f32 %v2730_v59, %v16756_v39  ;;  %v2728_v37 = vpop.permute.xlu0 %2727 }
 0xe49   :  { %v2751_v22 = vadd.f32 %v2728_v37, %v16758_v6 }
 0xe4a   :  { %14931 = vtanh.f32 %v2752_v5 }
 0xe4b   :  { %14933 = vtanh.f32 %v2751_v22  ;;  %v2734_v62 = vpop.permute.xlu1 %2733  ;;  %v2768_v22 = vsub.f32 1.0, %v16796_v53 }
 0xe4c   :  { %v2754_v49 = vadd.f32 %v2734_v62, %v16764_v1  ;;  %v2732_v28 = vpop.permute.xlu0 %2731 }
 0xe4d   :  { %v2753_v12 = vadd.f32 %v2732_v28, %v16766_v58  ;;  %v2816_v28 = vmul.f32 %v16796_v53, %v16293_v41 }
 0xe4e   :  { %14935 = vtanh.f32 %v2754_v49  ;;  %v2767_v49 = vsub.f32 1.0, %v16798_v47 }
 0xe4f   :  { %14937 = vtanh.f32 %v2753_v12 }
 0xe52   :  { %v2738_v0 = vpop.permute.xlu1 %2737 }
 0xe53   :  { %v2756_v30 = vadd.f32 %v2738_v0, %v16772_v43  ;;  %v2736_v45 = vpop.permute.xlu0 %2735 }
 0xe54   :  { %v14932_v51 = vpop.eup %14931  ;;  %v2755_v39 = vadd.f32 %v2736_v45, %v16774_v15 }
 0xe55   :  { %v14934_v48 = vpop.eup %14933  ;;  %14939 = vtanh.f32 %v2756_v30  ;;  %2785 = vrot.lane.b32.xlu0 %v14932_v51, %s15605_s11  ;;  %v2815_v30 = vmul.f32 %v16798_v47, %v16295_v63  ;;  %v2817_v47 = vmul.f32 %v16806_v4, %v16305_v8 }
 0xe56   :  { %14941 = vtanh.f32 %v2755_v39  ;;  %2783 = vrot.lane.b32.xlu1 %v14934_v48, %s15605_s11  ;;  %v2770_v39 = vsub.f32 1.0, %v16803_v44 }
 0xe58   :  { %v14936_v6 = vpop.eup %14935 }
 0xe59   :  { %v14938_v1 = vpop.eup %14937  ;;  %2789 = vrot.lane.b32.xlu0 %v14936_v6, %s15605_s11 }
 0xe5a   :  { %2787 = vrot.lane.b32.xlu1 %v14938_v1, %s15605_s11  ;;  %v2769_v1 = vsub.f32 1.0, %v16806_v4  ;;  %v2772_v4 = vsub.f32 1.0, %v16812_v19 }
 0xe5f   :  { %v14940_v58 = vpop.eup %14939 }
 0xe60   :  { %v14942_v46 = vpop.eup %14941  ;;  %2793 = vrot.lane.b32.xlu0 %v14940_v58, %s15605_s11  ;;  %v2742_v43 = vpop.permute.xlu1 %2741 }
 0xe61   :  { %2791 = vrot.lane.b32.xlu1 %v14942_v46, %s15605_s11  ;;  %v2758_v15 = vadd.f32 %v2742_v43, %v16780_v38  ;;  %v2740_v56 = vpop.permute.xlu0 %2739  ;;  %v2818_v43 = vmul.f32 %v16803_v44, %v16302_v52 }
 0xe62   :  { %v2757_v14 = vadd.f32 %v2740_v56, %v16782_v25 }
 0xe63   :  { %14943 = vtanh.f32 %v2758_v15 }
 0xe64   :  { %14945 = vtanh.f32 %v2757_v14 }
 0xe6d   :  { %v14944_v40 = vpop.eup %14943 }
 0xe6e   :  { %v14946_v3 = vpop.eup %14945  ;;  %2797 = vrot.lane.b32.xlu0 %v14944_v40, %s15605_s11 }
 0xe6f   :  { %2795 = vrot.lane.b32.xlu1 %v14946_v3, %s15605_s11 }
 0xe71   :  { %v2837_v55 = vpop.permute.xlu1 %2836 }
 0xe72   :  { %v2833_v27 = vpop.permute.xlu0 %2832 }
 0xe75   :  { %v2873_v34 = vpop.permute.xlu1 %2872 }
 0xe76   :  { %v2877_v13 = vpop.permute.xlu0 %2876  ;;  %v2903_v56 = vmul.f32 %v2873_v34, %v16295_v63  ;;  %v2771_v34 = vsub.f32 1.0, %v16814_v54 }
 0xe77   :  { %v2904_v58 = vmul.f32 %v2877_v13, %v16293_v41 }
 0xe79   :  { %v2841_v9 = vpop.permute.xlu1 %2840 }
 0xe7a   :  { %v2845_v57 = vpop.permute.xlu0 %2844 }
 0xe7d   :  { %v2881_v42 = vpop.permute.xlu1 %2880 }
 0xe7e   :  { %v2885_v60 = vpop.permute.xlu0 %2884  ;;  %v2905_v44 = vmul.f32 %v2881_v42, %v16305_v8  ;;  %v2819_v8 = vmul.f32 %v16814_v54, %v16315_v17  ;;  %v2774_v54 = vsub.f32 1.0, %v16820_v23 }
 0xe7f   :  { %v2906_v41 = vmul.f32 %v2885_v60, %v16302_v52  ;;  %v2820_v52 = vmul.f32 %v16812_v19, %v16313_v33 }
 0xe81   :  { %v2849_v36 = vpop.permute.xlu1 %2848 }
 0xe82   :  { %v2853_v38 = vpop.permute.xlu0 %2852 }
 0xe85   :  { %v2889_v25 = vpop.permute.xlu1 %2888 }
 0xe86   :  { %v2893_v31 = vpop.permute.xlu0 %2892 }
 0xe89   :  { %v16888_v59 = vpop.permute.xlu1 %2856 }
 0xe8a   :  { %v16886_v21 = vpop.permute.xlu0 %2860 }
 0xe8d   :  { %v16892_v37 = vpop.permute.xlu1 %2896 }
 0xe8e   :  { %v16890_v5 = vpop.permute.xlu0 %2900 }
 0xec7   :  { %v2786_v62 = vpop.permute.xlu0 %2785 }
 0xec8   :  { %v2808_v12 = vmul.f32 %v2786_v62, %v2768_v22  ;;  %v2784_v0 = vpop.permute.xlu1 %2783 }
 0xec9   :  { %v2807_v45 = vmul.f32 %v2784_v0, %v2767_v49  ;;  %v2908_v0 = vmul.f32 %v2893_v31, %v16313_v33  ;;  %v11791_v33 = vld [vmem:[%s20709_s0 + $0x80] sm:$0xff]  ;;  %v2821_v31 = vmul.f32 %v16822_v7, %v16335_v18 }
 0xeca   :  { %v2824_v51 = vadd.f32 %v2816_v28, %v2808_v12  ;;  %13186 = vmatprep.mubr.msk.f32.mxu0 %vm80_vm0, %v11791_v33 }
 0xecb   :  { %v2823_v48 = vadd.f32 %v2815_v30, %v2807_v45  ;;  %v2790_v6 = vpop.permute.xlu0 %2789  ;;  %v2907_v45 = vmul.f32 %v2889_v25, %v16315_v17  ;;  %v2822_v17 = vmul.f32 %v16820_v23, %v16333_v2 }
 0xecc   :  { %v2864_v46 = vmul.f32 %v2837_v55, %v2824_v51  ;;  %v2810_v53 = vmul.f32 %v2790_v6, %v2770_v39  ;;  %v2788_v15 = vpop.permute.xlu1 %2787  ;;  %v2773_v6 = vsub.f32 1.0, %v16822_v7 }
 0xecd   :  { %v2863_v14 = vmul.f32 %v2833_v27, %v2823_v48  ;;  %v2809_v40 = vmul.f32 %v2788_v15, %v2769_v1 }
 0xece   :  { %v16908_v3 = vadd.f32 %v2904_v58, %v2864_v46  ;;  %v2826_v22 = vadd.f32 %v2818_v43, %v2810_v53  ;;  %v2910_v46 = vmul.f32 %v16890_v5, %v16333_v2  ;;  %v2909_v53 = vmul.f32 %v16892_v37, %v16335_v18 }
 0xecf   :  { %v16910_v62 = vadd.f32 %v2903_v56, %v2863_v14  ;;  %v2825_v49 = vadd.f32 %v2817_v47, %v2809_v40 }
 0xed0   :  { %v2866_v55 = vmul.f32 %v2845_v57, %v2826_v22  ;;  %2929 = vrot.lane.b32.xlu0 %v16908_v3, %s15605_s11 }
 0xed1   :  { %v2865_v63 = vmul.f32 %v2841_v9, %v2825_v49  ;;  %2927 = vrot.lane.b32.xlu1 %v16910_v62, %s15605_s11 }
 0xed2   :  { %v16919_v27 = vadd.f32 %v2906_v41, %v2866_v55  ;;  %v2794_v13 = vpop.permute.xlu0 %2793  ;;  %v11792_v41 = vld [vmem:[%s20709_s0 + $0x88] sm:$0xff]  ;;  %v11793_v55 = vld [vmem:[%s20709_s0 + $0x90] sm:$0xff] }
 0xed3   :  { %v16922_v28 = vadd.f32 %v2905_v44, %v2865_v63  ;;  %v2812_v57 = vmul.f32 %v2794_v13, %v2772_v4  ;;  %v2792_v60 = vpop.permute.xlu1 %2791  ;;  %v11794_v44 = vld [vmem:[%s20709_s0 + $0x98] sm:$0xff]  ;;  %v11795_v63 = vld [vmem:[%s20709_s0 + $0xa0] sm:$0xff]  ;;  %v11796_v4 = vld [vmem:[%s20709_s0 + $0xa8] sm:$0xff] }
 0xed4   :  { %v2811_v9 = vmul.f32 %v2792_v60, %v2771_v34  ;;  %2933 = vrot.lane.b32.xlu0 %v16919_v27, %s15605_s11  ;;  %v11797_v13 = vld [vmem:[%s20709_s0 + $0xb0] sm:$0xff]  ;;  %v11798_v34 = vld [vmem:[%s20709_s0 + $0xb8] sm:$0xff]  ;;  %v17042_v60 = vld [vmem:[%s20711_s1 + $0x88] sm:$0xff] }
 0xed5   :  { %v2828_v42 = vadd.f32 %v2820_v52, %v2812_v57  ;;  %2931 = vrot.lane.b32.xlu1 %v16922_v28, %s15605_s11  ;;  %v20867_v52 = vld [vmem:[#allocation2_spill] sm:$0xff]  ;;  %v20868_v57 = vld [vmem:[#allocation4_spill] sm:$0xff] }
 0xed6   :  { %v2827_v12 = vadd.f32 %v2819_v8, %v2811_v9 }
 0xed7   :  { %v2868_v30 = vmul.f32 %v2853_v38, %v2828_v42 }
 0xed8   :  { %v2867_v19 = vmul.f32 %v2849_v36, %v2827_v12 }
 0xed9   :  { %v16934_v51 = vadd.f32 %v2908_v0, %v2868_v30 }
 0xeda   :  { %v16936_v39 = vadd.f32 %v2907_v45, %v2867_v19  ;;  %v20869_v19 = vld [vmem:[#allocation3_spill] sm:$0xff] }
 0xedb   :  { %2937 = vrot.lane.b32.xlu0 %v16934_v51, %s15605_s11 }
 0xedc   :  { %2935 = vrot.lane.b32.xlu1 %v16936_v39, %s15605_s11 }
 0xee0   :  { %v2798_v48 = vpop.permute.xlu0 %2797 }
 0xee1   :  { %v2814_v38 = vmul.f32 %v2798_v48, %v2774_v54  ;;  %v2796_v36 = vpop.permute.xlu1 %2795 }
 0xee2   :  { %v2813_v25 = vmul.f32 %v2796_v36, %v2773_v6 }
 0xee3   :  { %v2830_v1 = vadd.f32 %v2822_v17, %v2814_v38 }
 0xee4   :  { %v2829_v58 = vadd.f32 %v2821_v31, %v2813_v25 }
 0xee5   :  { %v2870_v43 = vmul.f32 %v16886_v21, %v2830_v1  ;;  %v17075_v1 = vld [vmem:[%s20711_s1 + $0x80] sm:$0xff] }
 0xee6   :  { %v2869_v23 = vmul.f32 %v16888_v59, %v2829_v58  ;;  %v17081_v58 = vld [vmem:[%s20711_s1 + $0x90] sm:$0xff] }
 0xee7   :  { %v16958_v15 = vadd.f32 %v2910_v46, %v2870_v43  ;;  %v17087_v46 = vld [vmem:[%s20711_s1 + $0x98] sm:$0xff]  ;;  %v17092_v43 = vld [vmem:[%s20711_s1 + $0xa0] sm:$0xff] }
 0xee8   :  { %v16960_v56 = vadd.f32 %v2909_v53, %v2869_v23  ;;  %v17099_v53 = vld [vmem:[%s20711_s1 + $0xa8] sm:$0xff]  ;;  %v17104_v23 = vld [vmem:[%s20711_s1 + $0xb0] sm:$0xff] }
 0xee9   :  { %2941 = vrot.lane.b32.xlu0 %v16958_v15, %s15605_s11 }
 0xeea   :  { %2939 = vrot.lane.b32.xlu1 %v16960_v56, %s15605_s11 }
 0xeed   :  { %3490 = vperm.xlu0 %14678, %v17042_v60  }
 0xeee   :  { %3486 = vperm.xlu1 %14677, %v17075_v1  }
 0xef1   :  { %3502 = vperm.xlu0 %14678, %v17092_v43  }
 0xef2   :  { %3494 = vperm.xlu1 %14677, %v17081_v58  }
 0xef5   :  { %3510 = vperm.xlu0 %14678, %v17104_v23  }
 0xef6   :  { %3498 = vperm.xlu1 %14677, %v17087_v46  }
 0xefa   :  { %3506 = vperm.xlu1 %14677, %v17099_v53  }
 0xf42   :  { %v2930_v7 = vpop.permute.xlu0 %2929 }
 0xf43   :  { %11784 = vst.msk [vmem:[%s20713_s4 + $0x48] sm:$0xff] %vm210_vm1, %v2930_v7  ;;  %v2928_v2 = vpop.permute.xlu1 %2927 }
 0xf44   :  { %11783 = vst.msk [vmem:[%s20713_s4 + $0x40] sm:$0xff] %vm210_vm1, %v2928_v2  ;;  %v14154_v18 = vpack.c.bf16 %v2930_v7, %v2928_v2  ;;  %v17111_v7 = vld [vmem:[%s20711_s1 + $0xb8] sm:$0xff]  ;;  %v20870_v2 = vmov 96  }
 0xf45   :  { %3514 = vperm.xlu1 %14677, %v17111_v7   ;;  %14679 = vset.pattern.permute.xlu0 %v20870_v2 }
 0xf46   :  { %14155 = vmatprep.subr.bf16.mxu0 %v14154_v18  ;;  %v2934_v21 = vpop.permute.xlu0 %2933  ;;  %3446 = vperm.xlu0 %14679, %v17075_v1  }
 0xf47   :  { %11786 = vst.msk [vmem:[%s20713_s4 + $0x58] sm:$0xff] %vm210_vm1, %v2934_v21  ;;  %v2932_v59 = vpop.permute.xlu1 %2931  ;;  %14157 = vmatpush3.bf16.msra.mxu0 %v14154_v18  ;;  %v20760_v18 = vsub.f32 1.0, %v17075_v1 }
 0xf48   :  { %11785 = vst.msk [vmem:[%s20713_s4 + $0x50] sm:$0xff] %vm210_vm1, %v2932_v59  ;;  %v14158_v5 = vpack.c.bf16 %v2934_v21, %v2932_v59  ;;  %v20871_v21 = vmov 98   ;;  %v20757_v59 = vsub.f32 1.0, %v17092_v43 }
 0xf49   :  { %14680 = vset.pattern.permute.xlu1 %v20870_v2 }
 0xf4a   :  { %14159 = vmatprep.subr.bf16.mxu0 %v14158_v5  ;;  %3450 = vperm.xlu1 %14680, %v17042_v60  }
 0xf4b   :  { %14161 = vmatpush3.bf16.msra.mxu0 %v14158_v5  ;;  %3462 = vperm.xlu0 %14679, %v17092_v43   ;;  %v20758_v5 = vsub.f32 1.0, %v17042_v60 }
 0xf4d   :  { %v2938_v37 = vpop.permute.xlu0 %2937 }
 0xf4e   :  { %11788 = vst.msk [vmem:[%s20713_s4 + $0x68] sm:$0xff] %vm210_vm1, %v2938_v37  ;;  %v2936_v14 = vpop.permute.xlu1 %2935  ;;  %3454 = vperm.xlu1 %14680, %v17081_v58  }
 0xf4f   :  { %11787 = vst.msk [vmem:[%s20713_s4 + $0x60] sm:$0xff] %vm210_vm1, %v2936_v14  ;;  %v14162_v47 = vpack.c.bf16 %v2938_v37, %v2936_v14  ;;  %14682 = vset.pattern.permute.xlu0 %v20871_v21  ;;  %v20754_v37 = vsub.f32 1.0, %v17099_v53  ;;  %v20759_v14 = vsub.f32 1.0, %v17081_v58 }
 0xf50   :  { %3567 = vperm.xlu0 %14682, %v20760_v18  }
 0xf51   :  { %14163 = vmatprep.subr.bf16.mxu0 %v14162_v47 }
 0xf52   :  { %14165 = vmatpush3.bf16.msra.mxu0 %v14162_v47  ;;  %3458 = vperm.xlu1 %14680, %v17087_v46   ;;  %v20756_v47 = vsub.f32 1.0, %v17087_v46 }
 0xf54   :  { %3587 = vperm.xlu0 %14682, %v20757_v59  }
 0xf56   :  { %14681 = vset.pattern.permute.xlu1 %v20871_v21 }
 0xf57   :  { %3572 = vperm.xlu1 %14681, %v20758_v5  }
 0xf58   :  { %3592 = vperm.xlu0 %14682, %v20754_v37  }
 0xf5b   :  { %v2942_v40 = vpop.permute.xlu0 %2941  ;;  %3577 = vperm.xlu1 %14681, %v20759_v14  }
 0xf5c   :  { %11790 = vst.msk [vmem:[%s20713_s4 + $0x78] sm:$0xff] %vm210_vm1, %v2942_v40  ;;  %v2940_v22 = vpop.permute.xlu1 %2939 }
 0xf5d   :  { %11789 = vst.msk [vmem:[%s20713_s4 + $0x70] sm:$0xff] %vm210_vm1, %v2940_v22  ;;  %v14166_v49 = vpack.c.bf16 %v2942_v40, %v2940_v22 }
 0xf5f   :  { %14167 = vmatprep.subr.bf16.mxu0 %v14166_v49  ;;  %14683 = vset.pattern.permute.xlu1 %v20870_v2 }
 0xf60   :  { %14169 = vmatpush3.bf16.msra.mxu0 %v14166_v49  ;;  %3466 = vperm.xlu1 %14683, %v17099_v53  }
 0xf61   :  { %14187 = vmatprep.subr.bf16.mxu0 %v15716_v24 }
 0xf63   :  { %13187 = vmatmul.mubr.msk.f32.vlgmr.msra.gmra.mrb[40].mxu0 %vm80_vm0, %v11792_v41 }
 0xf64   :  { %13189 = vmatprep.mubr.msk.f32.mxu0 %vm80_vm0, %v11793_v55  ;;  %14189 = vmatpush3.bf16.msra.mxu0 %v15716_v24 }
 0xf65   :  { %14191 = vmatprep.subr.bf16.mxu0 %v15721_v26  ;;  %14684 = vset.pattern.permute.xlu1 %v20871_v21 }
 0xf66   :  { %3582 = vperm.xlu1 %14684, %v20756_v47  }
 0xf67   :  { %13190 = vmatmul.mubr.msk.f32.gmra.mrb[42].mxu0 %vm80_vm0, %v11794_v44 }
 0xf68   :  { %13192 = vmatprep.mubr.msk.f32.mxu0 %vm80_vm0, %v11795_v63  ;;  %14193 = vmatpush3.bf16.msra.mxu0 %v15721_v26 }
 0xf69   :  { %14195 = vmatprep.subr.bf16.mxu0 %v15732_v29 }
 0xf6a   :  { %14685 = vset.pattern.permute.xlu1 %v20870_v2 }
 0xf6b   :  { %13193 = vmatmul.mubr.msk.f32.gmra.mrb[44].mxu0 %vm80_vm0, %v11796_v4  ;;  %3470 = vperm.xlu1 %14685, %v17104_v23  }
 0xf6c   :  { %13195 = vmatprep.mubr.msk.f32.mxu0 %vm80_vm0, %v11797_v13  ;;  %14197 = vmatpush3.bf16.msra.mxu0 %v15732_v29 }
 0xf6d   :  { %14199 = vmatprep.subr.bf16.mxu0 %v15742_v32 }
 0xf6f   :  { %13196 = vmatmul.mubr.msk.f32.gmra.mrb[46].mxu0 %vm80_vm0, %v11798_v34  ;;  %3474 = vperm.xlu1 %14685, %v17111_v7  }
 0xf70   :  { %14201 = vmatpush3.bf16.msra.mxu0 %v15742_v32 }
 0xf71   :  { %14203 = vmatprep.subr.bf16.mxu0 %v15752_v35 }
 0xf73   :  { %14686 = vset.pattern.permute.xlu1 %v20871_v21 }
 0xf74   :  { %14205 = vmatpush3.bf16.msra.mxu0 %v15752_v35 }
 0xf75   :  { %14207 = vmatprep.subr.bf16.mxu0 %v20867_v52 }
 0xf78   :  { %14209 = vmatpush3.bf16.msra.mxu0 %v20867_v52 }
 0xf79   :  { %14219 = vmatprep.subr.bf16.mxu0 %v20868_v57 }
0x1036   :  { %v13188_v8 = vpop.f32.mrb[40].mxu0 }
0x1037   :  { %v3068_v9 = vpop.f32.mrb[41].mxu0  ;;  %v3108_v12 = vsel %vm210_vm1, %v13188_v8, %v16908_v3 }
0x1038   :  { %v3107_v42 = vsel %vm210_vm1, %v3068_v9, %v16910_v62 }
0x1039   :  { %13214 = vmatprep.mubr.msk.f32.mxu1 %vm80_vm0, %v3107_v42 }
0x103a   :  { %v13191_v0 = vpop.f32.mrb[42].mxu0  ;;  %13215 = vmatmul.mubr.msk.f32.vlgmr.msra.gmra.mrb[40].mxu1 %vm80_vm0, %v3108_v12 }
0x103b   :  { %v3078_v30 = vpop.f32.mrb[43].mxu0  ;;  %14213 = vmatpush3.bf16.msra.mxu1 %v15938_v50  ;;  %v3110_v54 = vsel %vm210_vm1, %v13191_v0, %v16919_v27 }
0x103c   :  { %v3109_v45 = vsel %vm210_vm1, %v3078_v30, %v16922_v28  ;;  %14215 = vmatprep.subr.bf16.mxu1 %v20869_v19  ;;  %v20872_v30 = vld [vmem:[#allocation5_spill] sm:$0xff] }
0x103d   :  { %13217 = vmatprep.mubr.msk.f32.mxu1 %vm80_vm0, %v3109_v45 }
0x103e   :  { %v13194_v48 = vpop.f32.mrb[44].mxu0  ;;  %13218 = vmatmul.mubr.msk.f32.gmra.mrb[42].mxu1 %vm80_vm0, %v3110_v54 }
0x103f   :  { %v3088_v6 = vpop.f32.mrb[45].mxu0  ;;  %14217 = vmatpush3.bf16.msra.mxu1 %v20869_v19  ;;  %v3112_v17 = vsel %vm210_vm1, %v13194_v48, %v16934_v51 }
0x1040   :  { %v3111_v33 = vsel %vm210_vm1, %v3088_v6, %v16936_v39 }
0x1041   :  { %13220 = vmatprep.mubr.msk.f32.mxu1 %vm80_vm0, %v3111_v33 }
0x1042   :  { %v13197_v38 = vpop.f32.mrb[46].mxu0  ;;  %13221 = vmatmul.mubr.msk.f32.gmra.mrb[44].mxu1 %vm80_vm0, %v3112_v17 }
0x1043   :  { %v3098_v36 = vpop.f32.mrb[47].mxu0  ;;  %v3114_v25 = vsel %vm210_vm1, %v13197_v38, %v16958_v15  ;;  %v20873_v38 = vld [vmem:[#allocation6_spill] sm:$0xff] }
0x1044   :  { %v3113_v31 = vsel %vm210_vm1, %v3098_v36, %v16960_v56 }
0x1045   :  { %13223 = vmatprep.mubr.msk.f32.mxu1 %vm80_vm0, %v3113_v31 }
0x1046   :  { %13224 = vmatmul.mubr.msk.f32.gmra.mrb[46].mxu1 %vm80_vm0, %v3114_v25 }
0x110d   :  { %v13216_v40 = vpop.f32.mrb[40].mxu1 }
0x110e   :  { %v3211_v22 = vadd.f32 %v13216_v40, %v17042_v60  ;;  %v3205_v49 = vpop.f32.mrb[41].mxu1  ;;  %v20874_v40 = vld [vmem:[#allocation7_spill] sm:$0xff] }
0x110f   :  { %v3206_v41 = vadd.f32 %v17075_v1, %v3205_v49 }
0x1110   :  { %v3245_v63 = vmax.f32 %v3211_v22, 0.0  ;;  %v3487_v22 = vpop.permute.xlu1 %3486 }
0x1111   :  { %v3244_v55 = vmax.f32 %v3206_v41, 0.0  ;;  %v13219_v44 = vpop.f32.mrb[42].mxu1  ;;  %v15542_v41 = vld [vmem:[%s20712_s3] ss:$0 sm:$0xff] }
0x1112   :  { %v3221_v4 = vadd.f32 %v13219_v44, %v17087_v46  ;;  %v3215_v13 = vpop.f32.mrb[43].mxu1 }
0x1113   :  { %v3216_v34 = vadd.f32 %v17081_v58, %v3215_v13  ;;  %13250 = vmatprep.mubr.msk.f32.mxu0 %vm356_vm2, %v3244_v55 }
0x1114   :  { %13251 = vmatmul.mubr.msk.f32.vlgmr.msra.gmra.mrb[48].mxu0 %vm356_vm2, %v3245_v63  ;;  %v3247_v42 = vmax.f32 %v3221_v4, 0.0  ;;  %v3495_v63 = vpop.permute.xlu1 %3494 }
0x1115   :  { %v3246_v8 = vmax.f32 %v3216_v34, 0.0  ;;  %v13222_v9 = vpop.f32.mrb[44].mxu1  ;;  %14221 = vmatpush3.bf16.msra.mxu0 %v20868_v57  ;;  %v3491_v34 = vpop.permute.xlu0 %3490 }
0x1116   :  { %v3231_v12 = vadd.f32 %v13222_v9, %v17099_v53  ;;  %v3225_v0 = vpop.f32.mrb[45].mxu1  ;;  %14223 = vmatprep.subr.bf16.mxu0 %v20872_v30 }
0x1117   :  { %v3226_v45 = vadd.f32 %v17092_v43, %v3225_v0  ;;  %13253 = vmatprep.mubr.msk.f32.mxu0 %vm356_vm2, %v3246_v8 }
0x1118   :  { %13254 = vmatmul.mubr.msk.f32.gmra.mrb[50].mxu0 %vm356_vm2, %v3247_v42  ;;  %v3249_v6 = vmax.f32 %v3231_v12, 0.0 }
0x1119   :  { %v3248_v54 = vmax.f32 %v3226_v45, 0.0  ;;  %v13225_v48 = vpop.f32.mrb[46].mxu1  ;;  %14225 = vmatpush3.bf16.msra.mxu0 %v20872_v30 }
0x111a   :  { %v3241_v33 = vadd.f32 %v13225_v48, %v17111_v7  ;;  %v3235_v17 = vpop.f32.mrb[47].mxu1  ;;  %14227 = vmatprep.subr.bf16.mxu0 %v20873_v38  ;;  %v3499_v48 = vpop.permute.xlu1 %3498 }
0x111b   :  { %v3236_v36 = vadd.f32 %v17104_v23, %v3235_v17  ;;  %13256 = vmatprep.mubr.msk.f32.mxu0 %vm356_vm2, %v3248_v54 }
0x111c   :  { %13257 = vmatmul.mubr.msk.f32.gmra.mrb[52].mxu0 %vm356_vm2, %v3249_v6  ;;  %v3251_v25 = vmax.f32 %v3241_v33, 0.0 }
0x111d   :  { %v3250_v31 = vmax.f32 %v3236_v36, 0.0  ;;  %14229 = vmatpush3.bf16.msra.mxu0 %v20873_v38 }
0x111e   :  { %14231 = vmatprep.subr.bf16.mxu0 %v20874_v40 }
0x111f   :  { %13259 = vmatprep.mubr.msk.f32.mxu0 %vm356_vm2, %v3250_v31 }
0x1120   :  { %13260 = vmatmul.mubr.msk.f32.gmra.mrb[54].mxu0 %vm356_vm2, %v3251_v25 }
0x1121   :  { %14233 = vmatpush3.bf16.msra.mxu0 %v20874_v40 }
0x1122   :  { %14251 = vmatprep.subr.bf16.mxu0 %v15665_v10 }
0x11e7   :  { %v13252_v49 = vpop.f32.mrb[48].mxu0 }
0x11e8   :  { %v3348_v55 = vadd.f32 %v15542_v41, %v13252_v49  ;;  %v3342_v44 = vpop.f32.mrb[49].mxu0  ;;  %v20755_v49 = vsub.f32 1.0, %v17104_v23 }
0x11e9   :  { %v3343_v4 = vadd.f32 %v15542_v41, %v3342_v44 }
0x11ea   :  { %v17175_v13 = vmax.f32 %v3348_v55, 0.0 }
0x11eb   :  { %v13255_v8 = vpop.f32.mrb[50].mxu0  ;;  %v17178_v42 = vmax.f32 %v3343_v4, 0.0 }
0x11ec   :  { %v3518_v9 = vmul.f32 %v3491_v34, %v17175_v13  ;;  %v3358_v12 = vadd.f32 %v15542_v41, %v13255_v8  ;;  %v3352_v0 = vpop.f32.mrb[51].mxu0 }
0x11ed   :  { %v3353_v45 = vadd.f32 %v15542_v41, %v3352_v0  ;;  %v3517_v33 = vmul.f32 %v3487_v22, %v17178_v42  ;;  %v3503_v22 = vpop.permute.xlu0 %3502 }
0x11ee   :  { %v17180_v54 = vmax.f32 %v3358_v12, 0.0  ;;  %3535 = vrot.lane.b32.xlu0 %v3518_v9, %s15605_s11  ;;  %v20753_v12 = vsub.f32 1.0, %v17111_v7 }
0x11ef   :  { %v13258_v6 = vpop.f32.mrb[52].mxu0  ;;  %v17185_v36 = vmax.f32 %v3353_v45, 0.0 }
0x11f0   :  { %v3520_v17 = vmul.f32 %v3499_v48, %v17180_v54  ;;  %v3362_v31 = vpop.f32.mrb[53].mxu0  ;;  %v3368_v4 = vadd.f32 %v15542_v41, %v13258_v6 }
0x11f1   :  { %v3363_v25 = vadd.f32 %v15542_v41, %v3362_v31  ;;  %v3519_v44 = vmul.f32 %v3495_v63, %v17185_v36  ;;  %v3507_v63 = vpop.permute.xlu1 %3506  ;;  %v3511_v6 = vpop.permute.xlu0 %3510 }
0x11f2   :  { %3539 = vrot.lane.b32.xlu1 %v3520_v17, %s15605_s11  ;;  %3533 = vrot.lane.b32.xlu0 %v3517_v33, %s15605_s11  ;;  %v17197_v0 = vmax.f32 %v3368_v4, 0.0 }
0x11f3   :  { %v13261_v55 = vpop.f32.mrb[54].mxu0  ;;  %v17191_v34 = vmax.f32 %v3363_v25, 0.0 }
0x11f4   :  { %v3372_v8 = vpop.f32.mrb[55].mxu0  ;;  %v3378_v48 = vadd.f32 %v15542_v41, %v13261_v55  ;;  %v3522_v17 = vmul.f32 %v3507_v63, %v17197_v0 }
0x11f5   :  { %v3373_v9 = vadd.f32 %v15542_v41, %v3372_v8  ;;  %v3521_v45 = vmul.f32 %v3503_v22, %v17191_v34  ;;  %v3515_v41 = vpop.permute.xlu1 %3514 }
0x11f6   :  { %3537 = vrot.lane.b32.xlu1 %v3519_v44, %s15605_s11  ;;  %3597 = vperm.xlu0 %14682, %v20755_v49   ;;  %v17206_v31 = vmax.f32 %v3378_v48, 0.0  ;;  %v20875_v44 = vmov 100  }
0x11f7   :  { %v17200_v33 = vmax.f32 %v3373_v9, 0.0 }
0x11f8   :  { %v3524_v55 = vmul.f32 %v3515_v41, %v17206_v31 }
0x11f9   :  { %v3523_v25 = vmul.f32 %v3511_v6, %v17200_v33  ;;  %v3451_v4 = vpop.permute.xlu1 %3450 }
0x11fa   :  { %3602 = vperm.xlu0 %14682, %v20753_v12   ;;  %3541 = vrot.lane.b32.xlu1 %v3521_v45, %s15605_s11  ;;  %v3447_v45 = vpop.permute.xlu0 %3446  ;;  %v3478_v37 = vmul.f32 %v3451_v4, %v17175_v13 }
0x11fb   :  { %v3477_v5 = vmul.f32 %v3447_v45, %v17178_v42 }
0x11fd   :  { %v3455_v8 = vpop.permute.xlu1 %3454 }
0x11fe   :  { %3543 = vrot.lane.b32.xlu1 %v3522_v17, %s15605_s11  ;;  %3545 = vrot.lane.b32.xlu0 %v3523_v25, %s15605_s11  ;;  %v3463_v63 = vpop.permute.xlu0 %3462  ;;  %v3479_v19 = vmul.f32 %v3455_v8, %v17185_v36 }
0x1201   :  { %v3459_v22 = vpop.permute.xlu1 %3458 }
0x1202   :  { %3547 = vrot.lane.b32.xlu1 %v3524_v55, %s15605_s11  ;;  %3391 = vperm.xlu0 %14682, %v17075_v1   ;;  %v3568_v17 = vpop.permute.xlu0 %3567  ;;  %v3480_v18 = vmul.f32 %v3459_v22, %v17180_v54 }
0x1205   :  { %v3573_v9 = vpop.permute.xlu1 %3572 }
0x1206   :  { %3396 = vperm.xlu1 %14686, %v17042_v60   ;;  %3401 = vperm.xlu0 %14682, %v17081_v58   ;;  %v3588_v41 = vpop.permute.xlu0 %3587 }
0x1209   :  { %v3578_v48 = vpop.permute.xlu1 %3577 }
0x120a   :  { %3406 = vperm.xlu1 %14686, %v17087_v46   ;;  %3411 = vperm.xlu0 %14682, %v17092_v43   ;;  %v3593_v12 = vpop.permute.xlu0 %3592 }
0x120d   :  { %v3467_v6 = vpop.permute.xlu1 %3466 }
0x120e   :  { %3416 = vperm.xlu1 %14686, %v17099_v53   ;;  %3421 = vperm.xlu0 %14682, %v17104_v23  }
0x1211   :  { %v3583_v25 = vpop.permute.xlu1 %3582 }
0x1212   :  { %3426 = vperm.xlu1 %14686, %v17111_v7   ;;  %14687 = vset.pattern.permute.xlu0 %v20875_v44 }
0x1215   :  { %v3471_v55 = vpop.permute.xlu1 %3470 }
0x1216   :  { %14688 = vset.pattern.permute.xlu1 %v20875_v44  ;;  %v3483_v8 = vmul.f32 %v3471_v55, %v17200_v33 }
0x1219   :  { %v3475_v49 = vpop.permute.xlu1 %3474 }
0x1260   :  { %v3536_v47 = vpop.permute.xlu0 %3535 }
0x1261   :  { %v3558_v59 = vadd.f32 %v3536_v47, %v3478_v37 }
0x1263   :  { %v3606_v14 = vmul.f32 %v3573_v9, %v3558_v59  ;;  %v3481_v59 = vmul.f32 %v3463_v63, %v17191_v34 }
0x1264   :  { %v3540_v44 = vpop.permute.xlu1 %3539  ;;  %v3534_v40 = vpop.permute.xlu0 %3533 }
0x1265   :  { %v3560_v38 = vadd.f32 %v3540_v44, %v3480_v18  ;;  %v3557_v30 = vadd.f32 %v3534_v40, %v3477_v5  ;;  %3623 = vrot.lane.b32.xlu1 %v3606_v14, %s15605_s11  ;;  %v3482_v5 = vmul.f32 %v3467_v6, %v17197_v0 }
0x1267   :  { %v3608_v21 = vmul.f32 %v3583_v25, %v3560_v38  ;;  %v3605_v2 = vmul.f32 %v3568_v17, %v3557_v30 }
0x1268   :  { %v3538_v57 = vpop.permute.xlu1 %3537 }
0x1269   :  { %v3559_v4 = vadd.f32 %v3538_v57, %v3479_v19  ;;  %3627 = vrot.lane.b32.xlu1 %v3608_v21, %s15605_s11  ;;  %3621 = vrot.lane.b32.xlu0 %v3605_v2, %s15605_s11  ;;  %v3484_v2 = vmul.f32 %v3475_v49, %v17206_v31  ;;  %v20876_v49 = vmov 99  }
0x126b   :  { %v3607_v37 = vmul.f32 %v3578_v48, %v3559_v4 }
0x126c   :  { %v3542_v47 = vpop.permute.xlu1 %3541 }
0x126d   :  { %v3561_v22 = vadd.f32 %v3542_v47, %v3481_v59  ;;  %3625 = vrot.lane.b32.xlu0 %v3607_v37, %s15605_s11 }
0x126f   :  { %v3609_v18 = vmul.f32 %v3588_v41, %v3561_v22 }
0x1270   :  { %v3544_v14 = vpop.permute.xlu1 %3543 }
0x1271   :  { %v3562_v30 = vadd.f32 %v3544_v14, %v3482_v5  ;;  %3629 = vrot.lane.b32.xlu0 %v3609_v18, %s15605_s11 }
0x1273   :  { %v3610_v38 = vmul.f32 %v3593_v12, %v3562_v30 }
0x1274   :  { %v3548_v57 = vpop.permute.xlu1 %3547 }
0x1275   :  { %3631 = vrot.lane.b32.xlu1 %v3610_v38, %s15605_s11  ;;  %v3598_v19 = vpop.permute.xlu0 %3597  ;;  %v3564_v21 = vadd.f32 %v3548_v57, %v3484_v2 }
0x1279   :  { %v3603_v40 = vpop.permute.xlu0 %3602 }
0x127a   :  { %v3612_v44 = vmul.f32 %v3603_v40, %v3564_v21 }
0x127c   :  { %3635 = vrot.lane.b32.xlu1 %v3612_v44, %s15605_s11 }
0x127d   :  { %v3546_v9 = vpop.permute.xlu0 %3545 }
0x127e   :  { %v3563_v45 = vadd.f32 %v3546_v9, %v3483_v8 }
0x1280   :  { %v3611_v48 = vmul.f32 %v3598_v19, %v3563_v45  ;;  %3843 = vperm.xlu1 %14688, %v17042_v60  }
0x1281   :  { %v3392_v63 = vpop.permute.xlu0 %3391 }
0x1282   :  { %3633 = vrot.lane.b32.xlu0 %v3611_v48, %s15605_s11  ;;  %v3429_v37 = vmul.f32 %v3392_v63, %v17178_v42 }
0x1284   :  { %3847 = vperm.xlu1 %14688, %v17081_v58  }
0x1285   :  { %v3397_v12 = vpop.permute.xlu1 %3396  ;;  %v3402_v17 = vpop.permute.xlu0 %3401 }
0x1286   :  { %3839 = vperm.xlu0 %14687, %v17075_v1   ;;  %v3430_v47 = vmul.f32 %v3397_v12, %v17175_v13  ;;  %v3431_v14 = vmul.f32 %v3402_v17, %v17185_v36  ;;  %v15543_v12 = vld [vmem:[%s20712_s3 + $0x1] ss:$0 sm:$0xff] }
0x1288   :  { %3855 = vperm.xlu1 %14688, %v17092_v43  }
0x1289   :  { %v3407_v6 = vpop.permute.xlu1 %3406  ;;  %v3412_v41 = vpop.permute.xlu0 %3411 }
0x128a   :  { %3851 = vperm.xlu0 %14687, %v17087_v46   ;;  %v3432_v38 = vmul.f32 %v3407_v6, %v17180_v54  ;;  %v3433_v19 = vmul.f32 %v3412_v41, %v17191_v34 }
0x128c   :  { %3863 = vperm.xlu1 %14688, %v17104_v23  }
0x128d   :  { %v3417_v25 = vpop.permute.xlu1 %3416  ;;  %v3422_v4 = vpop.permute.xlu0 %3421 }
0x128e   :  { %3859 = vperm.xlu0 %14687, %v17099_v53   ;;  %v3434_v54 = vmul.f32 %v3417_v25, %v17197_v0  ;;  %v3435_v34 = vmul.f32 %v3422_v4, %v17200_v33 }
0x1290   :  { %14689 = vset.pattern.permute.xlu1 %v20876_v49 }
0x1291   :  { %v3427_v55 = vpop.permute.xlu1 %3426 }
0x1292   :  { %3867 = vperm.xlu0 %14687, %v17111_v7   ;;  %v3436_v8 = vmul.f32 %v3427_v55, %v17206_v31 }
0x1296   :  { %14690 = vset.pattern.permute.xlu0 %v20876_v49 }
0x12d7   :  { %v3624_v59 = vpop.permute.xlu1 %3623 }
0x12d8   :  { %v17253_v5 = vadd.f32 %v3624_v59, %v3430_v47 }
0x12db   :  { %v3622_v22 = vpop.permute.xlu0 %3621  ;;  %v3628_v30 = vpop.permute.xlu1 %3627 }
0x12dc   :  { %v17251_v18 = vadd.f32 %v3622_v22, %v3429_v37  ;;  %v17263_v13 = vadd.f32 %v3628_v30, %v3432_v38 }
0x12de   :  { %13270 = vmatprep.mubr.msk.f32.mxu1 %vm210_vm1, %v17251_v18 }
0x12df   :  { %13271 = vmatmul.mubr.msk.f32.vlgmr.msra.gmra.mrb[48].mxu1 %vm210_vm1, %v17253_v5  ;;  %v3626_v57 = vpop.permute.xlu0 %3625 }
0x12e0   :  { %v17261_v42 = vadd.f32 %v3626_v57, %v3431_v14 }
0x12e2   :  { %13273 = vmatprep.mubr.msk.f32.mxu1 %vm210_vm1, %v17261_v42 }
0x12e3   :  { %13274 = vmatmul.mubr.msk.f32.gmra.mrb[50].mxu1 %vm210_vm1, %v17263_v13  ;;  %v3630_v36 = vpop.permute.xlu0 %3629 }
0x12e4   :  { %v17270_v2 = vadd.f32 %v3630_v36, %v3433_v19 }
0x12e6   :  { %13276 = vmatprep.mubr.msk.f32.mxu1 %vm210_vm1, %v17270_v2 }
0x12e7   :  { %v3632_v21 = vpop.permute.xlu1 %3631 }
0x12e8   :  { %v17275_v40 = vadd.f32 %v3632_v21, %v3434_v54 }
0x12ea   :  { %13277 = vmatmul.mubr.msk.f32.gmra.mrb[52].mxu1 %vm210_vm1, %v17275_v40 }
0x12ee   :  { %v3636_v44 = vpop.permute.xlu1 %3635 }
0x12ef   :  { %v17283_v48 = vadd.f32 %v3636_v44, %v3436_v8 }
0x12f4   :  { %v3634_v9 = vpop.permute.xlu0 %3633 }
0x12f5   :  { %v17281_v45 = vadd.f32 %v3634_v9, %v3435_v34 }
0x12f7   :  { %13279 = vmatprep.mubr.msk.f32.mxu1 %vm210_vm1, %v17281_v45 }
0x12f8   :  { %13280 = vmatmul.mubr.msk.f32.gmra.mrb[54].mxu1 %vm210_vm1, %v17283_v48 }
0x12ff   :  { %v17294_v4 = vpop.permute.xlu1 %3843 }
0x1303   :  { %v17301_v36 = vpop.permute.xlu1 %3847 }
0x1305   :  { %v17292_v55 = vpop.permute.xlu0 %3839 }
0x1309   :  { %v17298_v19 = vpop.permute.xlu0 %3851 }
0x130d   :  { %v17308_v8 = vpop.permute.xlu0 %3859 }
0x13b2   :  { %v13272_v0 = vpop.f32.mrb[48].mxu1 }
0x13b3   :  { %v3749_v33 = vadd.f32 %v15543_v12, %v13272_v0  ;;  %v3743_v63 = vpop.f32.mrb[49].mxu1 }
0x13b4   :  { %v3744_v6 = vadd.f32 %v15543_v12, %v3743_v63  ;;  %v17310_v63 = vpop.permute.xlu1 %3855 }
0x13b5   :  { %14947 = vtanh.f32 %v3749_v33 }
0x13b6   :  { %14949 = vtanh.f32 %v3744_v6  ;;  %v13275_v31 = vpop.f32.mrb[50].mxu1 }
0x13b7   :  { %v3759_v17 = vadd.f32 %v15543_v12, %v13275_v31  ;;  %v3753_v25 = vpop.f32.mrb[51].mxu1 }
0x13b8   :  { %v3754_v41 = vadd.f32 %v15543_v12, %v3753_v25 }
0x13b9   :  { %14951 = vtanh.f32 %v3759_v17 }
0x13ba   :  { %14953 = vtanh.f32 %v3754_v41 }
0x13bd   :  { %v13278_v59 = vpop.f32.mrb[52].mxu1 }
0x13be   :  { %v3769_v37 = vadd.f32 %v15543_v12, %v13278_v59  ;;  %v3763_v47 = vpop.f32.mrb[53].mxu1 }
0x13bf   :  { %v14948_v22 = vpop.eup %14947  ;;  %v3764_v14 = vadd.f32 %v15543_v12, %v3763_v47 }
0x13c0   :  { %v14950_v30 = vpop.eup %14949  ;;  %14955 = vtanh.f32 %v3769_v37  ;;  %v3895_v38 = vmul.f32 %v14948_v22, %v17294_v4 }
0x13c1   :  { %14957 = vtanh.f32 %v3764_v14  ;;  %v3894_v57 = vmul.f32 %v14950_v30, %v17292_v55 }
0x13c2   :  { %3912 = vrot.lane.b32.xlu0 %v3895_v38, %s15605_s11 }
0x13c3   :  { %v14952_v54 = vpop.eup %14951  ;;  %3910 = vrot.lane.b32.xlu1 %v3894_v57, %s15605_s11  ;;  %v17316_v57 = vpop.permute.xlu0 %3867 }
0x13c4   :  { %v14954_v21 = vpop.eup %14953  ;;  %v3897_v34 = vmul.f32 %v14952_v54, %v17298_v19 }
0x13c5   :  { %v3896_v44 = vmul.f32 %v14954_v21, %v17301_v36 }
0x13c6   :  { %3916 = vrot.lane.b32.xlu0 %v3897_v34, %s15605_s11  ;;  %v17320_v34 = vpop.permute.xlu1 %3863 }
0x13c7   :  { %3914 = vrot.lane.b32.xlu1 %v3896_v44, %s15605_s11 }
0x13ca   :  { %v14956_v9 = vpop.eup %14955 }
0x13cb   :  { %v14958_v0 = vpop.eup %14957  ;;  %v3899_v31 = vmul.f32 %v14956_v9, %v17308_v8  ;;  %v13281_v25 = vpop.f32.mrb[54].mxu1  ;;  %v11840_v9 = vmul.f32 -1.442695, %v3749_v33 }
0x13cc   :  { %v3898_v59 = vmul.f32 %v14958_v0, %v17310_v63  ;;  %v3779_v47 = vadd.f32 %v15543_v12, %v13281_v25  ;;  %v3773_v22 = vpop.f32.mrb[55].mxu1  ;;  %v11839_v0 = vmul.f32 -1.442695, %v3744_v6  ;;  %v11844_v25 = vmul.f32 -1.442695, %v3769_v37 }
0x13cd   :  { %3920 = vrot.lane.b32.xlu0 %v3899_v31, %s15605_s11  ;;  %v3774_v30 = vadd.f32 %v15543_v12, %v3773_v22  ;;  %v11842_v31 = vmul.f32 -1.442695, %v3759_v17  ;;  %v11841_v12 = vmul.f32 -1.442695, %v3754_v41 }
0x13ce   :  { %14959 = vtanh.f32 %v3779_v47  ;;  %3918 = vrot.lane.b32.xlu1 %v3898_v59, %s15605_s11  ;;  %v11843_v59 = vmul.f32 -1.442695, %v3764_v14  ;;  %v11846_v37 = vmul.f32 -1.442695, %v3779_v47 }
0x13cf   :  { %14961 = vtanh.f32 %v3774_v30  ;;  %v11845_v14 = vmul.f32 -1.442695, %v3774_v30 }
0x13d0   :  { %14963 = vpow2.f32 %v11840_v9 }
0x13d1   :  { %14965 = vpow2.f32 %v11839_v0 }
0x13d2   :  { %14967 = vpow2.f32 %v11842_v31 }
0x13d3   :  { %14969 = vpow2.f32 %v11841_v12 }
0x13d4   :  { %14971 = vpow2.f32 %v11844_v25 }
0x13d5   :  { %14973 = vpow2.f32 %v11843_v59 }
0x13d8   :  { %v14960_v38 = vpop.eup %14959 }
0x13d9   :  { %v3901_v54 = vmul.f32 %v14960_v38, %v17316_v57  ;;  %v14962_v21 = vpop.eup %14961 }
0x13da   :  { %v3900_v44 = vmul.f32 %v14962_v21, %v17320_v34  ;;  %v14964_v22 = vpop.eup %14963 }
0x13db   :  { %3924 = vrot.lane.b32.xlu0 %v3901_v54, %s15605_s11  ;;  %v14966_v38 = vpop.eup %14965  ;;  %v3807_v54 = vadd.f32 1.0, %v14964_v22 }
0x13dc   :  { %3922 = vrot.lane.b32.xlu1 %v3900_v44, %s15605_s11  ;;  %v14968_v49 = vpop.eup %14967  ;;  %v3806_v52 = vadd.f32 1.0, %v14966_v38 }
0x13dd   :  { %v14970_v21 = vpop.eup %14969  ;;  %14975 = vrcp.f32 %v3807_v54  ;;  %v3809_v44 = vadd.f32 1.0, %v14968_v49 }
0x13de   :  { %14977 = vrcp.f32 %v3806_v52  ;;  %v3808_v33 = vadd.f32 1.0, %v14970_v21  ;;  %v14972_v6 = vpop.eup %14971 }
0x13df   :  { %v14974_v17 = vpop.eup %14973  ;;  %14979 = vrcp.f32 %v3809_v44  ;;  %v3811_v41 = vadd.f32 1.0, %v14972_v6 }
0x13e0   :  { %14981 = vrcp.f32 %v3808_v33  ;;  %v3810_v9 = vadd.f32 1.0, %v14974_v17 }
0x13e1   :  { %14983 = vrcp.f32 %v3811_v41 }
0x13e2   :  { %14985 = vrcp.f32 %v3810_v9 }
0x13e3   :  { %14987 = vpow2.f32 %v11846_v37 }
0x13e4   :  { %14989 = vpow2.f32 %v11845_v14 }
0x13e7   :  { %v14976_v0 = vpop.eup %14975 }
0x13e8   :  { %v14978_v31 = vpop.eup %14977  ;;  %v3871_v12 = vmul.f32 %v14976_v0, %v17294_v4 }
0x13e9   :  { %v14980_v25 = vpop.eup %14979  ;;  %v3870_v52 = vmul.f32 %v14978_v31, %v17292_v55 }
0x13ea   :  { %v14982_v49 = vpop.eup %14981  ;;  %v3879_v59 = vmul.f32 %v3871_v12, %v17253_v5  ;;  %v3873_v22 = vmul.f32 %v14980_v25, %v17298_v19 }
0x13eb   :  { %v3878_v38 = vmul.f32 %v3870_v52, %v17251_v18  ;;  %v3872_v47 = vmul.f32 %v14982_v49, %v17301_v36  ;;  %v14984_v30 = vpop.eup %14983 }
0x13ec   :  { %v14986_v54 = vpop.eup %14985  ;;  %v3881_v21 = vmul.f32 %v3873_v22, %v17263_v13  ;;  %v3887_v44 = vsub.f32 %v17253_v5, %v3879_v59  ;;  %v3875_v19 = vmul.f32 %v14984_v30, %v17308_v8 }
0x13ed   :  { %v14988_v4 = vpop.eup %14987  ;;  %v3880_v33 = vmul.f32 %v3872_v47, %v17261_v42  ;;  %v3886_v55 = vsub.f32 %v17251_v18, %v3878_v38  ;;  %v3874_v36 = vmul.f32 %v14986_v54, %v17310_v63 }
0x13ee   :  { %v14990_v17 = vpop.eup %14989  ;;  %v3813_v14 = vadd.f32 1.0, %v14988_v4  ;;  %v3889_v0 = vsub.f32 %v17263_v13, %v3881_v21  ;;  %v3883_v8 = vmul.f32 %v3875_v19, %v17275_v40 }
0x13ef   :  { %v3812_v31 = vadd.f32 1.0, %v14990_v17  ;;  %v3888_v5 = vsub.f32 %v17261_v42, %v3880_v33  ;;  %v3882_v13 = vmul.f32 %v3874_v36, %v17270_v2 }
0x13f0   :  { %14991 = vrcp.f32 %v3813_v14  ;;  %v3891_v22 = vsub.f32 %v17275_v40, %v3883_v8 }
0x13f1   :  { %14993 = vrcp.f32 %v3812_v31  ;;  %v3890_v47 = vsub.f32 %v17270_v2, %v3882_v13 }
0x13fa   :  { %v14992_v2 = vpop.eup %14991 }
0x13fb   :  { %v14994_v4 = vpop.eup %14993  ;;  %v3877_v33 = vmul.f32 %v14992_v2, %v17316_v57 }
0x1434   :  { %v3913_v6 = vpop.permute.xlu0 %3912 }
0x1435   :  { %v3935_v41 = vadd.f32 %v3913_v6, %v3887_v44  ;;  %v3911_v9 = vpop.permute.xlu1 %3910  ;;  %v3876_v6 = vmul.f32 %v14994_v4, %v17320_v34 }
0x1436   :  { %v3934_v37 = vadd.f32 %v3911_v9, %v3886_v55  ;;  %v3885_v55 = vmul.f32 %v3877_v33, %v17283_v48 }
0x1437   :  { %v3943_v18 = vsel %vm210_vm1, %v3935_v41, %v16908_v3  ;;  %v3884_v17 = vmul.f32 %v3876_v6, %v17281_v45 }
0x1438   :  { %v3917_v12 = vpop.permute.xlu0 %3916  ;;  %v3942_v25 = vsel %vm210_vm1, %v3934_v37, %v16910_v62  ;;  %v3893_v9 = vsub.f32 %v17283_v48, %v3885_v55  ;;  %v15544_v48 = vld [vmem:[%s20712_s3 + $0x2] ss:$0 sm:$0xff] }
0x1439   :  { %v3937_v52 = vadd.f32 %v3917_v12, %v3889_v0  ;;  %v3915_v49 = vpop.permute.xlu1 %3914  ;;  %13298 = vmatprep.mubr.msk.f32.mxu0 %vm80_vm0, %v3942_v25  ;;  %v3892_v19 = vsub.f32 %v17281_v45, %v3884_v17 }
0x143a   :  { %v3936_v63 = vadd.f32 %v3915_v49, %v3888_v5  ;;  %13299 = vmatmul.mubr.msk.f32.vlgmr.msra.gmra.mrb[56].mxu0 %vm80_vm0, %v3943_v18 }
0x143b   :  { %14253 = vmatpush3.bf16.msra.mxu0 %v15665_v10  ;;  %v3945_v59 = vsel %vm210_vm1, %v3937_v52, %v16919_v27 }
0x143c   :  { %v3944_v42 = vsel %vm210_vm1, %v3936_v63, %v16922_v28  ;;  %14255 = vmatprep.subr.bf16.mxu0 %v15667_v11 }
0x143d   :  { %13301 = vmatprep.mubr.msk.f32.mxu0 %vm80_vm0, %v3944_v42 }
0x143e   :  { %13302 = vmatmul.mubr.msk.f32.gmra.mrb[58].mxu0 %vm80_vm0, %v3945_v59 }
0x143f   :  { %v3921_v38 = vpop.permute.xlu0 %3920  ;;  %14257 = vmatpush3.bf16.msra.mxu0 %v15667_v11 }
0x1440   :  { %v3939_v30 = vadd.f32 %v3921_v38, %v3891_v22  ;;  %v3919_v54 = vpop.permute.xlu1 %3918  ;;  %14259 = vmatprep.subr.bf16.mxu0 %v15686_v16 }
0x1441   :  { %v3938_v21 = vadd.f32 %v3919_v54, %v3890_v47 }
0x1442   :  { %v3947_v40 = vsel %vm210_vm1, %v3939_v30, %v16934_v51 }
0x1443   :  { %v3946_v44 = vsel %vm210_vm1, %v3938_v21, %v16936_v39  ;;  %14261 = vmatpush3.bf16.msra.mxu0 %v15686_v16 }
0x1444   :  { %13304 = vmatprep.mubr.msk.f32.mxu0 %vm80_vm0, %v3946_v44  ;;  %14263 = vmatprep.subr.bf16.mxu0 %v15703_v20 }
0x1445   :  { %13305 = vmatmul.mubr.msk.f32.gmra.mrb[60].mxu0 %vm80_vm0, %v3947_v40 }
0x1447   :  { %14265 = vmatpush3.bf16.msra.mxu0 %v15703_v20 }
0x1448   :  { %14291 = vmatprep.subr.bf16.mxu0 %v15938_v50 }
0x144d   :  { %v3925_v41 = vpop.permute.xlu0 %3924 }
0x144e   :  { %v3941_v37 = vadd.f32 %v3925_v41, %v3893_v9  ;;  %v3923_v36 = vpop.permute.xlu1 %3922 }
0x144f   :  { %v3940_v14 = vadd.f32 %v3923_v36, %v3892_v19 }
0x1450   :  { %v3949_v57 = vsel %vm210_vm1, %v3941_v37, %v16958_v15 }
0x1451   :  { %v3948_v0 = vsel %vm210_vm1, %v3940_v14, %v16960_v56 }
0x1452   :  { %13307 = vmatprep.mubr.msk.f32.mxu0 %vm80_vm0, %v3948_v0 }
0x1453   :  { %13308 = vmatmul.mubr.msk.f32.gmra.mrb[62].mxu0 %vm80_vm0, %v3949_v57 }
0x150d   :  { %v13300_v34 = vpop.f32.mrb[56].mxu0 }
0x150e   :  { %v17383_v31 = vadd.f32 %v15544_v48, %v13300_v34  ;;  %v4040_v45 = vpop.f32.mrb[57].mxu0 }
0x150f   :  { %v17385_v12 = vadd.f32 %v15544_v48, %v4040_v45 }
0x1510   :  { %4137 = vrot.lane.b32.xlu0 %v17383_v31, %s15607_s14  ;;  %v11856_v47 = vmul.f32 -1.442695, %v17383_v31 }
0x1511   :  { %4135 = vrot.lane.b32.xlu1 %v17385_v12, %s15607_s14  ;;  %v13303_v5 = vpop.f32.mrb[58].mxu0  ;;  %v11855_v30 = vmul.f32 -1.442695, %v17385_v12 }
0x1512   :  { %v17391_v25 = vadd.f32 %v15544_v48, %v13303_v5  ;;  %v4050_v18 = vpop.f32.mrb[59].mxu0  ;;  %14995 = vpow2.f32 %v11856_v47 }
0x1513   :  { %v17393_v52 = vadd.f32 %v15544_v48, %v4050_v18  ;;  %14997 = vpow2.f32 %v11855_v30 }
0x1514   :  { %4141 = vrot.lane.b32.xlu0 %v17391_v25, %s15607_s14  ;;  %v11858_v54 = vmul.f32 -1.442695, %v17391_v25 }
0x1515   :  { %4139 = vrot.lane.b32.xlu1 %v17393_v52, %s15607_s14  ;;  %v11857_v21 = vmul.f32 -1.442695, %v17393_v52 }
0x1516   :  { %14999 = vpow2.f32 %v11858_v54 }
0x1517   :  { %15001 = vpow2.f32 %v11857_v21 }
0x1518   :  { %v13306_v49 = vpop.f32.mrb[60].mxu0 }
0x1519   :  { %v17399_v8 = vadd.f32 %v15544_v48, %v13306_v49  ;;  %v4060_v63 = vpop.f32.mrb[61].mxu0 }
0x151a   :  { %v17401_v13 = vadd.f32 %v15544_v48, %v4060_v63 }
0x151b   :  { %4145 = vrot.lane.b32.xlu0 %v17399_v8, %s15607_s14  ;;  %v11860_v44 = vmul.f32 -1.442695, %v17399_v8 }
0x151c   :  { %4143 = vrot.lane.b32.xlu1 %v17401_v13, %s15607_s14  ;;  %v11859_v40 = vmul.f32 -1.442695, %v17401_v13  ;;  %v14996_v2 = vpop.eup %14995 }
0x151d   :  { %15003 = vpow2.f32 %v11860_v44  ;;  %v14998_v4 = vpop.eup %14997  ;;  %v4104_v33 = vadd.f32 1.0, %v14996_v2 }
0x151e   :  { %15005 = vpow2.f32 %v11859_v40  ;;  %v4103_v55 = vadd.f32 1.0, %v14998_v4 }
0x151f   :  { %15007 = vrcp.f32 %v4104_v33 }
0x1520   :  { %v15000_v6 = vpop.eup %14999  ;;  %15009 = vrcp.f32 %v4103_v55 }
0x1521   :  { %v15002_v17 = vpop.eup %15001  ;;  %v4106_v41 = vadd.f32 1.0, %v15000_v6 }
0x1522   :  { %v4105_v9 = vadd.f32 1.0, %v15002_v17 }
0x1523   :  { %15011 = vrcp.f32 %v4106_v41 }
0x1524   :  { %15013 = vrcp.f32 %v4105_v9 }
0x1526   :  { %v13309_v42 = vpop.f32.mrb[62].mxu0 }
0x1527   :  { %v17407_v59 = vadd.f32 %v15544_v48, %v13309_v42  ;;  %v4070_v22 = vpop.f32.mrb[63].mxu0  ;;  %v15004_v19 = vpop.eup %15003 }
0x1528   :  { %v17409_v38 = vadd.f32 %v15544_v48, %v4070_v22  ;;  %v15006_v37 = vpop.eup %15005  ;;  %v4108_v36 = vadd.f32 1.0, %v15004_v19 }
0x1529   :  { %4149 = vrot.lane.b32.xlu0 %v17407_v59, %s15607_s14  ;;  %v4107_v14 = vadd.f32 1.0, %v15006_v37  ;;  %v11862_v0 = vmul.f32 -1.442695, %v17407_v59  ;;  %v17423_v34 = vpop.eup %15007 }
0x152a   :  { %4147 = vrot.lane.b32.xlu1 %v17409_v38, %s15607_s14  ;;  %v11861_v57 = vmul.f32 -1.442695, %v17409_v38  ;;  %15015 = vrcp.f32 %v4108_v36  ;;  %v17425_v45 = vpop.eup %15009 }
0x152b   :  { %15017 = vrcp.f32 %v4107_v14 }
0x152c   :  { %15019 = vpow2.f32 %v11862_v0 }
0x152d   :  { %15021 = vpow2.f32 %v11861_v57  ;;  %v17430_v63 = vpop.eup %15011  ;;  %v15545_v57 = vld [vmem:[%s20711_s1 + $0x88] sm:$0xff] }
0x152e   :  { %v17433_v22 = vpop.eup %15013 }
0x1534   :  { %v17439_v21 = vpop.eup %15015 }
0x1535   :  { %v17441_v44 = vpop.eup %15017 }
0x1536   :  { %v15020_v2 = vpop.eup %15019 }
0x1537   :  { %v15022_v6 = vpop.eup %15021  ;;  %v4110_v17 = vadd.f32 1.0, %v15020_v2  ;;  %v20883_v2 = vsub.f32 1.0, %v17099_v53 }
0x1538   :  { %v4109_v41 = vadd.f32 1.0, %v15022_v6 }
0x1539   :  { %15023 = vrcp.f32 %v4110_v17 }
0x153a   :  { %15025 = vrcp.f32 %v4109_v41 }
0x1543   :  { %v17447_v9 = vpop.eup %15023 }
0x1544   :  { %v17449_v37 = vpop.eup %15025 }
0x1582   :  { %v4138_v48 = vpop.permute.xlu0 %4137 }
0x1583   :  { %v4160_v5 = vmul.f32 %v17423_v34, %v4138_v48  ;;  %v4136_v18 = vpop.permute.xlu1 %4135  ;;  %v15546_v48 = vld [vmem:[%s20711_s1 + $0x80] sm:$0xff] }
0x1584   :  { %v4159_v49 = vmul.f32 %v17425_v45, %v4136_v18  ;;  %v20877_v18 = vsub.f32 1.0, %v17075_v1  ;;  %v20881_v1 = vsub.f32 1.0, %v17087_v46  ;;  %v15552_v46 = vld [vmem:[%s20711_s1 + $0xb8] sm:$0xff] }
0x1585   :  { %4177 = vrot.lane.b32.xlu0 %v4160_v5, %s15609_s15  ;;  %v15547_v5 = vld [vmem:[%s20711_s1 + $0x90] sm:$0xff] }
0x1586   :  { %4175 = vrot.lane.b32.xlu1 %v4159_v49, %s15609_s15  ;;  %v4142_v42 = vpop.permute.xlu0 %4141  ;;  %v20878_v49 = vsub.f32 1.0, %v17081_v58  ;;  %v15551_v58 = vld [vmem:[%s20711_s1 + $0xa8] sm:$0xff] }
0x1587   :  { %v4162_v47 = vmul.f32 %v17430_v63, %v4142_v42  ;;  %v4140_v30 = vpop.permute.xlu1 %4139  ;;  %v20879_v42 = vsub.f32 1.0, %v17042_v60  ;;  %v15550_v60 = vld [vmem:[%s20711_s1 + $0xb0] sm:$0xff] }
0x1588   :  { %v4161_v54 = vmul.f32 %v17433_v22, %v4140_v30  ;;  %v15549_v30 = vld [vmem:[%s20711_s1 + $0x98] sm:$0xff] }
0x1589   :  { %4181 = vrot.lane.b32.xlu0 %v4162_v47, %s15609_s15  ;;  %v15548_v47 = vld [vmem:[%s20711_s1 + $0xa0] sm:$0xff] }
0x158a   :  { %4179 = vrot.lane.b32.xlu1 %v4161_v54, %s15609_s15  ;;  %v20880_v54 = vsub.f32 1.0, %v17092_v43  ;;  %v20884_v43 = vsub.f32 1.0, %v17111_v7 }
0x158d   :  { %v4146_v40 = vpop.permute.xlu0 %4145 }
0x158e   :  { %v4164_v4 = vmul.f32 %v17439_v21, %v4146_v40  ;;  %v4144_v33 = vpop.permute.xlu1 %4143  ;;  %v20882_v40 = vsub.f32 1.0, %v17104_v23 }
0x158f   :  { %v4163_v55 = vmul.f32 %v17441_v44, %v4144_v33 }
0x1590   :  { %4185 = vrot.lane.b32.xlu0 %v4164_v4, %s15609_s15 }
0x1591   :  { %4183 = vrot.lane.b32.xlu1 %v4163_v55, %s15609_s15 }
0x159b   :  { %v4150_v19 = vpop.permute.xlu0 %4149 }
0x159c   :  { %v4166_v36 = vmul.f32 %v17447_v9, %v4150_v19  ;;  %v4148_v14 = vpop.permute.xlu1 %4147 }
0x159d   :  { %v4165_v0 = vmul.f32 %v17449_v37, %v4148_v14 }
0x159e   :  { %4189 = vrot.lane.b32.xlu0 %v4166_v36, %s15609_s15 }
0x159f   :  { %4187 = vrot.lane.b32.xlu1 %v4165_v0, %s15609_s15 }
0x15a2   :  { %4284 = vperm.xlu0 %14690, %v15545_v57  }
0x15a3   :  { %4280 = vperm.xlu1 %14689, %v15546_v48  }
0x15a6   :  { %4288 = vperm.xlu0 %14690, %v15547_v5  }
0x15a7   :  { %4320 = vperm.xlu1 %14689, %v20877_v18  }
0x15aa   :  { %4328 = vperm.xlu0 %14690, %v20878_v49  }
0x15ab   :  { %4324 = vperm.xlu1 %14689, %v20879_v42  }
0x15ae   :  { %4296 = vperm.xlu0 %14690, %v15548_v47  }
0x15af   :  { %4292 = vperm.xlu1 %14689, %v15549_v30  }
0x15b2   :  { %4336 = vperm.xlu0 %14690, %v20880_v54  }
0x15b3   :  { %4332 = vperm.xlu1 %14689, %v20881_v1  }
0x15b6   :  { %4304 = vperm.xlu0 %14690, %v15550_v60  }
0x15b7   :  { %4300 = vperm.xlu1 %14689, %v15551_v58  }
0x15ba   :  { %4344 = vperm.xlu0 %14690, %v20882_v40  }
0x15bb   :  { %4340 = vperm.xlu1 %14689, %v20883_v2  }
0x15be   :  { %14691 = vset.pattern.permute.xlu0 %v20853_v61 }
0x15bf   :  { %4308 = vperm.xlu1 %14689, %v15552_v46  }
0x15c3   :  { %4348 = vperm.xlu1 %14689, %v20884_v43  }
0x15c7   :  { %14692 = vset.pattern.permute.xlu1 %v20853_v61 }
0x15f7   :  { %v4178_v4 = vpop.permute.xlu0 %4177 }
0x15f8   :  { %v4200_v33 = vadd.f32 %v4178_v4, %v17383_v31  ;;  %v4176_v23 = vpop.permute.xlu1 %4175 }
0x15f9   :  { %v4199_v6 = vadd.f32 %v4176_v23, %v17385_v12 }
0x15fa   :  { %15027 = vtanh.f32 %v4200_v33 }
0x15fb   :  { %15029 = vtanh.f32 %v4199_v6  ;;  %v4182_v53 = vpop.permute.xlu0 %4181  ;;  %v4216_v6 = vsub.f32 1.0, %v17423_v34 }
0x15fc   :  { %v4202_v55 = vadd.f32 %v4182_v53, %v17391_v25  ;;  %v4180_v17 = vpop.permute.xlu1 %4179 }
0x15fd   :  { %v4201_v41 = vadd.f32 %v4180_v17, %v17393_v52  ;;  %v4264_v17 = vmul.f32 %v17423_v34, %v16908_v3 }
0x15fe   :  { %15031 = vtanh.f32 %v4202_v55  ;;  %v4215_v55 = vsub.f32 1.0, %v17425_v45 }
0x15ff   :  { %15033 = vtanh.f32 %v4201_v41 }
0x1602   :  { %v4186_v7 = vpop.permute.xlu0 %4185 }
0x1603   :  { %v4204_v19 = vadd.f32 %v4186_v7, %v17399_v8  ;;  %v4184_v36 = vpop.permute.xlu1 %4183 }
0x1604   :  { %v15028_v14 = vpop.eup %15027  ;;  %v4203_v31 = vadd.f32 %v4184_v36, %v17401_v13 }
0x1605   :  { %v15030_v0 = vpop.eup %15029  ;;  %15035 = vtanh.f32 %v4204_v19  ;;  %4233 = vrot.lane.b32.xlu1 %v15028_v14, %s15605_s11  ;;  %v4263_v19 = vmul.f32 %v17425_v45, %v16910_v62  ;;  %v4265_v45 = vmul.f32 %v17433_v22, %v16922_v28 }
0x1606   :  { %15037 = vtanh.f32 %v4203_v31  ;;  %4231 = vrot.lane.b32.xlu0 %v15030_v0, %s15605_s11  ;;  %v4218_v31 = vsub.f32 1.0, %v17430_v63 }
0x1608   :  { %v15032_v12 = vpop.eup %15031 }
0x1609   :  { %v15034_v25 = vpop.eup %15033  ;;  %4237 = vrot.lane.b32.xlu1 %v15032_v12, %s15605_s11 }
0x160a   :  { %4235 = vrot.lane.b32.xlu0 %v15034_v25, %s15605_s11  ;;  %v4217_v25 = vsub.f32 1.0, %v17433_v22  ;;  %v4220_v22 = vsub.f32 1.0, %v17439_v21 }
0x160f   :  { %v15036_v52 = vpop.eup %15035 }
0x1610   :  { %v15038_v57 = vpop.eup %15037  ;;  %4241 = vrot.lane.b32.xlu1 %v15036_v52, %s15605_s11  ;;  %v4190_v8 = vpop.permute.xlu0 %4189 }
0x1611   :  { %4239 = vrot.lane.b32.xlu0 %v15038_v57, %s15605_s11  ;;  %v4206_v13 = vadd.f32 %v4190_v8, %v17407_v59  ;;  %v4188_v48 = vpop.permute.xlu1 %4187  ;;  %v4266_v8 = vmul.f32 %v17430_v63, %v16919_v27 }
0x1612   :  { %v4205_v5 = vadd.f32 %v4188_v48, %v17409_v38 }
0x1613   :  { %15039 = vtanh.f32 %v4206_v13 }
0x1614   :  { %15041 = vtanh.f32 %v4205_v5 }
0x161d   :  { %v15040_v18 = vpop.eup %15039 }
0x161e   :  { %v15042_v49 = vpop.eup %15041  ;;  %4245 = vrot.lane.b32.xlu1 %v15040_v18, %s15605_s11 }
0x161f   :  { %4243 = vrot.lane.b32.xlu0 %v15042_v49, %s15605_s11 }
0x1621   :  { %v4285_v54 = vpop.permute.xlu0 %4284 }
0x1622   :  { %v4281_v42 = vpop.permute.xlu1 %4280 }
0x1625   :  { %v4289_v60 = vpop.permute.xlu0 %4288 }
0x1626   :  { %v4321_v47 = vpop.permute.xlu1 %4320 }
0x1627   :  { %v4351_v48 = vmul.f32 %v4321_v47, %v16910_v62 }
0x1629   :  { %v4329_v40 = vpop.permute.xlu0 %4328 }
0x162a   :  { %v4325_v30 = vpop.permute.xlu1 %4324  ;;  %v4353_v63 = vmul.f32 %v4329_v40, %v16922_v28  ;;  %v4267_v28 = vmul.f32 %v17441_v44, %v16936_v39 }
0x162b   :  { %v4352_v52 = vmul.f32 %v4325_v30, %v16908_v3 }
0x162d   :  { %v4297_v2 = vpop.permute.xlu0 %4296 }
0x162e   :  { %v4293_v1 = vpop.permute.xlu1 %4292 }
0x1631   :  { %v4337_v38 = vpop.permute.xlu0 %4336 }
0x1632   :  { %v4333_v58 = vpop.permute.xlu1 %4332 }
0x1633   :  { %v4354_v3 = vmul.f32 %v4333_v58, %v16919_v27  ;;  %v4268_v27 = vmul.f32 %v17439_v21, %v16934_v51 }
0x1635   :  { %v17515_v4 = vpop.permute.xlu0 %4304 }
0x1636   :  { %v4301_v59 = vpop.permute.xlu1 %4300 }
0x1639   :  { %v17519_v23 = vpop.permute.xlu0 %4344 }
0x163a   :  { %v4341_v46 = vpop.permute.xlu1 %4340 }
0x163e   :  { %v17513_v43 = vpop.permute.xlu1 %4308 }
0x1642   :  { %v17517_v33 = vpop.permute.xlu1 %4348 }
0x1677   :  { %v4234_v53 = vpop.permute.xlu1 %4233 }
0x1678   :  { %v4256_v41 = vmul.f32 %v4234_v53, %v4216_v6  ;;  %v4232_v7 = vpop.permute.xlu0 %4231 }
0x1679   :  { %v4255_v36 = vmul.f32 %v4232_v7, %v4215_v55  ;;  %v4356_v7 = vmul.f32 %v4341_v46, %v16934_v51  ;;  %v11871_v51 = vld [vmem:[%s20709_s0 + $0xc0] sm:$0xff]  ;;  %v4269_v46 = vmul.f32 %v17449_v37, %v16960_v56 }
0x167a   :  { %v4272_v14 = vadd.f32 %v4264_v17, %v4256_v41  ;;  %13326 = vmatprep.mubr.msk.f32.mxu1 %vm80_vm0, %v11871_v51 }
0x167b   :  { %v4271_v0 = vadd.f32 %v4263_v19, %v4255_v36  ;;  %v4238_v12 = vpop.permute.xlu1 %4237  ;;  %v4355_v36 = vmul.f32 %v4337_v38, %v16936_v39  ;;  %v4270_v39 = vmul.f32 %v17447_v9, %v16958_v15 }
0x167c   :  { %v4312_v57 = vmul.f32 %v4285_v54, %v4272_v14  ;;  %v4258_v34 = vmul.f32 %v4238_v12, %v4218_v31  ;;  %v4236_v13 = vpop.permute.xlu0 %4235  ;;  %v4219_v54 = vsub.f32 1.0, %v17441_v44  ;;  %v4222_v44 = vsub.f32 1.0, %v17447_v9 }
0x167d   :  { %v4311_v5 = vmul.f32 %v4281_v42, %v4271_v0  ;;  %v4257_v18 = vmul.f32 %v4236_v13, %v4217_v25  ;;  %v4221_v12 = vsub.f32 1.0, %v17449_v37 }
0x167e   :  { %v17535_v49 = vadd.f32 %v4352_v52, %v4312_v57  ;;  %v4274_v6 = vadd.f32 %v4266_v8, %v4258_v34  ;;  %v4358_v57 = vmul.f32 %v17517_v33, %v16958_v15  ;;  %v4357_v34 = vmul.f32 %v17519_v23, %v16960_v56 }
0x167f   :  { %v17537_v53 = vadd.f32 %v4351_v48, %v4311_v5  ;;  %v4273_v55 = vadd.f32 %v4265_v45, %v4257_v18 }
0x1680   :  { %v4314_v30 = vmul.f32 %v4293_v1, %v4274_v6  ;;  %4377 = vrot.lane.b32.xlu1 %v17535_v49, %s15605_s11 }
0x1681   :  { %v4313_v62 = vmul.f32 %v4289_v60, %v4273_v55  ;;  %4375 = vrot.lane.b32.xlu0 %v17537_v53, %s15605_s11 }
0x1682   :  { %v17546_v42 = vadd.f32 %v4354_v3, %v4314_v30  ;;  %v4242_v47 = vpop.permute.xlu1 %4241  ;;  %v11872_v3 = vld [vmem:[%s20709_s0 + $0xc8] sm:$0xff]  ;;  %v11873_v30 = vld [vmem:[%s20709_s0 + $0xd0] sm:$0xff] }
0x1683   :  { %v17549_v17 = vadd.f32 %v4353_v63, %v4313_v62  ;;  %v4260_v1 = vmul.f32 %v4242_v47, %v4220_v22  ;;  %v4240_v58 = vpop.permute.xlu0 %4239  ;;  %v11874_v63 = vld [vmem:[%s20709_s0 + $0xd8] sm:$0xff]  ;;  %v11875_v62 = vld [vmem:[%s20709_s0 + $0xe0] sm:$0xff]  ;;  %v11876_v22 = vld [vmem:[%s20709_s0 + $0xe8] sm:$0xff] }
0x1684   :  { %v4259_v60 = vmul.f32 %v4240_v58, %v4219_v54  ;;  %4381 = vrot.lane.b32.xlu1 %v17546_v42, %s15605_s11  ;;  %v11877_v47 = vld [vmem:[%s20709_s0 + $0xf0] sm:$0xff]  ;;  %v11878_v54 = vld [vmem:[%s20709_s0 + $0xf8] sm:$0xff]  ;;  %v17669_v58 = vld [vmem:[%s20711_s1 + $0xc8] sm:$0xff] }
0x1685   :  { %v4276_v40 = vadd.f32 %v4268_v27, %v4260_v1  ;;  %4379 = vrot.lane.b32.xlu0 %v17549_v17, %s15605_s11  ;;  %v20885_v27 = vld [vmem:[#allocation2_spill] sm:$0xff]  ;;  %v20886_v1 = vld [vmem:[#allocation4_spill] sm:$0xff] }
0x1686   :  { %v4275_v41 = vadd.f32 %v4267_v28, %v4259_v60 }
0x1687   :  { %v4316_v19 = vmul.f32 %v4301_v59, %v4276_v40 }
0x1688   :  { %v4315_v21 = vmul.f32 %v4297_v2, %v4275_v41 }
0x1689   :  { %v17561_v14 = vadd.f32 %v4356_v7, %v4316_v19 }
0x168a   :  { %v17563_v31 = vadd.f32 %v4355_v36, %v4315_v21  ;;  %v20887_v21 = vld [vmem:[#allocation3_spill] sm:$0xff] }
0x168b   :  { %4385 = vrot.lane.b32.xlu1 %v17561_v14, %s15605_s11 }
0x168c   :  { %4383 = vrot.lane.b32.xlu0 %v17563_v31, %s15605_s11 }
0x1690   :  { %v4246_v0 = vpop.permute.xlu1 %4245 }
0x1691   :  { %v4262_v59 = vmul.f32 %v4246_v0, %v4222_v44  ;;  %v4244_v2 = vpop.permute.xlu0 %4243 }
0x1692   :  { %v4261_v38 = vmul.f32 %v4244_v2, %v4221_v12 }
0x1693   :  { %v4278_v25 = vadd.f32 %v4270_v39, %v4262_v59 }
0x1694   :  { %v4277_v52 = vadd.f32 %v4269_v46, %v4261_v38 }
0x1695   :  { %v4318_v8 = vmul.f32 %v17513_v43, %v4278_v25  ;;  %v17702_v25 = vld [vmem:[%s20711_s1 + $0xc0] sm:$0xff] }
0x1696   :  { %v4317_v9 = vmul.f32 %v17515_v4, %v4277_v52  ;;  %v17708_v52 = vld [vmem:[%s20711_s1 + $0xd8] sm:$0xff] }
0x1697   :  { %v17585_v13 = vadd.f32 %v4358_v57, %v4318_v8  ;;  %v17713_v57 = vld [vmem:[%s20711_s1 + $0xd0] sm:$0xff]  ;;  %v17720_v8 = vld [vmem:[%s20711_s1 + $0xe8] sm:$0xff] }
0x1698   :  { %v17587_v48 = vadd.f32 %v4357_v34, %v4317_v9  ;;  %v17725_v34 = vld [vmem:[%s20711_s1 + $0xe0] sm:$0xff]  ;;  %v17732_v9 = vld [vmem:[%s20711_s1 + $0xf8] sm:$0xff] }
0x1699   :  { %4389 = vrot.lane.b32.xlu1 %v17585_v13, %s15605_s11 }
0x169a   :  { %4387 = vrot.lane.b32.xlu0 %v17587_v48, %s15605_s11 }
0x169d   :  { %4938 = vperm.xlu1 %14692, %v17669_v58  }
0x169e   :  { %4934 = vperm.xlu0 %14691, %v17702_v25  }
0x16a1   :  { %4942 = vperm.xlu1 %14692, %v17713_v57  }
0x16a2   :  { %4946 = vperm.xlu0 %14691, %v17708_v52  }
0x16a5   :  { %4950 = vperm.xlu1 %14692, %v17725_v34  }
0x16a6   :  { %4954 = vperm.xlu0 %14691, %v17720_v8  }
0x16aa   :  { %4962 = vperm.xlu0 %14691, %v17732_v9  }
0x16f2   :  { %v4378_v37 = vpop.permute.xlu1 %4377 }
0x16f3   :  { %11864 = vst.msk [vmem:[%s20713_s4 + $0x88] sm:$0xff] %vm210_vm1, %v4378_v37  ;;  %v4376_v15 = vpop.permute.xlu0 %4375 }
0x16f4   :  { %11863 = vst.msk [vmem:[%s20713_s4 + $0x80] sm:$0xff] %vm210_vm1, %v4376_v15  ;;  %v14234_v56 = vpack.c.bf16 %v4378_v37, %v4376_v15  ;;  %v17737_v37 = vld [vmem:[%s20711_s1 + $0xf0] sm:$0xff]  ;;  %v20888_v15 = vmov 96  }
0x16f5   :  { %4958 = vperm.xlu1 %14692, %v17737_v37   ;;  %14694 = vset.pattern.permute.xlu0 %v20888_v15 }
0x16f6   :  { %v4382_v43 = vpop.permute.xlu1 %4381  ;;  %14235 = vmatprep.subr.bf16.mxu1 %v14234_v56  ;;  %4898 = vperm.xlu0 %14694, %v17669_v58  }
0x16f7   :  { %11866 = vst.msk [vmem:[%s20713_s4 + $0x98] sm:$0xff] %vm210_vm1, %v4382_v43  ;;  %14237 = vmatpush3.bf16.msra.mxu1 %v14234_v56  ;;  %v4380_v4 = vpop.permute.xlu0 %4379  ;;  %v20778_v56 = vsub.f32 1.0, %v17702_v25 }
0x16f8   :  { %11865 = vst.msk [vmem:[%s20713_s4 + $0x90] sm:$0xff] %vm210_vm1, %v4380_v4  ;;  %v14238_v33 = vpack.c.bf16 %v4382_v43, %v4380_v4  ;;  %v20889_v43 = vmov 98   ;;  %v20777_v4 = vsub.f32 1.0, %v17669_v58 }
0x16f9   :  { %14693 = vset.pattern.permute.xlu1 %v20888_v15 }
0x16fa   :  { %14239 = vmatprep.subr.bf16.mxu1 %v14238_v33  ;;  %4894 = vperm.xlu1 %14693, %v17702_v25  }
0x16fb   :  { %14241 = vmatpush3.bf16.msra.mxu1 %v14238_v33  ;;  %4906 = vperm.xlu0 %14694, %v17708_v52   ;;  %v20776_v33 = vsub.f32 1.0, %v17713_v57 }
0x16fd   :  { %v4386_v23 = vpop.permute.xlu1 %4385 }
0x16fe   :  { %11868 = vst.msk [vmem:[%s20713_s4 + $0xa8] sm:$0xff] %vm210_vm1, %v4386_v23  ;;  %v4384_v5 = vpop.permute.xlu0 %4383  ;;  %4902 = vperm.xlu1 %14693, %v17713_v57  }
0x16ff   :  { %11867 = vst.msk [vmem:[%s20713_s4 + $0xa0] sm:$0xff] %vm210_vm1, %v4384_v5  ;;  %v14242_v45 = vpack.c.bf16 %v4386_v23, %v4384_v5  ;;  %4910 = vperm.xlu0 %14694, %v17725_v34   ;;  %v20775_v23 = vsub.f32 1.0, %v17708_v52  ;;  %v20774_v5 = vsub.f32 1.0, %v17725_v34 }
0x1701   :  { %14243 = vmatprep.subr.bf16.mxu1 %v14242_v45 }
0x1702   :  { %14245 = vmatpush3.bf16.msra.mxu1 %v14242_v45  ;;  %14695 = vset.pattern.permute.xlu1 %v20889_v43  ;;  %v20773_v45 = vsub.f32 1.0, %v17720_v8 }
0x1703   :  { %5015 = vperm.xlu1 %14695, %v20778_v56   ;;  %4914 = vperm.xlu0 %14694, %v17720_v8  }
0x1707   :  { %5020 = vperm.xlu1 %14695, %v20777_v4   ;;  %14696 = vset.pattern.permute.xlu0 %v20889_v43 }
0x1708   :  { %5030 = vperm.xlu0 %14696, %v20775_v23  }
0x170b   :  { %v4390_v18 = vpop.permute.xlu1 %4389  ;;  %5025 = vperm.xlu1 %14695, %v20776_v33  }
0x170c   :  { %11870 = vst.msk [vmem:[%s20713_s4 + $0xb8] sm:$0xff] %vm210_vm1, %v4390_v18  ;;  %v4388_v6 = vpop.permute.xlu0 %4387  ;;  %5035 = vperm.xlu0 %14696, %v20774_v5  }
0x170d   :  { %11869 = vst.msk [vmem:[%s20713_s4 + $0xb0] sm:$0xff] %vm210_vm1, %v4388_v6  ;;  %v14246_v55 = vpack.c.bf16 %v4390_v18, %v4388_v6 }
0x170f   :  { %14247 = vmatprep.subr.bf16.mxu1 %v14246_v55  ;;  %14697 = vset.pattern.permute.xlu1 %v20888_v15 }
0x1710   :  { %14249 = vmatpush3.bf16.msra.mxu1 %v14246_v55  ;;  %4918 = vperm.xlu1 %14697, %v17737_v37  }
0x1711   :  { %14267 = vmatprep.subr.bf16.mxu1 %v15716_v24 }
0x1713   :  { %13327 = vmatmul.mubr.msk.f32.vlgmr.msra.gmra.mrb[56].mxu1 %vm80_vm0, %v11872_v3 }
0x1714   :  { %13329 = vmatprep.mubr.msk.f32.mxu1 %vm80_vm0, %v11873_v30  ;;  %14269 = vmatpush3.bf16.msra.mxu1 %v15716_v24 }
0x1715   :  { %14271 = vmatprep.subr.bf16.mxu1 %v15721_v26  ;;  %4922 = vperm.xlu1 %14697, %v17732_v9  }
0x1717   :  { %13330 = vmatmul.mubr.msk.f32.gmra.mrb[58].mxu1 %vm80_vm0, %v11874_v63 }
0x1718   :  { %13332 = vmatprep.mubr.msk.f32.mxu1 %vm80_vm0, %v11875_v62  ;;  %14273 = vmatpush3.bf16.msra.mxu1 %v15721_v26 }
0x1719   :  { %14275 = vmatprep.subr.bf16.mxu1 %v15732_v29  ;;  %14698 = vset.pattern.permute.xlu1 %v20889_v43 }
0x171a   :  { %5040 = vperm.xlu1 %14698, %v20773_v45  }
0x171b   :  { %13333 = vmatmul.mubr.msk.f32.gmra.mrb[60].mxu1 %vm80_vm0, %v11876_v22 }
0x171c   :  { %13335 = vmatprep.mubr.msk.f32.mxu1 %vm80_vm0, %v11877_v47  ;;  %14277 = vmatpush3.bf16.msra.mxu1 %v15732_v29 }
0x171d   :  { %14279 = vmatprep.subr.bf16.mxu1 %v15742_v32 }
0x171f   :  { %13336 = vmatmul.mubr.msk.f32.gmra.mrb[62].mxu1 %vm80_vm0, %v11878_v54 }
0x1720   :  { %14281 = vmatpush3.bf16.msra.mxu1 %v15742_v32 }
0x1721   :  { %14283 = vmatprep.subr.bf16.mxu1 %v15752_v35 }
0x1724   :  { %14285 = vmatpush3.bf16.msra.mxu1 %v15752_v35 }
0x1725   :  { %14287 = vmatprep.subr.bf16.mxu1 %v20885_v27 }
0x1728   :  { %14289 = vmatpush3.bf16.msra.mxu1 %v20885_v27 }
0x1729   :  { %14299 = vmatprep.subr.bf16.mxu1 %v20886_v1 }
0x17e6   :  { %v13328_v28 = vpop.f32.mrb[56].mxu1 }
0x17e7   :  { %v4516_v60 = vpop.f32.mrb[57].mxu1  ;;  %v4556_v41 = vsel %vm210_vm1, %v13328_v28, %v17535_v49 }
0x17e8   :  { %v4555_v40 = vsel %vm210_vm1, %v4516_v60, %v17537_v53 }
0x17e9   :  { %13354 = vmatprep.mubr.msk.f32.mxu0 %vm80_vm0, %v4555_v40 }
0x17ea   :  { %v13331_v7 = vpop.f32.mrb[58].mxu1  ;;  %13355 = vmatmul.mubr.msk.f32.vlgmr.msra.gmra.mrb[64].mxu0 %vm80_vm0, %v4556_v41 }
0x17eb   :  { %v4526_v19 = vpop.f32.mrb[59].mxu1  ;;  %14293 = vmatpush3.bf16.msra.mxu0 %v15938_v50  ;;  %v4558_v44 = vsel %vm210_vm1, %v13331_v7, %v17546_v42 }
0x17ec   :  { %v4557_v36 = vsel %vm210_vm1, %v4526_v19, %v17549_v17  ;;  %14295 = vmatprep.subr.bf16.mxu0 %v20887_v21  ;;  %v20890_v19 = vld [vmem:[#allocation5_spill] sm:$0xff] }
0x17ed   :  { %13357 = vmatprep.mubr.msk.f32.mxu0 %vm80_vm0, %v4557_v36 }
0x17ee   :  { %v13334_v0 = vpop.f32.mrb[60].mxu1  ;;  %13358 = vmatmul.mubr.msk.f32.gmra.mrb[66].mxu0 %vm80_vm0, %v4558_v44 }
0x17ef   :  { %v4536_v12 = vpop.f32.mrb[61].mxu1  ;;  %14297 = vmatpush3.bf16.msra.mxu0 %v20887_v21  ;;  %v4560_v39 = vsel %vm210_vm1, %v13334_v0, %v17561_v14 }
0x17f0   :  { %v4559_v51 = vsel %vm210_vm1, %v4536_v12, %v17563_v31 }
0x17f1   :  { %13360 = vmatprep.mubr.msk.f32.mxu0 %vm80_vm0, %v4559_v51 }
0x17f2   :  { %v13337_v59 = vpop.f32.mrb[62].mxu1  ;;  %13361 = vmatmul.mubr.msk.f32.gmra.mrb[68].mxu0 %vm80_vm0, %v4560_v39 }
0x17f3   :  { %v4546_v2 = vpop.f32.mrb[63].mxu1  ;;  %v4562_v38 = vsel %vm210_vm1, %v13337_v59, %v17585_v13  ;;  %v20891_v59 = vld [vmem:[#allocation6_spill] sm:$0xff] }
0x17f4   :  { %v4561_v46 = vsel %vm210_vm1, %v4546_v2, %v17587_v48 }
0x17f5   :  { %13363 = vmatprep.mubr.msk.f32.mxu0 %vm80_vm0, %v4561_v46 }
0x17f6   :  { %13364 = vmatmul.mubr.msk.f32.gmra.mrb[70].mxu0 %vm80_vm0, %v4562_v38 }
0x18bd   :  { %v13356_v18 = vpop.f32.mrb[64].mxu0 }
0x18be   :  { %v4659_v6 = vadd.f32 %v13356_v18, %v17669_v58  ;;  %v4653_v55 = vpop.f32.mrb[65].mxu0  ;;  %v20892_v18 = vld [vmem:[#allocation7_spill] sm:$0xff] }
0x18bf   :  { %v4654_v3 = vadd.f32 %v17702_v25, %v4653_v55  ;;  %v4939_v55 = vpop.permute.xlu1 %4938 }
0x18c0   :  { %v4693_v62 = vmax.f32 %v4659_v6, 0.0 }
0x18c1   :  { %v4692_v30 = vmax.f32 %v4654_v3, 0.0  ;;  %v13359_v63 = vpop.f32.mrb[66].mxu0  ;;  %v15553_v3 = vld [vmem:[%s20712_s3] ss:$0 sm:$0xff] }
0x18c2   :  { %v4669_v22 = vadd.f32 %v13359_v63, %v17708_v52  ;;  %v4663_v47 = vpop.f32.mrb[67].mxu0 }
0x18c3   :  { %v4664_v54 = vadd.f32 %v17713_v57, %v4663_v47  ;;  %13390 = vmatprep.mubr.msk.f32.mxu1 %vm356_vm2, %v4692_v30 }
0x18c4   :  { %13391 = vmatmul.mubr.msk.f32.vlgmr.msra.gmra.mrb[64].mxu1 %vm356_vm2, %v4693_v62  ;;  %v4695_v40 = vmax.f32 %v4669_v22, 0.0  ;;  %v4935_v62 = vpop.permute.xlu0 %4934 }
0x18c5   :  { %v4694_v28 = vmax.f32 %v4664_v54, 0.0  ;;  %v13362_v60 = vpop.f32.mrb[68].mxu0  ;;  %14301 = vmatpush3.bf16.msra.mxu1 %v20886_v1 }
0x18c6   :  { %v4679_v41 = vadd.f32 %v13362_v60, %v17720_v8  ;;  %v4673_v7 = vpop.f32.mrb[69].mxu0  ;;  %14303 = vmatprep.subr.bf16.mxu1 %v20890_v19 }
0x18c7   :  { %v4674_v36 = vadd.f32 %v17725_v34, %v4673_v7  ;;  %13393 = vmatprep.mubr.msk.f32.mxu1 %vm356_vm2, %v4694_v28 }
0x18c8   :  { %13394 = vmatmul.mubr.msk.f32.gmra.mrb[66].mxu1 %vm356_vm2, %v4695_v40  ;;  %v4697_v12 = vmax.f32 %v4679_v41, 0.0 }
0x18c9   :  { %v4696_v44 = vmax.f32 %v4674_v36, 0.0  ;;  %v13365_v0 = vpop.f32.mrb[70].mxu0  ;;  %14305 = vmatpush3.bf16.msra.mxu1 %v20890_v19  ;;  %v4943_v36 = vpop.permute.xlu1 %4942 }
0x18ca   :  { %v4689_v51 = vadd.f32 %v13365_v0, %v17732_v9  ;;  %v4683_v39 = vpop.f32.mrb[71].mxu0  ;;  %14307 = vmatprep.subr.bf16.mxu1 %v20891_v59  ;;  %v4947_v0 = vpop.permute.xlu0 %4946 }
0x18cb   :  { %v4684_v2 = vadd.f32 %v17737_v37, %v4683_v39  ;;  %13396 = vmatprep.mubr.msk.f32.mxu1 %vm356_vm2, %v4696_v44 }
0x18cc   :  { %13397 = vmatmul.mubr.msk.f32.gmra.mrb[68].mxu1 %vm356_vm2, %v4697_v12  ;;  %v4699_v38 = vmax.f32 %v4689_v51, 0.0 }
0x18cd   :  { %v4698_v46 = vmax.f32 %v4684_v2, 0.0  ;;  %14309 = vmatpush3.bf16.msra.mxu1 %v20891_v59 }
0x18ce   :  { %14311 = vmatprep.subr.bf16.mxu1 %v20892_v18 }
0x18cf   :  { %13399 = vmatprep.mubr.msk.f32.mxu1 %vm356_vm2, %v4698_v46 }
0x18d0   :  { %13400 = vmatmul.mubr.msk.f32.gmra.mrb[70].mxu1 %vm356_vm2, %v4699_v38 }
0x18d1   :  { %14313 = vmatpush3.bf16.msra.mxu1 %v20892_v18 }
0x18d2   :  { %14331 = vmatprep.subr.bf16.mxu1 %v15665_v10 }
0x1997   :  { %v13392_v6 = vpop.f32.mrb[64].mxu1 }
0x1998   :  { %v4796_v30 = vadd.f32 %v15553_v3, %v13392_v6  ;;  %v4790_v63 = vpop.f32.mrb[65].mxu1  ;;  %v20772_v6 = vsub.f32 1.0, %v17737_v37 }
0x1999   :  { %v4791_v22 = vadd.f32 %v15553_v3, %v4790_v63 }
0x199a   :  { %v17800_v47 = vmax.f32 %v4796_v30, 0.0 }
0x199b   :  { %v13395_v54 = vpop.f32.mrb[66].mxu1  ;;  %v17803_v60 = vmax.f32 %v4791_v22, 0.0 }
0x199c   :  { %v4966_v28 = vmul.f32 %v4939_v55, %v17800_v47  ;;  %v4806_v40 = vadd.f32 %v15553_v3, %v13395_v54  ;;  %v4800_v41 = vpop.f32.mrb[67].mxu1 }
0x199d   :  { %v4801_v7 = vadd.f32 %v15553_v3, %v4800_v41  ;;  %v4965_v51 = vmul.f32 %v4935_v62, %v17803_v60  ;;  %v4951_v62 = vpop.permute.xlu1 %4950 }
0x199e   :  { %v17805_v44 = vmax.f32 %v4806_v40, 0.0  ;;  %4983 = vrot.lane.b32.xlu1 %v4966_v28, %s15605_s11  ;;  %v20771_v40 = vsub.f32 1.0, %v17732_v9 }
0x199f   :  { %v13398_v12 = vpop.f32.mrb[68].mxu1  ;;  %v17810_v2 = vmax.f32 %v4801_v7, 0.0 }
0x19a0   :  { %v4968_v39 = vmul.f32 %v4947_v0, %v17805_v44  ;;  %v4810_v46 = vpop.f32.mrb[69].mxu1  ;;  %v4816_v63 = vadd.f32 %v15553_v3, %v13398_v12 }
0x19a1   :  { %v4811_v38 = vadd.f32 %v15553_v3, %v4810_v46  ;;  %v4967_v30 = vmul.f32 %v4943_v36, %v17810_v2  ;;  %v4955_v36 = vpop.permute.xlu0 %4954  ;;  %v4959_v12 = vpop.permute.xlu1 %4958 }
0x19a2   :  { %4981 = vrot.lane.b32.xlu1 %v4965_v51, %s15605_s11  ;;  %4987 = vrot.lane.b32.xlu0 %v4968_v39, %s15605_s11  ;;  %v17822_v41 = vmax.f32 %v4816_v63, 0.0 }
0x19a3   :  { %v13401_v55 = vpop.f32.mrb[70].mxu1  ;;  %v17816_v22 = vmax.f32 %v4811_v38, 0.0 }
0x19a4   :  { %v4820_v54 = vpop.f32.mrb[71].mxu1  ;;  %v4826_v0 = vadd.f32 %v15553_v3, %v13401_v55  ;;  %v4970_v39 = vmul.f32 %v4955_v36, %v17822_v41 }
0x19a5   :  { %v4821_v28 = vadd.f32 %v15553_v3, %v4820_v54  ;;  %v4969_v7 = vmul.f32 %v4951_v62, %v17816_v22  ;;  %v4963_v3 = vpop.permute.xlu0 %4962  ;;  %v4895_v63 = vpop.permute.xlu1 %4894 }
0x19a6   :  { %5045 = vperm.xlu1 %14698, %v20772_v6   ;;  %4985 = vrot.lane.b32.xlu0 %v4967_v30, %s15605_s11  ;;  %v17831_v46 = vmax.f32 %v4826_v0, 0.0  ;;  %v20893_v30 = vmov 100   ;;  %v4925_v56 = vmul.f32 %v4895_v63, %v17803_v60 }
0x19a7   :  { %v17825_v51 = vmax.f32 %v4821_v28, 0.0 }
0x19a8   :  { %v4972_v55 = vmul.f32 %v4963_v3, %v17831_v46 }
0x19a9   :  { %v4971_v38 = vmul.f32 %v4959_v12, %v17825_v51  ;;  %v4903_v54 = vpop.permute.xlu1 %4902  ;;  %v4899_v28 = vpop.permute.xlu0 %4898 }
0x19aa   :  { %5050 = vperm.xlu1 %14698, %v20771_v40   ;;  %4989 = vrot.lane.b32.xlu0 %v4969_v7, %s15605_s11  ;;  %v4926_v45 = vmul.f32 %v4899_v28, %v17800_v47  ;;  %v4927_v21 = vmul.f32 %v4903_v54, %v17810_v2 }
0x19ad   :  { %v5016_v62 = vpop.permute.xlu1 %5015  ;;  %v4907_v0 = vpop.permute.xlu0 %4906 }
0x19ae   :  { %4993 = vrot.lane.b32.xlu1 %v4971_v38, %s15605_s11  ;;  %4991 = vrot.lane.b32.xlu0 %v4970_v39, %s15605_s11  ;;  %v4928_v33 = vmul.f32 %v4907_v0, %v17805_v44 }
0x19b1   :  { %v5021_v7 = vpop.permute.xlu1 %5020  ;;  %v4911_v12 = vpop.permute.xlu0 %4910 }
0x19b2   :  { %4839 = vperm.xlu1 %14698, %v17702_v25   ;;  %4995 = vrot.lane.b32.xlu0 %v4972_v55, %s15605_s11 }
0x19b5   :  { %v5026_v36 = vpop.permute.xlu1 %5025  ;;  %v4915_v38 = vpop.permute.xlu0 %4914 }
0x19b6   :  { %4849 = vperm.xlu1 %14698, %v17713_v57   ;;  %4844 = vperm.xlu0 %14696, %v17669_v58  }
0x19b9   :  { %v4919_v39 = vpop.permute.xlu1 %4918  ;;  %v5031_v55 = vpop.permute.xlu0 %5030 }
0x19ba   :  { %4859 = vperm.xlu1 %14698, %v17725_v34   ;;  %4854 = vperm.xlu0 %14696, %v17708_v52  }
0x19bd   :  { %v4923_v3 = vpop.permute.xlu1 %4922  ;;  %v5036_v6 = vpop.permute.xlu0 %5035 }
0x19be   :  { %4869 = vperm.xlu1 %14698, %v17737_v37   ;;  %4864 = vperm.xlu0 %14696, %v17720_v8  }
0x19c1   :  { %v5041_v40 = vpop.permute.xlu1 %5040 }
0x19c2   :  { %4874 = vperm.xlu0 %14696, %v17732_v9   ;;  %14699 = vset.pattern.permute.xlu1 %v20893_v30 }
0x19c6   :  { %14700 = vset.pattern.permute.xlu0 %v20893_v30 }
0x1a10   :  { %v4984_v5 = vpop.permute.xlu1 %4983 }
0x1a11   :  { %v5006_v23 = vadd.f32 %v4984_v5, %v4926_v45 }
0x1a13   :  { %v5054_v4 = vmul.f32 %v5021_v7, %v5006_v23  ;;  %v4929_v23 = vmul.f32 %v4911_v12, %v17816_v22 }
0x1a14   :  { %v4982_v30 = vpop.permute.xlu1 %4981  ;;  %v4988_v18 = vpop.permute.xlu0 %4987 }
0x1a15   :  { %v5005_v59 = vadd.f32 %v4982_v30, %v4925_v56  ;;  %v5008_v19 = vadd.f32 %v4988_v18, %v4928_v33  ;;  %5071 = vrot.lane.b32.xlu0 %v5054_v4, %s15605_s11  ;;  %v4930_v56 = vmul.f32 %v4915_v38, %v17822_v41  ;;  %v4931_v30 = vmul.f32 %v4919_v39, %v17825_v51 }
0x1a17   :  { %v5053_v43 = vmul.f32 %v5016_v62, %v5005_v59  ;;  %v5056_v15 = vmul.f32 %v5031_v55, %v5008_v19 }
0x1a18   :  { %v4986_v1 = vpop.permute.xlu0 %4985 }
0x1a19   :  { %v5007_v27 = vadd.f32 %v4986_v1, %v4927_v21  ;;  %5069 = vrot.lane.b32.xlu1 %v5053_v43, %s15605_s11  ;;  %5075 = vrot.lane.b32.xlu0 %v5056_v15, %s15605_s11 }
0x1a1b   :  { %v5055_v5 = vmul.f32 %v5026_v36, %v5007_v27  ;;  %v4932_v27 = vmul.f32 %v4923_v3, %v17831_v46 }
0x1a1c   :  { %v4990_v45 = vpop.permute.xlu0 %4989 }
0x1a1d   :  { %v5009_v63 = vadd.f32 %v4990_v45, %v4929_v23  ;;  %5073 = vrot.lane.b32.xlu1 %v5055_v5, %s15605_s11 }
0x1a1f   :  { %v5057_v4 = vmul.f32 %v5036_v6, %v5009_v63 }
0x1a20   :  { %v4992_v33 = vpop.permute.xlu0 %4991 }
0x1a21   :  { %v5010_v19 = vadd.f32 %v4992_v33, %v4930_v56  ;;  %5077 = vrot.lane.b32.xlu1 %v5057_v4, %s15605_s11 }
0x1a23   :  { %v5058_v59 = vmul.f32 %v5041_v40, %v5010_v19  ;;  %v20894_v40 = vmov 99  }
0x1a24   :  { %v4996_v1 = vpop.permute.xlu0 %4995 }
0x1a25   :  { %v5046_v21 = vpop.permute.xlu1 %5045  ;;  %5079 = vrot.lane.b32.xlu0 %v5058_v59, %s15605_s11  ;;  %v5012_v15 = vadd.f32 %v4996_v1, %v4932_v27 }
0x1a29   :  { %v5051_v43 = vpop.permute.xlu1 %5050 }
0x1a2a   :  { %v5060_v18 = vmul.f32 %v5051_v43, %v5012_v15 }
0x1a2c   :  { %5083 = vrot.lane.b32.xlu0 %v5060_v18, %s15605_s11 }
0x1a2d   :  { %v4994_v54 = vpop.permute.xlu1 %4993 }
0x1a2e   :  { %v5011_v6 = vadd.f32 %v4994_v54, %v4931_v30 }
0x1a30   :  { %v5059_v62 = vmul.f32 %v5046_v21, %v5011_v6  ;;  %5291 = vperm.xlu0 %14700, %v17669_v58  }
0x1a31   :  { %v4840_v7 = vpop.permute.xlu1 %4839 }
0x1a32   :  { %5081 = vrot.lane.b32.xlu1 %v5059_v62, %s15605_s11  ;;  %v4877_v5 = vmul.f32 %v4840_v7, %v17803_v60  ;;  %v15554_v62 = vld [vmem:[%s20712_s3 + $0x1] ss:$0 sm:$0xff] }
0x1a34   :  { %5303 = vperm.xlu0 %14700, %v17725_v34  }
0x1a35   :  { %v4845_v28 = vpop.permute.xlu0 %4844  ;;  %v4850_v36 = vpop.permute.xlu1 %4849 }
0x1a36   :  { %5287 = vperm.xlu1 %14699, %v17702_v25   ;;  %v4878_v23 = vmul.f32 %v4845_v28, %v17800_v47  ;;  %v4879_v4 = vmul.f32 %v4850_v36, %v17810_v2 }
0x1a38   :  { %5311 = vperm.xlu0 %14700, %v17737_v37  }
0x1a39   :  { %v4855_v0 = vpop.permute.xlu0 %4854  ;;  %v4860_v39 = vpop.permute.xlu1 %4859 }
0x1a3a   :  { %5295 = vperm.xlu1 %14699, %v17713_v57   ;;  %v4880_v19 = vmul.f32 %v4855_v0, %v17805_v44  ;;  %v4881_v1 = vmul.f32 %v4860_v39, %v17816_v22 }
0x1a3c   :  { %14701 = vset.pattern.permute.xlu0 %v20894_v40 }
0x1a3d   :  { %v4865_v12 = vpop.permute.xlu0 %4864  ;;  %v4870_v3 = vpop.permute.xlu1 %4869 }
0x1a3e   :  { %5299 = vperm.xlu1 %14699, %v17708_v52   ;;  %v4882_v44 = vmul.f32 %v4865_v12, %v17822_v41  ;;  %v4883_v22 = vmul.f32 %v4870_v3, %v17825_v51 }
0x1a41   :  { %v4875_v38 = vpop.permute.xlu0 %4874 }
0x1a42   :  { %5307 = vperm.xlu1 %14699, %v17720_v8   ;;  %v4884_v18 = vmul.f32 %v4875_v38, %v17831_v46 }
0x1a46   :  { %5315 = vperm.xlu1 %14699, %v17732_v9  }
0x1a4a   :  { %14702 = vset.pattern.permute.xlu1 %v20894_v40 }
0x1a87   :  { %v5072_v55 = vpop.permute.xlu0 %5071 }
0x1a88   :  { %v17878_v56 = vadd.f32 %v5072_v55, %v4878_v23 }
0x1a8b   :  { %v5070_v45 = vpop.permute.xlu1 %5069  ;;  %v5076_v33 = vpop.permute.xlu0 %5075 }
0x1a8c   :  { %v17876_v63 = vadd.f32 %v5070_v45, %v4877_v5  ;;  %v17888_v47 = vadd.f32 %v5076_v33, %v4880_v19 }
0x1a8e   :  { %13410 = vmatprep.mubr.msk.f32.mxu0 %vm210_vm1, %v17876_v63 }
0x1a8f   :  { %v5074_v59 = vpop.permute.xlu1 %5073  ;;  %13411 = vmatmul.mubr.msk.f32.vlgmr.msra.gmra.mrb[72].mxu0 %vm210_vm1, %v17878_v56 }
0x1a90   :  { %v17886_v60 = vadd.f32 %v5074_v59, %v4879_v4 }
0x1a92   :  { %13413 = vmatprep.mubr.msk.f32.mxu0 %vm210_vm1, %v17886_v60 }
0x1a93   :  { %v5078_v2 = vpop.permute.xlu1 %5077  ;;  %13414 = vmatmul.mubr.msk.f32.gmra.mrb[74].mxu0 %vm210_vm1, %v17888_v47 }
0x1a94   :  { %v17895_v21 = vadd.f32 %v5078_v2, %v4881_v1 }
0x1a96   :  { %13416 = vmatprep.mubr.msk.f32.mxu0 %vm210_vm1, %v17895_v21 }
0x1a97   :  { %v5080_v27 = vpop.permute.xlu0 %5079 }
0x1a98   :  { %v17900_v15 = vadd.f32 %v5080_v27, %v4882_v44 }
0x1a9a   :  { %13417 = vmatmul.mubr.msk.f32.gmra.mrb[76].mxu0 %vm210_vm1, %v17900_v15 }
0x1a9e   :  { %v5084_v43 = vpop.permute.xlu0 %5083 }
0x1a9f   :  { %v17908_v6 = vadd.f32 %v5084_v43, %v4884_v18 }
0x1aa4   :  { %v5082_v30 = vpop.permute.xlu1 %5081 }
0x1aa5   :  { %v17906_v54 = vadd.f32 %v5082_v30, %v4883_v22 }
0x1aa7   :  { %13419 = vmatprep.mubr.msk.f32.mxu0 %vm210_vm1, %v17906_v54 }
0x1aa8   :  { %13420 = vmatmul.mubr.msk.f32.gmra.mrb[78].mxu0 %vm210_vm1, %v17908_v6 }
0x1aaf   :  { %v17921_v55 = vpop.permute.xlu0 %5291 }
0x1ab3   :  { %v17933_v43 = vpop.permute.xlu0 %5303 }
0x1ab5   :  { %v17917_v46 = vpop.permute.xlu1 %5287 }
0x1ab9   :  { %v17919_v38 = vpop.permute.xlu1 %5295 }
0x1abd   :  { %v17925_v1 = vpop.permute.xlu1 %5299 }
0x1ac1   :  { %v17935_v30 = vpop.permute.xlu1 %5307 }
0x1b62   :  { %v13412_v41 = vpop.f32.mrb[72].mxu0 }
0x1b63   :  { %v5197_v51 = vadd.f32 %v15554_v62, %v13412_v41  ;;  %v5191_v28 = vpop.f32.mrb[73].mxu0 }
0x1b64   :  { %v5192_v7 = vadd.f32 %v15554_v62, %v5191_v28 }
0x1b65   :  { %15043 = vtanh.f32 %v5197_v51 }
0x1b66   :  { %15045 = vtanh.f32 %v5192_v7  ;;  %v13415_v0 = vpop.f32.mrb[74].mxu0 }
0x1b67   :  { %v5207_v36 = vadd.f32 %v15554_v62, %v13415_v0  ;;  %v5201_v12 = vpop.f32.mrb[75].mxu0 }
0x1b68   :  { %v5202_v39 = vadd.f32 %v15554_v62, %v5201_v12 }
0x1b69   :  { %15047 = vtanh.f32 %v5207_v36 }
0x1b6a   :  { %15049 = vtanh.f32 %v5202_v39 }
0x1b6d   :  { %v13418_v3 = vpop.f32.mrb[76].mxu0 }
0x1b6e   :  { %v5217_v5 = vadd.f32 %v15554_v62, %v13418_v3  ;;  %v5211_v23 = vpop.f32.mrb[77].mxu0 }
0x1b6f   :  { %v15044_v45 = vpop.eup %15043  ;;  %v5212_v4 = vadd.f32 %v15554_v62, %v5211_v23 }
0x1b70   :  { %v15046_v33 = vpop.eup %15045  ;;  %15051 = vtanh.f32 %v5217_v5  ;;  %v5343_v19 = vmul.f32 %v15044_v45, %v17921_v55 }
0x1b71   :  { %v5342_v59 = vmul.f32 %v15046_v33, %v17917_v46  ;;  %15053 = vtanh.f32 %v5212_v4 }
0x1b72   :  { %5360 = vrot.lane.b32.xlu1 %v5343_v19, %s15605_s11  ;;  %v17941_v19 = vpop.permute.xlu1 %5315 }
0x1b73   :  { %v15048_v2 = vpop.eup %15047  ;;  %5358 = vrot.lane.b32.xlu0 %v5342_v59, %s15605_s11 }
0x1b74   :  { %v15050_v44 = vpop.eup %15049  ;;  %v5345_v27 = vmul.f32 %v15048_v2, %v17925_v1 }
0x1b75   :  { %v5344_v22 = vmul.f32 %v15050_v44, %v17919_v38  ;;  %v17945_v44 = vpop.permute.xlu0 %5311 }
0x1b76   :  { %5364 = vrot.lane.b32.xlu1 %v5345_v27, %s15605_s11 }
0x1b77   :  { %5362 = vrot.lane.b32.xlu0 %v5344_v22, %s15605_s11  ;;  %v11920_v22 = vmul.f32 -1.442695, %v5197_v51 }
0x1b7a   :  { %v15052_v18 = vpop.eup %15051 }
0x1b7b   :  { %v15054_v41 = vpop.eup %15053  ;;  %v5347_v28 = vmul.f32 %v15052_v18, %v17935_v30  ;;  %v13421_v0 = vpop.f32.mrb[78].mxu0  ;;  %v11919_v18 = vmul.f32 -1.442695, %v5192_v7 }
0x1b7c   :  { %v5346_v12 = vmul.f32 %v15054_v41, %v17933_v43  ;;  %v5227_v3 = vadd.f32 %v15554_v62, %v13421_v0  ;;  %v5221_v23 = vpop.f32.mrb[79].mxu0  ;;  %v11922_v41 = vmul.f32 -1.442695, %v5207_v36  ;;  %v11923_v0 = vmul.f32 -1.442695, %v5212_v4 }
0x1b7d   :  { %5368 = vrot.lane.b32.xlu1 %v5347_v28, %s15605_s11  ;;  %v5222_v45 = vadd.f32 %v15554_v62, %v5221_v23  ;;  %v11921_v62 = vmul.f32 -1.442695, %v5202_v39  ;;  %v11924_v28 = vmul.f32 -1.442695, %v5217_v5 }
0x1b7e   :  { %15055 = vtanh.f32 %v5227_v3  ;;  %5366 = vrot.lane.b32.xlu0 %v5346_v12, %s15605_s11  ;;  %v11926_v5 = vmul.f32 -1.442695, %v5227_v3 }
0x1b7f   :  { %15057 = vtanh.f32 %v5222_v45  ;;  %v11925_v4 = vmul.f32 -1.442695, %v5222_v45 }
0x1b80   :  { %15059 = vpow2.f32 %v11920_v22 }
0x1b81   :  { %15061 = vpow2.f32 %v11919_v18 }
0x1b82   :  { %15063 = vpow2.f32 %v11922_v41 }
0x1b83   :  { %15065 = vpow2.f32 %v11921_v62 }
0x1b84   :  { %15067 = vpow2.f32 %v11924_v28 }
0x1b85   :  { %15069 = vpow2.f32 %v11923_v0 }
0x1b88   :  { %v15056_v33 = vpop.eup %15055 }
0x1b89   :  { %v5349_v59 = vmul.f32 %v15056_v33, %v17941_v19  ;;  %v15058_v2 = vpop.eup %15057 }
0x1b8a   :  { %v5348_v27 = vmul.f32 %v15058_v2, %v17945_v44  ;;  %v15060_v12 = vpop.eup %15059 }
0x1b8b   :  { %5372 = vrot.lane.b32.xlu1 %v5349_v59, %s15605_s11  ;;  %v15062_v23 = vpop.eup %15061  ;;  %v5255_v33 = vadd.f32 1.0, %v15060_v12 }
0x1b8c   :  { %5370 = vrot.lane.b32.xlu0 %v5348_v27, %s15605_s11  ;;  %v15064_v59 = vpop.eup %15063  ;;  %v5254_v40 = vadd.f32 1.0, %v15062_v23 }
0x1b8d   :  { %v15066_v2 = vpop.eup %15065  ;;  %15071 = vrcp.f32 %v5255_v33  ;;  %v5257_v27 = vadd.f32 1.0, %v15064_v59 }
0x1b8e   :  { %15073 = vrcp.f32 %v5254_v40  ;;  %v5256_v51 = vadd.f32 1.0, %v15066_v2  ;;  %v15068_v7 = vpop.eup %15067 }
0x1b8f   :  { %v15070_v36 = vpop.eup %15069  ;;  %15075 = vrcp.f32 %v5257_v27  ;;  %v5259_v39 = vadd.f32 1.0, %v15068_v7 }
0x1b90   :  { %15077 = vrcp.f32 %v5256_v51  ;;  %v5258_v22 = vadd.f32 1.0, %v15070_v36 }
0x1b91   :  { %15079 = vrcp.f32 %v5259_v39 }
0x1b92   :  { %15081 = vrcp.f32 %v5258_v22 }
0x1b93   :  { %15083 = vpow2.f32 %v11926_v5 }
0x1b94   :  { %15085 = vpow2.f32 %v11925_v4 }
0x1b97   :  { %v15072_v18 = vpop.eup %15071 }
0x1b98   :  { %v15074_v41 = vpop.eup %15073  ;;  %v5319_v62 = vmul.f32 %v15072_v18, %v17921_v55 }
0x1b99   :  { %v15076_v28 = vpop.eup %15075  ;;  %v5318_v40 = vmul.f32 %v15074_v41, %v17917_v46 }
0x1b9a   :  { %v15078_v0 = vpop.eup %15077  ;;  %v5327_v12 = vmul.f32 %v5319_v62, %v17878_v56  ;;  %v5321_v23 = vmul.f32 %v15076_v28, %v17925_v1 }
0x1b9b   :  { %v5326_v33 = vmul.f32 %v5318_v40, %v17876_v63  ;;  %v5320_v3 = vmul.f32 %v15078_v0, %v17919_v38  ;;  %v15080_v45 = vpop.eup %15079 }
0x1b9c   :  { %v15082_v59 = vpop.eup %15081  ;;  %v5329_v2 = vmul.f32 %v5321_v23, %v17888_v47  ;;  %v5335_v27 = vsub.f32 %v17878_v56, %v5327_v12  ;;  %v5323_v1 = vmul.f32 %v15080_v45, %v17935_v30 }
0x1b9d   :  { %v15084_v55 = vpop.eup %15083  ;;  %v5328_v51 = vmul.f32 %v5320_v3, %v17886_v60  ;;  %v5334_v46 = vsub.f32 %v17876_v63, %v5326_v33  ;;  %v5322_v38 = vmul.f32 %v15082_v59, %v17933_v43 }
0x1b9e   :  { %v15086_v36 = vpop.eup %15085  ;;  %v5261_v4 = vadd.f32 1.0, %v15084_v55  ;;  %v5337_v18 = vsub.f32 %v17888_v47, %v5329_v2  ;;  %v5331_v0 = vmul.f32 %v5323_v1, %v17900_v15 }
0x1b9f   :  { %v5260_v41 = vadd.f32 1.0, %v15086_v36  ;;  %v5336_v28 = vsub.f32 %v17886_v60, %v5328_v51  ;;  %v5330_v47 = vmul.f32 %v5322_v38, %v17895_v21 }
0x1ba0   :  { %15087 = vrcp.f32 %v5261_v4  ;;  %v5339_v23 = vsub.f32 %v17900_v15, %v5331_v0 }
0x1ba1   :  { %15089 = vrcp.f32 %v5260_v41  ;;  %v5338_v3 = vsub.f32 %v17895_v21, %v5330_v47 }
0x1baa   :  { %v15088_v21 = vpop.eup %15087 }
0x1bab   :  { %v15090_v55 = vpop.eup %15089  ;;  %v5325_v51 = vmul.f32 %v15088_v21, %v17941_v19 }
0x1be4   :  { %v5361_v7 = vpop.permute.xlu1 %5360 }
0x1be5   :  { %v5383_v39 = vadd.f32 %v5361_v7, %v5335_v27  ;;  %v5359_v22 = vpop.permute.xlu0 %5358  ;;  %v5324_v7 = vmul.f32 %v15090_v55, %v17945_v44 }
0x1be6   :  { %v5382_v5 = vadd.f32 %v5359_v22, %v5334_v46  ;;  %v5333_v46 = vmul.f32 %v5325_v51, %v17908_v6 }
0x1be7   :  { %v5391_v63 = vsel %vm210_vm1, %v5383_v39, %v17535_v49  ;;  %v5332_v36 = vmul.f32 %v5324_v7, %v17906_v54 }
0x1be8   :  { %v5365_v62 = vpop.permute.xlu1 %5364  ;;  %v5390_v56 = vsel %vm210_vm1, %v5382_v5, %v17537_v53  ;;  %v5341_v22 = vsub.f32 %v17908_v6, %v5333_v46  ;;  %v15555_v6 = vld [vmem:[%s20712_s3 + $0x2] ss:$0 sm:$0xff] }
0x1be9   :  { %v5385_v40 = vadd.f32 %v5365_v62, %v5337_v18  ;;  %13438 = vmatprep.mubr.msk.f32.mxu1 %vm80_vm0, %v5390_v56  ;;  %v5363_v30 = vpop.permute.xlu0 %5362  ;;  %v5340_v1 = vsub.f32 %v17906_v54, %v5332_v36 }
0x1bea   :  { %v5384_v43 = vadd.f32 %v5363_v30, %v5336_v28  ;;  %13439 = vmatmul.mubr.msk.f32.vlgmr.msra.gmra.mrb[72].mxu1 %vm80_vm0, %v5391_v63 }
0x1beb   :  { %14333 = vmatpush3.bf16.msra.mxu1 %v15665_v10  ;;  %v5393_v12 = vsel %vm210_vm1, %v5385_v40, %v17546_v42 }
0x1bec   :  { %v5392_v60 = vsel %vm210_vm1, %v5384_v43, %v17549_v17  ;;  %14335 = vmatprep.subr.bf16.mxu1 %v15667_v11 }
0x1bed   :  { %13441 = vmatprep.mubr.msk.f32.mxu1 %vm80_vm0, %v5392_v60 }
0x1bee   :  { %13442 = vmatmul.mubr.msk.f32.gmra.mrb[74].mxu1 %vm80_vm0, %v5393_v12 }
0x1bef   :  { %v5369_v33 = vpop.permute.xlu1 %5368  ;;  %14337 = vmatpush3.bf16.msra.mxu1 %v15667_v11 }
0x1bf0   :  { %v5387_v45 = vadd.f32 %v5369_v33, %v5339_v23  ;;  %v5367_v59 = vpop.permute.xlu0 %5366  ;;  %14339 = vmatprep.subr.bf16.mxu1 %v15686_v16 }
0x1bf1   :  { %v5386_v2 = vadd.f32 %v5367_v59, %v5338_v3 }
0x1bf2   :  { %v5395_v15 = vsel %vm210_vm1, %v5387_v45, %v17561_v14 }
0x1bf3   :  { %v5394_v27 = vsel %vm210_vm1, %v5386_v2, %v17563_v31  ;;  %14341 = vmatpush3.bf16.msra.mxu1 %v15686_v16 }
0x1bf4   :  { %13444 = vmatprep.mubr.msk.f32.mxu1 %vm80_vm0, %v5394_v27  ;;  %14343 = vmatprep.subr.bf16.mxu1 %v15703_v20 }
0x1bf5   :  { %13445 = vmatmul.mubr.msk.f32.gmra.mrb[76].mxu1 %vm80_vm0, %v5395_v15 }
0x1bf7   :  { %14345 = vmatpush3.bf16.msra.mxu1 %v15703_v20 }
0x1bf8   :  { %14371 = vmatprep.subr.bf16.mxu1 %v15938_v50 }
0x1bfd   :  { %v5373_v39 = vpop.permute.xlu1 %5372 }
0x1bfe   :  { %v5389_v5 = vadd.f32 %v5373_v39, %v5341_v22  ;;  %v5371_v38 = vpop.permute.xlu0 %5370 }
0x1bff   :  { %v5388_v4 = vadd.f32 %v5371_v38, %v5340_v1 }
0x1c00   :  { %v5397_v19 = vsel %vm210_vm1, %v5389_v5, %v17585_v13 }
0x1c01   :  { %v5396_v18 = vsel %vm210_vm1, %v5388_v4, %v17587_v48 }
0x1c02   :  { %13447 = vmatprep.mubr.msk.f32.mxu1 %vm80_vm0, %v5396_v18 }
0x1c03   :  { %13448 = vmatmul.mubr.msk.f32.gmra.mrb[78].mxu1 %vm80_vm0, %v5397_v19 }
0x1cbd   :  { %v13440_v44 = vpop.f32.mrb[72].mxu1 }
0x1cbe   :  { %v18008_v41 = vadd.f32 %v15555_v6, %v13440_v44  ;;  %v5488_v54 = vpop.f32.mrb[73].mxu1 }
0x1cbf   :  { %v18010_v62 = vadd.f32 %v15555_v6, %v5488_v54 }
0x1cc0   :  { %5585 = vrot.lane.b32.xlu1 %v18008_v41, %s15607_s14  ;;  %v11936_v3 = vmul.f32 -1.442695, %v18008_v41 }
0x1cc1   :  { %5583 = vrot.lane.b32.xlu0 %v18010_v62, %s15607_s14  ;;  %v13443_v56 = vpop.f32.mrb[74].mxu1  ;;  %v11935_v45 = vmul.f32 -1.442695, %v18010_v62 }
0x1cc2   :  { %v18016_v28 = vadd.f32 %v15555_v6, %v13443_v56  ;;  %v5498_v63 = vpop.f32.mrb[75].mxu1  ;;  %15091 = vpow2.f32 %v11936_v3 }
0x1cc3   :  { %v18018_v40 = vadd.f32 %v15555_v6, %v5498_v63  ;;  %15093 = vpow2.f32 %v11935_v45 }
0x1cc4   :  { %5589 = vrot.lane.b32.xlu1 %v18016_v28, %s15607_s14  ;;  %v11938_v59 = vmul.f32 -1.442695, %v18016_v28 }
0x1cc5   :  { %5587 = vrot.lane.b32.xlu0 %v18018_v40, %s15607_s14  ;;  %v11937_v2 = vmul.f32 -1.442695, %v18018_v40 }
0x1cc6   :  { %15095 = vpow2.f32 %v11938_v59 }
0x1cc7   :  { %15097 = vpow2.f32 %v11937_v2 }
0x1cc8   :  { %v13446_v30 = vpop.f32.mrb[76].mxu1 }
0x1cc9   :  { %v18024_v0 = vadd.f32 %v15555_v6, %v13446_v30  ;;  %v5508_v43 = vpop.f32.mrb[77].mxu1 }
0x1cca   :  { %v18026_v47 = vadd.f32 %v15555_v6, %v5508_v43 }
0x1ccb   :  { %5593 = vrot.lane.b32.xlu1 %v18024_v0, %s15607_s14  ;;  %v11940_v27 = vmul.f32 -1.442695, %v18024_v0 }
0x1ccc   :  { %5591 = vrot.lane.b32.xlu0 %v18026_v47, %s15607_s14  ;;  %v11939_v15 = vmul.f32 -1.442695, %v18026_v47  ;;  %v15092_v21 = vpop.eup %15091 }
0x1ccd   :  { %15099 = vpow2.f32 %v11940_v27  ;;  %v15094_v55 = vpop.eup %15093  ;;  %v5552_v51 = vadd.f32 1.0, %v15092_v21 }
0x1cce   :  { %15101 = vpow2.f32 %v11939_v15  ;;  %v5551_v46 = vadd.f32 1.0, %v15094_v55 }
0x1ccf   :  { %15103 = vrcp.f32 %v5552_v51 }
0x1cd0   :  { %v15096_v7 = vpop.eup %15095  ;;  %15105 = vrcp.f32 %v5551_v46 }
0x1cd1   :  { %v15098_v36 = vpop.eup %15097  ;;  %v5554_v39 = vadd.f32 1.0, %v15096_v7 }
0x1cd2   :  { %v5553_v22 = vadd.f32 1.0, %v15098_v36 }
0x1cd3   :  { %15107 = vrcp.f32 %v5554_v39 }
0x1cd4   :  { %15109 = vrcp.f32 %v5553_v22 }
0x1cd6   :  { %v13449_v60 = vpop.f32.mrb[78].mxu1 }
0x1cd7   :  { %v18032_v12 = vadd.f32 %v15555_v6, %v13449_v60  ;;  %v5518_v23 = vpop.f32.mrb[79].mxu1  ;;  %v15100_v1 = vpop.eup %15099 }
0x1cd8   :  { %v18034_v33 = vadd.f32 %v15555_v6, %v5518_v23  ;;  %v15102_v5 = vpop.eup %15101  ;;  %v5556_v38 = vadd.f32 1.0, %v15100_v1 }
0x1cd9   :  { %5597 = vrot.lane.b32.xlu1 %v18032_v12, %s15607_s14  ;;  %v5555_v4 = vadd.f32 1.0, %v15102_v5  ;;  %v11942_v18 = vmul.f32 -1.442695, %v18032_v12  ;;  %v18048_v44 = vpop.eup %15103 }
0x1cda   :  { %5595 = vrot.lane.b32.xlu0 %v18034_v33, %s15607_s14  ;;  %v11941_v19 = vmul.f32 -1.442695, %v18034_v33  ;;  %15111 = vrcp.f32 %v5556_v38  ;;  %v18050_v54 = vpop.eup %15105 }
0x1cdb   :  { %15113 = vrcp.f32 %v5555_v4 }
0x1cdc   :  { %15115 = vpow2.f32 %v11942_v18 }
0x1cdd   :  { %15117 = vpow2.f32 %v11941_v19  ;;  %v18055_v43 = vpop.eup %15107  ;;  %v15556_v19 = vld [vmem:[%s20711_s1 + $0xc8] sm:$0xff] }
0x1cde   :  { %v18058_v23 = vpop.eup %15109 }
0x1ce4   :  { %v18064_v2 = vpop.eup %15111 }
0x1ce5   :  { %v18066_v27 = vpop.eup %15113 }
0x1ce6   :  { %v15116_v21 = vpop.eup %15115 }
0x1ce7   :  { %v15118_v7 = vpop.eup %15117  ;;  %v5558_v36 = vadd.f32 1.0, %v15116_v21  ;;  %v20901_v21 = vsub.f32 1.0, %v17737_v37 }
0x1ce8   :  { %v5557_v39 = vadd.f32 1.0, %v15118_v7 }
0x1ce9   :  { %15119 = vrcp.f32 %v5558_v36 }
0x1cea   :  { %15121 = vrcp.f32 %v5557_v39 }
0x1cf3   :  { %v18072_v22 = vpop.eup %15119 }
0x1cf4   :  { %v18074_v5 = vpop.eup %15121 }
0x1d32   :  { %v5586_v6 = vpop.permute.xlu1 %5585 }
0x1d33   :  { %v5608_v56 = vmul.f32 %v18048_v44, %v5586_v6  ;;  %v5584_v63 = vpop.permute.xlu0 %5583  ;;  %v15557_v6 = vld [vmem:[%s20711_s1 + $0xc0] sm:$0xff] }
0x1d34   :  { %v5607_v30 = vmul.f32 %v18050_v54, %v5584_v63  ;;  %v20896_v63 = vsub.f32 1.0, %v17669_v58  ;;  %v15560_v58 = vld [vmem:[%s20711_s1 + $0xe0] sm:$0xff] }
0x1d35   :  { %5625 = vrot.lane.b32.xlu1 %v5608_v56, %s15609_s15  ;;  %v20895_v56 = vsub.f32 1.0, %v17702_v25  ;;  %v15561_v25 = vld [vmem:[%s20711_s1 + $0xe8] sm:$0xff] }
0x1d36   :  { %v5590_v60 = vpop.permute.xlu1 %5589  ;;  %5623 = vrot.lane.b32.xlu0 %v5607_v30, %s15609_s15  ;;  %v15558_v30 = vld [vmem:[%s20711_s1 + $0xd0] sm:$0xff] }
0x1d37   :  { %v5610_v3 = vmul.f32 %v18055_v43, %v5590_v60  ;;  %v5588_v45 = vpop.permute.xlu0 %5587  ;;  %v15559_v60 = vld [vmem:[%s20711_s1 + $0xd8] sm:$0xff] }
0x1d38   :  { %v5609_v59 = vmul.f32 %v18058_v23, %v5588_v45  ;;  %v20898_v45 = vsub.f32 1.0, %v17708_v52  ;;  %v15562_v52 = vld [vmem:[%s20711_s1 + $0xf0] sm:$0xff] }
0x1d39   :  { %5629 = vrot.lane.b32.xlu1 %v5610_v3, %s15609_s15  ;;  %v20897_v3 = vsub.f32 1.0, %v17713_v57  ;;  %v15563_v57 = vld [vmem:[%s20711_s1 + $0xf8] sm:$0xff] }
0x1d3a   :  { %5627 = vrot.lane.b32.xlu0 %v5609_v59, %s15609_s15  ;;  %v20899_v59 = vsub.f32 1.0, %v17725_v34 }
0x1d3d   :  { %v5594_v15 = vpop.permute.xlu1 %5593 }
0x1d3e   :  { %v5612_v55 = vmul.f32 %v18064_v2, %v5594_v15  ;;  %v5592_v51 = vpop.permute.xlu0 %5591  ;;  %v20900_v15 = vsub.f32 1.0, %v17720_v8 }
0x1d3f   :  { %v5611_v46 = vmul.f32 %v18066_v27, %v5592_v51 }
0x1d40   :  { %5633 = vrot.lane.b32.xlu1 %v5612_v55, %s15609_s15  ;;  %v20902_v55 = vsub.f32 1.0, %v17732_v9 }
0x1d41   :  { %5631 = vrot.lane.b32.xlu0 %v5611_v46, %s15609_s15 }
0x1d4b   :  { %v5598_v1 = vpop.permute.xlu1 %5597 }
0x1d4c   :  { %v5614_v38 = vmul.f32 %v18072_v22, %v5598_v1  ;;  %v5596_v4 = vpop.permute.xlu0 %5595 }
0x1d4d   :  { %v5613_v18 = vmul.f32 %v18074_v5, %v5596_v4 }
0x1d4e   :  { %5637 = vrot.lane.b32.xlu1 %v5614_v38, %s15609_s15 }
0x1d4f   :  { %5635 = vrot.lane.b32.xlu0 %v5613_v18, %s15609_s15 }
0x1d52   :  { %5732 = vperm.xlu1 %14702, %v15556_v19  }
0x1d53   :  { %5728 = vperm.xlu0 %14701, %v15557_v6  }
0x1d56   :  { %5768 = vperm.xlu1 %14702, %v20895_v56  }
0x1d57   :  { %5772 = vperm.xlu0 %14701, %v20896_v63  }
0x1d5a   :  { %5736 = vperm.xlu1 %14702, %v15558_v30  }
0x1d5b   :  { %5740 = vperm.xlu0 %14701, %v15559_v60  }
0x1d5e   :  { %5776 = vperm.xlu1 %14702, %v20897_v3  }
0x1d5f   :  { %5780 = vperm.xlu0 %14701, %v20898_v45  }
0x1d62   :  { %5744 = vperm.xlu1 %14702, %v15560_v58  }
0x1d63   :  { %5748 = vperm.xlu0 %14701, %v15561_v25  }
0x1d66   :  { %5784 = vperm.xlu1 %14702, %v20899_v59  }
0x1d67   :  { %5788 = vperm.xlu0 %14701, %v20900_v15  }
0x1d6a   :  { %5752 = vperm.xlu1 %14702, %v15562_v52  }
0x1d6b   :  { %5756 = vperm.xlu0 %14701, %v15563_v57  }
0x1d6e   :  { %5792 = vperm.xlu1 %14702, %v20901_v21  }
0x1d6f   :  { %5796 = vperm.xlu0 %14701, %v20902_v55  }
0x1d72   :  { %14703 = vset.pattern.permute.xlu1 %v20853_v61 }
0x1d73   :  { %14704 = vset.pattern.permute.xlu0 %v20853_v61 }
0x1da7   :  { %v5626_v8 = vpop.permute.xlu1 %5625 }
0x1da8   :  { %v5648_v34 = vadd.f32 %v5626_v8, %v18008_v41  ;;  %v5624_v51 = vpop.permute.xlu0 %5623 }
0x1da9   :  { %v5647_v7 = vadd.f32 %v5624_v51, %v18010_v62 }
0x1daa   :  { %15123 = vtanh.f32 %v5648_v34 }
0x1dab   :  { %15125 = vtanh.f32 %v5647_v7  ;;  %v5630_v46 = vpop.permute.xlu1 %5629  ;;  %v5664_v7 = vsub.f32 1.0, %v18048_v44 }
0x1dac   :  { %v5650_v36 = vadd.f32 %v5630_v46, %v18016_v28  ;;  %v5628_v37 = vpop.permute.xlu0 %5627 }
0x1dad   :  { %v5649_v39 = vadd.f32 %v5628_v37, %v18018_v40  ;;  %v5712_v37 = vmul.f32 %v18048_v44, %v17535_v49 }
0x1dae   :  { %15127 = vtanh.f32 %v5650_v36  ;;  %v5663_v36 = vsub.f32 1.0, %v18050_v54 }
0x1daf   :  { %15129 = vtanh.f32 %v5649_v39 }
0x1db2   :  { %v5634_v9 = vpop.permute.xlu1 %5633 }
0x1db3   :  { %v5652_v1 = vadd.f32 %v5634_v9, %v18024_v0  ;;  %v5632_v38 = vpop.permute.xlu0 %5631 }
0x1db4   :  { %v15124_v4 = vpop.eup %15123  ;;  %v5651_v41 = vadd.f32 %v5632_v38, %v18026_v47 }
0x1db5   :  { %v15126_v18 = vpop.eup %15125  ;;  %15131 = vtanh.f32 %v5652_v1  ;;  %5681 = vrot.lane.b32.xlu0 %v15124_v4, %s15605_s11  ;;  %v5711_v1 = vmul.f32 %v18050_v54, %v17537_v53  ;;  %v5713_v54 = vmul.f32 %v18058_v23, %v17549_v17 }
0x1db6   :  { %15133 = vtanh.f32 %v5651_v41  ;;  %5679 = vrot.lane.b32.xlu1 %v15126_v18, %s15605_s11  ;;  %v5666_v41 = vsub.f32 1.0, %v18055_v43 }
0x1db8   :  { %v15128_v62 = vpop.eup %15127 }
0x1db9   :  { %v15130_v28 = vpop.eup %15129  ;;  %5685 = vrot.lane.b32.xlu0 %v15128_v62, %s15605_s11 }
0x1dba   :  { %5683 = vrot.lane.b32.xlu1 %v15130_v28, %s15605_s11  ;;  %v5665_v28 = vsub.f32 1.0, %v18058_v23  ;;  %v5668_v23 = vsub.f32 1.0, %v18064_v2 }
0x1dbf   :  { %v15132_v40 = vpop.eup %15131 }
0x1dc0   :  { %v15134_v19 = vpop.eup %15133  ;;  %5689 = vrot.lane.b32.xlu0 %v15132_v40, %s15605_s11  ;;  %v5638_v0 = vpop.permute.xlu1 %5637 }
0x1dc1   :  { %5687 = vrot.lane.b32.xlu1 %v15134_v19, %s15605_s11  ;;  %v5654_v47 = vadd.f32 %v5638_v0, %v18032_v12  ;;  %v5636_v6 = vpop.permute.xlu0 %5635  ;;  %v5714_v0 = vmul.f32 %v18055_v43, %v17546_v42 }
0x1dc2   :  { %v5653_v56 = vadd.f32 %v5636_v6, %v18034_v33 }
0x1dc3   :  { %15135 = vtanh.f32 %v5654_v47 }
0x1dc4   :  { %15137 = vtanh.f32 %v5653_v56 }
0x1dcd   :  { %v15136_v63 = vpop.eup %15135 }
0x1dce   :  { %v15138_v30 = vpop.eup %15137  ;;  %5693 = vrot.lane.b32.xlu0 %v15136_v63, %s15605_s11 }
0x1dcf   :  { %5691 = vrot.lane.b32.xlu1 %v15138_v30, %s15605_s11 }
0x1dd1   :  { %v5733_v3 = vpop.permute.xlu1 %5732 }
0x1dd2   :  { %v5729_v60 = vpop.permute.xlu0 %5728 }
0x1dd5   :  { %v5769_v58 = vpop.permute.xlu1 %5768 }
0x1dd6   :  { %v5773_v45 = vpop.permute.xlu0 %5772  ;;  %v5799_v6 = vmul.f32 %v5769_v58, %v17537_v53  ;;  %v5667_v58 = vsub.f32 1.0, %v18066_v27 }
0x1dd7   :  { %v5800_v40 = vmul.f32 %v5773_v45, %v17535_v49 }
0x1dd9   :  { %v5737_v59 = vpop.permute.xlu1 %5736 }
0x1dda   :  { %v5741_v25 = vpop.permute.xlu0 %5740 }
0x1ddd   :  { %v5777_v52 = vpop.permute.xlu1 %5776 }
0x1dde   :  { %v5781_v15 = vpop.permute.xlu0 %5780  ;;  %v5801_v43 = vmul.f32 %v5777_v52, %v17549_v17  ;;  %v5715_v17 = vmul.f32 %v18066_v27, %v17563_v31  ;;  %v5670_v27 = vsub.f32 1.0, %v18072_v22 }
0x1ddf   :  { %v5802_v49 = vmul.f32 %v5781_v15, %v17546_v42  ;;  %v5716_v42 = vmul.f32 %v18064_v2, %v17561_v14 }
0x1de1   :  { %v5745_v57 = vpop.permute.xlu1 %5744 }
0x1de2   :  { %v5749_v12 = vpop.permute.xlu0 %5748 }
0x1de5   :  { %v5785_v33 = vpop.permute.xlu1 %5784 }
0x1de6   :  { %v5789_v21 = vpop.permute.xlu0 %5788 }
0x1de9   :  { %v18140_v8 = vpop.permute.xlu1 %5752 }
0x1dea   :  { %v18138_v55 = vpop.permute.xlu0 %5756 }
0x1ded   :  { %v18144_v51 = vpop.permute.xlu1 %5792 }
0x1dee   :  { %v18142_v34 = vpop.permute.xlu0 %5796 }
0x1e27   :  { %v5682_v46 = vpop.permute.xlu0 %5681 }
0x1e28   :  { %v5704_v39 = vmul.f32 %v5682_v46, %v5664_v7  ;;  %v5680_v9 = vpop.permute.xlu1 %5679 }
0x1e29   :  { %v5703_v38 = vmul.f32 %v5680_v9, %v5663_v36  ;;  %v5804_v9 = vmul.f32 %v5789_v21, %v17561_v14  ;;  %v11951_v14 = vld [vmem:[%s20709_s0 + $0x100] sm:$0xff]  ;;  %v5717_v21 = vmul.f32 %v18074_v5, %v17587_v48 }
0x1e2a   :  { %v5720_v4 = vadd.f32 %v5712_v37, %v5704_v39  ;;  %13466 = vmatprep.mubr.msk.f32.mxu0 %vm80_vm0, %v11951_v14 }
0x1e2b   :  { %v5719_v18 = vadd.f32 %v5711_v1, %v5703_v38  ;;  %v5686_v62 = vpop.permute.xlu0 %5685  ;;  %v5803_v38 = vmul.f32 %v5785_v33, %v17563_v31  ;;  %v5718_v31 = vmul.f32 %v18072_v22, %v17585_v13 }
0x1e2c   :  { %v5760_v19 = vmul.f32 %v5733_v3, %v5720_v4  ;;  %v5706_v44 = vmul.f32 %v5686_v62, %v5666_v41  ;;  %v5684_v47 = vpop.permute.xlu1 %5683  ;;  %v5669_v62 = vsub.f32 1.0, %v18074_v5 }
0x1e2d   :  { %v5759_v56 = vmul.f32 %v5729_v60, %v5719_v18  ;;  %v5705_v63 = vmul.f32 %v5684_v47, %v5665_v28 }
0x1e2e   :  { %v18160_v30 = vadd.f32 %v5800_v40, %v5760_v19  ;;  %v5722_v7 = vadd.f32 %v5714_v0, %v5706_v44  ;;  %v5806_v19 = vmul.f32 %v18142_v34, %v17585_v13  ;;  %v5805_v44 = vmul.f32 %v18144_v51, %v17587_v48 }
0x1e2f   :  { %v18162_v46 = vadd.f32 %v5799_v6, %v5759_v56  ;;  %v5721_v36 = vadd.f32 %v5713_v54, %v5705_v63 }
0x1e30   :  { %v5762_v3 = vmul.f32 %v5741_v25, %v5722_v7  ;;  %5825 = vrot.lane.b32.xlu0 %v18160_v30, %s15605_s11 }
0x1e31   :  { %v5761_v53 = vmul.f32 %v5737_v59, %v5721_v36  ;;  %5823 = vrot.lane.b32.xlu1 %v18162_v46, %s15605_s11 }
0x1e32   :  { %v18171_v60 = vadd.f32 %v5802_v49, %v5762_v3  ;;  %v5690_v45 = vpop.permute.xlu0 %5689  ;;  %v11952_v49 = vld [vmem:[%s20709_s0 + $0x108] sm:$0xff]  ;;  %v11953_v3 = vld [vmem:[%s20709_s0 + $0x110] sm:$0xff] }
0x1e33   :  { %v18174_v37 = vadd.f32 %v5801_v43, %v5761_v53  ;;  %v5708_v25 = vmul.f32 %v5690_v45, %v5668_v23  ;;  %v5688_v15 = vpop.permute.xlu1 %5687  ;;  %v11954_v43 = vld [vmem:[%s20709_s0 + $0x118] sm:$0xff]  ;;  %v11955_v53 = vld [vmem:[%s20709_s0 + $0x120] sm:$0xff]  ;;  %v11956_v23 = vld [vmem:[%s20709_s0 + $0x128] sm:$0xff] }
0x1e34   :  { %v5707_v59 = vmul.f32 %v5688_v15, %v5667_v58  ;;  %5829 = vrot.lane.b32.xlu0 %v18171_v60, %s15605_s11  ;;  %v11957_v45 = vld [vmem:[%s20709_s0 + $0x130] sm:$0xff]  ;;  %v11958_v58 = vld [vmem:[%s20709_s0 + $0x138] sm:$0xff]  ;;  %v18294_v15 = vld [vmem:[%s20711_s1 + $0x108] sm:$0xff] }
0x1e35   :  { %v5724_v52 = vadd.f32 %v5716_v42, %v5708_v25  ;;  %5827 = vrot.lane.b32.xlu1 %v18174_v37, %s15605_s11  ;;  %v20903_v42 = vld [vmem:[#allocation2_spill] sm:$0xff]  ;;  %v20904_v25 = vld [vmem:[#allocation4_spill] sm:$0xff] }
0x1e36   :  { %v5723_v39 = vadd.f32 %v5715_v17, %v5707_v59 }
0x1e37   :  { %v5764_v1 = vmul.f32 %v5749_v12, %v5724_v52 }
0x1e38   :  { %v5763_v2 = vmul.f32 %v5745_v57, %v5723_v39 }
0x1e39   :  { %v18186_v4 = vadd.f32 %v5804_v9, %v5764_v1 }
0x1e3a   :  { %v18188_v41 = vadd.f32 %v5803_v38, %v5763_v2  ;;  %v20905_v2 = vld [vmem:[#allocation3_spill] sm:$0xff] }
0x1e3b   :  { %5833 = vrot.lane.b32.xlu0 %v18186_v4, %s15605_s11 }
0x1e3c   :  { %5831 = vrot.lane.b32.xlu1 %v18188_v41, %s15605_s11 }
0x1e40   :  { %v5694_v18 = vpop.permute.xlu0 %5693 }
0x1e41   :  { %v5710_v12 = vmul.f32 %v5694_v18, %v5670_v27  ;;  %v5692_v57 = vpop.permute.xlu1 %5691 }
0x1e42   :  { %v5709_v33 = vmul.f32 %v5692_v57, %v5669_v62 }
0x1e43   :  { %v5726_v28 = vadd.f32 %v5718_v31, %v5710_v12 }
0x1e44   :  { %v5725_v40 = vadd.f32 %v5717_v21, %v5709_v33 }
0x1e45   :  { %v5766_v0 = vmul.f32 %v18138_v55, %v5726_v28  ;;  %v18327_v28 = vld [vmem:[%s20711_s1 + $0x100] sm:$0xff] }
0x1e46   :  { %v5765_v22 = vmul.f32 %v18140_v8, %v5725_v40  ;;  %v18333_v40 = vld [vmem:[%s20711_s1 + $0x110] sm:$0xff] }
0x1e47   :  { %v18210_v47 = vadd.f32 %v5806_v19, %v5766_v0  ;;  %v18339_v19 = vld [vmem:[%s20711_s1 + $0x118] sm:$0xff]  ;;  %v18344_v0 = vld [vmem:[%s20711_s1 + $0x120] sm:$0xff] }
0x1e48   :  { %v18212_v6 = vadd.f32 %v5805_v44, %v5765_v22  ;;  %v18351_v44 = vld [vmem:[%s20711_s1 + $0x128] sm:$0xff]  ;;  %v18356_v22 = vld [vmem:[%s20711_s1 + $0x130] sm:$0xff] }
0x1e49   :  { %5837 = vrot.lane.b32.xlu0 %v18210_v47, %s15605_s11 }
0x1e4a   :  { %5835 = vrot.lane.b32.xlu1 %v18212_v6, %s15605_s11 }
0x1e4d   :  { %6386 = vperm.xlu0 %14704, %v18294_v15  }
0x1e4e   :  { %6382 = vperm.xlu1 %14703, %v18327_v28  }
0x1e51   :  { %6398 = vperm.xlu0 %14704, %v18344_v0  }
0x1e52   :  { %6390 = vperm.xlu1 %14703, %v18333_v40  }
0x1e55   :  { %6406 = vperm.xlu0 %14704, %v18356_v22  }
0x1e56   :  { %6394 = vperm.xlu1 %14703, %v18339_v19  }
0x1e5a   :  { %6402 = vperm.xlu1 %14703, %v18351_v44  }
0x1ea2   :  { %v5826_v5 = vpop.permute.xlu0 %5825 }
0x1ea3   :  { %11944 = vst.msk [vmem:[%s20713_s4 + $0xc8] sm:$0xff] %vm210_vm1, %v5826_v5  ;;  %v5824_v13 = vpop.permute.xlu1 %5823 }
0x1ea4   :  { %11943 = vst.msk [vmem:[%s20713_s4 + $0xc0] sm:$0xff] %vm210_vm1, %v5824_v13  ;;  %v14314_v48 = vpack.c.bf16 %v5826_v5, %v5824_v13  ;;  %v18363_v5 = vld [vmem:[%s20711_s1 + $0x138] sm:$0xff]  ;;  %v20906_v13 = vmov 96  }
0x1ea5   :  { %6410 = vperm.xlu1 %14703, %v18363_v5   ;;  %14705 = vset.pattern.permute.xlu0 %v20906_v13 }
0x1ea6   :  { %14315 = vmatprep.subr.bf16.mxu0 %v14314_v48  ;;  %v5830_v55 = vpop.permute.xlu0 %5829  ;;  %6342 = vperm.xlu0 %14705, %v18327_v28  }
0x1ea7   :  { %11946 = vst.msk [vmem:[%s20713_s4 + $0xd8] sm:$0xff] %vm210_vm1, %v5830_v55  ;;  %v5828_v8 = vpop.permute.xlu1 %5827  ;;  %14317 = vmatpush3.bf16.msra.mxu0 %v14314_v48  ;;  %v20796_v48 = vsub.f32 1.0, %v18327_v28 }
0x1ea8   :  { %11945 = vst.msk [vmem:[%s20713_s4 + $0xd0] sm:$0xff] %vm210_vm1, %v5828_v8  ;;  %v14318_v34 = vpack.c.bf16 %v5830_v55, %v5828_v8  ;;  %v20907_v55 = vmov 98   ;;  %v20793_v8 = vsub.f32 1.0, %v18344_v0 }
0x1ea9   :  { %14706 = vset.pattern.permute.xlu1 %v20906_v13 }
0x1eaa   :  { %14319 = vmatprep.subr.bf16.mxu0 %v14318_v34  ;;  %6346 = vperm.xlu1 %14706, %v18294_v15  }
0x1eab   :  { %14321 = vmatpush3.bf16.msra.mxu0 %v14318_v34  ;;  %6358 = vperm.xlu0 %14705, %v18344_v0   ;;  %v20794_v34 = vsub.f32 1.0, %v18294_v15 }
0x1ead   :  { %v5834_v51 = vpop.permute.xlu0 %5833 }
0x1eae   :  { %11948 = vst.msk [vmem:[%s20713_s4 + $0xe8] sm:$0xff] %vm210_vm1, %v5834_v51  ;;  %v5832_v56 = vpop.permute.xlu1 %5831  ;;  %6350 = vperm.xlu1 %14706, %v18333_v40  }
0x1eaf   :  { %11947 = vst.msk [vmem:[%s20713_s4 + $0xe0] sm:$0xff] %vm210_vm1, %v5832_v56  ;;  %v14322_v54 = vpack.c.bf16 %v5834_v51, %v5832_v56  ;;  %14708 = vset.pattern.permute.xlu0 %v20907_v55  ;;  %v20790_v51 = vsub.f32 1.0, %v18351_v44  ;;  %v20795_v56 = vsub.f32 1.0, %v18333_v40 }
0x1eb0   :  { %6463 = vperm.xlu0 %14708, %v20796_v48  }
0x1eb1   :  { %14323 = vmatprep.subr.bf16.mxu0 %v14322_v54 }
0x1eb2   :  { %14325 = vmatpush3.bf16.msra.mxu0 %v14322_v54  ;;  %6354 = vperm.xlu1 %14706, %v18339_v19   ;;  %v20792_v54 = vsub.f32 1.0, %v18339_v19 }
0x1eb4   :  { %6483 = vperm.xlu0 %14708, %v20793_v8  }
0x1eb6   :  { %14707 = vset.pattern.permute.xlu1 %v20907_v55 }
0x1eb7   :  { %6468 = vperm.xlu1 %14707, %v20794_v34  }
0x1eb8   :  { %6488 = vperm.xlu0 %14708, %v20790_v51  }
0x1ebb   :  { %v5838_v63 = vpop.permute.xlu0 %5837  ;;  %6473 = vperm.xlu1 %14707, %v20795_v56  }
0x1ebc   :  { %11950 = vst.msk [vmem:[%s20713_s4 + $0xf8] sm:$0xff] %vm210_vm1, %v5838_v63  ;;  %v5836_v7 = vpop.permute.xlu1 %5835 }
0x1ebd   :  { %11949 = vst.msk [vmem:[%s20713_s4 + $0xf0] sm:$0xff] %vm210_vm1, %v5836_v7  ;;  %v14326_v36 = vpack.c.bf16 %v5838_v63, %v5836_v7 }
0x1ebf   :  { %14327 = vmatprep.subr.bf16.mxu0 %v14326_v36  ;;  %14709 = vset.pattern.permute.xlu1 %v20906_v13 }
0x1ec0   :  { %14329 = vmatpush3.bf16.msra.mxu0 %v14326_v36  ;;  %6362 = vperm.xlu1 %14709, %v18351_v44  }
0x1ec1   :  { %14347 = vmatprep.subr.bf16.mxu0 %v15716_v24 }
0x1ec3   :  { %13467 = vmatmul.mubr.msk.f32.vlgmr.msra.gmra.mrb[80].mxu0 %vm80_vm0, %v11952_v49 }
0x1ec4   :  { %13469 = vmatprep.mubr.msk.f32.mxu0 %vm80_vm0, %v11953_v3  ;;  %14349 = vmatpush3.bf16.msra.mxu0 %v15716_v24 }
0x1ec5   :  { %14351 = vmatprep.subr.bf16.mxu0 %v15721_v26  ;;  %14710 = vset.pattern.permute.xlu1 %v20907_v55 }
0x1ec6   :  { %6478 = vperm.xlu1 %14710, %v20792_v54  }
0x1ec7   :  { %13470 = vmatmul.mubr.msk.f32.gmra.mrb[82].mxu0 %vm80_vm0, %v11954_v43 }
0x1ec8   :  { %13472 = vmatprep.mubr.msk.f32.mxu0 %vm80_vm0, %v11955_v53  ;;  %14353 = vmatpush3.bf16.msra.mxu0 %v15721_v26 }
0x1ec9   :  { %14355 = vmatprep.subr.bf16.mxu0 %v15732_v29 }
0x1eca   :  { %14711 = vset.pattern.permute.xlu1 %v20906_v13 }
0x1ecb   :  { %13473 = vmatmul.mubr.msk.f32.gmra.mrb[84].mxu0 %vm80_vm0, %v11956_v23  ;;  %6366 = vperm.xlu1 %14711, %v18356_v22  }
0x1ecc   :  { %13475 = vmatprep.mubr.msk.f32.mxu0 %vm80_vm0, %v11957_v45  ;;  %14357 = vmatpush3.bf16.msra.mxu0 %v15732_v29 }
0x1ecd   :  { %14359 = vmatprep.subr.bf16.mxu0 %v15742_v32 }
0x1ecf   :  { %13476 = vmatmul.mubr.msk.f32.gmra.mrb[86].mxu0 %vm80_vm0, %v11958_v58  ;;  %6370 = vperm.xlu1 %14711, %v18363_v5  }
0x1ed0   :  { %14361 = vmatpush3.bf16.msra.mxu0 %v15742_v32 }
0x1ed1   :  { %14363 = vmatprep.subr.bf16.mxu0 %v15752_v35 }
0x1ed3   :  { %14712 = vset.pattern.permute.xlu1 %v20907_v55 }
0x1ed4   :  { %14365 = vmatpush3.bf16.msra.mxu0 %v15752_v35 }
0x1ed5   :  { %14367 = vmatprep.subr.bf16.mxu0 %v20903_v42 }
0x1ed8   :  { %14369 = vmatpush3.bf16.msra.mxu0 %v20903_v42 }
0x1ed9   :  { %14379 = vmatprep.subr.bf16.mxu0 %v20904_v25 }
0x1f96   :  { %v13468_v17 = vpop.f32.mrb[80].mxu0 }
0x1f97   :  { %v5964_v59 = vpop.f32.mrb[81].mxu0  ;;  %v6004_v39 = vsel %vm210_vm1, %v13468_v17, %v18160_v30 }
0x1f98   :  { %v6003_v52 = vsel %vm210_vm1, %v5964_v59, %v18162_v46 }
0x1f99   :  { %13494 = vmatprep.mubr.msk.f32.mxu1 %vm80_vm0, %v6003_v52 }
0x1f9a   :  { %v13471_v9 = vpop.f32.mrb[82].mxu0  ;;  %13495 = vmatmul.mubr.msk.f32.vlgmr.msra.gmra.mrb[80].mxu1 %vm80_vm0, %v6004_v39 }
0x1f9b   :  { %v5974_v1 = vpop.f32.mrb[83].mxu0  ;;  %14373 = vmatpush3.bf16.msra.mxu1 %v15938_v50  ;;  %v6006_v27 = vsel %vm210_vm1, %v13471_v9, %v18171_v60 }
0x1f9c   :  { %v6005_v38 = vsel %vm210_vm1, %v5974_v1, %v18174_v37  ;;  %14375 = vmatprep.subr.bf16.mxu1 %v20905_v2  ;;  %v20908_v1 = vld [vmem:[#allocation5_spill] sm:$0xff] }
0x1f9d   :  { %13497 = vmatprep.mubr.msk.f32.mxu1 %vm80_vm0, %v6005_v38 }
0x1f9e   :  { %v13474_v18 = vpop.f32.mrb[84].mxu0  ;;  %13498 = vmatmul.mubr.msk.f32.gmra.mrb[82].mxu1 %vm80_vm0, %v6006_v27 }
0x1f9f   :  { %v5984_v62 = vpop.f32.mrb[85].mxu0  ;;  %14377 = vmatpush3.bf16.msra.mxu1 %v20905_v2  ;;  %v6008_v31 = vsel %vm210_vm1, %v13474_v18, %v18186_v4 }
0x1fa0   :  { %v6007_v14 = vsel %vm210_vm1, %v5984_v62, %v18188_v41 }
0x1fa1   :  { %13500 = vmatprep.mubr.msk.f32.mxu1 %vm80_vm0, %v6007_v14 }
0x1fa2   :  { %v13477_v12 = vpop.f32.mrb[86].mxu0  ;;  %13501 = vmatmul.mubr.msk.f32.gmra.mrb[84].mxu1 %vm80_vm0, %v6008_v31 }
0x1fa3   :  { %v5994_v57 = vpop.f32.mrb[87].mxu0  ;;  %v6010_v33 = vsel %vm210_vm1, %v13477_v12, %v18210_v47  ;;  %v20909_v12 = vld [vmem:[#allocation6_spill] sm:$0xff] }
0x1fa4   :  { %v6009_v21 = vsel %vm210_vm1, %v5994_v57, %v18212_v6 }
0x1fa5   :  { %13503 = vmatprep.mubr.msk.f32.mxu1 %vm80_vm0, %v6009_v21 }
0x1fa6   :  { %13504 = vmatmul.mubr.msk.f32.gmra.mrb[86].mxu1 %vm80_vm0, %v6010_v33 }
0x206d   :  { %v13496_v63 = vpop.f32.mrb[80].mxu1 }
0x206e   :  { %v6107_v7 = vadd.f32 %v13496_v63, %v18294_v15  ;;  %v6101_v36 = vpop.f32.mrb[81].mxu1  ;;  %v20910_v63 = vld [vmem:[#allocation7_spill] sm:$0xff] }
0x206f   :  { %v6102_v49 = vadd.f32 %v18327_v28, %v6101_v36 }
0x2070   :  { %v6141_v53 = vmax.f32 %v6107_v7, 0.0  ;;  %v6383_v7 = vpop.permute.xlu1 %6382 }
0x2071   :  { %v6140_v3 = vmax.f32 %v6102_v49, 0.0  ;;  %v13499_v43 = vpop.f32.mrb[82].mxu1  ;;  %v15564_v49 = vld [vmem:[%s20712_s3] ss:$0 sm:$0xff] }
0x2072   :  { %v6117_v23 = vadd.f32 %v13499_v43, %v18339_v19  ;;  %v6111_v45 = vpop.f32.mrb[83].mxu1 }
0x2073   :  { %v6112_v58 = vadd.f32 %v18333_v40, %v6111_v45  ;;  %13530 = vmatprep.mubr.msk.f32.mxu0 %vm356_vm2, %v6140_v3 }
0x2074   :  { %13531 = vmatmul.mubr.msk.f32.vlgmr.msra.gmra.mrb[88].mxu0 %vm356_vm2, %v6141_v53  ;;  %v6143_v52 = vmax.f32 %v6117_v23, 0.0  ;;  %v6391_v53 = vpop.permute.xlu1 %6390 }
0x2075   :  { %v6142_v17 = vmax.f32 %v6112_v58, 0.0  ;;  %v13502_v59 = vpop.f32.mrb[84].mxu1  ;;  %14381 = vmatpush3.bf16.msra.mxu0 %v20904_v25  ;;  %v6387_v58 = vpop.permute.xlu0 %6386 }
0x2076   :  { %v6127_v39 = vadd.f32 %v13502_v59, %v18351_v44  ;;  %v6121_v9 = vpop.f32.mrb[85].mxu1  ;;  %14383 = vmatprep.subr.bf16.mxu0 %v20908_v1 }
0x2077   :  { %v6122_v38 = vadd.f32 %v18344_v0, %v6121_v9  ;;  %13533 = vmatprep.mubr.msk.f32.mxu0 %vm356_vm2, %v6142_v17 }
0x2078   :  { %13534 = vmatmul.mubr.msk.f32.gmra.mrb[90].mxu0 %vm356_vm2, %v6143_v52  ;;  %v6145_v62 = vmax.f32 %v6127_v39, 0.0 }
0x2079   :  { %v6144_v27 = vmax.f32 %v6122_v38, 0.0  ;;  %v13505_v18 = vpop.f32.mrb[86].mxu1  ;;  %14385 = vmatpush3.bf16.msra.mxu0 %v20908_v1 }
0x207a   :  { %v6137_v14 = vadd.f32 %v13505_v18, %v18363_v5  ;;  %v6131_v31 = vpop.f32.mrb[87].mxu1  ;;  %14387 = vmatprep.subr.bf16.mxu0 %v20909_v12  ;;  %v6395_v18 = vpop.permute.xlu1 %6394 }
0x207b   :  { %v6132_v57 = vadd.f32 %v18356_v22, %v6131_v31  ;;  %13536 = vmatprep.mubr.msk.f32.mxu0 %vm356_vm2, %v6144_v27 }
0x207c   :  { %13537 = vmatmul.mubr.msk.f32.gmra.mrb[92].mxu0 %vm356_vm2, %v6145_v62  ;;  %v6147_v33 = vmax.f32 %v6137_v14, 0.0 }
0x207d   :  { %v6146_v21 = vmax.f32 %v6132_v57, 0.0  ;;  %14389 = vmatpush3.bf16.msra.mxu0 %v20909_v12 }
0x207e   :  { %14391 = vmatprep.subr.bf16.mxu0 %v20910_v63 }
0x207f   :  { %13539 = vmatprep.mubr.msk.f32.mxu0 %vm356_vm2, %v6146_v21 }
0x2080   :  { %13540 = vmatmul.mubr.msk.f32.gmra.mrb[94].mxu0 %vm356_vm2, %v6147_v33 }
0x2081   :  { %14393 = vmatpush3.bf16.msra.mxu0 %v20910_v63 }
0x2082   :  { %14411 = vmatprep.subr.bf16.mxu0 %v15665_v10 }
0x2147   :  { %v13532_v36 = vpop.f32.mrb[88].mxu0 }
0x2148   :  { %v6244_v3 = vadd.f32 %v15564_v49, %v13532_v36  ;;  %v6238_v43 = vpop.f32.mrb[89].mxu0  ;;  %v20791_v36 = vsub.f32 1.0, %v18356_v22 }
0x2149   :  { %v6239_v23 = vadd.f32 %v15564_v49, %v6238_v43 }
0x214a   :  { %v18427_v45 = vmax.f32 %v6244_v3, 0.0 }
0x214b   :  { %v13535_v17 = vpop.f32.mrb[90].mxu0  ;;  %v18430_v52 = vmax.f32 %v6239_v23, 0.0 }
0x214c   :  { %v6414_v59 = vmul.f32 %v6387_v58, %v18427_v45  ;;  %v6254_v39 = vadd.f32 %v15564_v49, %v13535_v17  ;;  %v6248_v9 = vpop.f32.mrb[91].mxu0 }
0x214d   :  { %v6249_v38 = vadd.f32 %v15564_v49, %v6248_v9  ;;  %v6413_v14 = vmul.f32 %v6383_v7, %v18430_v52  ;;  %v6399_v7 = vpop.permute.xlu0 %6398 }
0x214e   :  { %v18432_v27 = vmax.f32 %v6254_v39, 0.0  ;;  %6431 = vrot.lane.b32.xlu0 %v6414_v59, %s15605_s11  ;;  %v20789_v39 = vsub.f32 1.0, %v18363_v5 }
0x214f   :  { %v13538_v62 = vpop.f32.mrb[92].mxu0  ;;  %v18437_v57 = vmax.f32 %v6249_v38, 0.0 }
0x2150   :  { %v6416_v31 = vmul.f32 %v6395_v18, %v18432_v27  ;;  %v6258_v21 = vpop.f32.mrb[93].mxu0  ;;  %v6264_v23 = vadd.f32 %v15564_v49, %v13538_v62 }
0x2151   :  { %v6259_v33 = vadd.f32 %v15564_v49, %v6258_v21  ;;  %v6415_v43 = vmul.f32 %v6391_v53, %v18437_v57  ;;  %v6403_v53 = vpop.permute.xlu1 %6402  ;;  %v6407_v62 = vpop.permute.xlu0 %6406 }
0x2152   :  { %6435 = vrot.lane.b32.xlu1 %v6416_v31, %s15605_s11  ;;  %6429 = vrot.lane.b32.xlu0 %v6413_v14, %s15605_s11  ;;  %v18449_v9 = vmax.f32 %v6264_v23, 0.0 }
0x2153   :  { %v13541_v3 = vpop.f32.mrb[94].mxu0  ;;  %v18443_v58 = vmax.f32 %v6259_v33, 0.0 }
0x2154   :  { %v6268_v17 = vpop.f32.mrb[95].mxu0  ;;  %v6274_v18 = vadd.f32 %v15564_v49, %v13541_v3  ;;  %v6418_v31 = vmul.f32 %v6403_v53, %v18449_v9 }
0x2155   :  { %v6269_v59 = vadd.f32 %v15564_v49, %v6268_v17  ;;  %v6417_v38 = vmul.f32 %v6399_v7, %v18443_v58  ;;  %v6411_v49 = vpop.permute.xlu1 %6410 }
0x2156   :  { %6433 = vrot.lane.b32.xlu1 %v6415_v43, %s15605_s11  ;;  %6493 = vperm.xlu0 %14708, %v20791_v36   ;;  %v18458_v21 = vmax.f32 %v6274_v18, 0.0  ;;  %v20911_v43 = vmov 100  }
0x2157   :  { %v18452_v14 = vmax.f32 %v6269_v59, 0.0 }
0x2158   :  { %v6420_v3 = vmul.f32 %v6411_v49, %v18458_v21 }
0x2159   :  { %v6419_v33 = vmul.f32 %v6407_v62, %v18452_v14  ;;  %v6347_v23 = vpop.permute.xlu1 %6346 }
0x215a   :  { %6498 = vperm.xlu0 %14708, %v20789_v39   ;;  %6437 = vrot.lane.b32.xlu1 %v6417_v38, %s15605_s11  ;;  %v6343_v38 = vpop.permute.xlu0 %6342  ;;  %v6374_v51 = vmul.f32 %v6347_v23, %v18427_v45 }
0x215b   :  { %v6373_v34 = vmul.f32 %v6343_v38, %v18430_v52 }
0x215d   :  { %v6351_v17 = vpop.permute.xlu1 %6350 }
0x215e   :  { %6439 = vrot.lane.b32.xlu1 %v6418_v31, %s15605_s11  ;;  %6441 = vrot.lane.b32.xlu0 %v6419_v33, %s15605_s11  ;;  %v6359_v53 = vpop.permute.xlu0 %6358  ;;  %v6375_v2 = vmul.f32 %v6351_v17, %v18437_v57 }
0x2161   :  { %v6355_v7 = vpop.permute.xlu1 %6354 }
0x2162   :  { %6443 = vrot.lane.b32.xlu1 %v6420_v3, %s15605_s11  ;;  %6287 = vperm.xlu0 %14708, %v18327_v28   ;;  %v6464_v31 = vpop.permute.xlu0 %6463  ;;  %v6376_v48 = vmul.f32 %v6355_v7, %v18432_v27 }
0x2165   :  { %v6469_v59 = vpop.permute.xlu1 %6468 }
0x2166   :  { %6292 = vperm.xlu1 %14712, %v18294_v15   ;;  %6297 = vperm.xlu0 %14708, %v18333_v40   ;;  %v6484_v49 = vpop.permute.xlu0 %6483 }
0x2169   :  { %v6474_v18 = vpop.permute.xlu1 %6473 }
0x216a   :  { %6302 = vperm.xlu1 %14712, %v18339_v19   ;;  %6307 = vperm.xlu0 %14708, %v18344_v0   ;;  %v6489_v39 = vpop.permute.xlu0 %6488 }
0x216d   :  { %v6363_v62 = vpop.permute.xlu1 %6362 }
0x216e   :  { %6312 = vperm.xlu1 %14712, %v18351_v44   ;;  %6317 = vperm.xlu0 %14708, %v18356_v22  }
0x2171   :  { %v6479_v33 = vpop.permute.xlu1 %6478 }
0x2172   :  { %6322 = vperm.xlu1 %14712, %v18363_v5   ;;  %14713 = vset.pattern.permute.xlu0 %v20911_v43 }
0x2175   :  { %v6367_v3 = vpop.permute.xlu1 %6366 }
0x2176   :  { %14714 = vset.pattern.permute.xlu1 %v20911_v43  ;;  %v6379_v17 = vmul.f32 %v6367_v3, %v18452_v14 }
0x2179   :  { %v6371_v36 = vpop.permute.xlu1 %6370 }
0x21c0   :  { %v6432_v54 = vpop.permute.xlu0 %6431 }
0x21c1   :  { %v6454_v8 = vadd.f32 %v6432_v54, %v6374_v51 }
0x21c3   :  { %v6502_v56 = vmul.f32 %v6469_v59, %v6454_v8  ;;  %v6377_v8 = vmul.f32 %v6359_v53, %v18443_v58 }
0x21c4   :  { %v6436_v43 = vpop.permute.xlu1 %6435  ;;  %v6430_v63 = vpop.permute.xlu0 %6429 }
0x21c5   :  { %v6456_v12 = vadd.f32 %v6436_v43, %v6376_v48  ;;  %v6453_v1 = vadd.f32 %v6430_v63, %v6373_v34  ;;  %6519 = vrot.lane.b32.xlu1 %v6502_v56, %s15605_s11  ;;  %v6378_v34 = vmul.f32 %v6363_v62, %v18449_v9 }
0x21c7   :  { %v6504_v55 = vmul.f32 %v6479_v33, %v6456_v12  ;;  %v6501_v13 = vmul.f32 %v6464_v31, %v6453_v1 }
0x21c8   :  { %v6434_v25 = vpop.permute.xlu1 %6433 }
0x21c9   :  { %v6455_v23 = vadd.f32 %v6434_v25, %v6375_v2  ;;  %6523 = vrot.lane.b32.xlu1 %v6504_v55, %s15605_s11  ;;  %6517 = vrot.lane.b32.xlu0 %v6501_v13, %s15605_s11  ;;  %v6380_v13 = vmul.f32 %v6371_v36, %v18458_v21  ;;  %v20912_v36 = vmov 99  }
0x21cb   :  { %v6503_v51 = vmul.f32 %v6474_v18, %v6455_v23 }
0x21cc   :  { %v6438_v54 = vpop.permute.xlu1 %6437 }
0x21cd   :  { %v6457_v7 = vadd.f32 %v6438_v54, %v6377_v8  ;;  %6521 = vrot.lane.b32.xlu0 %v6503_v51, %s15605_s11 }
0x21cf   :  { %v6505_v48 = vmul.f32 %v6484_v49, %v6457_v7 }
0x21d0   :  { %v6440_v56 = vpop.permute.xlu1 %6439 }
0x21d1   :  { %v6458_v1 = vadd.f32 %v6440_v56, %v6378_v34  ;;  %6525 = vrot.lane.b32.xlu0 %v6505_v48, %s15605_s11 }
0x21d3   :  { %v6506_v12 = vmul.f32 %v6489_v39, %v6458_v1 }
0x21d4   :  { %v6444_v25 = vpop.permute.xlu1 %6443 }
0x21d5   :  { %6527 = vrot.lane.b32.xlu1 %v6506_v12, %s15605_s11  ;;  %v6494_v2 = vpop.permute.xlu0 %6493  ;;  %v6460_v55 = vadd.f32 %v6444_v25, %v6380_v13 }
0x21d9   :  { %v6499_v63 = vpop.permute.xlu0 %6498 }
0x21da   :  { %v6508_v43 = vmul.f32 %v6499_v63, %v6460_v55 }
0x21dc   :  { %6531 = vrot.lane.b32.xlu1 %v6508_v43, %s15605_s11 }
0x21dd   :  { %v6442_v59 = vpop.permute.xlu0 %6441 }
0x21de   :  { %v6459_v38 = vadd.f32 %v6442_v59, %v6379_v17 }
0x21e0   :  { %v6507_v18 = vmul.f32 %v6494_v2, %v6459_v38  ;;  %6739 = vperm.xlu1 %14714, %v18294_v15  }
0x21e1   :  { %v6288_v53 = vpop.permute.xlu0 %6287 }
0x21e2   :  { %6529 = vrot.lane.b32.xlu0 %v6507_v18, %s15605_s11  ;;  %v6325_v51 = vmul.f32 %v6288_v53, %v18430_v52 }
0x21e4   :  { %6743 = vperm.xlu1 %14714, %v18333_v40  }
0x21e5   :  { %v6293_v39 = vpop.permute.xlu1 %6292  ;;  %v6298_v31 = vpop.permute.xlu0 %6297 }
0x21e6   :  { %6735 = vperm.xlu0 %14713, %v18327_v28   ;;  %v6326_v54 = vmul.f32 %v6293_v39, %v18427_v45  ;;  %v6327_v56 = vmul.f32 %v6298_v31, %v18437_v57  ;;  %v15565_v39 = vld [vmem:[%s20712_s3 + $0x1] ss:$0 sm:$0xff] }
0x21e8   :  { %6751 = vperm.xlu1 %14714, %v18344_v0  }
0x21e9   :  { %v6303_v62 = vpop.permute.xlu1 %6302  ;;  %v6308_v49 = vpop.permute.xlu0 %6307 }
0x21ea   :  { %6747 = vperm.xlu0 %14713, %v18339_v19   ;;  %v6328_v12 = vmul.f32 %v6303_v62, %v18432_v27  ;;  %v6329_v2 = vmul.f32 %v6308_v49, %v18443_v58 }
0x21ec   :  { %6759 = vperm.xlu1 %14714, %v18356_v22  }
0x21ed   :  { %v6313_v33 = vpop.permute.xlu1 %6312  ;;  %v6318_v23 = vpop.permute.xlu0 %6317 }
0x21ee   :  { %6755 = vperm.xlu0 %14713, %v18351_v44   ;;  %v6330_v27 = vmul.f32 %v6313_v33, %v18449_v9  ;;  %v6331_v58 = vmul.f32 %v6318_v23, %v18452_v14 }
0x21f0   :  { %14715 = vset.pattern.permute.xlu1 %v20912_v36 }
0x21f1   :  { %v6323_v3 = vpop.permute.xlu1 %6322 }
0x21f2   :  { %6763 = vperm.xlu0 %14713, %v18363_v5   ;;  %v6332_v17 = vmul.f32 %v6323_v3, %v18458_v21 }
0x21f6   :  { %14716 = vset.pattern.permute.xlu0 %v20912_v36 }
0x2237   :  { %v6520_v8 = vpop.permute.xlu1 %6519 }
0x2238   :  { %v18505_v34 = vadd.f32 %v6520_v8, %v6326_v54 }
0x223b   :  { %v6518_v7 = vpop.permute.xlu0 %6517  ;;  %v6524_v1 = vpop.permute.xlu1 %6523 }
0x223c   :  { %v18503_v48 = vadd.f32 %v6518_v7, %v6325_v51  ;;  %v18515_v45 = vadd.f32 %v6524_v1, %v6328_v12 }
0x223e   :  { %13550 = vmatprep.mubr.msk.f32.mxu1 %vm210_vm1, %v18503_v48 }
0x223f   :  { %13551 = vmatmul.mubr.msk.f32.vlgmr.msra.gmra.mrb[88].mxu1 %vm210_vm1, %v18505_v34  ;;  %v6522_v25 = vpop.permute.xlu0 %6521 }
0x2240   :  { %v18513_v52 = vadd.f32 %v6522_v25, %v6327_v56 }
0x2242   :  { %13553 = vmatprep.mubr.msk.f32.mxu1 %vm210_vm1, %v18513_v52 }
0x2243   :  { %13554 = vmatmul.mubr.msk.f32.gmra.mrb[90].mxu1 %vm210_vm1, %v18515_v45  ;;  %v6526_v57 = vpop.permute.xlu0 %6525 }
0x2244   :  { %v18522_v13 = vadd.f32 %v6526_v57, %v6329_v2 }
0x2246   :  { %13556 = vmatprep.mubr.msk.f32.mxu1 %vm210_vm1, %v18522_v13 }
0x2247   :  { %v6528_v55 = vpop.permute.xlu1 %6527 }
0x2248   :  { %v18527_v63 = vadd.f32 %v6528_v55, %v6330_v27 }
0x224a   :  { %13557 = vmatmul.mubr.msk.f32.gmra.mrb[92].mxu1 %vm210_vm1, %v18527_v63 }
0x224e   :  { %v6532_v43 = vpop.permute.xlu1 %6531 }
0x224f   :  { %v18535_v18 = vadd.f32 %v6532_v43, %v6332_v17 }
0x2254   :  { %v6530_v59 = vpop.permute.xlu0 %6529 }
0x2255   :  { %v18533_v38 = vadd.f32 %v6530_v59, %v6331_v58 }
0x2257   :  { %13559 = vmatprep.mubr.msk.f32.mxu1 %vm210_vm1, %v18533_v38 }
0x2258   :  { %13560 = vmatmul.mubr.msk.f32.gmra.mrb[94].mxu1 %vm210_vm1, %v18535_v18 }
0x225f   :  { %v18546_v23 = vpop.permute.xlu1 %6739 }
0x2263   :  { %v18553_v57 = vpop.permute.xlu1 %6743 }
0x2265   :  { %v18544_v3 = vpop.permute.xlu0 %6735 }
0x2269   :  { %v18550_v2 = vpop.permute.xlu0 %6747 }
0x226d   :  { %v18560_v17 = vpop.permute.xlu0 %6755 }
0x2312   :  { %v13552_v9 = vpop.f32.mrb[88].mxu1 }
0x2313   :  { %v6645_v14 = vadd.f32 %v15565_v39, %v13552_v9  ;;  %v6639_v53 = vpop.f32.mrb[89].mxu1 }
0x2314   :  { %v6640_v62 = vadd.f32 %v15565_v39, %v6639_v53  ;;  %v18562_v53 = vpop.permute.xlu1 %6751 }
0x2315   :  { %15139 = vtanh.f32 %v6645_v14 }
0x2316   :  { %15141 = vtanh.f32 %v6640_v62  ;;  %v13555_v21 = vpop.f32.mrb[90].mxu1 }
0x2317   :  { %v6655_v31 = vadd.f32 %v15565_v39, %v13555_v21  ;;  %v6649_v33 = vpop.f32.mrb[91].mxu1 }
0x2318   :  { %v6650_v49 = vadd.f32 %v15565_v39, %v6649_v33 }
0x2319   :  { %15143 = vtanh.f32 %v6655_v31 }
0x231a   :  { %15145 = vtanh.f32 %v6650_v49 }
0x231d   :  { %v13558_v8 = vpop.f32.mrb[92].mxu1 }
0x231e   :  { %v6665_v51 = vadd.f32 %v15565_v39, %v13558_v8  ;;  %v6659_v54 = vpop.f32.mrb[93].mxu1 }
0x231f   :  { %v15140_v7 = vpop.eup %15139  ;;  %v6660_v56 = vadd.f32 %v15565_v39, %v6659_v54 }
0x2320   :  { %v15142_v1 = vpop.eup %15141  ;;  %15147 = vtanh.f32 %v6665_v51  ;;  %v6791_v12 = vmul.f32 %v15140_v7, %v18546_v23 }
0x2321   :  { %15149 = vtanh.f32 %v6660_v56  ;;  %v6790_v25 = vmul.f32 %v15142_v1, %v18544_v3 }
0x2322   :  { %6808 = vrot.lane.b32.xlu0 %v6791_v12, %s15605_s11 }
0x2323   :  { %v15144_v27 = vpop.eup %15143  ;;  %6806 = vrot.lane.b32.xlu1 %v6790_v25, %s15605_s11  ;;  %v18568_v25 = vpop.permute.xlu0 %6763 }
0x2324   :  { %v15146_v55 = vpop.eup %15145  ;;  %v6793_v58 = vmul.f32 %v15144_v27, %v18550_v2 }
0x2325   :  { %v6792_v43 = vmul.f32 %v15146_v55, %v18553_v57 }
0x2326   :  { %6812 = vrot.lane.b32.xlu0 %v6793_v58, %s15605_s11  ;;  %v18572_v58 = vpop.permute.xlu1 %6759 }
0x2327   :  { %6810 = vrot.lane.b32.xlu1 %v6792_v43, %s15605_s11 }
0x232a   :  { %v15148_v59 = vpop.eup %15147 }
0x232b   :  { %v15150_v9 = vpop.eup %15149  ;;  %v6795_v21 = vmul.f32 %v15148_v59, %v18560_v17  ;;  %v13561_v33 = vpop.f32.mrb[94].mxu1  ;;  %v12000_v59 = vmul.f32 -1.442695, %v6645_v14 }
0x232c   :  { %v6794_v8 = vmul.f32 %v15150_v9, %v18562_v53  ;;  %v6675_v54 = vadd.f32 %v15565_v39, %v13561_v33  ;;  %v6669_v7 = vpop.f32.mrb[95].mxu1  ;;  %v11999_v9 = vmul.f32 -1.442695, %v6640_v62  ;;  %v12004_v33 = vmul.f32 -1.442695, %v6665_v51 }
0x232d   :  { %6816 = vrot.lane.b32.xlu0 %v6795_v21, %s15605_s11  ;;  %v6670_v1 = vadd.f32 %v15565_v39, %v6669_v7  ;;  %v12002_v21 = vmul.f32 -1.442695, %v6655_v31  ;;  %v12001_v39 = vmul.f32 -1.442695, %v6650_v49 }
0x232e   :  { %15151 = vtanh.f32 %v6675_v54  ;;  %6814 = vrot.lane.b32.xlu1 %v6794_v8, %s15605_s11  ;;  %v12003_v8 = vmul.f32 -1.442695, %v6660_v56  ;;  %v12006_v51 = vmul.f32 -1.442695, %v6675_v54 }
0x232f   :  { %15153 = vtanh.f32 %v6670_v1  ;;  %v12005_v56 = vmul.f32 -1.442695, %v6670_v1 }
0x2330   :  { %15155 = vpow2.f32 %v12000_v59 }
0x2331   :  { %15157 = vpow2.f32 %v11999_v9 }
0x2332   :  { %15159 = vpow2.f32 %v12002_v21 }
0x2333   :  { %15161 = vpow2.f32 %v12001_v39 }
0x2334   :  { %15163 = vpow2.f32 %v12004_v33 }
0x2335   :  { %15165 = vpow2.f32 %v12003_v8 }
0x2338   :  { %v15152_v12 = vpop.eup %15151 }
0x2339   :  { %v6797_v27 = vmul.f32 %v15152_v12, %v18568_v25  ;;  %v15154_v55 = vpop.eup %15153 }
0x233a   :  { %v6796_v43 = vmul.f32 %v15154_v55, %v18572_v58  ;;  %v15156_v7 = vpop.eup %15155 }
0x233b   :  { %6820 = vrot.lane.b32.xlu0 %v6797_v27, %s15605_s11  ;;  %v15158_v12 = vpop.eup %15157  ;;  %v6703_v27 = vadd.f32 1.0, %v15156_v7 }
0x233c   :  { %6818 = vrot.lane.b32.xlu1 %v6796_v43, %s15605_s11  ;;  %v15160_v36 = vpop.eup %15159  ;;  %v6702_v42 = vadd.f32 1.0, %v15158_v12 }
0x233d   :  { %v15162_v55 = vpop.eup %15161  ;;  %15167 = vrcp.f32 %v6703_v27  ;;  %v6705_v43 = vadd.f32 1.0, %v15160_v36 }
0x233e   :  { %15169 = vrcp.f32 %v6702_v42  ;;  %v6704_v14 = vadd.f32 1.0, %v15162_v55  ;;  %v15164_v62 = vpop.eup %15163 }
0x233f   :  { %v15166_v31 = vpop.eup %15165  ;;  %15171 = vrcp.f32 %v6705_v43  ;;  %v6707_v49 = vadd.f32 1.0, %v15164_v62 }
0x2340   :  { %15173 = vrcp.f32 %v6704_v14  ;;  %v6706_v59 = vadd.f32 1.0, %v15166_v31 }
0x2341   :  { %15175 = vrcp.f32 %v6707_v49 }
0x2342   :  { %15177 = vrcp.f32 %v6706_v59 }
0x2343   :  { %15179 = vpow2.f32 %v12006_v51 }
0x2344   :  { %15181 = vpow2.f32 %v12005_v56 }
0x2347   :  { %v15168_v9 = vpop.eup %15167 }
0x2348   :  { %v15170_v21 = vpop.eup %15169  ;;  %v6767_v39 = vmul.f32 %v15168_v9, %v18546_v23 }
0x2349   :  { %v15172_v33 = vpop.eup %15171  ;;  %v6766_v42 = vmul.f32 %v15170_v21, %v18544_v3 }
0x234a   :  { %v15174_v36 = vpop.eup %15173  ;;  %v6775_v8 = vmul.f32 %v6767_v39, %v18505_v34  ;;  %v6769_v7 = vmul.f32 %v15172_v33, %v18550_v2 }
0x234b   :  { %v6774_v12 = vmul.f32 %v6766_v42, %v18503_v48  ;;  %v6768_v54 = vmul.f32 %v15174_v36, %v18553_v57  ;;  %v15176_v1 = vpop.eup %15175 }
0x234c   :  { %v15178_v27 = vpop.eup %15177  ;;  %v6777_v55 = vmul.f32 %v6769_v7, %v18515_v45  ;;  %v6783_v43 = vsub.f32 %v18505_v34, %v6775_v8  ;;  %v6771_v2 = vmul.f32 %v15176_v1, %v18560_v17 }
0x234d   :  { %v15180_v23 = vpop.eup %15179  ;;  %v6776_v14 = vmul.f32 %v6768_v54, %v18513_v52  ;;  %v6782_v3 = vsub.f32 %v18503_v48, %v6774_v12  ;;  %v6770_v57 = vmul.f32 %v15178_v27, %v18562_v53 }
0x234e   :  { %v15182_v31 = vpop.eup %15181  ;;  %v6709_v56 = vadd.f32 1.0, %v15180_v23  ;;  %v6785_v9 = vsub.f32 %v18515_v45, %v6777_v55  ;;  %v6779_v17 = vmul.f32 %v6771_v2, %v18527_v63 }
0x234f   :  { %v6708_v21 = vadd.f32 1.0, %v15182_v31  ;;  %v6784_v34 = vsub.f32 %v18513_v52, %v6776_v14  ;;  %v6778_v45 = vmul.f32 %v6770_v57, %v18522_v13 }
0x2350   :  { %15183 = vrcp.f32 %v6709_v56  ;;  %v6787_v7 = vsub.f32 %v18527_v63, %v6779_v17 }
0x2351   :  { %15185 = vrcp.f32 %v6708_v21  ;;  %v6786_v54 = vsub.f32 %v18522_v13, %v6778_v45 }
0x235a   :  { %v15184_v13 = vpop.eup %15183 }
0x235b   :  { %v15186_v23 = vpop.eup %15185  ;;  %v6773_v14 = vmul.f32 %v15184_v13, %v18568_v25 }
0x2394   :  { %v6809_v62 = vpop.permute.xlu0 %6808 }
0x2395   :  { %v6831_v49 = vadd.f32 %v6809_v62, %v6783_v43  ;;  %v6807_v59 = vpop.permute.xlu1 %6806  ;;  %v6772_v62 = vmul.f32 %v15186_v23, %v18572_v58 }
0x2396   :  { %v6830_v51 = vadd.f32 %v6807_v59, %v6782_v3  ;;  %v6781_v3 = vmul.f32 %v6773_v14, %v18535_v18 }
0x2397   :  { %v6839_v48 = vsel %vm210_vm1, %v6831_v49, %v18160_v30  ;;  %v6780_v31 = vmul.f32 %v6772_v62, %v18533_v38 }
0x2398   :  { %v6813_v39 = vpop.permute.xlu0 %6812  ;;  %v6838_v33 = vsel %vm210_vm1, %v6830_v51, %v18162_v46  ;;  %v6789_v59 = vsub.f32 %v18535_v18, %v6781_v3  ;;  %v15566_v18 = vld [vmem:[%s20712_s3 + $0x2] ss:$0 sm:$0xff] }
0x2399   :  { %v6833_v42 = vadd.f32 %v6813_v39, %v6785_v9  ;;  %v6811_v36 = vpop.permute.xlu1 %6810  ;;  %13578 = vmatprep.mubr.msk.f32.mxu0 %vm80_vm0, %v6838_v33  ;;  %v6788_v2 = vsub.f32 %v18533_v38, %v6780_v31 }
0x239a   :  { %v6832_v53 = vadd.f32 %v6811_v36, %v6784_v34  ;;  %13579 = vmatmul.mubr.msk.f32.vlgmr.msra.gmra.mrb[96].mxu0 %vm80_vm0, %v6839_v48 }
0x239b   :  { %14413 = vmatpush3.bf16.msra.mxu0 %v15665_v10  ;;  %v6841_v8 = vsel %vm210_vm1, %v6833_v42, %v18171_v60 }
0x239c   :  { %v6840_v52 = vsel %vm210_vm1, %v6832_v53, %v18174_v37  ;;  %14415 = vmatprep.subr.bf16.mxu0 %v15667_v11 }
0x239d   :  { %13581 = vmatprep.mubr.msk.f32.mxu0 %vm80_vm0, %v6840_v52 }
0x239e   :  { %13582 = vmatmul.mubr.msk.f32.gmra.mrb[98].mxu0 %vm80_vm0, %v6841_v8 }
0x239f   :  { %v6817_v12 = vpop.permute.xlu0 %6816  ;;  %14417 = vmatpush3.bf16.msra.mxu0 %v15667_v11 }
0x23a0   :  { %v6835_v1 = vadd.f32 %v6817_v12, %v6787_v7  ;;  %v6815_v27 = vpop.permute.xlu1 %6814  ;;  %14419 = vmatprep.subr.bf16.mxu0 %v15686_v16 }
0x23a1   :  { %v6834_v55 = vadd.f32 %v6815_v27, %v6786_v54 }
0x23a2   :  { %v6843_v63 = vsel %vm210_vm1, %v6835_v1, %v18186_v4 }
0x23a3   :  { %v6842_v43 = vsel %vm210_vm1, %v6834_v55, %v18188_v41  ;;  %14421 = vmatpush3.bf16.msra.mxu0 %v15686_v16 }
0x23a4   :  { %13584 = vmatprep.mubr.msk.f32.mxu0 %vm80_vm0, %v6842_v43  ;;  %14423 = vmatprep.subr.bf16.mxu0 %v15703_v20 }
0x23a5   :  { %13585 = vmatmul.mubr.msk.f32.gmra.mrb[100].mxu0 %vm80_vm0, %v6843_v63 }
0x23a7   :  { %14425 = vmatpush3.bf16.msra.mxu0 %v15703_v20 }
0x23a8   :  { %14451 = vmatprep.subr.bf16.mxu0 %v15938_v50 }
0x23ad   :  { %v6821_v49 = vpop.permute.xlu0 %6820 }
0x23ae   :  { %v6837_v51 = vadd.f32 %v6821_v49, %v6789_v59  ;;  %v6819_v57 = vpop.permute.xlu1 %6818 }
0x23af   :  { %v6836_v56 = vadd.f32 %v6819_v57, %v6788_v2 }
0x23b0   :  { %v6845_v25 = vsel %vm210_vm1, %v6837_v51, %v18210_v47 }
0x23b1   :  { %v6844_v9 = vsel %vm210_vm1, %v6836_v56, %v18212_v6 }
0x23b2   :  { %13587 = vmatprep.mubr.msk.f32.mxu0 %vm80_vm0, %v6844_v9 }
0x23b3   :  { %13588 = vmatmul.mubr.msk.f32.gmra.mrb[102].mxu0 %vm80_vm0, %v6845_v25 }
0x246d   :  { %v13580_v58 = vpop.f32.mrb[96].mxu0 }
0x246e   :  { %v18635_v21 = vadd.f32 %v15566_v18, %v13580_v58  ;;  %v6936_v38 = vpop.f32.mrb[97].mxu0 }
0x246f   :  { %v18637_v39 = vadd.f32 %v15566_v18, %v6936_v38 }
0x2470   :  { %7033 = vrot.lane.b32.xlu0 %v18635_v21, %s15607_s14  ;;  %v12016_v54 = vmul.f32 -1.442695, %v18635_v21 }
0x2471   :  { %7031 = vrot.lane.b32.xlu1 %v18637_v39, %s15607_s14  ;;  %v13583_v34 = vpop.f32.mrb[98].mxu0  ;;  %v12015_v1 = vmul.f32 -1.442695, %v18637_v39 }
0x2472   :  { %v18643_v33 = vadd.f32 %v15566_v18, %v13583_v34  ;;  %v6946_v48 = vpop.f32.mrb[99].mxu0  ;;  %15187 = vpow2.f32 %v12016_v54 }
0x2473   :  { %v18645_v42 = vadd.f32 %v15566_v18, %v6946_v48  ;;  %15189 = vpow2.f32 %v12015_v1 }
0x2474   :  { %7037 = vrot.lane.b32.xlu0 %v18643_v33, %s15607_s14  ;;  %v12018_v27 = vmul.f32 -1.442695, %v18643_v33 }
0x2475   :  { %7035 = vrot.lane.b32.xlu1 %v18645_v42, %s15607_s14  ;;  %v12017_v55 = vmul.f32 -1.442695, %v18645_v42 }
0x2476   :  { %15191 = vpow2.f32 %v12018_v27 }
0x2477   :  { %15193 = vpow2.f32 %v12017_v55 }
0x2478   :  { %v13586_v36 = vpop.f32.mrb[100].mxu0 }
0x2479   :  { %v18651_v17 = vadd.f32 %v15566_v18, %v13586_v36  ;;  %v6956_v53 = vpop.f32.mrb[101].mxu0 }
0x247a   :  { %v18653_v45 = vadd.f32 %v15566_v18, %v6956_v53 }
0x247b   :  { %7041 = vrot.lane.b32.xlu0 %v18651_v17, %s15607_s14  ;;  %v12020_v43 = vmul.f32 -1.442695, %v18651_v17 }
0x247c   :  { %7039 = vrot.lane.b32.xlu1 %v18653_v45, %s15607_s14  ;;  %v12019_v63 = vmul.f32 -1.442695, %v18653_v45  ;;  %v15188_v13 = vpop.eup %15187 }
0x247d   :  { %15195 = vpow2.f32 %v12020_v43  ;;  %v15190_v23 = vpop.eup %15189  ;;  %v7000_v14 = vadd.f32 1.0, %v15188_v13 }
0x247e   :  { %15197 = vpow2.f32 %v12019_v63  ;;  %v6999_v3 = vadd.f32 1.0, %v15190_v23 }
0x247f   :  { %15199 = vrcp.f32 %v7000_v14 }
0x2480   :  { %v15192_v62 = vpop.eup %15191  ;;  %15201 = vrcp.f32 %v6999_v3 }
0x2481   :  { %v15194_v31 = vpop.eup %15193  ;;  %v7002_v49 = vadd.f32 1.0, %v15192_v62 }
0x2482   :  { %v7001_v59 = vadd.f32 1.0, %v15194_v31 }
0x2483   :  { %15203 = vrcp.f32 %v7002_v49 }
0x2484   :  { %15205 = vrcp.f32 %v7001_v59 }
0x2486   :  { %v13589_v52 = vpop.f32.mrb[102].mxu0 }
0x2487   :  { %v18659_v8 = vadd.f32 %v15566_v18, %v13589_v52  ;;  %v6966_v7 = vpop.f32.mrb[103].mxu0  ;;  %v15196_v2 = vpop.eup %15195 }
0x2488   :  { %v18661_v12 = vadd.f32 %v15566_v18, %v6966_v7  ;;  %v15198_v51 = vpop.eup %15197  ;;  %v7004_v57 = vadd.f32 1.0, %v15196_v2 }
0x2489   :  { %7045 = vrot.lane.b32.xlu0 %v18659_v8, %s15607_s14  ;;  %v7003_v56 = vadd.f32 1.0, %v15198_v51  ;;  %v12022_v9 = vmul.f32 -1.442695, %v18659_v8  ;;  %v18675_v58 = vpop.eup %15199 }
0x248a   :  { %7043 = vrot.lane.b32.xlu1 %v18661_v12, %s15607_s14  ;;  %v12021_v25 = vmul.f32 -1.442695, %v18661_v12  ;;  %15207 = vrcp.f32 %v7004_v57  ;;  %v18677_v38 = vpop.eup %15201 }
0x248b   :  { %15209 = vrcp.f32 %v7003_v56 }
0x248c   :  { %15211 = vpow2.f32 %v12022_v9 }
0x248d   :  { %15213 = vpow2.f32 %v12021_v25  ;;  %v18682_v53 = vpop.eup %15203  ;;  %v15567_v25 = vld [vmem:[%s20711_s1 + $0x108] sm:$0xff] }
0x248e   :  { %v18685_v7 = vpop.eup %15205 }
0x2494   :  { %v18691_v55 = vpop.eup %15207 }
0x2495   :  { %v18693_v43 = vpop.eup %15209 }
0x2496   :  { %v15212_v13 = vpop.eup %15211 }
0x2497   :  { %v15214_v62 = vpop.eup %15213  ;;  %v7006_v31 = vadd.f32 1.0, %v15212_v13  ;;  %v20919_v13 = vsub.f32 1.0, %v18351_v44 }
0x2498   :  { %v7005_v49 = vadd.f32 1.0, %v15214_v62 }
0x2499   :  { %15215 = vrcp.f32 %v7006_v31 }
0x249a   :  { %15217 = vrcp.f32 %v7005_v49 }
0x24a3   :  { %v18699_v59 = vpop.eup %15215 }
0x24a4   :  { %v18701_v51 = vpop.eup %15217 }
0x24e2   :  { %v7034_v18 = vpop.permute.xlu0 %7033 }
0x24e3   :  { %v7056_v34 = vmul.f32 %v18675_v58, %v7034_v18  ;;  %v7032_v48 = vpop.permute.xlu1 %7031  ;;  %v15568_v18 = vld [vmem:[%s20711_s1 + $0x100] sm:$0xff] }
0x24e4   :  { %v7055_v36 = vmul.f32 %v18677_v38, %v7032_v48  ;;  %v20913_v48 = vsub.f32 1.0, %v18327_v28  ;;  %v20917_v28 = vsub.f32 1.0, %v18339_v19  ;;  %v15574_v19 = vld [vmem:[%s20711_s1 + $0x138] sm:$0xff] }
0x24e5   :  { %7073 = vrot.lane.b32.xlu0 %v7056_v34, %s15609_s15  ;;  %v15569_v34 = vld [vmem:[%s20711_s1 + $0x110] sm:$0xff] }
0x24e6   :  { %7071 = vrot.lane.b32.xlu1 %v7055_v36, %s15609_s15  ;;  %v7038_v52 = vpop.permute.xlu0 %7037  ;;  %v20914_v36 = vsub.f32 1.0, %v18333_v40  ;;  %v15573_v40 = vld [vmem:[%s20711_s1 + $0x128] sm:$0xff] }
0x24e7   :  { %v7058_v54 = vmul.f32 %v18682_v53, %v7038_v52  ;;  %v7036_v1 = vpop.permute.xlu1 %7035  ;;  %v20915_v52 = vsub.f32 1.0, %v18294_v15  ;;  %v15572_v15 = vld [vmem:[%s20711_s1 + $0x130] sm:$0xff] }
0x24e8   :  { %v7057_v27 = vmul.f32 %v18685_v7, %v7036_v1  ;;  %v15571_v1 = vld [vmem:[%s20711_s1 + $0x118] sm:$0xff] }
0x24e9   :  { %7077 = vrot.lane.b32.xlu0 %v7058_v54, %s15609_s15  ;;  %v15570_v54 = vld [vmem:[%s20711_s1 + $0x120] sm:$0xff] }
0x24ea   :  { %7075 = vrot.lane.b32.xlu1 %v7057_v27, %s15609_s15  ;;  %v20916_v27 = vsub.f32 1.0, %v18344_v0  ;;  %v20920_v0 = vsub.f32 1.0, %v18363_v5 }
0x24ed   :  { %v7042_v63 = vpop.permute.xlu0 %7041 }
0x24ee   :  { %v7060_v23 = vmul.f32 %v18691_v55, %v7042_v63  ;;  %v7040_v14 = vpop.permute.xlu1 %7039  ;;  %v20918_v63 = vsub.f32 1.0, %v18356_v22 }
0x24ef   :  { %v7059_v3 = vmul.f32 %v18693_v43, %v7040_v14 }
0x24f0   :  { %7081 = vrot.lane.b32.xlu0 %v7060_v23, %s15609_s15 }
0x24f1   :  { %7079 = vrot.lane.b32.xlu1 %v7059_v3, %s15609_s15 }
0x24fb   :  { %v7046_v2 = vpop.permute.xlu0 %7045 }
0x24fc   :  { %v7062_v57 = vmul.f32 %v18699_v59, %v7046_v2  ;;  %v7044_v56 = vpop.permute.xlu1 %7043 }
0x24fd   :  { %v7061_v9 = vmul.f32 %v18701_v51, %v7044_v56 }
0x24fe   :  { %7085 = vrot.lane.b32.xlu0 %v7062_v57, %s15609_s15 }
0x24ff   :  { %7083 = vrot.lane.b32.xlu1 %v7061_v9, %s15609_s15 }
0x2502   :  { %7180 = vperm.xlu0 %14716, %v15567_v25  }
0x2503   :  { %7176 = vperm.xlu1 %14715, %v15568_v18  }
0x2506   :  { %7184 = vperm.xlu0 %14716, %v15569_v34  }
0x2507   :  { %7216 = vperm.xlu1 %14715, %v20913_v48  }
0x250a   :  { %7224 = vperm.xlu0 %14716, %v20914_v36  }
0x250b   :  { %7220 = vperm.xlu1 %14715, %v20915_v52  }
0x250e   :  { %7192 = vperm.xlu0 %14716, %v15570_v54  }
0x250f   :  { %7188 = vperm.xlu1 %14715, %v15571_v1  }
0x2512   :  { %7232 = vperm.xlu0 %14716, %v20916_v27  }
0x2513   :  { %7228 = vperm.xlu1 %14715, %v20917_v28  }
0x2516   :  { %7200 = vperm.xlu0 %14716, %v15572_v15  }
0x2517   :  { %7196 = vperm.xlu1 %14715, %v15573_v40  }
0x251a   :  { %7240 = vperm.xlu0 %14716, %v20918_v63  }
0x251b   :  { %7236 = vperm.xlu1 %14715, %v20919_v13  }
0x251e   :  { %14717 = vset.pattern.permute.xlu0 %v20853_v61 }
0x251f   :  { %7204 = vperm.xlu1 %14715, %v15574_v19  }
0x2523   :  { %7244 = vperm.xlu1 %14715, %v20920_v0  }
0x2527   :  { %14718 = vset.pattern.permute.xlu1 %v20853_v61 }
0x2557   :  { %v7074_v23 = vpop.permute.xlu0 %7073 }
0x2558   :  { %v7096_v14 = vadd.f32 %v7074_v23, %v18635_v21  ;;  %v7072_v22 = vpop.permute.xlu1 %7071 }
0x2559   :  { %v7095_v62 = vadd.f32 %v7072_v22, %v18637_v39 }
0x255a   :  { %15219 = vtanh.f32 %v7096_v14 }
0x255b   :  { %15221 = vtanh.f32 %v7095_v62  ;;  %v7078_v44 = vpop.permute.xlu0 %7077  ;;  %v7112_v62 = vsub.f32 1.0, %v18675_v58 }
0x255c   :  { %v7098_v3 = vadd.f32 %v7078_v44, %v18643_v33  ;;  %v7076_v31 = vpop.permute.xlu1 %7075 }
0x255d   :  { %v7097_v49 = vadd.f32 %v7076_v31, %v18645_v42  ;;  %v7160_v31 = vmul.f32 %v18675_v58, %v18160_v30 }
0x255e   :  { %15223 = vtanh.f32 %v7098_v3  ;;  %v7111_v3 = vsub.f32 1.0, %v18677_v38 }
0x255f   :  { %15225 = vtanh.f32 %v7097_v49 }
0x2562   :  { %v7082_v5 = vpop.permute.xlu0 %7081 }
0x2563   :  { %v7100_v2 = vadd.f32 %v7082_v5, %v18651_v17  ;;  %v7080_v57 = vpop.permute.xlu1 %7079 }
0x2564   :  { %v15220_v56 = vpop.eup %15219  ;;  %v7099_v21 = vadd.f32 %v7080_v57, %v18653_v45 }
0x2565   :  { %v15222_v9 = vpop.eup %15221  ;;  %15227 = vtanh.f32 %v7100_v2  ;;  %7129 = vrot.lane.b32.xlu1 %v15220_v56, %s15605_s11  ;;  %v7159_v2 = vmul.f32 %v18677_v38, %v18162_v46  ;;  %v7161_v38 = vmul.f32 %v18685_v7, %v18174_v37 }
0x2566   :  { %15229 = vtanh.f32 %v7099_v21  ;;  %7127 = vrot.lane.b32.xlu0 %v15222_v9, %s15605_s11  ;;  %v7114_v21 = vsub.f32 1.0, %v18682_v53 }
0x2568   :  { %v15224_v39 = vpop.eup %15223 }
0x2569   :  { %v15226_v33 = vpop.eup %15225  ;;  %7133 = vrot.lane.b32.xlu1 %v15224_v39, %s15605_s11 }
0x256a   :  { %7131 = vrot.lane.b32.xlu0 %v15226_v33, %s15605_s11  ;;  %v7113_v33 = vsub.f32 1.0, %v18685_v7  ;;  %v7116_v7 = vsub.f32 1.0, %v18691_v55 }
0x256f   :  { %v15228_v42 = vpop.eup %15227 }
0x2570   :  { %v15230_v25 = vpop.eup %15229  ;;  %7137 = vrot.lane.b32.xlu1 %v15228_v42, %s15605_s11  ;;  %v7086_v17 = vpop.permute.xlu0 %7085 }
0x2571   :  { %7135 = vrot.lane.b32.xlu0 %v15230_v25, %s15605_s11  ;;  %v7102_v45 = vadd.f32 %v7086_v17, %v18659_v8  ;;  %v7084_v18 = vpop.permute.xlu1 %7083  ;;  %v7162_v17 = vmul.f32 %v18682_v53, %v18171_v60 }
0x2572   :  { %v7101_v34 = vadd.f32 %v7084_v18, %v18661_v12 }
0x2573   :  { %15231 = vtanh.f32 %v7102_v45 }
0x2574   :  { %15233 = vtanh.f32 %v7101_v34 }
0x257d   :  { %v15232_v48 = vpop.eup %15231 }
0x257e   :  { %v15234_v36 = vpop.eup %15233  ;;  %7141 = vrot.lane.b32.xlu1 %v15232_v48, %s15605_s11 }
0x257f   :  { %7139 = vrot.lane.b32.xlu0 %v15234_v36, %s15605_s11 }
0x2581   :  { %v7181_v27 = vpop.permute.xlu0 %7180 }
0x2582   :  { %v7177_v52 = vpop.permute.xlu1 %7176 }
0x2585   :  { %v7185_v15 = vpop.permute.xlu0 %7184 }
0x2586   :  { %v7217_v54 = vpop.permute.xlu1 %7216 }
0x2587   :  { %v7247_v18 = vmul.f32 %v7217_v54, %v18162_v46 }
0x2589   :  { %v7225_v63 = vpop.permute.xlu0 %7224 }
0x258a   :  { %v7221_v1 = vpop.permute.xlu1 %7220  ;;  %v7249_v53 = vmul.f32 %v7225_v63, %v18174_v37  ;;  %v7163_v37 = vmul.f32 %v18693_v43, %v18188_v41 }
0x258b   :  { %v7248_v42 = vmul.f32 %v7221_v1, %v18160_v30 }
0x258d   :  { %v7193_v13 = vpop.permute.xlu0 %7192 }
0x258e   :  { %v7189_v28 = vpop.permute.xlu1 %7188 }
0x2591   :  { %v7233_v12 = vpop.permute.xlu0 %7232 }
0x2592   :  { %v7229_v40 = vpop.permute.xlu1 %7228 }
0x2593   :  { %v7250_v30 = vmul.f32 %v7229_v40, %v18171_v60  ;;  %v7164_v60 = vmul.f32 %v18691_v55, %v18186_v4 }
0x2595   :  { %v18767_v23 = vpop.permute.xlu0 %7200 }
0x2596   :  { %v7197_v8 = vpop.permute.xlu1 %7196 }
0x2599   :  { %v18771_v22 = vpop.permute.xlu0 %7240 }
0x259a   :  { %v7237_v19 = vpop.permute.xlu1 %7236 }
0x259e   :  { %v18765_v0 = vpop.permute.xlu1 %7204 }
0x25a2   :  { %v18769_v14 = vpop.permute.xlu1 %7244 }
0x25d7   :  { %v7130_v44 = vpop.permute.xlu1 %7129 }
0x25d8   :  { %v7152_v49 = vmul.f32 %v7130_v44, %v7112_v62  ;;  %v7128_v5 = vpop.permute.xlu0 %7127 }
0x25d9   :  { %v7151_v57 = vmul.f32 %v7128_v5, %v7111_v3  ;;  %v7252_v5 = vmul.f32 %v7237_v19, %v18186_v4  ;;  %v12031_v4 = vld [vmem:[%s20709_s0 + $0x140] sm:$0xff]  ;;  %v7165_v19 = vmul.f32 %v18701_v51, %v18212_v6 }
0x25da   :  { %v7168_v56 = vadd.f32 %v7160_v31, %v7152_v49  ;;  %13606 = vmatprep.mubr.msk.f32.mxu1 %vm80_vm0, %v12031_v4 }
0x25db   :  { %v7167_v9 = vadd.f32 %v7159_v2, %v7151_v57  ;;  %v7134_v39 = vpop.permute.xlu1 %7133  ;;  %v7251_v57 = vmul.f32 %v7233_v12, %v18188_v41  ;;  %v7166_v41 = vmul.f32 %v18699_v59, %v18210_v47 }
0x25dc   :  { %v7208_v25 = vmul.f32 %v7181_v27, %v7168_v56  ;;  %v7154_v58 = vmul.f32 %v7134_v39, %v7114_v21  ;;  %v7132_v45 = vpop.permute.xlu0 %7131  ;;  %v7115_v27 = vsub.f32 1.0, %v18693_v43  ;;  %v7118_v43 = vsub.f32 1.0, %v18699_v59 }
0x25dd   :  { %v7207_v34 = vmul.f32 %v7177_v52, %v7167_v9  ;;  %v7153_v48 = vmul.f32 %v7132_v45, %v7113_v33  ;;  %v7117_v39 = vsub.f32 1.0, %v18701_v51 }
0x25de   :  { %v18787_v36 = vadd.f32 %v7248_v42, %v7208_v25  ;;  %v7170_v62 = vadd.f32 %v7162_v17, %v7154_v58  ;;  %v7254_v25 = vmul.f32 %v18769_v14, %v18210_v47  ;;  %v7253_v58 = vmul.f32 %v18771_v22, %v18212_v6 }
0x25df   :  { %v18789_v44 = vadd.f32 %v7247_v18, %v7207_v34  ;;  %v7169_v3 = vadd.f32 %v7161_v38, %v7153_v48 }
0x25e0   :  { %v7210_v1 = vmul.f32 %v7189_v28, %v7170_v62  ;;  %7273 = vrot.lane.b32.xlu1 %v18787_v36, %s15605_s11 }
0x25e1   :  { %v7209_v46 = vmul.f32 %v7185_v15, %v7169_v3  ;;  %7271 = vrot.lane.b32.xlu0 %v18789_v44, %s15605_s11 }
0x25e2   :  { %v18798_v52 = vadd.f32 %v7250_v30, %v7210_v1  ;;  %v7138_v54 = vpop.permute.xlu1 %7137  ;;  %v12032_v30 = vld [vmem:[%s20709_s0 + $0x148] sm:$0xff]  ;;  %v12033_v1 = vld [vmem:[%s20709_s0 + $0x150] sm:$0xff] }
0x25e3   :  { %v18801_v31 = vadd.f32 %v7249_v53, %v7209_v46  ;;  %v7156_v28 = vmul.f32 %v7138_v54, %v7116_v7  ;;  %v7136_v40 = vpop.permute.xlu0 %7135  ;;  %v12034_v53 = vld [vmem:[%s20709_s0 + $0x158] sm:$0xff]  ;;  %v12035_v46 = vld [vmem:[%s20709_s0 + $0x160] sm:$0xff]  ;;  %v12036_v7 = vld [vmem:[%s20709_s0 + $0x168] sm:$0xff] }
0x25e4   :  { %v7155_v15 = vmul.f32 %v7136_v40, %v7115_v27  ;;  %7277 = vrot.lane.b32.xlu1 %v18798_v52, %s15605_s11  ;;  %v12037_v54 = vld [vmem:[%s20709_s0 + $0x170] sm:$0xff]  ;;  %v12038_v27 = vld [vmem:[%s20709_s0 + $0x178] sm:$0xff]  ;;  %v18921_v40 = vld [vmem:[%s20711_s1 + $0x148] sm:$0xff] }
0x25e5   :  { %v7172_v63 = vadd.f32 %v7164_v60, %v7156_v28  ;;  %7275 = vrot.lane.b32.xlu0 %v18801_v31, %s15605_s11  ;;  %v20921_v60 = vld [vmem:[#allocation2_spill] sm:$0xff]  ;;  %v20922_v28 = vld [vmem:[#allocation4_spill] sm:$0xff] }
0x25e6   :  { %v7171_v49 = vadd.f32 %v7163_v37, %v7155_v15 }
0x25e7   :  { %v7212_v2 = vmul.f32 %v7197_v8, %v7172_v63 }
0x25e8   :  { %v7211_v55 = vmul.f32 %v7193_v13, %v7171_v49 }
0x25e9   :  { %v18813_v56 = vadd.f32 %v7252_v5, %v7212_v2 }
0x25ea   :  { %v18815_v21 = vadd.f32 %v7251_v57, %v7211_v55  ;;  %v20923_v55 = vld [vmem:[#allocation3_spill] sm:$0xff] }
0x25eb   :  { %7281 = vrot.lane.b32.xlu1 %v18813_v56, %s15605_s11 }
0x25ec   :  { %7279 = vrot.lane.b32.xlu0 %v18815_v21, %s15605_s11 }
0x25f0   :  { %v7142_v9 = vpop.permute.xlu1 %7141 }
0x25f1   :  { %v7158_v8 = vmul.f32 %v7142_v9, %v7118_v43  ;;  %v7140_v13 = vpop.permute.xlu0 %7139 }
0x25f2   :  { %v7157_v12 = vmul.f32 %v7140_v13, %v7117_v39 }
0x25f3   :  { %v7174_v33 = vadd.f32 %v7166_v41, %v7158_v8 }
0x25f4   :  { %v7173_v42 = vadd.f32 %v7165_v19, %v7157_v12 }
0x25f5   :  { %v7214_v17 = vmul.f32 %v18765_v0, %v7174_v33  ;;  %v18954_v33 = vld [vmem:[%s20711_s1 + $0x140] sm:$0xff] }
0x25f6   :  { %v7213_v59 = vmul.f32 %v18767_v23, %v7173_v42  ;;  %v18960_v42 = vld [vmem:[%s20711_s1 + $0x158] sm:$0xff] }
0x25f7   :  { %v18837_v45 = vadd.f32 %v7254_v25, %v7214_v17  ;;  %v18965_v25 = vld [vmem:[%s20711_s1 + $0x150] sm:$0xff]  ;;  %v18972_v17 = vld [vmem:[%s20711_s1 + $0x168] sm:$0xff] }
0x25f8   :  { %v18839_v18 = vadd.f32 %v7253_v58, %v7213_v59  ;;  %v18977_v58 = vld [vmem:[%s20711_s1 + $0x160] sm:$0xff]  ;;  %v18984_v59 = vld [vmem:[%s20711_s1 + $0x178] sm:$0xff] }
0x25f9   :  { %7285 = vrot.lane.b32.xlu1 %v18837_v45, %s15605_s11 }
0x25fa   :  { %7283 = vrot.lane.b32.xlu0 %v18839_v18, %s15605_s11 }
0x25fd   :  { %7834 = vperm.xlu1 %14718, %v18921_v40  }
0x25fe   :  { %7830 = vperm.xlu0 %14717, %v18954_v33  }
0x2601   :  { %7838 = vperm.xlu1 %14718, %v18965_v25  }
0x2602   :  { %7842 = vperm.xlu0 %14717, %v18960_v42  }
0x2605   :  { %7846 = vperm.xlu1 %14718, %v18977_v58  }
0x2606   :  { %7850 = vperm.xlu0 %14717, %v18972_v17  }
0x260a   :  { %7858 = vperm.xlu0 %14717, %v18984_v59  }
0x2652   :  { %v7274_v51 = vpop.permute.xlu1 %7273 }
0x2653   :  { %12024 = vst.msk [vmem:[%s20713_s4 + $0x108] sm:$0xff] %vm210_vm1, %v7274_v51  ;;  %v7272_v47 = vpop.permute.xlu0 %7271 }
0x2654   :  { %12023 = vst.msk [vmem:[%s20713_s4 + $0x100] sm:$0xff] %vm210_vm1, %v7272_v47  ;;  %v14394_v6 = vpack.c.bf16 %v7274_v51, %v7272_v47  ;;  %v18989_v51 = vld [vmem:[%s20711_s1 + $0x170] sm:$0xff]  ;;  %v20924_v47 = vmov 96  }
0x2655   :  { %7854 = vperm.xlu1 %14718, %v18989_v51   ;;  %14720 = vset.pattern.permute.xlu0 %v20924_v47 }
0x2656   :  { %v7278_v0 = vpop.permute.xlu1 %7277  ;;  %14395 = vmatprep.subr.bf16.mxu1 %v14394_v6  ;;  %7794 = vperm.xlu0 %14720, %v18921_v40  }
0x2657   :  { %12026 = vst.msk [vmem:[%s20713_s4 + $0x118] sm:$0xff] %vm210_vm1, %v7278_v0  ;;  %14397 = vmatpush3.bf16.msra.mxu1 %v14394_v6  ;;  %v7276_v23 = vpop.permute.xlu0 %7275  ;;  %v20814_v6 = vsub.f32 1.0, %v18954_v33 }
0x2658   :  { %12025 = vst.msk [vmem:[%s20713_s4 + $0x110] sm:$0xff] %vm210_vm1, %v7276_v23  ;;  %v14398_v14 = vpack.c.bf16 %v7278_v0, %v7276_v23  ;;  %v20925_v0 = vmov 98   ;;  %v20813_v23 = vsub.f32 1.0, %v18921_v40 }
0x2659   :  { %14719 = vset.pattern.permute.xlu1 %v20924_v47 }
0x265a   :  { %14399 = vmatprep.subr.bf16.mxu1 %v14398_v14  ;;  %7790 = vperm.xlu1 %14719, %v18954_v33  }
0x265b   :  { %14401 = vmatpush3.bf16.msra.mxu1 %v14398_v14  ;;  %7802 = vperm.xlu0 %14720, %v18960_v42   ;;  %v20812_v14 = vsub.f32 1.0, %v18965_v25 }
0x265d   :  { %v7282_v22 = vpop.permute.xlu1 %7281 }
0x265e   :  { %12028 = vst.msk [vmem:[%s20713_s4 + $0x128] sm:$0xff] %vm210_vm1, %v7282_v22  ;;  %v7280_v34 = vpop.permute.xlu0 %7279  ;;  %7798 = vperm.xlu1 %14719, %v18965_v25  }
0x265f   :  { %12027 = vst.msk [vmem:[%s20713_s4 + $0x120] sm:$0xff] %vm210_vm1, %v7280_v34  ;;  %v14402_v38 = vpack.c.bf16 %v7282_v22, %v7280_v34  ;;  %7806 = vperm.xlu0 %14720, %v18977_v58   ;;  %v20811_v22 = vsub.f32 1.0, %v18960_v42  ;;  %v20810_v34 = vsub.f32 1.0, %v18977_v58 }
0x2661   :  { %14403 = vmatprep.subr.bf16.mxu1 %v14402_v38 }
0x2662   :  { %14405 = vmatpush3.bf16.msra.mxu1 %v14402_v38  ;;  %14721 = vset.pattern.permute.xlu1 %v20925_v0  ;;  %v20809_v38 = vsub.f32 1.0, %v18972_v17 }
0x2663   :  { %7911 = vperm.xlu1 %14721, %v20814_v6   ;;  %7810 = vperm.xlu0 %14720, %v18972_v17  }
0x2667   :  { %7916 = vperm.xlu1 %14721, %v20813_v23   ;;  %14722 = vset.pattern.permute.xlu0 %v20925_v0 }
0x2668   :  { %7926 = vperm.xlu0 %14722, %v20811_v22  }
0x266b   :  { %v7286_v48 = vpop.permute.xlu1 %7285  ;;  %7921 = vperm.xlu1 %14721, %v20812_v14  }
0x266c   :  { %12030 = vst.msk [vmem:[%s20713_s4 + $0x138] sm:$0xff] %vm210_vm1, %v7286_v48  ;;  %v7284_v62 = vpop.permute.xlu0 %7283  ;;  %7931 = vperm.xlu0 %14722, %v20810_v34  }
0x266d   :  { %12029 = vst.msk [vmem:[%s20713_s4 + $0x130] sm:$0xff] %vm210_vm1, %v7284_v62  ;;  %v14406_v3 = vpack.c.bf16 %v7286_v48, %v7284_v62 }
0x266f   :  { %14407 = vmatprep.subr.bf16.mxu1 %v14406_v3  ;;  %14723 = vset.pattern.permute.xlu1 %v20924_v47 }
0x2670   :  { %14409 = vmatpush3.bf16.msra.mxu1 %v14406_v3  ;;  %7814 = vperm.xlu1 %14723, %v18989_v51  }
0x2671   :  { %14427 = vmatprep.subr.bf16.mxu1 %v15716_v24 }
0x2673   :  { %13607 = vmatmul.mubr.msk.f32.vlgmr.msra.gmra.mrb[96].mxu1 %vm80_vm0, %v12032_v30 }
0x2674   :  { %13609 = vmatprep.mubr.msk.f32.mxu1 %vm80_vm0, %v12033_v1  ;;  %14429 = vmatpush3.bf16.msra.mxu1 %v15716_v24 }
0x2675   :  { %14431 = vmatprep.subr.bf16.mxu1 %v15721_v26  ;;  %7818 = vperm.xlu1 %14723, %v18984_v59  }
0x2677   :  { %13610 = vmatmul.mubr.msk.f32.gmra.mrb[98].mxu1 %vm80_vm0, %v12034_v53 }
0x2678   :  { %13612 = vmatprep.mubr.msk.f32.mxu1 %vm80_vm0, %v12035_v46  ;;  %14433 = vmatpush3.bf16.msra.mxu1 %v15721_v26 }
0x2679   :  { %14435 = vmatprep.subr.bf16.mxu1 %v15732_v29  ;;  %14724 = vset.pattern.permute.xlu1 %v20925_v0 }
0x267a   :  { %7936 = vperm.xlu1 %14724, %v20809_v38  }
0x267b   :  { %13613 = vmatmul.mubr.msk.f32.gmra.mrb[100].mxu1 %vm80_vm0, %v12036_v7 }
0x267c   :  { %13615 = vmatprep.mubr.msk.f32.mxu1 %vm80_vm0, %v12037_v54  ;;  %14437 = vmatpush3.bf16.msra.mxu1 %v15732_v29 }
0x267d   :  { %14439 = vmatprep.subr.bf16.mxu1 %v15742_v32 }
0x267f   :  { %13616 = vmatmul.mubr.msk.f32.gmra.mrb[102].mxu1 %vm80_vm0, %v12038_v27 }
0x2680   :  { %14441 = vmatpush3.bf16.msra.mxu1 %v15742_v32 }
0x2681   :  { %14443 = vmatprep.subr.bf16.mxu1 %v15752_v35 }
0x2684   :  { %14445 = vmatpush3.bf16.msra.mxu1 %v15752_v35 }
0x2685   :  { %14447 = vmatprep.subr.bf16.mxu1 %v20921_v60 }
0x2688   :  { %14449 = vmatpush3.bf16.msra.mxu1 %v20921_v60 }
0x2689   :  { %14459 = vmatprep.subr.bf16.mxu1 %v20922_v28 }
0x2746   :  { %v13608_v37 = vpop.f32.mrb[96].mxu1 }
0x2747   :  { %v7412_v15 = vpop.f32.mrb[97].mxu1  ;;  %v7452_v49 = vsel %vm210_vm1, %v13608_v37, %v18787_v36 }
0x2748   :  { %v7451_v63 = vsel %vm210_vm1, %v7412_v15, %v18789_v44 }
0x2749   :  { %13634 = vmatprep.mubr.msk.f32.mxu0 %vm80_vm0, %v7451_v63 }
0x274a   :  { %v13611_v5 = vpop.f32.mrb[98].mxu1  ;;  %13635 = vmatmul.mubr.msk.f32.vlgmr.msra.gmra.mrb[104].mxu0 %vm80_vm0, %v7452_v49 }
0x274b   :  { %v7422_v2 = vpop.f32.mrb[99].mxu1  ;;  %14453 = vmatpush3.bf16.msra.mxu0 %v15938_v50  ;;  %v7454_v43 = vsel %vm210_vm1, %v13611_v5, %v18798_v52 }
0x274c   :  { %v7453_v57 = vsel %vm210_vm1, %v7422_v2, %v18801_v31  ;;  %14455 = vmatprep.subr.bf16.mxu0 %v20923_v55  ;;  %v20926_v2 = vld [vmem:[#allocation5_spill] sm:$0xff] }
0x274d   :  { %13637 = vmatprep.mubr.msk.f32.mxu0 %vm80_vm0, %v7453_v57 }
0x274e   :  { %v13614_v9 = vpop.f32.mrb[100].mxu1  ;;  %13638 = vmatmul.mubr.msk.f32.gmra.mrb[106].mxu0 %vm80_vm0, %v7454_v43 }
0x274f   :  { %v7432_v39 = vpop.f32.mrb[101].mxu1  ;;  %14457 = vmatpush3.bf16.msra.mxu0 %v20923_v55  ;;  %v7456_v41 = vsel %vm210_vm1, %v13614_v9, %v18813_v56 }
0x2750   :  { %v7455_v4 = vsel %vm210_vm1, %v7432_v39, %v18815_v21 }
0x2751   :  { %13640 = vmatprep.mubr.msk.f32.mxu0 %vm80_vm0, %v7455_v4 }
0x2752   :  { %v13617_v8 = vpop.f32.mrb[102].mxu1  ;;  %13641 = vmatmul.mubr.msk.f32.gmra.mrb[108].mxu0 %vm80_vm0, %v7456_v41 }
0x2753   :  { %v7442_v13 = vpop.f32.mrb[103].mxu1  ;;  %v7458_v12 = vsel %vm210_vm1, %v13617_v8, %v18837_v45  ;;  %v20927_v8 = vld [vmem:[#allocation6_spill] sm:$0xff] }
0x2754   :  { %v7457_v19 = vsel %vm210_vm1, %v7442_v13, %v18839_v18 }
0x2755   :  { %13643 = vmatprep.mubr.msk.f32.mxu0 %vm80_vm0, %v7457_v19 }
0x2756   :  { %13644 = vmatmul.mubr.msk.f32.gmra.mrb[110].mxu0 %vm80_vm0, %v7458_v12 }
0x281d   :  { %v13636_v48 = vpop.f32.mrb[104].mxu0 }
0x281e   :  { %v7555_v62 = vadd.f32 %v13636_v48, %v18921_v40  ;;  %v7549_v3 = vpop.f32.mrb[105].mxu0  ;;  %v20928_v48 = vld [vmem:[#allocation7_spill] sm:$0xff] }
0x281f   :  { %v7550_v30 = vadd.f32 %v18954_v33, %v7549_v3  ;;  %v7835_v3 = vpop.permute.xlu1 %7834 }
0x2820   :  { %v7589_v46 = vmax.f32 %v7555_v62, 0.0 }
0x2821   :  { %v7588_v1 = vmax.f32 %v7550_v30, 0.0  ;;  %v13639_v53 = vpop.f32.mrb[106].mxu0  ;;  %v15575_v30 = vld [vmem:[%s20712_s3] ss:$0 sm:$0xff] }
0x2822   :  { %v7565_v7 = vadd.f32 %v13639_v53, %v18960_v42  ;;  %v7559_v54 = vpop.f32.mrb[107].mxu0 }
0x2823   :  { %v7560_v27 = vadd.f32 %v18965_v25, %v7559_v54  ;;  %13670 = vmatprep.mubr.msk.f32.mxu1 %vm356_vm2, %v7588_v1 }
0x2824   :  { %13671 = vmatmul.mubr.msk.f32.vlgmr.msra.gmra.mrb[104].mxu1 %vm356_vm2, %v7589_v46  ;;  %v7591_v63 = vmax.f32 %v7565_v7, 0.0  ;;  %v7831_v46 = vpop.permute.xlu0 %7830 }
0x2825   :  { %v7590_v37 = vmax.f32 %v7560_v27, 0.0  ;;  %v13642_v15 = vpop.f32.mrb[108].mxu0  ;;  %14461 = vmatpush3.bf16.msra.mxu1 %v20922_v28 }
0x2826   :  { %v7575_v49 = vadd.f32 %v13642_v15, %v18972_v17  ;;  %v7569_v5 = vpop.f32.mrb[109].mxu0  ;;  %14463 = vmatprep.subr.bf16.mxu1 %v20926_v2 }
0x2827   :  { %v7570_v57 = vadd.f32 %v18977_v58, %v7569_v5  ;;  %13673 = vmatprep.mubr.msk.f32.mxu1 %vm356_vm2, %v7590_v37 }
0x2828   :  { %13674 = vmatmul.mubr.msk.f32.gmra.mrb[106].mxu1 %vm356_vm2, %v7591_v63  ;;  %v7593_v39 = vmax.f32 %v7575_v49, 0.0 }
0x2829   :  { %v7592_v43 = vmax.f32 %v7570_v57, 0.0  ;;  %v13645_v9 = vpop.f32.mrb[110].mxu0  ;;  %14465 = vmatpush3.bf16.msra.mxu1 %v20926_v2  ;;  %v7839_v57 = vpop.permute.xlu1 %7838 }
0x282a   :  { %v7585_v4 = vadd.f32 %v13645_v9, %v18984_v59  ;;  %v7579_v41 = vpop.f32.mrb[111].mxu0  ;;  %14467 = vmatprep.subr.bf16.mxu1 %v20927_v8  ;;  %v7843_v9 = vpop.permute.xlu0 %7842 }
0x282b   :  { %v7580_v13 = vadd.f32 %v18989_v51, %v7579_v41  ;;  %13676 = vmatprep.mubr.msk.f32.mxu1 %vm356_vm2, %v7592_v43 }
0x282c   :  { %13677 = vmatmul.mubr.msk.f32.gmra.mrb[108].mxu1 %vm356_vm2, %v7593_v39  ;;  %v7595_v12 = vmax.f32 %v7585_v4, 0.0 }
0x282d   :  { %v7594_v19 = vmax.f32 %v7580_v13, 0.0  ;;  %14469 = vmatpush3.bf16.msra.mxu1 %v20927_v8 }
0x282e   :  { %14471 = vmatprep.subr.bf16.mxu1 %v20928_v48 }
0x282f   :  { %13679 = vmatprep.mubr.msk.f32.mxu1 %vm356_vm2, %v7594_v19 }
0x2830   :  { %13680 = vmatmul.mubr.msk.f32.gmra.mrb[110].mxu1 %vm356_vm2, %v7595_v12 }
0x2831   :  { %14473 = vmatpush3.bf16.msra.mxu1 %v20928_v48 }
0x2832   :  { %14491 = vmatprep.subr.bf16.mxu1 %v15665_v10 }
0x28f7   :  { %v13672_v62 = vpop.f32.mrb[104].mxu1 }
0x28f8   :  { %v7692_v1 = vadd.f32 %v15575_v30, %v13672_v62  ;;  %v7686_v53 = vpop.f32.mrb[105].mxu1  ;;  %v20808_v62 = vsub.f32 1.0, %v18989_v51 }
0x28f9   :  { %v7687_v7 = vadd.f32 %v15575_v30, %v7686_v53 }
0x28fa   :  { %v19052_v54 = vmax.f32 %v7692_v1, 0.0 }
0x28fb   :  { %v13675_v27 = vpop.f32.mrb[106].mxu1  ;;  %v19055_v15 = vmax.f32 %v7687_v7, 0.0 }
0x28fc   :  { %v7862_v37 = vmul.f32 %v7835_v3, %v19052_v54  ;;  %v7702_v63 = vadd.f32 %v15575_v30, %v13675_v27  ;;  %v7696_v49 = vpop.f32.mrb[107].mxu1 }
0x28fd   :  { %v7697_v5 = vadd.f32 %v15575_v30, %v7696_v49  ;;  %v7861_v4 = vmul.f32 %v7831_v46, %v19055_v15  ;;  %v7847_v46 = vpop.permute.xlu1 %7846 }
0x28fe   :  { %v19057_v43 = vmax.f32 %v7702_v63, 0.0  ;;  %7879 = vrot.lane.b32.xlu1 %v7862_v37, %s15605_s11  ;;  %v20807_v63 = vsub.f32 1.0, %v18984_v59 }
0x28ff   :  { %v13678_v39 = vpop.f32.mrb[108].mxu1  ;;  %v19062_v13 = vmax.f32 %v7697_v5, 0.0 }
0x2900   :  { %v7864_v41 = vmul.f32 %v7843_v9, %v19057_v43  ;;  %v7706_v19 = vpop.f32.mrb[109].mxu1  ;;  %v7712_v53 = vadd.f32 %v15575_v30, %v13678_v39 }
0x2901   :  { %v7707_v12 = vadd.f32 %v15575_v30, %v7706_v19  ;;  %v7863_v1 = vmul.f32 %v7839_v57, %v19062_v13  ;;  %v7851_v57 = vpop.permute.xlu0 %7850  ;;  %v7855_v39 = vpop.permute.xlu1 %7854 }
0x2902   :  { %7877 = vrot.lane.b32.xlu1 %v7861_v4, %s15605_s11  ;;  %7883 = vrot.lane.b32.xlu0 %v7864_v41, %s15605_s11  ;;  %v19074_v49 = vmax.f32 %v7712_v53, 0.0 }
0x2903   :  { %v13681_v3 = vpop.f32.mrb[110].mxu1  ;;  %v19068_v7 = vmax.f32 %v7707_v12, 0.0 }
0x2904   :  { %v7716_v27 = vpop.f32.mrb[111].mxu1  ;;  %v7722_v9 = vadd.f32 %v15575_v30, %v13681_v3  ;;  %v7866_v41 = vmul.f32 %v7851_v57, %v19074_v49 }
0x2905   :  { %v7717_v37 = vadd.f32 %v15575_v30, %v7716_v27  ;;  %v7865_v5 = vmul.f32 %v7847_v46, %v19068_v7  ;;  %v7859_v30 = vpop.permute.xlu0 %7858  ;;  %v7791_v53 = vpop.permute.xlu1 %7790 }
0x2906   :  { %7941 = vperm.xlu1 %14724, %v20808_v62   ;;  %7881 = vrot.lane.b32.xlu0 %v7863_v1, %s15605_s11  ;;  %v19083_v19 = vmax.f32 %v7722_v9, 0.0  ;;  %v20929_v1 = vmov 100   ;;  %v7821_v6 = vmul.f32 %v7791_v53, %v19055_v15 }
0x2907   :  { %v19077_v4 = vmax.f32 %v7717_v37, 0.0 }
0x2908   :  { %v7868_v3 = vmul.f32 %v7859_v30, %v19083_v19 }
0x2909   :  { %v7867_v12 = vmul.f32 %v7855_v39, %v19077_v4  ;;  %v7799_v27 = vpop.permute.xlu1 %7798  ;;  %v7795_v37 = vpop.permute.xlu0 %7794 }
0x290a   :  { %7946 = vperm.xlu1 %14724, %v20807_v63   ;;  %7885 = vrot.lane.b32.xlu0 %v7865_v5, %s15605_s11  ;;  %v7822_v38 = vmul.f32 %v7795_v37, %v19052_v54  ;;  %v7823_v55 = vmul.f32 %v7799_v27, %v19062_v13 }
0x290d   :  { %v7912_v46 = vpop.permute.xlu1 %7911  ;;  %v7803_v9 = vpop.permute.xlu0 %7802 }
0x290e   :  { %7889 = vrot.lane.b32.xlu1 %v7867_v12, %s15605_s11  ;;  %7887 = vrot.lane.b32.xlu0 %v7866_v41, %s15605_s11  ;;  %v7824_v14 = vmul.f32 %v7803_v9, %v19057_v43 }
0x2911   :  { %v7917_v5 = vpop.permute.xlu1 %7916  ;;  %v7807_v39 = vpop.permute.xlu0 %7806 }
0x2912   :  { %7735 = vperm.xlu1 %14724, %v18954_v33   ;;  %7891 = vrot.lane.b32.xlu0 %v7868_v3, %s15605_s11 }
0x2915   :  { %v7922_v57 = vpop.permute.xlu1 %7921  ;;  %v7811_v12 = vpop.permute.xlu0 %7810 }
0x2916   :  { %7745 = vperm.xlu1 %14724, %v18965_v25   ;;  %7740 = vperm.xlu0 %14722, %v18921_v40  }
0x2919   :  { %v7815_v41 = vpop.permute.xlu1 %7814  ;;  %v7927_v3 = vpop.permute.xlu0 %7926 }
0x291a   :  { %7755 = vperm.xlu1 %14724, %v18977_v58   ;;  %7750 = vperm.xlu0 %14722, %v18960_v42  }
0x291d   :  { %v7819_v30 = vpop.permute.xlu1 %7818  ;;  %v7932_v62 = vpop.permute.xlu0 %7931 }
0x291e   :  { %7765 = vperm.xlu1 %14724, %v18989_v51   ;;  %7760 = vperm.xlu0 %14722, %v18972_v17  }
0x2921   :  { %v7937_v63 = vpop.permute.xlu1 %7936 }
0x2922   :  { %7770 = vperm.xlu0 %14722, %v18984_v59   ;;  %14725 = vset.pattern.permute.xlu1 %v20929_v1 }
0x2926   :  { %14726 = vset.pattern.permute.xlu0 %v20929_v1 }
0x2970   :  { %v7880_v34 = vpop.permute.xlu1 %7879 }
0x2971   :  { %v7902_v22 = vadd.f32 %v7880_v34, %v7822_v38 }
0x2973   :  { %v7950_v23 = vmul.f32 %v7917_v5, %v7902_v22  ;;  %v7825_v22 = vmul.f32 %v7807_v39, %v19068_v7 }
0x2974   :  { %v7878_v1 = vpop.permute.xlu1 %7877  ;;  %v7884_v48 = vpop.permute.xlu0 %7883 }
0x2975   :  { %v7901_v8 = vadd.f32 %v7878_v1, %v7821_v6  ;;  %v7904_v2 = vadd.f32 %v7884_v48, %v7824_v14  ;;  %7967 = vrot.lane.b32.xlu0 %v7950_v23, %s15605_s11  ;;  %v7826_v6 = vmul.f32 %v7811_v12, %v19074_v49  ;;  %v7827_v1 = vmul.f32 %v7815_v41, %v19077_v4 }
0x2977   :  { %v7949_v0 = vmul.f32 %v7912_v46, %v7901_v8  ;;  %v7952_v47 = vmul.f32 %v7927_v3, %v7904_v2 }
0x2978   :  { %v7882_v28 = vpop.permute.xlu0 %7881 }
0x2979   :  { %v7903_v60 = vadd.f32 %v7882_v28, %v7823_v55  ;;  %7965 = vrot.lane.b32.xlu1 %v7949_v0, %s15605_s11  ;;  %7971 = vrot.lane.b32.xlu0 %v7952_v47, %s15605_s11 }
0x297b   :  { %v7951_v34 = vmul.f32 %v7922_v57, %v7903_v60  ;;  %v7828_v60 = vmul.f32 %v7819_v30, %v19083_v19 }
0x297c   :  { %v7886_v38 = vpop.permute.xlu0 %7885 }
0x297d   :  { %v7905_v53 = vadd.f32 %v7886_v38, %v7825_v22  ;;  %7969 = vrot.lane.b32.xlu1 %v7951_v34, %s15605_s11 }
0x297f   :  { %v7953_v23 = vmul.f32 %v7932_v62, %v7905_v53 }
0x2980   :  { %v7888_v14 = vpop.permute.xlu0 %7887 }
0x2981   :  { %v7906_v2 = vadd.f32 %v7888_v14, %v7826_v6  ;;  %7973 = vrot.lane.b32.xlu1 %v7953_v23, %s15605_s11 }
0x2983   :  { %v7954_v8 = vmul.f32 %v7937_v63, %v7906_v2  ;;  %v20930_v63 = vmov 99  }
0x2984   :  { %v7892_v28 = vpop.permute.xlu0 %7891 }
0x2985   :  { %v7942_v55 = vpop.permute.xlu1 %7941  ;;  %7975 = vrot.lane.b32.xlu0 %v7954_v8, %s15605_s11  ;;  %v7908_v47 = vadd.f32 %v7892_v28, %v7828_v60 }
0x2989   :  { %v7947_v0 = vpop.permute.xlu1 %7946 }
0x298a   :  { %v7956_v48 = vmul.f32 %v7947_v0, %v7908_v47 }
0x298c   :  { %7979 = vrot.lane.b32.xlu0 %v7956_v48, %s15605_s11 }
0x298d   :  { %v7890_v27 = vpop.permute.xlu1 %7889 }
0x298e   :  { %v7907_v62 = vadd.f32 %v7890_v27, %v7827_v1 }
0x2990   :  { %v7955_v46 = vmul.f32 %v7942_v55, %v7907_v62  ;;  %8187 = vperm.xlu0 %14726, %v18921_v40  }
0x2991   :  { %v7736_v5 = vpop.permute.xlu1 %7735 }
0x2992   :  { %7977 = vrot.lane.b32.xlu1 %v7955_v46, %s15605_s11  ;;  %v7773_v34 = vmul.f32 %v7736_v5, %v19055_v15  ;;  %v15576_v46 = vld [vmem:[%s20712_s3 + $0x1] ss:$0 sm:$0xff] }
0x2994   :  { %8199 = vperm.xlu0 %14726, %v18977_v58  }
0x2995   :  { %v7741_v37 = vpop.permute.xlu0 %7740  ;;  %v7746_v57 = vpop.permute.xlu1 %7745 }
0x2996   :  { %8183 = vperm.xlu1 %14725, %v18954_v33   ;;  %v7774_v22 = vmul.f32 %v7741_v37, %v19052_v54  ;;  %v7775_v23 = vmul.f32 %v7746_v57, %v19062_v13 }
0x2998   :  { %8207 = vperm.xlu0 %14726, %v18989_v51  }
0x2999   :  { %v7751_v9 = vpop.permute.xlu0 %7750  ;;  %v7756_v41 = vpop.permute.xlu1 %7755 }
0x299a   :  { %8191 = vperm.xlu1 %14725, %v18965_v25   ;;  %v7776_v2 = vmul.f32 %v7751_v9, %v19057_v43  ;;  %v7777_v28 = vmul.f32 %v7756_v41, %v19068_v7 }
0x299c   :  { %14727 = vset.pattern.permute.xlu0 %v20930_v63 }
0x299d   :  { %v7761_v39 = vpop.permute.xlu0 %7760  ;;  %v7766_v30 = vpop.permute.xlu1 %7765 }
0x299e   :  { %8195 = vperm.xlu1 %14725, %v18960_v42   ;;  %v7778_v43 = vmul.f32 %v7761_v39, %v19074_v49  ;;  %v7779_v7 = vmul.f32 %v7766_v30, %v19077_v4 }
0x29a1   :  { %v7771_v12 = vpop.permute.xlu0 %7770 }
0x29a2   :  { %8203 = vperm.xlu1 %14725, %v18972_v17   ;;  %v7780_v48 = vmul.f32 %v7771_v12, %v19083_v19 }
0x29a6   :  { %8211 = vperm.xlu1 %14725, %v18984_v59  }
0x29aa   :  { %14728 = vset.pattern.permute.xlu1 %v20930_v63 }
0x29e7   :  { %v7968_v3 = vpop.permute.xlu0 %7967 }
0x29e8   :  { %v19130_v6 = vadd.f32 %v7968_v3, %v7774_v22 }
0x29eb   :  { %v7966_v38 = vpop.permute.xlu1 %7965  ;;  %v7972_v14 = vpop.permute.xlu0 %7971 }
0x29ec   :  { %v19128_v53 = vadd.f32 %v7966_v38, %v7773_v34  ;;  %v19140_v54 = vadd.f32 %v7972_v14, %v7776_v2 }
0x29ee   :  { %13690 = vmatprep.mubr.msk.f32.mxu0 %vm210_vm1, %v19128_v53 }
0x29ef   :  { %v7970_v8 = vpop.permute.xlu1 %7969  ;;  %13691 = vmatmul.mubr.msk.f32.vlgmr.msra.gmra.mrb[112].mxu0 %vm210_vm1, %v19130_v6 }
0x29f0   :  { %v19138_v15 = vadd.f32 %v7970_v8, %v7775_v23 }
0x29f2   :  { %13693 = vmatprep.mubr.msk.f32.mxu0 %vm210_vm1, %v19138_v15 }
0x29f3   :  { %v7974_v13 = vpop.permute.xlu1 %7973  ;;  %13694 = vmatmul.mubr.msk.f32.gmra.mrb[114].mxu0 %vm210_vm1, %v19140_v54 }
0x29f4   :  { %v19147_v55 = vadd.f32 %v7974_v13, %v7777_v28 }
0x29f6   :  { %13696 = vmatprep.mubr.msk.f32.mxu0 %vm210_vm1, %v19147_v55 }
0x29f7   :  { %v7976_v60 = vpop.permute.xlu0 %7975 }
0x29f8   :  { %v19152_v47 = vadd.f32 %v7976_v60, %v7778_v43 }
0x29fa   :  { %13697 = vmatmul.mubr.msk.f32.gmra.mrb[116].mxu0 %vm210_vm1, %v19152_v47 }
0x29fe   :  { %v7980_v0 = vpop.permute.xlu0 %7979 }
0x29ff   :  { %v19160_v62 = vadd.f32 %v7980_v0, %v7780_v48 }
0x2a04   :  { %v7978_v1 = vpop.permute.xlu1 %7977 }
0x2a05   :  { %v19158_v27 = vadd.f32 %v7978_v1, %v7779_v7 }
0x2a07   :  { %13699 = vmatprep.mubr.msk.f32.mxu0 %vm210_vm1, %v19158_v27 }
0x2a08   :  { %13700 = vmatmul.mubr.msk.f32.gmra.mrb[118].mxu0 %vm210_vm1, %v19160_v62 }
0x2a0f   :  { %v19173_v3 = vpop.permute.xlu0 %8187 }
0x2a13   :  { %v19185_v0 = vpop.permute.xlu0 %8199 }
0x2a15   :  { %v19169_v19 = vpop.permute.xlu1 %8183 }
0x2a19   :  { %v19171_v12 = vpop.permute.xlu1 %8191 }
0x2a1d   :  { %v19177_v28 = vpop.permute.xlu1 %8195 }
0x2a21   :  { %v19187_v1 = vpop.permute.xlu1 %8203 }
0x2ac2   :  { %v13692_v49 = vpop.f32.mrb[112].mxu0 }
0x2ac3   :  { %v8093_v4 = vadd.f32 %v15576_v46, %v13692_v49  ;;  %v8087_v37 = vpop.f32.mrb[113].mxu0 }
0x2ac4   :  { %v8088_v5 = vadd.f32 %v15576_v46, %v8087_v37 }
0x2ac5   :  { %15235 = vtanh.f32 %v8093_v4 }
0x2ac6   :  { %15237 = vtanh.f32 %v8088_v5  ;;  %v13695_v9 = vpop.f32.mrb[114].mxu0 }
0x2ac7   :  { %v8103_v57 = vadd.f32 %v15576_v46, %v13695_v9  ;;  %v8097_v39 = vpop.f32.mrb[115].mxu0 }
0x2ac8   :  { %v8098_v41 = vadd.f32 %v15576_v46, %v8097_v39 }
0x2ac9   :  { %15239 = vtanh.f32 %v8103_v57 }
0x2aca   :  { %15241 = vtanh.f32 %v8098_v41 }
0x2acd   :  { %v13698_v30 = vpop.f32.mrb[116].mxu0 }
0x2ace   :  { %v8113_v34 = vadd.f32 %v15576_v46, %v13698_v30  ;;  %v8107_v22 = vpop.f32.mrb[117].mxu0 }
0x2acf   :  { %v15236_v38 = vpop.eup %15235  ;;  %v8108_v23 = vadd.f32 %v15576_v46, %v8107_v22 }
0x2ad0   :  { %v15238_v14 = vpop.eup %15237  ;;  %15243 = vtanh.f32 %v8113_v34  ;;  %v8239_v2 = vmul.f32 %v15236_v38, %v19173_v3 }
0x2ad1   :  { %v8238_v8 = vmul.f32 %v15238_v14, %v19169_v19  ;;  %15245 = vtanh.f32 %v8108_v23 }
0x2ad2   :  { %8256 = vrot.lane.b32.xlu1 %v8239_v2, %s15605_s11  ;;  %v19193_v2 = vpop.permute.xlu1 %8211 }
0x2ad3   :  { %v15240_v13 = vpop.eup %15239  ;;  %8254 = vrot.lane.b32.xlu0 %v8238_v8, %s15605_s11 }
0x2ad4   :  { %v15242_v43 = vpop.eup %15241  ;;  %v8241_v60 = vmul.f32 %v15240_v13, %v19177_v28 }
0x2ad5   :  { %v8240_v7 = vmul.f32 %v15242_v43, %v19171_v12  ;;  %v19197_v43 = vpop.permute.xlu0 %8207 }
0x2ad6   :  { %8260 = vrot.lane.b32.xlu1 %v8241_v60, %s15605_s11 }
0x2ad7   :  { %8258 = vrot.lane.b32.xlu0 %v8240_v7, %s15605_s11  ;;  %v12080_v7 = vmul.f32 -1.442695, %v8093_v4 }
0x2ada   :  { %v15244_v48 = vpop.eup %15243 }
0x2adb   :  { %v15246_v49 = vpop.eup %15245  ;;  %v8243_v37 = vmul.f32 %v15244_v48, %v19187_v1  ;;  %v13701_v9 = vpop.f32.mrb[118].mxu0  ;;  %v12079_v48 = vmul.f32 -1.442695, %v8088_v5 }
0x2adc   :  { %v8242_v39 = vmul.f32 %v15246_v49, %v19185_v0  ;;  %v8123_v30 = vadd.f32 %v15576_v46, %v13701_v9  ;;  %v8117_v22 = vpop.f32.mrb[119].mxu0  ;;  %v12082_v49 = vmul.f32 -1.442695, %v8103_v57  ;;  %v12083_v9 = vmul.f32 -1.442695, %v8108_v23 }
0x2add   :  { %8264 = vrot.lane.b32.xlu1 %v8243_v37, %s15605_s11  ;;  %v8118_v38 = vadd.f32 %v15576_v46, %v8117_v22  ;;  %v12081_v46 = vmul.f32 -1.442695, %v8098_v41  ;;  %v12084_v37 = vmul.f32 -1.442695, %v8113_v34 }
0x2ade   :  { %15247 = vtanh.f32 %v8123_v30  ;;  %8262 = vrot.lane.b32.xlu0 %v8242_v39, %s15605_s11  ;;  %v12086_v34 = vmul.f32 -1.442695, %v8123_v30 }
0x2adf   :  { %15249 = vtanh.f32 %v8118_v38  ;;  %v12085_v23 = vmul.f32 -1.442695, %v8118_v38 }
0x2ae0   :  { %15251 = vpow2.f32 %v12080_v7 }
0x2ae1   :  { %15253 = vpow2.f32 %v12079_v48 }
0x2ae2   :  { %15255 = vpow2.f32 %v12082_v49 }
0x2ae3   :  { %15257 = vpow2.f32 %v12081_v46 }
0x2ae4   :  { %15259 = vpow2.f32 %v12084_v37 }
0x2ae5   :  { %15261 = vpow2.f32 %v12083_v9 }
0x2ae8   :  { %v15248_v14 = vpop.eup %15247 }
0x2ae9   :  { %v8245_v8 = vmul.f32 %v15248_v14, %v19193_v2  ;;  %v15250_v13 = vpop.eup %15249 }
0x2aea   :  { %v8244_v60 = vmul.f32 %v15250_v13, %v19197_v43  ;;  %v15252_v39 = vpop.eup %15251 }
0x2aeb   :  { %8268 = vrot.lane.b32.xlu1 %v8245_v8, %s15605_s11  ;;  %v15254_v22 = vpop.eup %15253  ;;  %v8151_v14 = vadd.f32 1.0, %v15252_v39 }
0x2aec   :  { %8266 = vrot.lane.b32.xlu0 %v8244_v60, %s15605_s11  ;;  %v15256_v8 = vpop.eup %15255  ;;  %v8150_v63 = vadd.f32 1.0, %v15254_v22 }
0x2aed   :  { %v15258_v13 = vpop.eup %15257  ;;  %15263 = vrcp.f32 %v8151_v14  ;;  %v8153_v60 = vadd.f32 1.0, %v15256_v8 }
0x2aee   :  { %15265 = vrcp.f32 %v8150_v63  ;;  %v8152_v4 = vadd.f32 1.0, %v15258_v13  ;;  %v15260_v5 = vpop.eup %15259 }
0x2aef   :  { %v15262_v57 = vpop.eup %15261  ;;  %15267 = vrcp.f32 %v8153_v60  ;;  %v8155_v41 = vadd.f32 1.0, %v15260_v5 }
0x2af0   :  { %15269 = vrcp.f32 %v8152_v4  ;;  %v8154_v7 = vadd.f32 1.0, %v15262_v57 }
0x2af1   :  { %15271 = vrcp.f32 %v8155_v41 }
0x2af2   :  { %15273 = vrcp.f32 %v8154_v7 }
0x2af3   :  { %15275 = vpow2.f32 %v12086_v34 }
0x2af4   :  { %15277 = vpow2.f32 %v12085_v23 }
0x2af7   :  { %v15264_v48 = vpop.eup %15263 }
0x2af8   :  { %v15266_v49 = vpop.eup %15265  ;;  %v8215_v46 = vmul.f32 %v15264_v48, %v19173_v3 }
0x2af9   :  { %v15268_v37 = vpop.eup %15267  ;;  %v8214_v63 = vmul.f32 %v15266_v49, %v19169_v19 }
0x2afa   :  { %v15270_v9 = vpop.eup %15269  ;;  %v8223_v39 = vmul.f32 %v8215_v46, %v19130_v6  ;;  %v8217_v22 = vmul.f32 %v15268_v37, %v19177_v28 }
0x2afb   :  { %v8222_v14 = vmul.f32 %v8214_v63, %v19128_v53  ;;  %v8216_v30 = vmul.f32 %v15270_v9, %v19171_v12  ;;  %v15272_v38 = vpop.eup %15271 }
0x2afc   :  { %v15274_v8 = vpop.eup %15273  ;;  %v8225_v13 = vmul.f32 %v8217_v22, %v19140_v54  ;;  %v8231_v60 = vsub.f32 %v19130_v6, %v8223_v39  ;;  %v8219_v28 = vmul.f32 %v15272_v38, %v19187_v1 }
0x2afd   :  { %v15276_v3 = vpop.eup %15275  ;;  %v8224_v4 = vmul.f32 %v8216_v30, %v19138_v15  ;;  %v8230_v19 = vsub.f32 %v19128_v53, %v8222_v14  ;;  %v8218_v12 = vmul.f32 %v15274_v8, %v19185_v0 }
0x2afe   :  { %v15278_v57 = vpop.eup %15277  ;;  %v8157_v23 = vadd.f32 1.0, %v15276_v3  ;;  %v8233_v48 = vsub.f32 %v19140_v54, %v8225_v13  ;;  %v8227_v9 = vmul.f32 %v8219_v28, %v19152_v47 }
0x2aff   :  { %v8156_v49 = vadd.f32 1.0, %v15278_v57  ;;  %v8232_v37 = vsub.f32 %v19138_v15, %v8224_v4  ;;  %v8226_v54 = vmul.f32 %v8218_v12, %v19147_v55 }
0x2b00   :  { %15279 = vrcp.f32 %v8157_v23  ;;  %v8235_v22 = vsub.f32 %v19152_v47, %v8227_v9 }
0x2b01   :  { %15281 = vrcp.f32 %v8156_v49  ;;  %v8234_v30 = vsub.f32 %v19147_v55, %v8226_v54 }
0x2b0a   :  { %v15280_v55 = vpop.eup %15279 }
0x2b0b   :  { %v15282_v3 = vpop.eup %15281  ;;  %v8221_v4 = vmul.f32 %v15280_v55, %v19193_v2 }
0x2b44   :  { %v8257_v5 = vpop.permute.xlu1 %8256 }
0x2b45   :  { %v8279_v41 = vadd.f32 %v8257_v5, %v8231_v60  ;;  %v8255_v7 = vpop.permute.xlu0 %8254  ;;  %v8220_v5 = vmul.f32 %v15282_v3, %v19197_v43 }
0x2b46   :  { %v8278_v34 = vadd.f32 %v8255_v7, %v8230_v19  ;;  %v8229_v19 = vmul.f32 %v8221_v4, %v19160_v62 }
0x2b47   :  { %v8287_v53 = vsel %vm210_vm1, %v8279_v41, %v18787_v36  ;;  %v8228_v57 = vmul.f32 %v8220_v5, %v19158_v27 }
0x2b48   :  { %v8261_v46 = vpop.permute.xlu1 %8260  ;;  %v8286_v6 = vsel %vm210_vm1, %v8278_v34, %v18789_v44  ;;  %v8237_v7 = vsub.f32 %v19160_v62, %v8229_v19  ;;  %v15577_v62 = vld [vmem:[%s20712_s3 + $0x2] ss:$0 sm:$0xff] }
0x2b49   :  { %v8281_v63 = vadd.f32 %v8261_v46, %v8233_v48  ;;  %13718 = vmatprep.mubr.msk.f32.mxu1 %vm80_vm0, %v8286_v6  ;;  %v8259_v1 = vpop.permute.xlu0 %8258  ;;  %v8236_v28 = vsub.f32 %v19158_v27, %v8228_v57 }
0x2b4a   :  { %v8280_v0 = vadd.f32 %v8259_v1, %v8232_v37  ;;  %13719 = vmatmul.mubr.msk.f32.vlgmr.msra.gmra.mrb[112].mxu1 %vm80_vm0, %v8287_v53 }
0x2b4b   :  { %14493 = vmatpush3.bf16.msra.mxu1 %v15665_v10  ;;  %v8289_v39 = vsel %vm210_vm1, %v8281_v63, %v18798_v52 }
0x2b4c   :  { %v8288_v15 = vsel %vm210_vm1, %v8280_v0, %v18801_v31  ;;  %14495 = vmatprep.subr.bf16.mxu1 %v15667_v11 }
0x2b4d   :  { %13721 = vmatprep.mubr.msk.f32.mxu1 %vm80_vm0, %v8288_v15 }
0x2b4e   :  { %13722 = vmatmul.mubr.msk.f32.gmra.mrb[114].mxu1 %vm80_vm0, %v8289_v39 }
0x2b4f   :  { %v8265_v14 = vpop.permute.xlu1 %8264  ;;  %14497 = vmatpush3.bf16.msra.mxu1 %v15667_v11 }
0x2b50   :  { %v8283_v38 = vadd.f32 %v8265_v14, %v8235_v22  ;;  %v8263_v8 = vpop.permute.xlu0 %8262  ;;  %14499 = vmatprep.subr.bf16.mxu1 %v15686_v16 }
0x2b51   :  { %v8282_v13 = vadd.f32 %v8263_v8, %v8234_v30 }
0x2b52   :  { %v8291_v47 = vsel %vm210_vm1, %v8283_v38, %v18813_v56 }
0x2b53   :  { %v8290_v60 = vsel %vm210_vm1, %v8282_v13, %v18815_v21  ;;  %14501 = vmatpush3.bf16.msra.mxu1 %v15686_v16 }
0x2b54   :  { %13724 = vmatprep.mubr.msk.f32.mxu1 %vm80_vm0, %v8290_v60  ;;  %14503 = vmatprep.subr.bf16.mxu1 %v15703_v20 }
0x2b55   :  { %13725 = vmatmul.mubr.msk.f32.gmra.mrb[116].mxu1 %vm80_vm0, %v8291_v47 }
0x2b57   :  { %14505 = vmatpush3.bf16.msra.mxu1 %v15703_v20 }
0x2b58   :  { %14531 = vmatprep.subr.bf16.mxu1 %v15938_v50 }
0x2b5d   :  { %v8269_v41 = vpop.permute.xlu1 %8268 }
0x2b5e   :  { %v8285_v34 = vadd.f32 %v8269_v41, %v8237_v7  ;;  %v8267_v12 = vpop.permute.xlu0 %8266 }
0x2b5f   :  { %v8284_v23 = vadd.f32 %v8267_v12, %v8236_v28 }
0x2b60   :  { %v8293_v2 = vsel %vm210_vm1, %v8285_v34, %v18837_v45 }
0x2b61   :  { %v8292_v48 = vsel %vm210_vm1, %v8284_v23, %v18839_v18 }
0x2b62   :  { %13727 = vmatprep.mubr.msk.f32.mxu1 %vm80_vm0, %v8292_v48 }
0x2b63   :  { %13728 = vmatmul.mubr.msk.f32.gmra.mrb[118].mxu1 %vm80_vm0, %v8293_v2 }
0x2c1d   :  { %v13720_v43 = vpop.f32.mrb[112].mxu1 }
0x2c1e   :  { %v19260_v49 = vadd.f32 %v15577_v62, %v13720_v43  ;;  %v8384_v27 = vpop.f32.mrb[113].mxu1 }
0x2c1f   :  { %v19262_v46 = vadd.f32 %v15577_v62, %v8384_v27 }
0x2c20   :  { %8481 = vrot.lane.b32.xlu1 %v19260_v49, %s15607_s14  ;;  %v12096_v30 = vmul.f32 -1.442695, %v19260_v49 }
0x2c21   :  { %8479 = vrot.lane.b32.xlu0 %v19262_v46, %s15607_s14  ;;  %v13723_v6 = vpop.f32.mrb[114].mxu1  ;;  %v12095_v38 = vmul.f32 -1.442695, %v19262_v46 }
0x2c22   :  { %v19268_v37 = vadd.f32 %v15577_v62, %v13723_v6  ;;  %v8394_v53 = vpop.f32.mrb[115].mxu1  ;;  %15283 = vpow2.f32 %v12096_v30 }
0x2c23   :  { %v19270_v63 = vadd.f32 %v15577_v62, %v8394_v53  ;;  %15285 = vpow2.f32 %v12095_v38 }
0x2c24   :  { %8485 = vrot.lane.b32.xlu1 %v19268_v37, %s15607_s14  ;;  %v12098_v8 = vmul.f32 -1.442695, %v19268_v37 }
0x2c25   :  { %8483 = vrot.lane.b32.xlu0 %v19270_v63, %s15607_s14  ;;  %v12097_v13 = vmul.f32 -1.442695, %v19270_v63 }
0x2c26   :  { %15287 = vpow2.f32 %v12098_v8 }
0x2c27   :  { %15289 = vpow2.f32 %v12097_v13 }
0x2c28   :  { %v13726_v1 = vpop.f32.mrb[116].mxu1 }
0x2c29   :  { %v19276_v9 = vadd.f32 %v15577_v62, %v13726_v1  ;;  %v8404_v0 = vpop.f32.mrb[117].mxu1 }
0x2c2a   :  { %v19278_v54 = vadd.f32 %v15577_v62, %v8404_v0 }
0x2c2b   :  { %8489 = vrot.lane.b32.xlu1 %v19276_v9, %s15607_s14  ;;  %v12100_v60 = vmul.f32 -1.442695, %v19276_v9 }
0x2c2c   :  { %8487 = vrot.lane.b32.xlu0 %v19278_v54, %s15607_s14  ;;  %v12099_v47 = vmul.f32 -1.442695, %v19278_v54  ;;  %v15284_v55 = vpop.eup %15283 }
0x2c2d   :  { %15291 = vpow2.f32 %v12100_v60  ;;  %v15286_v3 = vpop.eup %15285  ;;  %v8448_v4 = vadd.f32 1.0, %v15284_v55 }
0x2c2e   :  { %15293 = vpow2.f32 %v12099_v47  ;;  %v8447_v19 = vadd.f32 1.0, %v15286_v3 }
0x2c2f   :  { %15295 = vrcp.f32 %v8448_v4 }
0x2c30   :  { %v15288_v5 = vpop.eup %15287  ;;  %15297 = vrcp.f32 %v8447_v19 }
0x2c31   :  { %v15290_v57 = vpop.eup %15289  ;;  %v8450_v41 = vadd.f32 1.0, %v15288_v5 }
0x2c32   :  { %v8449_v7 = vadd.f32 1.0, %v15290_v57 }
0x2c33   :  { %15299 = vrcp.f32 %v8450_v41 }
0x2c34   :  { %15301 = vrcp.f32 %v8449_v7 }
0x2c36   :  { %v13729_v15 = vpop.f32.mrb[118].mxu1 }
0x2c37   :  { %v19284_v39 = vadd.f32 %v15577_v62, %v13729_v15  ;;  %v8414_v22 = vpop.f32.mrb[119].mxu1  ;;  %v15292_v28 = vpop.eup %15291 }
0x2c38   :  { %v19286_v14 = vadd.f32 %v15577_v62, %v8414_v22  ;;  %v15294_v34 = vpop.eup %15293  ;;  %v8452_v12 = vadd.f32 1.0, %v15292_v28 }
0x2c39   :  { %8493 = vrot.lane.b32.xlu1 %v19284_v39, %s15607_s14  ;;  %v8451_v23 = vadd.f32 1.0, %v15294_v34  ;;  %v12102_v48 = vmul.f32 -1.442695, %v19284_v39  ;;  %v19300_v43 = vpop.eup %15295 }
0x2c3a   :  { %8491 = vrot.lane.b32.xlu0 %v19286_v14, %s15607_s14  ;;  %v12101_v2 = vmul.f32 -1.442695, %v19286_v14  ;;  %15303 = vrcp.f32 %v8452_v12  ;;  %v19302_v27 = vpop.eup %15297 }
0x2c3b   :  { %15305 = vrcp.f32 %v8451_v23 }
0x2c3c   :  { %15307 = vpow2.f32 %v12102_v48 }
0x2c3d   :  { %15309 = vpow2.f32 %v12101_v2  ;;  %v19307_v0 = vpop.eup %15299  ;;  %v15578_v2 = vld [vmem:[%s20711_s1 + $0x148] sm:$0xff] }
0x2c3e   :  { %v19310_v22 = vpop.eup %15301 }
0x2c44   :  { %v19316_v13 = vpop.eup %15303 }
0x2c45   :  { %v19318_v60 = vpop.eup %15305 }
0x2c46   :  { %v15308_v55 = vpop.eup %15307 }
0x2c47   :  { %v15310_v5 = vpop.eup %15309  ;;  %v8454_v57 = vadd.f32 1.0, %v15308_v55  ;;  %v20937_v55 = vsub.f32 1.0, %v18989_v51 }
0x2c48   :  { %v8453_v41 = vadd.f32 1.0, %v15310_v5 }
0x2c49   :  { %15311 = vrcp.f32 %v8454_v57 }
0x2c4a   :  { %15313 = vrcp.f32 %v8453_v41 }
0x2c53   :  { %v19324_v7 = vpop.eup %15311 }
0x2c54   :  { %v19326_v34 = vpop.eup %15313 }
0x2c92   :  { %v8482_v62 = vpop.permute.xlu1 %8481 }
0x2c93   :  { %v8504_v6 = vmul.f32 %v19300_v43, %v8482_v62  ;;  %v8480_v53 = vpop.permute.xlu0 %8479  ;;  %v15579_v62 = vld [vmem:[%s20711_s1 + $0x140] sm:$0xff] }
0x2c94   :  { %v8503_v1 = vmul.f32 %v19302_v27, %v8480_v53  ;;  %v20932_v53 = vsub.f32 1.0, %v18921_v40  ;;  %v15582_v40 = vld [vmem:[%s20711_s1 + $0x160] sm:$0xff] }
0x2c95   :  { %8521 = vrot.lane.b32.xlu1 %v8504_v6, %s15609_s15  ;;  %v20931_v6 = vsub.f32 1.0, %v18954_v33  ;;  %v15583_v33 = vld [vmem:[%s20711_s1 + $0x168] sm:$0xff] }
0x2c96   :  { %v8486_v15 = vpop.permute.xlu1 %8485  ;;  %8519 = vrot.lane.b32.xlu0 %v8503_v1, %s15609_s15  ;;  %v15580_v1 = vld [vmem:[%s20711_s1 + $0x150] sm:$0xff] }
0x2c97   :  { %v8506_v30 = vmul.f32 %v19307_v0, %v8486_v15  ;;  %v8484_v38 = vpop.permute.xlu0 %8483  ;;  %v15581_v15 = vld [vmem:[%s20711_s1 + $0x158] sm:$0xff] }
0x2c98   :  { %v8505_v8 = vmul.f32 %v19310_v22, %v8484_v38  ;;  %v20934_v38 = vsub.f32 1.0, %v18960_v42  ;;  %v15584_v42 = vld [vmem:[%s20711_s1 + $0x170] sm:$0xff] }
0x2c99   :  { %8525 = vrot.lane.b32.xlu1 %v8506_v30, %s15609_s15  ;;  %v20933_v30 = vsub.f32 1.0, %v18965_v25  ;;  %v15585_v25 = vld [vmem:[%s20711_s1 + $0x178] sm:$0xff] }
0x2c9a   :  { %8523 = vrot.lane.b32.xlu0 %v8505_v8, %s15609_s15  ;;  %v20935_v8 = vsub.f32 1.0, %v18977_v58 }
0x2c9d   :  { %v8490_v47 = vpop.permute.xlu1 %8489 }
0x2c9e   :  { %v8508_v3 = vmul.f32 %v19316_v13, %v8490_v47  ;;  %v8488_v4 = vpop.permute.xlu0 %8487  ;;  %v20936_v47 = vsub.f32 1.0, %v18972_v17 }
0x2c9f   :  { %v8507_v19 = vmul.f32 %v19318_v60, %v8488_v4 }
0x2ca0   :  { %8529 = vrot.lane.b32.xlu1 %v8508_v3, %s15609_s15  ;;  %v20938_v3 = vsub.f32 1.0, %v18984_v59 }
0x2ca1   :  { %8527 = vrot.lane.b32.xlu0 %v8507_v19, %s15609_s15 }
0x2cab   :  { %v8494_v28 = vpop.permute.xlu1 %8493 }
0x2cac   :  { %v8510_v12 = vmul.f32 %v19324_v7, %v8494_v28  ;;  %v8492_v23 = vpop.permute.xlu0 %8491 }
0x2cad   :  { %v8509_v48 = vmul.f32 %v19326_v34, %v8492_v23 }
0x2cae   :  { %8533 = vrot.lane.b32.xlu1 %v8510_v12, %s15609_s15 }
0x2caf   :  { %8531 = vrot.lane.b32.xlu0 %v8509_v48, %s15609_s15 }
0x2cb2   :  { %8628 = vperm.xlu1 %14728, %v15578_v2  }
0x2cb3   :  { %8624 = vperm.xlu0 %14727, %v15579_v62  }
0x2cb6   :  { %8664 = vperm.xlu1 %14728, %v20931_v6  }
0x2cb7   :  { %8668 = vperm.xlu0 %14727, %v20932_v53  }
0x2cba   :  { %8632 = vperm.xlu1 %14728, %v15580_v1  }
0x2cbb   :  { %8636 = vperm.xlu0 %14727, %v15581_v15  }
0x2cbe   :  { %8672 = vperm.xlu1 %14728, %v20933_v30  }
0x2cbf   :  { %8676 = vperm.xlu0 %14727, %v20934_v38  }
0x2cc2   :  { %8640 = vperm.xlu1 %14728, %v15582_v40  }
0x2cc3   :  { %8644 = vperm.xlu0 %14727, %v15583_v33  }
0x2cc6   :  { %8680 = vperm.xlu1 %14728, %v20935_v8  }
0x2cc7   :  { %8684 = vperm.xlu0 %14727, %v20936_v47  }
0x2cca   :  { %8648 = vperm.xlu1 %14728, %v15584_v42  }
0x2ccb   :  { %8652 = vperm.xlu0 %14727, %v15585_v25  }
0x2cce   :  { %8688 = vperm.xlu1 %14728, %v20937_v55  }
0x2ccf   :  { %8692 = vperm.xlu0 %14727, %v20938_v3  }
0x2cd2   :  { %14729 = vset.pattern.permute.xlu1 %v20853_v61 }
0x2cd3   :  { %14730 = vset.pattern.permute.xlu0 %v20853_v61 }
0x2d07   :  { %v8522_v17 = vpop.permute.xlu1 %8521 }
0x2d08   :  { %v8544_v58 = vadd.f32 %v8522_v17, %v19260_v49  ;;  %v8520_v4 = vpop.permute.xlu0 %8519 }
0x2d09   :  { %v8543_v5 = vadd.f32 %v8520_v4, %v19262_v46 }
0x2d0a   :  { %15315 = vtanh.f32 %v8544_v58 }
0x2d0b   :  { %15317 = vtanh.f32 %v8543_v5  ;;  %v8526_v19 = vpop.permute.xlu1 %8525  ;;  %v8560_v5 = vsub.f32 1.0, %v19300_v43 }
0x2d0c   :  { %v8546_v57 = vadd.f32 %v8526_v19, %v19268_v37  ;;  %v8524_v51 = vpop.permute.xlu0 %8523 }
0x2d0d   :  { %v8545_v41 = vadd.f32 %v8524_v51, %v19270_v63  ;;  %v8608_v51 = vmul.f32 %v19300_v43, %v18787_v36 }
0x2d0e   :  { %15319 = vtanh.f32 %v8546_v57  ;;  %v8559_v57 = vsub.f32 1.0, %v19302_v27 }
0x2d0f   :  { %15321 = vtanh.f32 %v8545_v41 }
0x2d12   :  { %v8530_v59 = vpop.permute.xlu1 %8529 }
0x2d13   :  { %v8548_v28 = vadd.f32 %v8530_v59, %v19276_v9  ;;  %v8528_v12 = vpop.permute.xlu0 %8527 }
0x2d14   :  { %v15316_v23 = vpop.eup %15315  ;;  %v8547_v49 = vadd.f32 %v8528_v12, %v19278_v54 }
0x2d15   :  { %v15318_v48 = vpop.eup %15317  ;;  %15323 = vtanh.f32 %v8548_v28  ;;  %8577 = vrot.lane.b32.xlu0 %v15316_v23, %s15605_s11  ;;  %v8607_v28 = vmul.f32 %v19302_v27, %v18789_v44  ;;  %v8609_v27 = vmul.f32 %v19310_v22, %v18801_v31 }
0x2d16   :  { %15325 = vtanh.f32 %v8547_v49  ;;  %8575 = vrot.lane.b32.xlu1 %v15318_v48, %s15605_s11  ;;  %v8562_v49 = vsub.f32 1.0, %v19307_v0 }
0x2d18   :  { %v15320_v46 = vpop.eup %15319 }
0x2d19   :  { %v15322_v37 = vpop.eup %15321  ;;  %8581 = vrot.lane.b32.xlu0 %v15320_v46, %s15605_s11 }
0x2d1a   :  { %8579 = vrot.lane.b32.xlu1 %v15322_v37, %s15605_s11  ;;  %v8561_v37 = vsub.f32 1.0, %v19310_v22  ;;  %v8564_v22 = vsub.f32 1.0, %v19316_v13 }
0x2d1f   :  { %v15324_v63 = vpop.eup %15323 }
0x2d20   :  { %v15326_v2 = vpop.eup %15325  ;;  %8585 = vrot.lane.b32.xlu0 %v15324_v63, %s15605_s11  ;;  %v8534_v9 = vpop.permute.xlu1 %8533 }
0x2d21   :  { %8583 = vrot.lane.b32.xlu1 %v15326_v2, %s15605_s11  ;;  %v8550_v54 = vadd.f32 %v8534_v9, %v19284_v39  ;;  %v8532_v62 = vpop.permute.xlu0 %8531  ;;  %v8610_v9 = vmul.f32 %v19307_v0, %v18798_v52 }
0x2d22   :  { %v8549_v6 = vadd.f32 %v8532_v62, %v19286_v14 }
0x2d23   :  { %15327 = vtanh.f32 %v8550_v54 }
0x2d24   :  { %15329 = vtanh.f32 %v8549_v6 }
0x2d2d   :  { %v15328_v53 = vpop.eup %15327 }
0x2d2e   :  { %v15330_v1 = vpop.eup %15329  ;;  %8589 = vrot.lane.b32.xlu0 %v15328_v53, %s15605_s11 }
0x2d2f   :  { %8587 = vrot.lane.b32.xlu1 %v15330_v1, %s15605_s11 }
0x2d31   :  { %v8629_v30 = vpop.permute.xlu1 %8628 }
0x2d32   :  { %v8625_v15 = vpop.permute.xlu0 %8624 }
0x2d35   :  { %v8665_v40 = vpop.permute.xlu1 %8664 }
0x2d36   :  { %v8669_v38 = vpop.permute.xlu0 %8668  ;;  %v8695_v62 = vmul.f32 %v8665_v40, %v18789_v44  ;;  %v8563_v40 = vsub.f32 1.0, %v19318_v60 }
0x2d37   :  { %v8696_v63 = vmul.f32 %v8669_v38, %v18787_v36 }
0x2d39   :  { %v8633_v8 = vpop.permute.xlu1 %8632 }
0x2d3a   :  { %v8637_v33 = vpop.permute.xlu0 %8636 }
0x2d3d   :  { %v8673_v42 = vpop.permute.xlu1 %8672 }
0x2d3e   :  { %v8677_v47 = vpop.permute.xlu0 %8676  ;;  %v8697_v0 = vmul.f32 %v8673_v42, %v18801_v31  ;;  %v8611_v31 = vmul.f32 %v19318_v60, %v18815_v21  ;;  %v8566_v60 = vsub.f32 1.0, %v19324_v7 }
0x2d3f   :  { %v8698_v36 = vmul.f32 %v8677_v47, %v18798_v52  ;;  %v8612_v52 = vmul.f32 %v19316_v13, %v18813_v56 }
0x2d41   :  { %v8641_v25 = vpop.permute.xlu1 %8640 }
0x2d42   :  { %v8645_v39 = vpop.permute.xlu0 %8644 }
0x2d45   :  { %v8681_v14 = vpop.permute.xlu1 %8680 }
0x2d46   :  { %v8685_v55 = vpop.permute.xlu0 %8684 }
0x2d49   :  { %v19392_v17 = vpop.permute.xlu1 %8648 }
0x2d4a   :  { %v19390_v3 = vpop.permute.xlu0 %8652 }
0x2d4d   :  { %v19396_v4 = vpop.permute.xlu1 %8688 }
0x2d4e   :  { %v19394_v58 = vpop.permute.xlu0 %8692 }
0x2d87   :  { %v8578_v19 = vpop.permute.xlu0 %8577 }
0x2d88   :  { %v8600_v41 = vmul.f32 %v8578_v19, %v8560_v5  ;;  %v8576_v59 = vpop.permute.xlu1 %8575 }
0x2d89   :  { %v8599_v12 = vmul.f32 %v8576_v59, %v8559_v57  ;;  %v8700_v59 = vmul.f32 %v8685_v55, %v18813_v56  ;;  %v12111_v56 = vld [vmem:[%s20709_s0 + $0x180] sm:$0xff]  ;;  %v8613_v55 = vmul.f32 %v19326_v34, %v18839_v18 }
0x2d8a   :  { %v8616_v23 = vadd.f32 %v8608_v51, %v8600_v41  ;;  %13746 = vmatprep.mubr.msk.f32.mxu0 %vm80_vm0, %v12111_v56 }
0x2d8b   :  { %v8615_v48 = vadd.f32 %v8607_v28, %v8599_v12  ;;  %v8582_v46 = vpop.permute.xlu0 %8581  ;;  %v8699_v12 = vmul.f32 %v8681_v14, %v18815_v21  ;;  %v8614_v21 = vmul.f32 %v19324_v7, %v18837_v45 }
0x2d8c   :  { %v8656_v2 = vmul.f32 %v8629_v30, %v8616_v23  ;;  %v8602_v43 = vmul.f32 %v8582_v46, %v8562_v49  ;;  %v8580_v54 = vpop.permute.xlu1 %8579  ;;  %v8565_v46 = vsub.f32 1.0, %v19326_v34 }
0x2d8d   :  { %v8655_v6 = vmul.f32 %v8625_v15, %v8615_v48  ;;  %v8601_v53 = vmul.f32 %v8580_v54, %v8561_v37 }
0x2d8e   :  { %v19412_v1 = vadd.f32 %v8696_v63, %v8656_v2  ;;  %v8618_v5 = vadd.f32 %v8610_v9, %v8602_v43  ;;  %v8702_v2 = vmul.f32 %v19394_v58, %v18837_v45  ;;  %v8701_v43 = vmul.f32 %v19396_v4, %v18839_v18 }
0x2d8f   :  { %v19414_v19 = vadd.f32 %v8695_v62, %v8655_v6  ;;  %v8617_v57 = vadd.f32 %v8609_v27, %v8601_v53 }
0x2d90   :  { %v8658_v30 = vmul.f32 %v8637_v33, %v8618_v5  ;;  %8721 = vrot.lane.b32.xlu0 %v19412_v1, %s15605_s11 }
0x2d91   :  { %v8657_v44 = vmul.f32 %v8633_v8, %v8617_v57  ;;  %8719 = vrot.lane.b32.xlu1 %v19414_v19, %s15605_s11 }
0x2d92   :  { %v19423_v15 = vadd.f32 %v8698_v36, %v8658_v30  ;;  %v8586_v38 = vpop.permute.xlu0 %8585  ;;  %v12112_v36 = vld [vmem:[%s20709_s0 + $0x188] sm:$0xff]  ;;  %v12113_v30 = vld [vmem:[%s20709_s0 + $0x190] sm:$0xff] }
0x2d93   :  { %v19426_v51 = vadd.f32 %v8697_v0, %v8657_v44  ;;  %v8604_v33 = vmul.f32 %v8586_v38, %v8564_v22  ;;  %v8584_v47 = vpop.permute.xlu1 %8583  ;;  %v12114_v0 = vld [vmem:[%s20709_s0 + $0x198] sm:$0xff]  ;;  %v12115_v44 = vld [vmem:[%s20709_s0 + $0x1a0] sm:$0xff]  ;;  %v12116_v22 = vld [vmem:[%s20709_s0 + $0x1a8] sm:$0xff] }
0x2d94   :  { %v8603_v8 = vmul.f32 %v8584_v47, %v8563_v40  ;;  %8725 = vrot.lane.b32.xlu0 %v19423_v15, %s15605_s11  ;;  %v12117_v38 = vld [vmem:[%s20709_s0 + $0x1b0] sm:$0xff]  ;;  %v12118_v40 = vld [vmem:[%s20709_s0 + $0x1b8] sm:$0xff]  ;;  %v19546_v47 = vld [vmem:[%s20711_s1 + $0x188] sm:$0xff] }
0x2d95   :  { %v8620_v42 = vadd.f32 %v8612_v52, %v8604_v33  ;;  %8723 = vrot.lane.b32.xlu1 %v19426_v51, %s15605_s11  ;;  %v20939_v52 = vld [vmem:[#allocation2_spill] sm:$0xff]  ;;  %v20940_v33 = vld [vmem:[#allocation4_spill] sm:$0xff] }
0x2d96   :  { %v8619_v41 = vadd.f32 %v8611_v31, %v8603_v8 }
0x2d97   :  { %v8660_v28 = vmul.f32 %v8645_v39, %v8620_v42 }
0x2d98   :  { %v8659_v13 = vmul.f32 %v8641_v25, %v8619_v41 }
0x2d99   :  { %v19438_v23 = vadd.f32 %v8700_v59, %v8660_v28 }
0x2d9a   :  { %v19440_v49 = vadd.f32 %v8699_v12, %v8659_v13  ;;  %v20941_v13 = vld [vmem:[#allocation3_spill] sm:$0xff] }
0x2d9b   :  { %8729 = vrot.lane.b32.xlu0 %v19438_v23, %s15605_s11 }
0x2d9c   :  { %8727 = vrot.lane.b32.xlu1 %v19440_v49, %s15605_s11 }
0x2da0   :  { %v8590_v48 = vpop.permute.xlu0 %8589 }
0x2da1   :  { %v8606_v39 = vmul.f32 %v8590_v48, %v8566_v60  ;;  %v8588_v25 = vpop.permute.xlu1 %8587 }
0x2da2   :  { %v8605_v14 = vmul.f32 %v8588_v25, %v8565_v46 }
0x2da3   :  { %v8622_v37 = vadd.f32 %v8614_v21, %v8606_v39 }
0x2da4   :  { %v8621_v63 = vadd.f32 %v8613_v55, %v8605_v14 }
0x2da5   :  { %v8662_v9 = vmul.f32 %v19390_v3, %v8622_v37  ;;  %v19579_v37 = vld [vmem:[%s20711_s1 + $0x180] sm:$0xff] }
0x2da6   :  { %v8661_v7 = vmul.f32 %v19392_v17, %v8621_v63  ;;  %v19585_v63 = vld [vmem:[%s20711_s1 + $0x190] sm:$0xff] }
0x2da7   :  { %v19462_v54 = vadd.f32 %v8702_v2, %v8662_v9  ;;  %v19591_v2 = vld [vmem:[%s20711_s1 + $0x198] sm:$0xff]  ;;  %v19596_v9 = vld [vmem:[%s20711_s1 + $0x1a0] sm:$0xff] }
0x2da8   :  { %v19464_v62 = vadd.f32 %v8701_v43, %v8661_v7  ;;  %v19603_v43 = vld [vmem:[%s20711_s1 + $0x1a8] sm:$0xff]  ;;  %v19608_v7 = vld [vmem:[%s20711_s1 + $0x1b0] sm:$0xff] }
0x2da9   :  { %8733 = vrot.lane.b32.xlu0 %v19462_v54, %s15605_s11 }
0x2daa   :  { %8731 = vrot.lane.b32.xlu1 %v19464_v62, %s15605_s11 }
0x2dad   :  { %9282 = vperm.xlu0 %14730, %v19546_v47  }
0x2dae   :  { %9278 = vperm.xlu1 %14729, %v19579_v37  }
0x2db1   :  { %9294 = vperm.xlu0 %14730, %v19596_v9  }
0x2db2   :  { %9286 = vperm.xlu1 %14729, %v19585_v63  }
0x2db5   :  { %9302 = vperm.xlu0 %14730, %v19608_v7  }
0x2db6   :  { %9290 = vperm.xlu1 %14729, %v19591_v2  }
0x2dba   :  { %9298 = vperm.xlu1 %14729, %v19603_v43  }
0x2e02   :  { %v8722_v34 = vpop.permute.xlu0 %8721 }
0x2e03   :  { %12104 = vst.msk [vmem:[%s20713_s4 + $0x148] sm:$0xff] %vm210_vm1, %v8722_v34  ;;  %v8720_v45 = vpop.permute.xlu1 %8719 }
0x2e04   :  { %12103 = vst.msk [vmem:[%s20713_s4 + $0x140] sm:$0xff] %vm210_vm1, %v8720_v45  ;;  %v14474_v18 = vpack.c.bf16 %v8722_v34, %v8720_v45  ;;  %v19615_v34 = vld [vmem:[%s20711_s1 + $0x1b8] sm:$0xff]  ;;  %v20942_v45 = vmov 96  }
0x2e05   :  { %9306 = vperm.xlu1 %14729, %v19615_v34   ;;  %14731 = vset.pattern.permute.xlu0 %v20942_v45 }
0x2e06   :  { %14475 = vmatprep.subr.bf16.mxu0 %v14474_v18  ;;  %v8726_v3 = vpop.permute.xlu0 %8725  ;;  %9238 = vperm.xlu0 %14731, %v19579_v37  }
0x2e07   :  { %12106 = vst.msk [vmem:[%s20713_s4 + $0x158] sm:$0xff] %vm210_vm1, %v8726_v3  ;;  %v8724_v17 = vpop.permute.xlu1 %8723  ;;  %14477 = vmatpush3.bf16.msra.mxu0 %v14474_v18  ;;  %v20832_v18 = vsub.f32 1.0, %v19579_v37 }
0x2e08   :  { %12105 = vst.msk [vmem:[%s20713_s4 + $0x150] sm:$0xff] %vm210_vm1, %v8724_v17  ;;  %v14478_v58 = vpack.c.bf16 %v8726_v3, %v8724_v17  ;;  %v20943_v3 = vmov 98   ;;  %v20829_v17 = vsub.f32 1.0, %v19596_v9 }
0x2e09   :  { %14732 = vset.pattern.permute.xlu1 %v20942_v45 }
0x2e0a   :  { %14479 = vmatprep.subr.bf16.mxu0 %v14478_v58  ;;  %9242 = vperm.xlu1 %14732, %v19546_v47  }
0x2e0b   :  { %14481 = vmatpush3.bf16.msra.mxu0 %v14478_v58  ;;  %9254 = vperm.xlu0 %14731, %v19596_v9   ;;  %v20830_v58 = vsub.f32 1.0, %v19546_v47 }
0x2e0d   :  { %v8730_v4 = vpop.permute.xlu0 %8729 }
0x2e0e   :  { %12108 = vst.msk [vmem:[%s20713_s4 + $0x168] sm:$0xff] %vm210_vm1, %v8730_v4  ;;  %v8728_v6 = vpop.permute.xlu1 %8727  ;;  %9246 = vperm.xlu1 %14732, %v19585_v63  }
0x2e0f   :  { %12107 = vst.msk [vmem:[%s20713_s4 + $0x160] sm:$0xff] %vm210_vm1, %v8728_v6  ;;  %v14482_v27 = vpack.c.bf16 %v8730_v4, %v8728_v6  ;;  %14734 = vset.pattern.permute.xlu0 %v20943_v3  ;;  %v20826_v4 = vsub.f32 1.0, %v19603_v43  ;;  %v20831_v6 = vsub.f32 1.0, %v19585_v63 }
0x2e10   :  { %9359 = vperm.xlu0 %14734, %v20832_v18  }
0x2e11   :  { %14483 = vmatprep.subr.bf16.mxu0 %v14482_v27 }
0x2e12   :  { %14485 = vmatpush3.bf16.msra.mxu0 %v14482_v27  ;;  %9250 = vperm.xlu1 %14732, %v19591_v2   ;;  %v20828_v27 = vsub.f32 1.0, %v19591_v2 }
0x2e14   :  { %9379 = vperm.xlu0 %14734, %v20829_v17  }
0x2e16   :  { %14733 = vset.pattern.permute.xlu1 %v20943_v3 }
0x2e17   :  { %9364 = vperm.xlu1 %14733, %v20830_v58  }
0x2e18   :  { %9384 = vperm.xlu0 %14734, %v20826_v4  }
0x2e1b   :  { %v8734_v53 = vpop.permute.xlu0 %8733  ;;  %9369 = vperm.xlu1 %14733, %v20831_v6  }
0x2e1c   :  { %12110 = vst.msk [vmem:[%s20713_s4 + $0x178] sm:$0xff] %vm210_vm1, %v8734_v53  ;;  %v8732_v5 = vpop.permute.xlu1 %8731 }
0x2e1d   :  { %12109 = vst.msk [vmem:[%s20713_s4 + $0x170] sm:$0xff] %vm210_vm1, %v8732_v5  ;;  %v14486_v57 = vpack.c.bf16 %v8734_v53, %v8732_v5 }
0x2e1f   :  { %14487 = vmatprep.subr.bf16.mxu0 %v14486_v57  ;;  %14735 = vset.pattern.permute.xlu1 %v20942_v45 }
0x2e20   :  { %14489 = vmatpush3.bf16.msra.mxu0 %v14486_v57  ;;  %9258 = vperm.xlu1 %14735, %v19603_v43  }
0x2e21   :  { %14507 = vmatprep.subr.bf16.mxu0 %v15716_v24 }
0x2e23   :  { %13747 = vmatmul.mubr.msk.f32.vlgmr.msra.gmra.mrb[120].mxu0 %vm80_vm0, %v12112_v36 }
0x2e24   :  { %13749 = vmatprep.mubr.msk.f32.mxu0 %vm80_vm0, %v12113_v30  ;;  %14509 = vmatpush3.bf16.msra.mxu0 %v15716_v24 }
0x2e25   :  { %14511 = vmatprep.subr.bf16.mxu0 %v15721_v26  ;;  %14736 = vset.pattern.permute.xlu1 %v20943_v3 }
0x2e26   :  { %9374 = vperm.xlu1 %14736, %v20828_v27  }
0x2e27   :  { %13750 = vmatmul.mubr.msk.f32.gmra.mrb[122].mxu0 %vm80_vm0, %v12114_v0 }
0x2e28   :  { %13752 = vmatprep.mubr.msk.f32.mxu0 %vm80_vm0, %v12115_v44  ;;  %14513 = vmatpush3.bf16.msra.mxu0 %v15721_v26 }
0x2e29   :  { %14515 = vmatprep.subr.bf16.mxu0 %v15732_v29 }
0x2e2a   :  { %14737 = vset.pattern.permute.xlu1 %v20942_v45 }
0x2e2b   :  { %13753 = vmatmul.mubr.msk.f32.gmra.mrb[124].mxu0 %vm80_vm0, %v12116_v22  ;;  %9262 = vperm.xlu1 %14737, %v19608_v7  }
0x2e2c   :  { %13755 = vmatprep.mubr.msk.f32.mxu0 %vm80_vm0, %v12117_v38  ;;  %14517 = vmatpush3.bf16.msra.mxu0 %v15732_v29 }
0x2e2d   :  { %14519 = vmatprep.subr.bf16.mxu0 %v15742_v32 }
0x2e2f   :  { %13756 = vmatmul.mubr.msk.f32.gmra.mrb[126].mxu0 %vm80_vm0, %v12118_v40  ;;  %9266 = vperm.xlu1 %14737, %v19615_v34  }
0x2e30   :  { %14521 = vmatpush3.bf16.msra.mxu0 %v15742_v32 }
0x2e31   :  { %14523 = vmatprep.subr.bf16.mxu0 %v15752_v35 }
0x2e33   :  { %14738 = vset.pattern.permute.xlu1 %v20943_v3 }
0x2e34   :  { %14525 = vmatpush3.bf16.msra.mxu0 %v15752_v35 }
0x2e35   :  { %14527 = vmatprep.subr.bf16.mxu0 %v20939_v52 }
0x2e38   :  { %14529 = vmatpush3.bf16.msra.mxu0 %v20939_v52 }
0x2e39   :  { %14539 = vmatprep.subr.bf16.mxu0 %v20940_v33 }
0x2ef6   :  { %v13748_v31 = vpop.f32.mrb[120].mxu0 }
0x2ef7   :  { %v8860_v8 = vpop.f32.mrb[121].mxu0  ;;  %v8900_v41 = vsel %vm210_vm1, %v13748_v31, %v19412_v1 }
0x2ef8   :  { %v8899_v42 = vsel %vm210_vm1, %v8860_v8, %v19414_v19 }
0x2ef9   :  { %13774 = vmatprep.mubr.msk.f32.mxu1 %vm80_vm0, %v8899_v42 }
0x2efa   :  { %v13751_v59 = vpop.f32.mrb[122].mxu0  ;;  %13775 = vmatmul.mubr.msk.f32.vlgmr.msra.gmra.mrb[120].mxu1 %vm80_vm0, %v8900_v41 }
0x2efb   :  { %v8870_v28 = vpop.f32.mrb[123].mxu0  ;;  %14533 = vmatpush3.bf16.msra.mxu1 %v15938_v50  ;;  %v8902_v60 = vsel %vm210_vm1, %v13751_v59, %v19423_v15 }
0x2efc   :  { %v8901_v12 = vsel %vm210_vm1, %v8870_v28, %v19426_v51  ;;  %14535 = vmatprep.subr.bf16.mxu1 %v20941_v13  ;;  %v20944_v28 = vld [vmem:[#allocation5_spill] sm:$0xff] }
0x2efd   :  { %13777 = vmatprep.mubr.msk.f32.mxu1 %vm80_vm0, %v8901_v12 }
0x2efe   :  { %v13754_v48 = vpop.f32.mrb[124].mxu0  ;;  %13778 = vmatmul.mubr.msk.f32.gmra.mrb[122].mxu1 %vm80_vm0, %v8902_v60 }
0x2eff   :  { %v8880_v46 = vpop.f32.mrb[125].mxu0  ;;  %14537 = vmatpush3.bf16.msra.mxu1 %v20941_v13  ;;  %v8904_v21 = vsel %vm210_vm1, %v13754_v48, %v19438_v23 }
0x2f00   :  { %v8903_v56 = vsel %vm210_vm1, %v8880_v46, %v19440_v49 }
0x2f01   :  { %13780 = vmatprep.mubr.msk.f32.mxu1 %vm80_vm0, %v8903_v56 }
0x2f02   :  { %v13757_v39 = vpop.f32.mrb[126].mxu0  ;;  %13781 = vmatmul.mubr.msk.f32.gmra.mrb[124].mxu1 %vm80_vm0, %v8904_v21 }
0x2f03   :  { %v8890_v25 = vpop.f32.mrb[127].mxu0  ;;  %v8906_v14 = vsel %vm210_vm1, %v13757_v39, %v19462_v54  ;;  %v20945_v39 = vld [vmem:[#allocation6_spill] sm:$0xff] }
0x2f04   :  { %v8905_v55 = vsel %vm210_vm1, %v8890_v25, %v19464_v62 }
0x2f05   :  { %13783 = vmatprep.mubr.msk.f32.mxu1 %vm80_vm0, %v8905_v55 }
0x2f06   :  { %13784 = vmatmul.mubr.msk.f32.gmra.mrb[126].mxu1 %vm80_vm0, %v8906_v14 }
0x2fcd   :  { %v13776_v53 = vpop.f32.mrb[120].mxu1 }
0x2fce   :  { %v9003_v5 = vadd.f32 %v13776_v53, %v19546_v47  ;;  %v8997_v57 = vpop.f32.mrb[121].mxu1  ;;  %v20946_v53 = vld [vmem:[#allocation7_spill] sm:$0xff] }
0x2fcf   :  { %v8998_v36 = vadd.f32 %v19579_v37, %v8997_v57 }
0x2fd0   :  { %v9037_v44 = vmax.f32 %v9003_v5, 0.0  ;;  %v9279_v5 = vpop.permute.xlu1 %9278 }
0x2fd1   :  { %v9036_v30 = vmax.f32 %v8998_v36, 0.0  ;;  %v13779_v0 = vpop.f32.mrb[122].mxu1  ;;  %v15586_v36 = vld [vmem:[%s20712_s3] ss:$0 sm:$0xff] }
0x2fd2   :  { %v9013_v22 = vadd.f32 %v13779_v0, %v19591_v2  ;;  %v9007_v38 = vpop.f32.mrb[123].mxu1 }
0x2fd3   :  { %v9008_v40 = vadd.f32 %v19585_v63, %v9007_v38  ;;  %13810 = vmatprep.mubr.msk.f32.mxu0 %vm356_vm2, %v9036_v30 }
0x2fd4   :  { %13811 = vmatmul.mubr.msk.f32.vlgmr.msra.gmra.mrb[128].mxu0 %vm356_vm2, %v9037_v44  ;;  %v9039_v42 = vmax.f32 %v9013_v22, 0.0  ;;  %v9287_v44 = vpop.permute.xlu1 %9286 }
0x2fd5   :  { %v9038_v31 = vmax.f32 %v9008_v40, 0.0  ;;  %v13782_v8 = vpop.f32.mrb[124].mxu1  ;;  %14541 = vmatpush3.bf16.msra.mxu0 %v20940_v33  ;;  %v9283_v40 = vpop.permute.xlu0 %9282 }
0x2fd6   :  { %v9023_v41 = vadd.f32 %v13782_v8, %v19603_v43  ;;  %v9017_v59 = vpop.f32.mrb[125].mxu1  ;;  %14543 = vmatprep.subr.bf16.mxu0 %v20944_v28 }
0x2fd7   :  { %v9018_v12 = vadd.f32 %v19596_v9, %v9017_v59  ;;  %13813 = vmatprep.mubr.msk.f32.mxu0 %vm356_vm2, %v9038_v31 }
0x2fd8   :  { %13814 = vmatmul.mubr.msk.f32.gmra.mrb[130].mxu0 %vm356_vm2, %v9039_v42  ;;  %v9041_v46 = vmax.f32 %v9023_v41, 0.0 }
0x2fd9   :  { %v9040_v60 = vmax.f32 %v9018_v12, 0.0  ;;  %v13785_v48 = vpop.f32.mrb[126].mxu1  ;;  %14545 = vmatpush3.bf16.msra.mxu0 %v20944_v28 }
0x2fda   :  { %v9033_v56 = vadd.f32 %v13785_v48, %v19615_v34  ;;  %v9027_v21 = vpop.f32.mrb[127].mxu1  ;;  %14547 = vmatprep.subr.bf16.mxu0 %v20945_v39  ;;  %v9291_v48 = vpop.permute.xlu1 %9290 }
0x2fdb   :  { %v9028_v25 = vadd.f32 %v19608_v7, %v9027_v21  ;;  %13816 = vmatprep.mubr.msk.f32.mxu0 %vm356_vm2, %v9040_v60 }
0x2fdc   :  { %13817 = vmatmul.mubr.msk.f32.gmra.mrb[132].mxu0 %vm356_vm2, %v9041_v46  ;;  %v9043_v14 = vmax.f32 %v9033_v56, 0.0 }
0x2fdd   :  { %v9042_v55 = vmax.f32 %v9028_v25, 0.0  ;;  %14549 = vmatpush3.bf16.msra.mxu0 %v20945_v39 }
0x2fde   :  { %14551 = vmatprep.subr.bf16.mxu0 %v20946_v53 }
0x2fdf   :  { %13819 = vmatprep.mubr.msk.f32.mxu0 %vm356_vm2, %v9042_v55 }
0x2fe0   :  { %13820 = vmatmul.mubr.msk.f32.gmra.mrb[134].mxu0 %vm356_vm2, %v9043_v14 }
0x2fe1   :  { %14553 = vmatpush3.bf16.msra.mxu0 %v20946_v53 }
0x2fe2   :  { %14571 = vmatprep.subr.bf16.mxu0 %v15665_v10 }
0x30a7   :  { %v13812_v57 = vpop.f32.mrb[128].mxu0 }
0x30a8   :  { %v9140_v30 = vadd.f32 %v15586_v36, %v13812_v57  ;;  %v9134_v0 = vpop.f32.mrb[129].mxu0  ;;  %v20827_v57 = vsub.f32 1.0, %v19608_v7 }
0x30a9   :  { %v9135_v22 = vadd.f32 %v15586_v36, %v9134_v0 }
0x30aa   :  { %v19679_v38 = vmax.f32 %v9140_v30, 0.0 }
0x30ab   :  { %v13815_v31 = vpop.f32.mrb[130].mxu0  ;;  %v19682_v42 = vmax.f32 %v9135_v22, 0.0 }
0x30ac   :  { %v9310_v8 = vmul.f32 %v9283_v40, %v19679_v38  ;;  %v9150_v41 = vadd.f32 %v15586_v36, %v13815_v31  ;;  %v9144_v59 = vpop.f32.mrb[131].mxu0 }
0x30ad   :  { %v9145_v12 = vadd.f32 %v15586_v36, %v9144_v59  ;;  %v9309_v56 = vmul.f32 %v9279_v5, %v19682_v42  ;;  %v9295_v5 = vpop.permute.xlu0 %9294 }
0x30ae   :  { %v19684_v60 = vmax.f32 %v9150_v41, 0.0  ;;  %9327 = vrot.lane.b32.xlu0 %v9310_v8, %s15605_s11  ;;  %v20825_v41 = vsub.f32 1.0, %v19615_v34 }
0x30af   :  { %v13818_v46 = vpop.f32.mrb[132].mxu0  ;;  %v19689_v25 = vmax.f32 %v9145_v12, 0.0 }
0x30b0   :  { %v9312_v21 = vmul.f32 %v9291_v48, %v19684_v60  ;;  %v9154_v55 = vpop.f32.mrb[133].mxu0  ;;  %v9160_v22 = vadd.f32 %v15586_v36, %v13818_v46 }
0x30b1   :  { %v9155_v14 = vadd.f32 %v15586_v36, %v9154_v55  ;;  %v9311_v0 = vmul.f32 %v9287_v44, %v19689_v25  ;;  %v9299_v44 = vpop.permute.xlu1 %9298  ;;  %v9303_v46 = vpop.permute.xlu0 %9302 }
0x30b2   :  { %9331 = vrot.lane.b32.xlu1 %v9312_v21, %s15605_s11  ;;  %9325 = vrot.lane.b32.xlu0 %v9309_v56, %s15605_s11  ;;  %v19701_v59 = vmax.f32 %v9160_v22, 0.0 }
0x30b3   :  { %v13821_v30 = vpop.f32.mrb[134].mxu0  ;;  %v19695_v40 = vmax.f32 %v9155_v14, 0.0 }
0x30b4   :  { %v9164_v31 = vpop.f32.mrb[135].mxu0  ;;  %v9170_v48 = vadd.f32 %v15586_v36, %v13821_v30  ;;  %v9314_v21 = vmul.f32 %v9299_v44, %v19701_v59 }
0x30b5   :  { %v9165_v8 = vadd.f32 %v15586_v36, %v9164_v31  ;;  %v9313_v12 = vmul.f32 %v9295_v5, %v19695_v40  ;;  %v9307_v36 = vpop.permute.xlu1 %9306 }
0x30b6   :  { %9329 = vrot.lane.b32.xlu1 %v9311_v0, %s15605_s11  ;;  %9389 = vperm.xlu0 %14734, %v20827_v57   ;;  %v19710_v55 = vmax.f32 %v9170_v48, 0.0  ;;  %v20947_v0 = vmov 100  }
0x30b7   :  { %v19704_v56 = vmax.f32 %v9165_v8, 0.0 }
0x30b8   :  { %v9316_v30 = vmul.f32 %v9307_v36, %v19710_v55 }
0x30b9   :  { %v9315_v14 = vmul.f32 %v9303_v46, %v19704_v56  ;;  %v9243_v22 = vpop.permute.xlu1 %9242 }
0x30ba   :  { %9394 = vperm.xlu0 %14734, %v20825_v41   ;;  %9333 = vrot.lane.b32.xlu1 %v9313_v12, %s15605_s11  ;;  %v9239_v12 = vpop.permute.xlu0 %9238  ;;  %v9270_v4 = vmul.f32 %v9243_v22, %v19679_v38 }
0x30bb   :  { %v9269_v58 = vmul.f32 %v9239_v12, %v19682_v42 }
0x30bd   :  { %v9247_v31 = vpop.permute.xlu1 %9246 }
0x30be   :  { %9335 = vrot.lane.b32.xlu1 %v9314_v21, %s15605_s11  ;;  %9337 = vrot.lane.b32.xlu0 %v9315_v14, %s15605_s11  ;;  %v9255_v44 = vpop.permute.xlu0 %9254  ;;  %v9271_v13 = vmul.f32 %v9247_v31, %v19689_v25 }
0x30c1   :  { %v9251_v5 = vpop.permute.xlu1 %9250 }
0x30c2   :  { %9339 = vrot.lane.b32.xlu1 %v9316_v30, %s15605_s11  ;;  %9183 = vperm.xlu0 %14734, %v19579_v37   ;;  %v9360_v21 = vpop.permute.xlu0 %9359  ;;  %v9272_v18 = vmul.f32 %v9251_v5, %v19684_v60 }
0x30c5   :  { %v9365_v8 = vpop.permute.xlu1 %9364 }
0x30c6   :  { %9188 = vperm.xlu1 %14738, %v19546_v47   ;;  %9193 = vperm.xlu0 %14734, %v19585_v63   ;;  %v9380_v36 = vpop.permute.xlu0 %9379 }
0x30c9   :  { %v9370_v48 = vpop.permute.xlu1 %9369 }
0x30ca   :  { %9198 = vperm.xlu1 %14738, %v19591_v2   ;;  %9203 = vperm.xlu0 %14734, %v19596_v9   ;;  %v9385_v41 = vpop.permute.xlu0 %9384 }
0x30cd   :  { %v9259_v46 = vpop.permute.xlu1 %9258 }
0x30ce   :  { %9208 = vperm.xlu1 %14738, %v19603_v43   ;;  %9213 = vperm.xlu0 %14734, %v19608_v7  }
0x30d1   :  { %v9375_v14 = vpop.permute.xlu1 %9374 }
0x30d2   :  { %9218 = vperm.xlu1 %14738, %v19615_v34   ;;  %14739 = vset.pattern.permute.xlu0 %v20947_v0 }
0x30d5   :  { %v9263_v30 = vpop.permute.xlu1 %9262 }
0x30d6   :  { %14740 = vset.pattern.permute.xlu1 %v20947_v0  ;;  %v9275_v31 = vmul.f32 %v9263_v30, %v19704_v56 }
0x30d9   :  { %v9267_v57 = vpop.permute.xlu1 %9266 }
0x3120   :  { %v9328_v27 = vpop.permute.xlu0 %9327 }
0x3121   :  { %v9350_v17 = vadd.f32 %v9328_v27, %v9270_v4 }
0x3123   :  { %v9398_v6 = vmul.f32 %v9365_v8, %v9350_v17  ;;  %v9273_v17 = vmul.f32 %v9255_v44, %v19695_v40 }
0x3124   :  { %v9332_v0 = vpop.permute.xlu1 %9331  ;;  %v9326_v53 = vpop.permute.xlu0 %9325 }
0x3125   :  { %v9352_v39 = vadd.f32 %v9332_v0, %v9272_v18  ;;  %v9349_v28 = vadd.f32 %v9326_v53, %v9269_v58  ;;  %9415 = vrot.lane.b32.xlu1 %v9398_v6, %s15605_s11  ;;  %v9274_v58 = vmul.f32 %v9259_v46, %v19701_v59 }
0x3127   :  { %v9400_v3 = vmul.f32 %v9375_v14, %v9352_v39  ;;  %v9397_v45 = vmul.f32 %v9360_v21, %v9349_v28 }
0x3128   :  { %v9330_v33 = vpop.permute.xlu1 %9329 }
0x3129   :  { %v9351_v22 = vadd.f32 %v9330_v33, %v9271_v13  ;;  %9419 = vrot.lane.b32.xlu1 %v9400_v3, %s15605_s11  ;;  %9413 = vrot.lane.b32.xlu0 %v9397_v45, %s15605_s11  ;;  %v9276_v45 = vmul.f32 %v9267_v57, %v19710_v55  ;;  %v20948_v57 = vmov 99  }
0x312b   :  { %v9399_v4 = vmul.f32 %v9370_v48, %v9351_v22 }
0x312c   :  { %v9334_v27 = vpop.permute.xlu1 %9333 }
0x312d   :  { %v9353_v5 = vadd.f32 %v9334_v27, %v9273_v17  ;;  %9417 = vrot.lane.b32.xlu0 %v9399_v4, %s15605_s11 }
0x312f   :  { %v9401_v18 = vmul.f32 %v9380_v36, %v9353_v5 }
0x3130   :  { %v9336_v6 = vpop.permute.xlu1 %9335 }
0x3131   :  { %v9354_v28 = vadd.f32 %v9336_v6, %v9274_v58  ;;  %9421 = vrot.lane.b32.xlu0 %v9401_v18, %s15605_s11 }
0x3133   :  { %v9402_v39 = vmul.f32 %v9385_v41, %v9354_v28 }
0x3134   :  { %v9340_v33 = vpop.permute.xlu1 %9339 }
0x3135   :  { %9423 = vrot.lane.b32.xlu1 %v9402_v39, %s15605_s11  ;;  %v9390_v13 = vpop.permute.xlu0 %9389  ;;  %v9356_v3 = vadd.f32 %v9340_v33, %v9276_v45 }
0x3139   :  { %v9395_v53 = vpop.permute.xlu0 %9394 }
0x313a   :  { %v9404_v0 = vmul.f32 %v9395_v53, %v9356_v3 }
0x313c   :  { %9427 = vrot.lane.b32.xlu1 %v9404_v0, %s15605_s11 }
0x313d   :  { %v9338_v8 = vpop.permute.xlu0 %9337 }
0x313e   :  { %v9355_v12 = vadd.f32 %v9338_v8, %v9275_v31 }
0x3140   :  { %v9403_v48 = vmul.f32 %v9390_v13, %v9355_v12  ;;  %9635 = vperm.xlu1 %14740, %v19546_v47  }
0x3141   :  { %v9184_v44 = vpop.permute.xlu0 %9183 }
0x3142   :  { %9425 = vrot.lane.b32.xlu0 %v9403_v48, %s15605_s11  ;;  %v9221_v4 = vmul.f32 %v9184_v44, %v19682_v42 }
0x3144   :  { %9639 = vperm.xlu1 %14740, %v19585_v63  }
0x3145   :  { %v9189_v41 = vpop.permute.xlu1 %9188  ;;  %v9194_v21 = vpop.permute.xlu0 %9193 }
0x3146   :  { %9631 = vperm.xlu0 %14739, %v19579_v37   ;;  %v9222_v27 = vmul.f32 %v9189_v41, %v19679_v38  ;;  %v9223_v6 = vmul.f32 %v9194_v21, %v19689_v25  ;;  %v15587_v41 = vld [vmem:[%s20712_s3 + $0x1] ss:$0 sm:$0xff] }
0x3148   :  { %9647 = vperm.xlu1 %14740, %v19596_v9  }
0x3149   :  { %v9199_v46 = vpop.permute.xlu1 %9198  ;;  %v9204_v36 = vpop.permute.xlu0 %9203 }
0x314a   :  { %9643 = vperm.xlu0 %14739, %v19591_v2   ;;  %v9224_v39 = vmul.f32 %v9199_v46, %v19684_v60  ;;  %v9225_v13 = vmul.f32 %v9204_v36, %v19695_v40 }
0x314c   :  { %9655 = vperm.xlu1 %14740, %v19608_v7  }
0x314d   :  { %v9209_v14 = vpop.permute.xlu1 %9208  ;;  %v9214_v22 = vpop.permute.xlu0 %9213 }
0x314e   :  { %9651 = vperm.xlu0 %14739, %v19603_v43   ;;  %v9226_v60 = vmul.f32 %v9209_v14, %v19701_v59  ;;  %v9227_v40 = vmul.f32 %v9214_v22, %v19704_v56 }
0x3150   :  { %14741 = vset.pattern.permute.xlu1 %v20948_v57 }
0x3151   :  { %v9219_v30 = vpop.permute.xlu1 %9218 }
0x3152   :  { %9659 = vperm.xlu0 %14739, %v19615_v34   ;;  %v9228_v31 = vmul.f32 %v9219_v30, %v19710_v55 }
0x3156   :  { %14742 = vset.pattern.permute.xlu0 %v20948_v57 }
0x3197   :  { %v9416_v17 = vpop.permute.xlu1 %9415 }
0x3198   :  { %v19757_v58 = vadd.f32 %v9416_v17, %v9222_v27 }
0x319b   :  { %v9414_v5 = vpop.permute.xlu0 %9413  ;;  %v9420_v28 = vpop.permute.xlu1 %9419 }
0x319c   :  { %v19755_v18 = vadd.f32 %v9414_v5, %v9221_v4  ;;  %v19767_v38 = vadd.f32 %v9420_v28, %v9224_v39 }
0x319e   :  { %13830 = vmatprep.mubr.msk.f32.mxu1 %vm210_vm1, %v19755_v18 }
0x319f   :  { %13831 = vmatmul.mubr.msk.f32.vlgmr.msra.gmra.mrb[128].mxu1 %vm210_vm1, %v19757_v58  ;;  %v9418_v33 = vpop.permute.xlu0 %9417 }
0x31a0   :  { %v19765_v42 = vadd.f32 %v9418_v33, %v9223_v6 }
0x31a2   :  { %13833 = vmatprep.mubr.msk.f32.mxu1 %vm210_vm1, %v19765_v42 }
0x31a3   :  { %13834 = vmatmul.mubr.msk.f32.gmra.mrb[130].mxu1 %vm210_vm1, %v19767_v38  ;;  %v9422_v25 = vpop.permute.xlu0 %9421 }
0x31a4   :  { %v19774_v45 = vadd.f32 %v9422_v25, %v9225_v13 }
0x31a6   :  { %13836 = vmatprep.mubr.msk.f32.mxu1 %vm210_vm1, %v19774_v45 }
0x31a7   :  { %v9424_v3 = vpop.permute.xlu1 %9423 }
0x31a8   :  { %v19779_v53 = vadd.f32 %v9424_v3, %v9226_v60 }
0x31aa   :  { %13837 = vmatmul.mubr.msk.f32.gmra.mrb[132].mxu1 %vm210_vm1, %v19779_v53 }
0x31ae   :  { %v9428_v0 = vpop.permute.xlu1 %9427 }
0x31af   :  { %v19787_v48 = vadd.f32 %v9428_v0, %v9228_v31 }
0x31b4   :  { %v9426_v8 = vpop.permute.xlu0 %9425 }
0x31b5   :  { %v19785_v12 = vadd.f32 %v9426_v8, %v9227_v40 }
0x31b7   :  { %13839 = vmatprep.mubr.msk.f32.mxu1 %vm210_vm1, %v19785_v12 }
0x31b8   :  { %13840 = vmatmul.mubr.msk.f32.gmra.mrb[134].mxu1 %vm210_vm1, %v19787_v48 }
0x31bf   :  { %v19798_v22 = vpop.permute.xlu1 %9635 }
0x31c3   :  { %v19805_v25 = vpop.permute.xlu1 %9639 }
0x31c5   :  { %v19796_v30 = vpop.permute.xlu0 %9631 }
0x31c9   :  { %v19802_v13 = vpop.permute.xlu0 %9643 }
0x31cd   :  { %v19812_v31 = vpop.permute.xlu0 %9651 }
0x3272   :  { %v13832_v59 = vpop.f32.mrb[128].mxu1 }
0x3273   :  { %v9541_v56 = vadd.f32 %v15587_v41, %v13832_v59  ;;  %v9535_v44 = vpop.f32.mrb[129].mxu1 }
0x3274   :  { %v9536_v46 = vadd.f32 %v15587_v41, %v9535_v44  ;;  %v19814_v44 = vpop.permute.xlu1 %9647 }
0x3275   :  { %15331 = vtanh.f32 %v9541_v56 }
0x3276   :  { %15333 = vtanh.f32 %v9536_v46  ;;  %v13835_v55 = vpop.f32.mrb[130].mxu1 }
0x3277   :  { %v9551_v21 = vadd.f32 %v15587_v41, %v13835_v55  ;;  %v9545_v14 = vpop.f32.mrb[131].mxu1 }
0x3278   :  { %v9546_v36 = vadd.f32 %v15587_v41, %v9545_v14 }
0x3279   :  { %15335 = vtanh.f32 %v9551_v21 }
0x327a   :  { %15337 = vtanh.f32 %v9546_v36 }
0x327d   :  { %v13838_v17 = vpop.f32.mrb[132].mxu1 }
0x327e   :  { %v9561_v4 = vadd.f32 %v15587_v41, %v13838_v17  ;;  %v9555_v27 = vpop.f32.mrb[133].mxu1 }
0x327f   :  { %v15332_v5 = vpop.eup %15331  ;;  %v9556_v6 = vadd.f32 %v15587_v41, %v9555_v27 }
0x3280   :  { %v15334_v28 = vpop.eup %15333  ;;  %15339 = vtanh.f32 %v9561_v4  ;;  %v9687_v39 = vmul.f32 %v15332_v5, %v19798_v22 }
0x3281   :  { %15341 = vtanh.f32 %v9556_v6  ;;  %v9686_v33 = vmul.f32 %v15334_v28, %v19796_v30 }
0x3282   :  { %9704 = vrot.lane.b32.xlu0 %v9687_v39, %s15605_s11 }
0x3283   :  { %v15336_v60 = vpop.eup %15335  ;;  %9702 = vrot.lane.b32.xlu1 %v9686_v33, %s15605_s11  ;;  %v19820_v33 = vpop.permute.xlu0 %9659 }
0x3284   :  { %v15338_v3 = vpop.eup %15337  ;;  %v9689_v40 = vmul.f32 %v15336_v60, %v19802_v13 }
0x3285   :  { %v9688_v0 = vmul.f32 %v15338_v3, %v19805_v25 }
0x3286   :  { %9708 = vrot.lane.b32.xlu0 %v9689_v40, %s15605_s11  ;;  %v19824_v40 = vpop.permute.xlu1 %9655 }
0x3287   :  { %9706 = vrot.lane.b32.xlu1 %v9688_v0, %s15605_s11 }
0x328a   :  { %v15340_v8 = vpop.eup %15339 }
0x328b   :  { %v15342_v59 = vpop.eup %15341  ;;  %v9691_v55 = vmul.f32 %v15340_v8, %v19812_v31  ;;  %v13841_v14 = vpop.f32.mrb[134].mxu1  ;;  %v12160_v8 = vmul.f32 -1.442695, %v9541_v56 }
0x328c   :  { %v9690_v17 = vmul.f32 %v15342_v59, %v19814_v44  ;;  %v9571_v27 = vadd.f32 %v15587_v41, %v13841_v14  ;;  %v9565_v5 = vpop.f32.mrb[135].mxu1  ;;  %v12159_v59 = vmul.f32 -1.442695, %v9536_v46  ;;  %v12164_v14 = vmul.f32 -1.442695, %v9561_v4 }
0x328d   :  { %9712 = vrot.lane.b32.xlu0 %v9691_v55, %s15605_s11  ;;  %v9566_v28 = vadd.f32 %v15587_v41, %v9565_v5  ;;  %v12162_v55 = vmul.f32 -1.442695, %v9551_v21  ;;  %v12161_v41 = vmul.f32 -1.442695, %v9546_v36 }
0x328e   :  { %15343 = vtanh.f32 %v9571_v27  ;;  %9710 = vrot.lane.b32.xlu1 %v9690_v17, %s15605_s11  ;;  %v12163_v17 = vmul.f32 -1.442695, %v9556_v6  ;;  %v12166_v4 = vmul.f32 -1.442695, %v9571_v27 }
0x328f   :  { %15345 = vtanh.f32 %v9566_v28  ;;  %v12165_v6 = vmul.f32 -1.442695, %v9566_v28 }
0x3290   :  { %15347 = vpow2.f32 %v12160_v8 }
0x3291   :  { %15349 = vpow2.f32 %v12159_v59 }
0x3292   :  { %15351 = vpow2.f32 %v12162_v55 }
0x3293   :  { %15353 = vpow2.f32 %v12161_v41 }
0x3294   :  { %15355 = vpow2.f32 %v12164_v14 }
0x3295   :  { %15357 = vpow2.f32 %v12163_v17 }
0x3298   :  { %v15344_v39 = vpop.eup %15343 }
0x3299   :  { %v9693_v60 = vmul.f32 %v15344_v39, %v19820_v33  ;;  %v15346_v3 = vpop.eup %15345 }
0x329a   :  { %v9692_v0 = vmul.f32 %v15346_v3, %v19824_v40  ;;  %v15348_v5 = vpop.eup %15347 }
0x329b   :  { %9716 = vrot.lane.b32.xlu0 %v9693_v60, %s15605_s11  ;;  %v15350_v39 = vpop.eup %15349  ;;  %v9599_v60 = vadd.f32 1.0, %v15348_v5 }
0x329c   :  { %9714 = vrot.lane.b32.xlu1 %v9692_v0, %s15605_s11  ;;  %v15352_v57 = vpop.eup %15351  ;;  %v9598_v52 = vadd.f32 1.0, %v15350_v39 }
0x329d   :  { %v15354_v3 = vpop.eup %15353  ;;  %15359 = vrcp.f32 %v9599_v60  ;;  %v9601_v0 = vadd.f32 1.0, %v15352_v57 }
0x329e   :  { %15361 = vrcp.f32 %v9598_v52  ;;  %v9600_v56 = vadd.f32 1.0, %v15354_v3  ;;  %v15356_v46 = vpop.eup %15355 }
0x329f   :  { %v15358_v21 = vpop.eup %15357  ;;  %15363 = vrcp.f32 %v9601_v0  ;;  %v9603_v36 = vadd.f32 1.0, %v15356_v46 }
0x32a0   :  { %15365 = vrcp.f32 %v9600_v56  ;;  %v9602_v8 = vadd.f32 1.0, %v15358_v21 }
0x32a1   :  { %15367 = vrcp.f32 %v9603_v36 }
0x32a2   :  { %15369 = vrcp.f32 %v9602_v8 }
0x32a3   :  { %15371 = vpow2.f32 %v12166_v4 }
0x32a4   :  { %15373 = vpow2.f32 %v12165_v6 }
0x32a7   :  { %v15360_v59 = vpop.eup %15359 }
0x32a8   :  { %v15362_v55 = vpop.eup %15361  ;;  %v9663_v41 = vmul.f32 %v15360_v59, %v19798_v22 }
0x32a9   :  { %v15364_v14 = vpop.eup %15363  ;;  %v9662_v52 = vmul.f32 %v15362_v55, %v19796_v30 }
0x32aa   :  { %v15366_v57 = vpop.eup %15365  ;;  %v9671_v17 = vmul.f32 %v9663_v41, %v19757_v58  ;;  %v9665_v5 = vmul.f32 %v15364_v14, %v19802_v13 }
0x32ab   :  { %v9670_v39 = vmul.f32 %v9662_v52, %v19755_v18  ;;  %v9664_v27 = vmul.f32 %v15366_v57, %v19805_v25  ;;  %v15368_v28 = vpop.eup %15367 }
0x32ac   :  { %v15370_v60 = vpop.eup %15369  ;;  %v9673_v3 = vmul.f32 %v9665_v5, %v19767_v38  ;;  %v9679_v0 = vsub.f32 %v19757_v58, %v9671_v17  ;;  %v9667_v13 = vmul.f32 %v15368_v28, %v19812_v31 }
0x32ad   :  { %v15372_v22 = vpop.eup %15371  ;;  %v9672_v56 = vmul.f32 %v9664_v27, %v19765_v42  ;;  %v9678_v30 = vsub.f32 %v19755_v18, %v9670_v39  ;;  %v9666_v25 = vmul.f32 %v15370_v60, %v19814_v44 }
0x32ae   :  { %v15374_v21 = vpop.eup %15373  ;;  %v9605_v6 = vadd.f32 1.0, %v15372_v22  ;;  %v9681_v59 = vsub.f32 %v19767_v38, %v9673_v3  ;;  %v9675_v31 = vmul.f32 %v9667_v13, %v19779_v53 }
0x32af   :  { %v9604_v55 = vadd.f32 1.0, %v15374_v21  ;;  %v9680_v58 = vsub.f32 %v19765_v42, %v9672_v56  ;;  %v9674_v38 = vmul.f32 %v9666_v25, %v19774_v45 }
0x32b0   :  { %15375 = vrcp.f32 %v9605_v6  ;;  %v9683_v5 = vsub.f32 %v19779_v53, %v9675_v31 }
0x32b1   :  { %15377 = vrcp.f32 %v9604_v55  ;;  %v9682_v27 = vsub.f32 %v19774_v45, %v9674_v38 }
0x32ba   :  { %v15376_v45 = vpop.eup %15375 }
0x32f4   :  { %v9705_v46 = vpop.permute.xlu0 %9704 }
0x32f5   :  { %v9727_v36 = vadd.f32 %v9705_v46, %v9679_v0  ;;  %v9703_v8 = vpop.permute.xlu1 %9702  ;;  %v9669_v0 = vmul.f32 %v15376_v45, %v19820_v33 }
0x32f6   :  { %v9726_v4 = vadd.f32 %v9703_v8, %v9678_v30 }
0x32f7   :  { %v9735_v18 = vsel %vm210_vm1, %v9727_v36, %v19412_v1 }
0x32f8   :  { %v9709_v41 = vpop.permute.xlu0 %9708  ;;  %v9734_v14 = vsel %vm210_vm1, %v9726_v4, %v19414_v19 }
0x32f9   :  { %v9729_v52 = vadd.f32 %v9709_v41, %v9681_v59  ;;  %v9707_v57 = vpop.permute.xlu1 %9706  ;;  %13858 = vmatprep.mubr.msk.f32.mxu0 %vm80_vm0, %v9734_v14 }
0x32fa   :  { %v9728_v44 = vadd.f32 %v9707_v57, %v9680_v58  ;;  %13859 = vmatmul.mubr.msk.f32.vlgmr.msra.gmra.mrb[136].mxu0 %vm80_vm0, %v9735_v18 }
0x32fb   :  { %14573 = vmatpush3.bf16.msra.mxu0 %v15665_v10  ;;  %v9737_v17 = vsel %vm210_vm1, %v9729_v52, %v19423_v15 }
0x32fc   :  { %v9736_v42 = vsel %vm210_vm1, %v9728_v44, %v19426_v51  ;;  %14575 = vmatprep.subr.bf16.mxu0 %v15667_v11 }
0x32fd   :  { %13861 = vmatprep.mubr.msk.f32.mxu0 %vm80_vm0, %v9736_v42 }
0x32fe   :  { %13862 = vmatmul.mubr.msk.f32.gmra.mrb[138].mxu0 %vm80_vm0, %v9737_v17 }
0x32ff   :  { %v9713_v39 = vpop.permute.xlu0 %9712  ;;  %14577 = vmatpush3.bf16.msra.mxu0 %v15667_v11  ;;  %v15378_v11 = vpop.eup %15377 }
0x3300   :  { %v9731_v10 = vadd.f32 %v9713_v39, %v9683_v5  ;;  %v9711_v28 = vpop.permute.xlu1 %9710  ;;  %14579 = vmatprep.subr.bf16.mxu0 %v15686_v16  ;;  %v9668_v22 = vmul.f32 %v15378_v11, %v19824_v40 }
0x3301   :  { %v9730_v60 = vadd.f32 %v9711_v28, %v9682_v27 }
0x3302   :  { %v9739_v53 = vsel %vm210_vm1, %v9731_v10, %v19438_v23  ;;  %v9676_v56 = vmul.f32 %v9668_v22, %v19785_v12 }
0x3303   :  { %v9738_v3 = vsel %vm210_vm1, %v9730_v60, %v19440_v49  ;;  %14581 = vmatpush3.bf16.msra.mxu0 %v15686_v16  ;;  %v9677_v16 = vmul.f32 %v9669_v0, %v19787_v48 }
0x3304   :  { %13864 = vmatprep.mubr.msk.f32.mxu0 %vm80_vm0, %v9738_v3  ;;  %14583 = vmatprep.subr.bf16.mxu0 %v15703_v20  ;;  %v9684_v21 = vsub.f32 %v19785_v12, %v9676_v56 }
0x3305   :  { %13865 = vmatmul.mubr.msk.f32.gmra.mrb[140].mxu0 %vm80_vm0, %v9739_v53  ;;  %v9685_v30 = vsub.f32 %v19787_v48, %v9677_v16  ;;  %v15588_v48 = vld [vmem:[%s20712_s3 + $0x2] ss:$0 sm:$0xff] }
0x3307   :  { %14585 = vmatpush3.bf16.msra.mxu0 %v15703_v20 }
0x3308   :  { %14611 = vmatprep.subr.bf16.mxu0 %v15938_v50 }
0x330d   :  { %v9717_v46 = vpop.permute.xlu0 %9716 }
0x330e   :  { %v9733_v36 = vadd.f32 %v9717_v46, %v9685_v30  ;;  %v9715_v8 = vpop.permute.xlu1 %9714 }
0x330f   :  { %v9732_v13 = vadd.f32 %v9715_v8, %v9684_v21 }
0x3310   :  { %v9741_v33 = vsel %vm210_vm1, %v9733_v36, %v19462_v54 }
0x3311   :  { %v9740_v20 = vsel %vm210_vm1, %v9732_v13, %v19464_v62 }
0x3312   :  { %13867 = vmatprep.mubr.msk.f32.mxu0 %vm80_vm0, %v9740_v20 }
0x3313   :  { %13868 = vmatmul.mubr.msk.f32.gmra.mrb[142].mxu0 %vm80_vm0, %v9741_v33 }
0x33cd   :  { %v13860_v40 = vpop.f32.mrb[136].mxu0 }
0x33ce   :  { %v19887_v4 = vadd.f32 %v15588_v48, %v13860_v40  ;;  %v9832_v12 = vpop.f32.mrb[137].mxu0 }
0x33cf   :  { %v19889_v25 = vadd.f32 %v15588_v48, %v9832_v12 }
0x33d0   :  { %9929 = vrot.lane.b32.xlu0 %v19887_v4, %s15607_s14  ;;  %v12176_v42 = vmul.f32 -1.442695, %v19887_v4 }
0x33d1   :  { %9927 = vrot.lane.b32.xlu1 %v19889_v25, %s15607_s14  ;;  %v13863_v6 = vpop.f32.mrb[138].mxu0  ;;  %v12175_v17 = vmul.f32 -1.442695, %v19889_v25 }
0x33d2   :  { %v19895_v59 = vadd.f32 %v15588_v48, %v13863_v6  ;;  %v9842_v55 = vpop.f32.mrb[139].mxu0  ;;  %15379 = vpow2.f32 %v12176_v42 }
0x33d3   :  { %v19897_v41 = vadd.f32 %v15588_v48, %v9842_v55  ;;  %15381 = vpow2.f32 %v12175_v17 }
0x33d4   :  { %9933 = vrot.lane.b32.xlu0 %v19895_v59, %s15607_s14  ;;  %v12178_v5 = vmul.f32 -1.442695, %v19895_v59 }
0x33d5   :  { %9931 = vrot.lane.b32.xlu1 %v19897_v41, %s15607_s14  ;;  %v12177_v39 = vmul.f32 -1.442695, %v19897_v41 }
0x33d6   :  { %15383 = vpow2.f32 %v12178_v5 }
0x33d7   :  { %15385 = vpow2.f32 %v12177_v39 }
0x33d8   :  { %v13866_v58 = vpop.f32.mrb[140].mxu0 }
0x33d9   :  { %v19903_v14 = vadd.f32 %v15588_v48, %v13866_v58  ;;  %v9852_v18 = vpop.f32.mrb[141].mxu0 }
0x33da   :  { %v19905_v52 = vadd.f32 %v15588_v48, %v9852_v18 }
0x33db   :  { %9937 = vrot.lane.b32.xlu0 %v19903_v14, %s15607_s14  ;;  %v12180_v27 = vmul.f32 -1.442695, %v19903_v14 }
0x33dc   :  { %9935 = vrot.lane.b32.xlu1 %v19905_v52, %s15607_s14  ;;  %v12179_v10 = vmul.f32 -1.442695, %v19905_v52  ;;  %v15380_v28 = vpop.eup %15379 }
0x33dd   :  { %15387 = vpow2.f32 %v12180_v27  ;;  %v15382_v60 = vpop.eup %15381  ;;  %v9896_v3 = vadd.f32 1.0, %v15380_v28 }
0x33de   :  { %15389 = vpow2.f32 %v12179_v10  ;;  %v9895_v45 = vadd.f32 1.0, %v15382_v60 }
0x33df   :  { %15391 = vrcp.f32 %v9896_v3 }
0x33e0   :  { %v15384_v53 = vpop.eup %15383  ;;  %15393 = vrcp.f32 %v9895_v45 }
0x33e1   :  { %v15386_v11 = vpop.eup %15385  ;;  %v9898_v0 = vadd.f32 1.0, %v15384_v53 }
0x33e2   :  { %v9897_v22 = vadd.f32 1.0, %v15386_v11 }
0x33e3   :  { %15395 = vrcp.f32 %v9898_v0 }
0x33e4   :  { %15397 = vrcp.f32 %v9897_v22 }
0x33e6   :  { %v13869_v57 = vpop.f32.mrb[142].mxu0 }
0x33e7   :  { %v19911_v31 = vadd.f32 %v15588_v48, %v13869_v57  ;;  %v9862_v44 = vpop.f32.mrb[143].mxu0  ;;  %v15388_v16 = vpop.eup %15387 }
0x33e8   :  { %v19913_v38 = vadd.f32 %v15588_v48, %v9862_v44  ;;  %v15390_v56 = vpop.eup %15389  ;;  %v9900_v46 = vadd.f32 1.0, %v15388_v16 }
0x33e9   :  { %9941 = vrot.lane.b32.xlu0 %v19911_v31, %s15607_s14  ;;  %v9899_v30 = vadd.f32 1.0, %v15390_v56  ;;  %v12182_v21 = vmul.f32 -1.442695, %v19911_v31  ;;  %v19927_v8 = vpop.eup %15391  ;;  %v15589_v56 = vld [vmem:[%s20711_s1 + $0x188] sm:$0xff] }
0x33ea   :  { %9939 = vrot.lane.b32.xlu1 %v19913_v38, %s15607_s14  ;;  %v12181_v36 = vmul.f32 -1.442695, %v19913_v38  ;;  %15399 = vrcp.f32 %v9900_v46  ;;  %v19929_v20 = vpop.eup %15393  ;;  %v15590_v46 = vld [vmem:[%s20711_s1 + $0x180] sm:$0xff] }
0x33eb   :  { %15401 = vrcp.f32 %v9899_v30  ;;  %v15591_v30 = vld [vmem:[%s20711_s1 + $0x190] sm:$0xff] }
0x33ec   :  { %15403 = vpow2.f32 %v12182_v21  ;;  %v20949_v21 = vsub.f32 1.0, %v19579_v37  ;;  %v20953_v37 = vsub.f32 1.0, %v19591_v2  ;;  %v15596_v2 = vld [vmem:[%s20711_s1 + $0x1b8] sm:$0xff] }
0x33ed   :  { %15405 = vpow2.f32 %v12181_v36  ;;  %v19934_v12 = vpop.eup %15395  ;;  %v20950_v36 = vsub.f32 1.0, %v19585_v63  ;;  %v15595_v63 = vld [vmem:[%s20711_s1 + $0x1a8] sm:$0xff] }
0x33ee   :  { %v19937_v55 = vpop.eup %15397 }
0x33f4   :  { %v19943_v44 = vpop.eup %15399 }
0x33f5   :  { %v19945_v42 = vpop.eup %15401 }
0x33f6   :  { %v15404_v5 = vpop.eup %15403 }
0x33f7   :  { %v15406_v10 = vpop.eup %15405  ;;  %v9902_v60 = vadd.f32 1.0, %v15404_v5 }
0x33f8   :  { %v9901_v3 = vadd.f32 1.0, %v15406_v10 }
0x33f9   :  { %15407 = vrcp.f32 %v9902_v60 }
0x33fa   :  { %15409 = vrcp.f32 %v9901_v3 }
0x3403   :  { %v19951_v53 = vpop.eup %15407 }
0x3404   :  { %v19953_v11 = vpop.eup %15409 }
0x3442   :  { %v9930_v13 = vpop.permute.xlu0 %9929 }
0x3443   :  { %v9952_v33 = vmul.f32 %v19927_v8, %v9930_v13  ;;  %v9928_v40 = vpop.permute.xlu1 %9927  ;;  %v20951_v13 = vsub.f32 1.0, %v19546_v47  ;;  %v15594_v47 = vld [vmem:[%s20711_s1 + $0x1b0] sm:$0xff] }
0x3444   :  { %v9951_v48 = vmul.f32 %v19929_v20, %v9928_v40  ;;  %v15593_v40 = vld [vmem:[%s20711_s1 + $0x198] sm:$0xff] }
0x3445   :  { %9969 = vrot.lane.b32.xlu0 %v9952_v33, %s15609_s15  ;;  %v15592_v33 = vld [vmem:[%s20711_s1 + $0x1a0] sm:$0xff] }
0x3446   :  { %9967 = vrot.lane.b32.xlu1 %v9951_v48, %s15609_s15  ;;  %v9934_v6 = vpop.permute.xlu0 %9933  ;;  %v20952_v48 = vsub.f32 1.0, %v19596_v9  ;;  %v20956_v9 = vsub.f32 1.0, %v19615_v34 }
0x3447   :  { %v9954_v58 = vmul.f32 %v19934_v12, %v9934_v6  ;;  %v9932_v18 = vpop.permute.xlu1 %9931  ;;  %v20954_v6 = vsub.f32 1.0, %v19608_v7 }
0x3448   :  { %v9953_v57 = vmul.f32 %v19937_v55, %v9932_v18 }
0x3449   :  { %9973 = vrot.lane.b32.xlu0 %v9954_v58, %s15609_s15  ;;  %v20955_v58 = vsub.f32 1.0, %v19603_v43 }
0x344a   :  { %9971 = vrot.lane.b32.xlu1 %v9953_v57, %s15609_s15 }
0x344d   :  { %v9938_v17 = vpop.permute.xlu0 %9937 }
0x344e   :  { %v9956_v39 = vmul.f32 %v19943_v44, %v9938_v17  ;;  %v9936_v27 = vpop.permute.xlu1 %9935 }
0x344f   :  { %v9955_v28 = vmul.f32 %v19945_v42, %v9936_v27 }
0x3450   :  { %9977 = vrot.lane.b32.xlu0 %v9956_v39, %s15609_s15 }
0x3451   :  { %9975 = vrot.lane.b32.xlu1 %v9955_v28, %s15609_s15 }
0x345b   :  { %v9942_v45 = vpop.permute.xlu0 %9941 }
0x345c   :  { %v9958_v0 = vmul.f32 %v19951_v53, %v9942_v45  ;;  %v9940_v22 = vpop.permute.xlu1 %9939 }
0x345d   :  { %v9957_v16 = vmul.f32 %v19953_v11, %v9940_v22 }
0x345e   :  { %9981 = vrot.lane.b32.xlu0 %v9958_v0, %s15609_s15 }
0x345f   :  { %9979 = vrot.lane.b32.xlu1 %v9957_v16, %s15609_s15 }
0x3462   :  { %10076 = vperm.xlu0 %14742, %v15589_v56  }
0x3463   :  { %10072 = vperm.xlu1 %14741, %v15590_v46  }
0x3466   :  { %10080 = vperm.xlu0 %14742, %v15591_v30  }
0x3467   :  { %10112 = vperm.xlu1 %14741, %v20949_v21  }
0x346a   :  { %10120 = vperm.xlu0 %14742, %v20950_v36  }
0x346b   :  { %10116 = vperm.xlu1 %14741, %v20951_v13  }
0x346e   :  { %10088 = vperm.xlu0 %14742, %v15592_v33  }
0x346f   :  { %10084 = vperm.xlu1 %14741, %v15593_v40  }
0x3472   :  { %10128 = vperm.xlu0 %14742, %v20952_v48  }
0x3473   :  { %10124 = vperm.xlu1 %14741, %v20953_v37  }
0x3476   :  { %10096 = vperm.xlu0 %14742, %v15594_v47  }
0x3477   :  { %10092 = vperm.xlu1 %14741, %v15595_v63  }
0x347a   :  { %10136 = vperm.xlu0 %14742, %v20954_v6  }
0x347b   :  { %10132 = vperm.xlu1 %14741, %v20955_v58  }
0x347e   :  { %14743 = vset.pattern.permute.xlu0 %v20853_v61 }
0x347f   :  { %10100 = vperm.xlu1 %14741, %v15596_v2   ;;  %v10008_v2 = vsub.f32 1.0, %v19927_v8 }
0x3483   :  { %10140 = vperm.xlu1 %14741, %v20956_v9  }
0x3487   :  { %14744 = vset.pattern.permute.xlu1 %v20853_v61 }
0x34b7   :  { %v9970_v18 = vpop.permute.xlu0 %9969 }
0x34b8   :  { %v9992_v57 = vadd.f32 %v9970_v18, %v19887_v4  ;;  %v9968_v7 = vpop.permute.xlu1 %9967  ;;  %v10007_v18 = vsub.f32 1.0, %v19929_v20 }
0x34b9   :  { %v9991_v17 = vadd.f32 %v9968_v7, %v19889_v25 }
0x34ba   :  { %15411 = vtanh.f32 %v9992_v57  ;;  %v10056_v57 = vmul.f32 %v19927_v8, %v19412_v1 }
0x34bb   :  { %15413 = vtanh.f32 %v9991_v17  ;;  %v9974_v43 = vpop.permute.xlu0 %9973 }
0x34bc   :  { %v9994_v5 = vadd.f32 %v9974_v43, %v19895_v59  ;;  %v9972_v39 = vpop.permute.xlu1 %9971  ;;  %v10055_v43 = vmul.f32 %v19929_v20, %v19414_v19  ;;  %v10057_v20 = vmul.f32 %v19937_v55, %v19426_v51 }
0x34bd   :  { %v9993_v27 = vadd.f32 %v9972_v39, %v19897_v41 }
0x34be   :  { %15415 = vtanh.f32 %v9994_v5 }
0x34bf   :  { %15417 = vtanh.f32 %v9993_v27  ;;  %v10010_v27 = vsub.f32 1.0, %v19934_v12 }
0x34c2   :  { %v9978_v34 = vpop.permute.xlu0 %9977 }
0x34c3   :  { %v9996_v10 = vadd.f32 %v9978_v34, %v19903_v14  ;;  %v9976_v61 = vpop.permute.xlu1 %9975 }
0x34c4   :  { %v15412_v28 = vpop.eup %15411  ;;  %v9995_v4 = vadd.f32 %v9976_v61, %v19905_v52  ;;  %v10009_v61 = vsub.f32 1.0, %v19937_v55  ;;  %v10012_v55 = vsub.f32 1.0, %v19943_v44 }
0x34c5   :  { %v15414_v60 = vpop.eup %15413  ;;  %15419 = vtanh.f32 %v9996_v10  ;;  %10025 = vrot.lane.b32.xlu1 %v15412_v28, %s15605_s11 }
0x34c6   :  { %15421 = vtanh.f32 %v9995_v4  ;;  %10023 = vrot.lane.b32.xlu0 %v15414_v60, %s15605_s11  ;;  %v10058_v60 = vmul.f32 %v19934_v12, %v19423_v15 }
0x34c8   :  { %v15416_v25 = vpop.eup %15415 }
0x34c9   :  { %v15418_v59 = vpop.eup %15417  ;;  %10029 = vrot.lane.b32.xlu1 %v15416_v25, %s15605_s11 }
0x34ca   :  { %10027 = vrot.lane.b32.xlu0 %v15418_v59, %s15605_s11 }
0x34cf   :  { %v15420_v41 = vpop.eup %15419 }
0x34d0   :  { %v15422_v3 = vpop.eup %15421  ;;  %10033 = vrot.lane.b32.xlu1 %v15420_v41, %s15605_s11  ;;  %v9982_v14 = vpop.permute.xlu0 %9981 }
0x34d1   :  { %10031 = vrot.lane.b32.xlu0 %v15422_v3, %s15605_s11  ;;  %v9998_v52 = vadd.f32 %v9982_v14, %v19911_v31  ;;  %v9980_v45 = vpop.permute.xlu1 %9979 }
0x34d2   :  { %v9997_v0 = vadd.f32 %v9980_v45, %v19913_v38 }
0x34d3   :  { %15423 = vtanh.f32 %v9998_v52 }
0x34d4   :  { %15425 = vtanh.f32 %v9997_v0 }
0x34dd   :  { %v15424_v22 = vpop.eup %15423 }
0x34de   :  { %v15426_v16 = vpop.eup %15425  ;;  %10037 = vrot.lane.b32.xlu1 %v15424_v22, %s15605_s11 }
0x34df   :  { %10035 = vrot.lane.b32.xlu0 %v15426_v16, %s15605_s11 }
0x34e1   :  { %v10077_v21 = vpop.permute.xlu0 %10076 }
0x34e2   :  { %v10073_v56 = vpop.permute.xlu1 %10072 }
0x34e5   :  { %v10081_v13 = vpop.permute.xlu0 %10080 }
0x34e6   :  { %v10113_v46 = vpop.permute.xlu1 %10112 }
0x34e7   :  { %v10143_v59 = vmul.f32 %v10113_v46, %v19414_v19  ;;  %v10011_v46 = vsub.f32 1.0, %v19945_v42 }
0x34e9   :  { %v10121_v40 = vpop.permute.xlu0 %10120 }
0x34ea   :  { %v10117_v30 = vpop.permute.xlu1 %10116  ;;  %v10145_v12 = vmul.f32 %v10121_v40, %v19426_v51  ;;  %v10059_v51 = vmul.f32 %v19945_v42, %v19440_v49  ;;  %v10014_v42 = vsub.f32 1.0, %v19951_v53 }
0x34eb   :  { %v10144_v28 = vmul.f32 %v10117_v30, %v19412_v1 }
0x34ed   :  { %v10089_v48 = vpop.permute.xlu0 %10088 }
0x34ee   :  { %v10085_v36 = vpop.permute.xlu1 %10084 }
0x34f1   :  { %v10129_v38 = vpop.permute.xlu0 %10128 }
0x34f2   :  { %v10125_v33 = vpop.permute.xlu1 %10124 }
0x34f3   :  { %v10146_v1 = vmul.f32 %v10125_v33, %v19423_v15  ;;  %v10060_v15 = vmul.f32 %v19943_v44, %v19438_v23 }
0x34f5   :  { %v20019_v63 = vpop.permute.xlu0 %10096 }
0x34f6   :  { %v10093_v31 = vpop.permute.xlu1 %10092 }
0x34f9   :  { %v20023_v58 = vpop.permute.xlu0 %10136 }
0x34fa   :  { %v10133_v37 = vpop.permute.xlu1 %10132 }
0x34fe   :  { %v20017_v47 = vpop.permute.xlu1 %10100 }
0x3502   :  { %v20021_v6 = vpop.permute.xlu1 %10140 }
0x3537   :  { %v10026_v9 = vpop.permute.xlu1 %10025 }
0x3538   :  { %v10048_v7 = vmul.f32 %v10026_v9, %v10008_v2  ;;  %v10024_v17 = vpop.permute.xlu0 %10023  ;;  %v10148_v2 = vmul.f32 %v10133_v37, %v19438_v23  ;;  %v12191_v23 = vld [vmem:[%s20709_s0 + $0x1c0] sm:$0xff]  ;;  %v10061_v37 = vmul.f32 %v19953_v11, %v19464_v62 }
0x3539   :  { %v10047_v5 = vmul.f32 %v10024_v17, %v10007_v18  ;;  %v10147_v18 = vmul.f32 %v10129_v38, %v19440_v49  ;;  %v10062_v49 = vmul.f32 %v19951_v53, %v19462_v54  ;;  %13886 = vmatprep.mubr.msk.f32.mxu1 %vm80_vm0, %v12191_v23  ;;  %v20237_v23 = vld [vmem:[%s20711_s1 + $0x1f8] sm:$0xff] }
0x353a   :  { %v10064_v39 = vadd.f32 %v10056_v57, %v10048_v7 }
0x353b   :  { %v10063_v34 = vadd.f32 %v10055_v43, %v10047_v5  ;;  %v10030_v10 = vpop.permute.xlu1 %10029  ;;  %v10013_v43 = vsub.f32 1.0, %v19953_v11 }
0x353c   :  { %v10104_v4 = vmul.f32 %v10077_v21, %v10064_v39  ;;  %v10050_v8 = vmul.f32 %v10030_v10, %v10010_v27  ;;  %v10028_v25 = vpop.permute.xlu0 %10027  ;;  %v10150_v27 = vmul.f32 %v20021_v6, %v19462_v54  ;;  %v10149_v10 = vmul.f32 %v20023_v58, %v19464_v62 }
0x353d   :  { %v10103_v41 = vmul.f32 %v10073_v56, %v10063_v34  ;;  %v10049_v3 = vmul.f32 %v10028_v25, %v10009_v61 }
0x353e   :  { %v20039_v14 = vadd.f32 %v10144_v28, %v10104_v4  ;;  %v10066_v52 = vadd.f32 %v10058_v60, %v10050_v8 }
0x353f   :  { %v20041_v45 = vadd.f32 %v10143_v59, %v10103_v41  ;;  %v10065_v0 = vadd.f32 %v10057_v20, %v10049_v3  ;;  %v12192_v41 = vld [vmem:[%s20709_s0 + $0x1c8] sm:$0xff]  ;;  %v12193_v20 = vld [vmem:[%s20709_s0 + $0x1d0] sm:$0xff]  ;;  %v12194_v3 = vld [vmem:[%s20709_s0 + $0x1d8] sm:$0xff] }
0x3540   :  { %v10106_v22 = vmul.f32 %v10085_v36, %v10066_v52  ;;  %10169 = vrot.lane.b32.xlu1 %v20039_v14, %s15605_s11  ;;  %v12195_v52 = vld [vmem:[%s20709_s0 + $0x1e0] sm:$0xff] }
0x3541   :  { %v10105_v19 = vmul.f32 %v10081_v13, %v10065_v0  ;;  %10167 = vrot.lane.b32.xlu0 %v20041_v45, %s15605_s11  ;;  %v12196_v0 = vld [vmem:[%s20709_s0 + $0x1e8] sm:$0xff] }
0x3542   :  { %v20050_v16 = vadd.f32 %v10146_v1, %v10106_v22  ;;  %v10034_v56 = vpop.permute.xlu1 %10033  ;;  %v12198_v1 = vld [vmem:[%s20709_s0 + $0x1f8] sm:$0xff]  ;;  %v20958_v22 = vld [vmem:[#allocation4_spill] sm:$0xff] }
0x3543   :  { %v20053_v30 = vadd.f32 %v10145_v12, %v10105_v19  ;;  %v10052_v21 = vmul.f32 %v10034_v56, %v10012_v55  ;;  %v10032_v36 = vpop.permute.xlu0 %10031 }
0x3544   :  { %v10051_v13 = vmul.f32 %v10032_v36, %v10011_v46  ;;  %10173 = vrot.lane.b32.xlu1 %v20050_v16, %s15605_s11 }
0x3545   :  { %v10068_v33 = vadd.f32 %v10060_v15, %v10052_v21  ;;  %10171 = vrot.lane.b32.xlu0 %v20053_v30, %s15605_s11  ;;  %v20959_v15 = vld [vmem:[#allocation3_spill] sm:$0xff] }
0x3546   :  { %v10067_v40 = vadd.f32 %v10059_v51, %v10051_v13 }
0x3547   :  { %v10108_v9 = vmul.f32 %v10093_v31, %v10068_v33 }
0x3548   :  { %v10107_v44 = vmul.f32 %v10089_v48, %v10067_v40 }
0x3549   :  { %v20065_v57 = vadd.f32 %v10148_v2, %v10108_v9 }
0x354a   :  { %v20067_v7 = vadd.f32 %v10147_v18, %v10107_v44  ;;  %v20207_v18 = vld [vmem:[%s20711_s1 + $0x1c0] sm:$0xff]  ;;  %v20213_v44 = vld [vmem:[%s20711_s1 + $0x1d8] sm:$0xff] }
0x354b   :  { %10177 = vrot.lane.b32.xlu1 %v20065_v57, %s15605_s11 }
0x354c   :  { %10175 = vrot.lane.b32.xlu0 %v20067_v7, %s15605_s11 }
0x3550   :  { %v10038_v17 = vpop.permute.xlu1 %10037 }
0x3551   :  { %v10054_v31 = vmul.f32 %v10038_v17, %v10014_v42  ;;  %v10036_v48 = vpop.permute.xlu0 %10035  ;;  %v20218_v42 = vld [vmem:[%s20711_s1 + $0x1d0] sm:$0xff]  ;;  %v20225_v17 = vld [vmem:[%s20711_s1 + $0x1e8] sm:$0xff] }
0x3552   :  { %v10053_v38 = vmul.f32 %v10036_v48, %v10013_v43  ;;  %v20230_v43 = vld [vmem:[%s20711_s1 + $0x1e0] sm:$0xff]  ;;  %v10677_v48 = vsub.f32 1.0, %v20207_v18 }
0x3553   :  { %v10070_v5 = vadd.f32 %v10062_v49, %v10054_v31  ;;  %v20242_v49 = vld [vmem:[%s20711_s1 + $0x1f0] sm:$0xff]  ;;  %v20960_v31 = vmov 96  }
0x3554   :  { %v10069_v39 = vadd.f32 %v10061_v37, %v10053_v38  ;;  %v20961_v37 = vmov 98  }
0x3555   :  { %v10110_v34 = vmul.f32 %v20017_v47, %v10070_v5  ;;  %v10679_v5 = vsub.f32 1.0, %v20218_v42 }
0x3556   :  { %v10109_v53 = vmul.f32 %v20019_v63, %v10069_v39  ;;  %v10680_v39 = vsub.f32 1.0, %v20213_v44 }
0x3557   :  { %v20089_v61 = vadd.f32 %v10150_v27, %v10110_v34  ;;  %v10681_v27 = vsub.f32 1.0, %v20230_v43  ;;  %v10682_v34 = vsub.f32 1.0, %v20225_v17 }
0x3558   :  { %v20091_v28 = vadd.f32 %v10149_v10, %v10109_v53 }
0x3559   :  { %10181 = vrot.lane.b32.xlu1 %v20089_v61, %s15605_s11 }
0x355a   :  { %10179 = vrot.lane.b32.xlu0 %v20091_v28, %s15605_s11 }
0x355e   :  { %10726 = vperm.xlu0 %14743, %v20207_v18  }
0x3562   :  { %10738 = vperm.xlu0 %14743, %v20213_v44  }
0x3566   :  { %10746 = vperm.xlu0 %14743, %v20225_v17  }
0x356a   :  { %10754 = vperm.xlu0 %14743, %v20237_v23  }
0x356e   :  { %14746 = vset.pattern.permute.xlu0 %v20960_v31 }
0x35b2   :  { %v10170_v11 = vpop.permute.xlu1 %10169 }
0x35b3   :  { %12184 = vst.msk [vmem:[%s20713_s4 + $0x188] sm:$0xff] %vm210_vm1, %v10170_v11  ;;  %v10168_v54 = vpop.permute.xlu0 %10167 }
0x35b4   :  { %12183 = vst.msk [vmem:[%s20713_s4 + $0x180] sm:$0xff] %vm210_vm1, %v10168_v54  ;;  %v14554_v62 = vpack.c.bf16 %v10170_v11, %v10168_v54 }
0x35b6   :  { %v10174_v47 = vpop.permute.xlu1 %10173  ;;  %14555 = vmatprep.subr.bf16.mxu1 %v14554_v62 }
0x35b7   :  { %12186 = vst.msk [vmem:[%s20713_s4 + $0x198] sm:$0xff] %vm210_vm1, %v10174_v47  ;;  %14557 = vmatpush3.bf16.msra.mxu1 %v14554_v62  ;;  %v10172_v63 = vpop.permute.xlu0 %10171 }
0x35b8   :  { %12185 = vst.msk [vmem:[%s20713_s4 + $0x190] sm:$0xff] %vm210_vm1, %v10172_v63  ;;  %v14558_v6 = vpack.c.bf16 %v10174_v47, %v10172_v63 }
0x35ba   :  { %14559 = vmatprep.subr.bf16.mxu1 %v14558_v6 }
0x35bb   :  { %14561 = vmatpush3.bf16.msra.mxu1 %v14558_v6 }
0x35bd   :  { %v10178_v58 = vpop.permute.xlu1 %10177 }
0x35be   :  { %12188 = vst.msk [vmem:[%s20713_s4 + $0x1a8] sm:$0xff] %vm210_vm1, %v10178_v58  ;;  %v10176_v4 = vpop.permute.xlu0 %10175 }
0x35bf   :  { %12187 = vst.msk [vmem:[%s20713_s4 + $0x1a0] sm:$0xff] %vm210_vm1, %v10176_v4  ;;  %v14562_v60 = vpack.c.bf16 %v10178_v58, %v10176_v4 }
0x35c1   :  { %14563 = vmatprep.subr.bf16.mxu1 %v14562_v60 }
0x35c2   :  { %14565 = vmatpush3.bf16.msra.mxu1 %v14562_v60 }
0x35cb   :  { %v10182_v8 = vpop.permute.xlu1 %10181 }
0x35cc   :  { %12190 = vst.msk [vmem:[%s20713_s4 + $0x1b8] sm:$0xff] %vm210_vm1, %v10182_v8  ;;  %v10180_v25 = vpop.permute.xlu0 %10179 }
0x35cd   :  { %12189 = vst.msk [vmem:[%s20713_s4 + $0x1b0] sm:$0xff] %vm210_vm1, %v10180_v25  ;;  %v14566_v59 = vpack.c.bf16 %v10182_v8, %v10180_v25 }
0x35cf   :  { %14567 = vmatprep.subr.bf16.mxu1 %v14566_v59 }
0x35d0   :  { %14569 = vmatpush3.bf16.msra.mxu1 %v14566_v59 }
0x35d1   :  { %14587 = vmatprep.subr.bf16.mxu1 %v15716_v24 }
0x35d3   :  { %13887 = vmatmul.mubr.msk.f32.vlgmr.msra.gmra.mrb[136].mxu1 %vm80_vm0, %v12192_v41 }
0x35d4   :  { %13889 = vmatprep.mubr.msk.f32.mxu1 %vm80_vm0, %v12193_v20  ;;  %14589 = vmatpush3.bf16.msra.mxu1 %v15716_v24  ;;  %v12197_v24 = vld [vmem:[%s20709_s0 + $0x1f0] sm:$0xff]  ;;  %v20962_v20 = vld [vmem:[#allocation5_spill] sm:$0xff] }
0x35d5   :  { %14591 = vmatprep.subr.bf16.mxu1 %v15721_v26 }
0x35d7   :  { %13890 = vmatmul.mubr.msk.f32.gmra.mrb[138].mxu1 %vm80_vm0, %v12194_v3 }
0x35d8   :  { %13892 = vmatprep.mubr.msk.f32.mxu1 %vm80_vm0, %v12195_v52  ;;  %14593 = vmatpush3.bf16.msra.mxu1 %v15721_v26  ;;  %v20957_v26 = vld [vmem:[#allocation2_spill] sm:$0xff] }
0x35d9   :  { %14595 = vmatprep.subr.bf16.mxu1 %v15732_v29 }
0x35db   :  { %13893 = vmatmul.mubr.msk.f32.gmra.mrb[140].mxu1 %vm80_vm0, %v12196_v0 }
0x35dc   :  { %13895 = vmatprep.mubr.msk.f32.mxu1 %vm80_vm0, %v12197_v24  ;;  %14597 = vmatpush3.bf16.msra.mxu1 %v15732_v29  ;;  %v20173_v29 = vld [vmem:[%s20711_s1 + $0x1c8] sm:$0xff] }
0x35dd   :  { %14599 = vmatprep.subr.bf16.mxu1 %v15742_v32  ;;  %10730 = vperm.xlu1 %14744, %v20173_v29   ;;  %v10678_v38 = vsub.f32 1.0, %v20173_v29 }
0x35de   :  { %10690 = vperm.xlu0 %14746, %v20173_v29  }
0x35df   :  { %13896 = vmatmul.mubr.msk.f32.gmra.mrb[142].mxu1 %vm80_vm0, %v12198_v1 }
0x35e0   :  { %14601 = vmatpush3.bf16.msra.mxu1 %v15742_v32 }
0x35e1   :  { %14603 = vmatprep.subr.bf16.mxu1 %v15752_v35  ;;  %10734 = vperm.xlu1 %14744, %v20218_v42  }
0x35e2   :  { %10698 = vperm.xlu0 %14746, %v20213_v44  }
0x35e4   :  { %14605 = vmatpush3.bf16.msra.mxu1 %v15752_v35 }
0x35e5   :  { %14607 = vmatprep.subr.bf16.mxu1 %v20957_v26  ;;  %10742 = vperm.xlu1 %14744, %v20230_v43  }
0x35e6   :  { %10702 = vperm.xlu0 %14746, %v20230_v43  }
0x35e8   :  { %14609 = vmatpush3.bf16.msra.mxu1 %v20957_v26 }
0x35e9   :  { %14634 = vmatprep.subr.bf16.mxu1 %v20958_v22  ;;  %10750 = vperm.xlu1 %14744, %v20242_v49  }
0x35ea   :  { %10706 = vperm.xlu0 %14746, %v20225_v17  }
0x35ed   :  { %14745 = vset.pattern.permute.xlu1 %v20960_v31 }
0x35ee   :  { %10686 = vperm.xlu1 %14745, %v20207_v18   ;;  %14748 = vset.pattern.permute.xlu0 %v20961_v37 }
0x35ef   :  { %10822 = vperm.xlu0 %14748, %v10680_v39  }
0x35f2   :  { %10694 = vperm.xlu1 %14745, %v20218_v42  }
0x35f3   :  { %10827 = vperm.xlu0 %14748, %v10681_v27  }
0x35f6   :  { %14747 = vset.pattern.permute.xlu1 %v20961_v37 }
0x35f7   :  { %10807 = vperm.xlu1 %14747, %v10677_v48  }
0x35fb   :  { %10812 = vperm.xlu1 %14747, %v10678_v38  }
0x35ff   :  { %10817 = vperm.xlu1 %14747, %v10679_v5  }
0x3603   :  { %14749 = vset.pattern.permute.xlu1 %v20960_v31 }
0x3604   :  { %10710 = vperm.xlu1 %14749, %v20242_v49  }
0x3608   :  { %10714 = vperm.xlu1 %14749, %v20237_v23  }
0x360c   :  { %14750 = vset.pattern.permute.xlu1 %v20961_v37 }
0x360d   :  { %10832 = vperm.xlu1 %14750, %v10682_v34  }
0x36a6   :  { %v13888_v12 = vpop.f32.mrb[136].mxu1 }
0x36a7   :  { %v10308_v19 = vpop.f32.mrb[137].mxu1  ;;  %v10348_v35 = vsel %vm210_vm1, %v13888_v12, %v20039_v14  ;;  %v20963_v12 = vld [vmem:[#allocation6_spill] sm:$0xff] }
0x36a8   :  { %v10347_v32 = vsel %vm210_vm1, %v10308_v19, %v20041_v45 }
0x36a9   :  { %13914 = vmatprep.mubr.msk.f32.mxu0 %vm80_vm0, %v10347_v32 }
0x36aa   :  { %v13891_v55 = vpop.f32.mrb[138].mxu1  ;;  %13915 = vmatmul.mubr.msk.f32.vlgmr.msra.gmra.mrb[144].mxu0 %vm80_vm0, %v10348_v35 }
0x36ab   :  { %v10318_v56 = vpop.f32.mrb[139].mxu1  ;;  %14613 = vmatpush3.bf16.msra.mxu0 %v15938_v50  ;;  %v10350_v21 = vsel %vm210_vm1, %v13891_v55, %v20050_v16  ;;  %v20964_v55 = vld [vmem:[#allocation7_spill] sm:$0xff] }
0x36ac   :  { %v10349_v46 = vsel %vm210_vm1, %v10318_v56, %v20053_v30  ;;  %14615 = vmatprep.subr.bf16.mxu0 %v20959_v15 }
0x36ad   :  { %13917 = vmatprep.mubr.msk.f32.mxu0 %vm80_vm0, %v10349_v46  ;;  %v10731_v46 = vpop.permute.xlu1 %10730 }
0x36ae   :  { %v13894_v36 = vpop.f32.mrb[140].mxu1  ;;  %13918 = vmatmul.mubr.msk.f32.gmra.mrb[146].mxu0 %vm80_vm0, %v10350_v21 }
0x36af   :  { %v10328_v51 = vpop.f32.mrb[141].mxu1  ;;  %14617 = vmatpush3.bf16.msra.mxu0 %v20959_v15  ;;  %v10352_v50 = vsel %vm210_vm1, %v13894_v36, %v20065_v57  ;;  %v15597_v15 = vld [vmem:[%s20712_s3] ss:$0 sm:$0xff] }
0x36b0   :  { %v10351_v13 = vsel %vm210_vm1, %v10328_v51, %v20067_v7  ;;  %14619 = vmatprep.subr.bf16.mxu0 %v20958_v22  ;;  %v10727_v51 = vpop.permute.xlu0 %10726 }
0x36b1   :  { %13920 = vmatprep.mubr.msk.f32.mxu0 %vm80_vm0, %v10351_v13 }
0x36b2   :  { %v13897_v33 = vpop.f32.mrb[142].mxu1  ;;  %13921 = vmatmul.mubr.msk.f32.gmra.mrb[148].mxu0 %vm80_vm0, %v10352_v50 }
0x36b3   :  { %v10338_v40 = vpop.f32.mrb[143].mxu1  ;;  %v10354_v9 = vsel %vm210_vm1, %v13897_v33, %v20089_v61 }
0x36b4   :  { %v10353_v2 = vsel %vm210_vm1, %v10338_v40, %v20091_v28 }
0x36b5   :  { %13923 = vmatprep.mubr.msk.f32.mxu0 %vm80_vm0, %v10353_v2 }
0x36b6   :  { %13924 = vmatmul.mubr.msk.f32.gmra.mrb[150].mxu0 %vm80_vm0, %v10354_v9 }
0x377d   :  { %v13916_v10 = vpop.f32.mrb[144].mxu0 }
0x377e   :  { %v10451_v53 = vadd.f32 %v13916_v10, %v20173_v29  ;;  %v10445_v11 = vpop.f32.mrb[145].mxu0  ;;  %v10735_v10 = vpop.permute.xlu1 %10734 }
0x377f   :  { %v10446_v54 = vadd.f32 %v20207_v18, %v10445_v11  ;;  %v10739_v11 = vpop.permute.xlu0 %10738 }
0x3780   :  { %v10485_v63 = vmax.f32 %v10451_v53, 0.0 }
0x3781   :  { %v10484_v62 = vmax.f32 %v10446_v54, 0.0  ;;  %v13919_v47 = vpop.f32.mrb[146].mxu0 }
0x3782   :  { %v10461_v6 = vadd.f32 %v13919_v47, %v20213_v44  ;;  %v10455_v58 = vpop.f32.mrb[147].mxu0 }
0x3783   :  { %v10456_v4 = vadd.f32 %v20218_v42, %v10455_v58  ;;  %13950 = vmatprep.mubr.msk.f32.mxu1 %vm356_vm2, %v10484_v62 }
0x3784   :  { %13951 = vmatmul.mubr.msk.f32.vlgmr.msra.gmra.mrb[144].mxu1 %vm356_vm2, %v10485_v63  ;;  %v10487_v25 = vmax.f32 %v10461_v6, 0.0 }
0x3785   :  { %v10486_v60 = vmax.f32 %v10456_v4, 0.0  ;;  %v13922_v8 = vpop.f32.mrb[148].mxu0  ;;  %14638 = vmatpush3.bf16.msra.mxu1 %v20958_v22  ;;  %v10683_v4 = vsub.f32 1.0, %v20242_v49 }
0x3786   :  { %v10471_v59 = vadd.f32 %v13922_v8, %v20225_v17  ;;  %v10465_v41 = vpop.f32.mrb[149].mxu0  ;;  %14635 = vmatprep.subr.bf16.mxu1 %v20962_v20 }
0x3787   :  { %v10466_v3 = vadd.f32 %v20230_v43, %v10465_v41  ;;  %13953 = vmatprep.mubr.msk.f32.mxu1 %vm356_vm2, %v10486_v60 }
0x3788   :  { %13954 = vmatmul.mubr.msk.f32.gmra.mrb[146].mxu1 %vm356_vm2, %v10487_v25  ;;  %v10489_v24 = vmax.f32 %v10471_v59, 0.0 }
0x3789   :  { %v10488_v52 = vmax.f32 %v10466_v3, 0.0  ;;  %v13925_v0 = vpop.f32.mrb[150].mxu0  ;;  %14639 = vmatpush3.bf16.msra.mxu1 %v20962_v20  ;;  %v10743_v3 = vpop.permute.xlu1 %10742 }
0x378a   :  { %v10481_v1 = vadd.f32 %v13925_v0, %v20237_v23  ;;  %v10475_v26 = vpop.f32.mrb[151].mxu0  ;;  %14636 = vmatprep.subr.bf16.mxu1 %v20963_v12  ;;  %v10684_v0 = vsub.f32 1.0, %v20237_v23 }
0x378b   :  { %v10476_v19 = vadd.f32 %v20242_v49, %v10475_v26  ;;  %13956 = vmatprep.mubr.msk.f32.mxu1 %vm356_vm2, %v10488_v52 }
0x378c   :  { %13957 = vmatmul.mubr.msk.f32.gmra.mrb[148].mxu1 %vm356_vm2, %v10489_v24  ;;  %v10491_v35 = vmax.f32 %v10481_v1, 0.0 }
0x378d   :  { %v10490_v32 = vmax.f32 %v10476_v19, 0.0  ;;  %14640 = vmatpush3.bf16.msra.mxu1 %v20963_v12 }
0x378e   :  { %14637 = vmatprep.subr.bf16.mxu1 %v20964_v55 }
0x378f   :  { %13959 = vmatprep.mubr.msk.f32.mxu1 %vm356_vm2, %v10490_v32  ;;  %v10747_v32 = vpop.permute.xlu0 %10746 }
0x3790   :  { %13960 = vmatmul.mubr.msk.f32.gmra.mrb[150].mxu1 %vm356_vm2, %v10491_v35  ;;  %v10751_v35 = vpop.permute.xlu1 %10750 }
0x3791   :  { %14641 = vmatpush3.bf16.msra.mxu1 %v20964_v55 }
0x3857   :  { %v13952_v56 = vpop.f32.mrb[144].mxu1 }
0x3858   :  { %v10588_v21 = vadd.f32 %v15597_v15, %v13952_v56  ;;  %v10582_v36 = vpop.f32.mrb[145].mxu1 }
0x3859   :  { %v10583_v13 = vadd.f32 %v15597_v15, %v10582_v36 }
0x385a   :  { %v20304_v50 = vmax.f32 %v10588_v21, 0.0 }
0x385b   :  { %v13955_v33 = vpop.f32.mrb[146].mxu1  ;;  %v20307_v2 = vmax.f32 %v10583_v13, 0.0  ;;  %v10687_v13 = vpop.permute.xlu1 %10686 }
0x385c   :  { %v10758_v40 = vmul.f32 %v10731_v46, %v20304_v50  ;;  %v10598_v9 = vadd.f32 %v15597_v15, %v13955_v33  ;;  %v10592_v31 = vpop.f32.mrb[147].mxu1 }
0x385d   :  { %v10593_v37 = vadd.f32 %v15597_v15, %v10592_v31  ;;  %v10757_v62 = vmul.f32 %v10727_v51, %v20307_v2  ;;  %v20965_v51 = vmov 100  }
0x385e   :  { %v20309_v53 = vmax.f32 %v10598_v9, 0.0  ;;  %10775 = vrot.lane.b32.xlu1 %v10758_v40, %s15605_s11 }
0x385f   :  { %v13958_v54 = vpop.f32.mrb[148].mxu1  ;;  %v20314_v63 = vmax.f32 %v10593_v37, 0.0  ;;  %v10695_v33 = vpop.permute.xlu1 %10694 }
0x3860   :  { %v10760_v47 = vmul.f32 %v10739_v11, %v20309_v53  ;;  %v10602_v6 = vpop.f32.mrb[149].mxu1  ;;  %v10608_v25 = vadd.f32 %v15597_v15, %v13958_v54 }
0x3861   :  { %v10603_v58 = vadd.f32 %v15597_v15, %v10602_v6  ;;  %v10759_v8 = vmul.f32 %v10735_v10, %v20314_v63 }
0x3862   :  { %10773 = vrot.lane.b32.xlu1 %v10757_v62, %s15605_s11  ;;  %10779 = vrot.lane.b32.xlu0 %v10760_v47, %s15605_s11  ;;  %v20326_v24 = vmax.f32 %v10608_v25, 0.0 }
0x3863   :  { %v13961_v60 = vpop.f32.mrb[150].mxu1  ;;  %v20320_v59 = vmax.f32 %v10603_v58, 0.0  ;;  %v10808_v40 = vpop.permute.xlu1 %10807 }
0x3864   :  { %v10612_v41 = vpop.f32.mrb[151].mxu1  ;;  %v10618_v26 = vadd.f32 %v15597_v15, %v13961_v60  ;;  %v10762_v56 = vmul.f32 %v10747_v32, %v20326_v24 }
0x3865   :  { %v10613_v52 = vadd.f32 %v15597_v15, %v10612_v41  ;;  %v10761_v1 = vmul.f32 %v10743_v3, %v20320_v59  ;;  %v10755_v15 = vpop.permute.xlu0 %10754 }
0x3866   :  { %10837 = vperm.xlu1 %14750, %v10683_v4   ;;  %10777 = vrot.lane.b32.xlu0 %v10759_v8, %s15605_s11  ;;  %v20335_v46 = vmax.f32 %v10618_v26, 0.0 }
0x3867   :  { %v20329_v19 = vmax.f32 %v10613_v52, 0.0  ;;  %v10813_v31 = vpop.permute.xlu1 %10812 }
0x3868   :  { %v10764_v36 = vmul.f32 %v10755_v15, %v20335_v46 }
0x3869   :  { %v10763_v21 = vmul.f32 %v10751_v35, %v20329_v19  ;;  %v10691_v9 = vpop.permute.xlu0 %10690 }
0x386a   :  { %10842 = vperm.xlu1 %14750, %v10684_v0   ;;  %10781 = vrot.lane.b32.xlu0 %v10761_v1, %s15605_s11  ;;  %v10718_v60 = vmul.f32 %v10691_v9, %v20304_v50  ;;  %v10717_v1 = vmul.f32 %v10687_v13, %v20307_v2 }
0x386b   :  { %v10818_v10 = vpop.permute.xlu1 %10817 }
0x386d   :  { %v10699_v37 = vpop.permute.xlu0 %10698 }
0x386e   :  { %10785 = vrot.lane.b32.xlu1 %v10763_v21, %s15605_s11  ;;  %10783 = vrot.lane.b32.xlu0 %v10762_v56, %s15605_s11  ;;  %v10720_v3 = vmul.f32 %v10699_v37, %v20309_v53 }
0x386f   :  { %v10711_v54 = vpop.permute.xlu1 %10710 }
0x3871   :  { %v10703_v11 = vpop.permute.xlu0 %10702 }
0x3872   :  { %10631 = vperm.xlu1 %14750, %v20207_v18   ;;  %10787 = vrot.lane.b32.xlu0 %v10764_v36, %s15605_s11  ;;  %v10719_v36 = vmul.f32 %v10695_v33, %v20314_v63 }
0x3873   :  { %v10715_v47 = vpop.permute.xlu1 %10714 }
0x3875   :  { %v10707_v62 = vpop.permute.xlu0 %10706 }
0x3876   :  { %10641 = vperm.xlu1 %14750, %v20218_v42   ;;  %10636 = vperm.xlu0 %14748, %v20173_v29  }
0x3877   :  { %v10833_v58 = vpop.permute.xlu1 %10832 }
0x3879   :  { %v10823_v6 = vpop.permute.xlu0 %10822 }
0x387a   :  { %10651 = vperm.xlu1 %14750, %v20230_v43   ;;  %10646 = vperm.xlu0 %14748, %v20213_v44  }
0x387d   :  { %v10828_v8 = vpop.permute.xlu0 %10827 }
0x387e   :  { %10661 = vperm.xlu1 %14750, %v20242_v49   ;;  %10656 = vperm.xlu0 %14748, %v20225_v17  }
0x3882   :  { %10666 = vperm.xlu0 %14748, %v20237_v23   ;;  %14751 = vset.pattern.permute.xlu1 %v20965_v51 }
0x3886   :  { %14752 = vset.pattern.permute.xlu0 %v20965_v51 }
0x38d0   :  { %v10776_v25 = vpop.permute.xlu1 %10775 }
0x38d1   :  { %v10798_v41 = vadd.f32 %v10776_v25, %v10718_v60  ;;  %v10722_v25 = vmul.f32 %v10707_v62, %v20326_v24 }
0x38d3   :  { %v10846_v52 = vmul.f32 %v10813_v31, %v10798_v41  ;;  %v10721_v31 = vmul.f32 %v10703_v11, %v20320_v59 }
0x38d4   :  { %v10774_v26 = vpop.permute.xlu1 %10773  ;;  %v10780_v32 = vpop.permute.xlu0 %10779 }
0x38d5   :  { %v10797_v35 = vadd.f32 %v10774_v26, %v10717_v1  ;;  %v10800_v56 = vadd.f32 %v10780_v32, %v10720_v3  ;;  %10863 = vrot.lane.b32.xlu0 %v10846_v52, %s15605_s11  ;;  %v10723_v32 = vmul.f32 %v10711_v54, %v20329_v19 }
0x38d7   :  { %v10845_v21 = vmul.f32 %v10808_v40, %v10797_v35  ;;  %v10848_v15 = vmul.f32 %v10823_v6, %v10800_v56 }
0x38d8   :  { %v10778_v51 = vpop.permute.xlu0 %10777 }
0x38d9   :  { %v10799_v9 = vadd.f32 %v10778_v51, %v10719_v36  ;;  %10861 = vrot.lane.b32.xlu1 %v10845_v21, %s15605_s11  ;;  %10867 = vrot.lane.b32.xlu0 %v10848_v15, %s15605_s11 }
0x38db   :  { %v10847_v37 = vmul.f32 %v10818_v10, %v10799_v9  ;;  %v10724_v10 = vmul.f32 %v10715_v47, %v20335_v46  ;;  %v20966_v47 = vmov 99  }
0x38dc   :  { %v10782_v13 = vpop.permute.xlu0 %10781 }
0x38dd   :  { %v10801_v60 = vadd.f32 %v10782_v13, %v10721_v31  ;;  %10865 = vrot.lane.b32.xlu1 %v10847_v37, %s15605_s11 }
0x38df   :  { %v10849_v41 = vmul.f32 %v10828_v8, %v10801_v60 }
0x38e0   :  { %v10784_v40 = vpop.permute.xlu0 %10783 }
0x38e1   :  { %v10802_v6 = vadd.f32 %v10784_v40, %v10722_v25  ;;  %10869 = vrot.lane.b32.xlu1 %v10849_v41, %s15605_s11 }
0x38e3   :  { %v10850_v33 = vmul.f32 %v10833_v58, %v10802_v6 }
0x38e4   :  { %v10788_v3 = vpop.permute.xlu0 %10787 }
0x38e5   :  { %v10838_v52 = vpop.permute.xlu1 %10837  ;;  %10871 = vrot.lane.b32.xlu0 %v10850_v33, %s15605_s11  ;;  %v10804_v1 = vadd.f32 %v10788_v3, %v10724_v10 }
0x38e9   :  { %v10843_v11 = vpop.permute.xlu1 %10842 }
0x38ea   :  { %v10852_v26 = vmul.f32 %v10843_v11, %v10804_v1 }
0x38ec   :  { %10875 = vrot.lane.b32.xlu0 %v10852_v26, %s15605_s11 }
0x38ed   :  { %v10786_v62 = vpop.permute.xlu1 %10785 }
0x38ee   :  { %v10803_v8 = vadd.f32 %v10786_v62, %v10723_v32 }
0x38f0   :  { %v10851_v35 = vmul.f32 %v10838_v52, %v10803_v8  ;;  %11091 = vperm.xlu0 %14752, %v20213_v44  }
0x38f1   :  { %v10632_v58 = vpop.permute.xlu1 %10631 }
0x38f2   :  { %10873 = vrot.lane.b32.xlu1 %v10851_v35, %s15605_s11  ;;  %v10669_v31 = vmul.f32 %v10632_v58, %v20307_v2 }
0x38f4   :  { %11079 = vperm.xlu0 %14752, %v20207_v18  }
0x38f5   :  { %v10637_v54 = vpop.permute.xlu0 %10636  ;;  %v10642_v21 = vpop.permute.xlu1 %10641 }
0x38f6   :  { %11087 = vperm.xlu1 %14751, %v20218_v42   ;;  %v10670_v13 = vmul.f32 %v10637_v54, %v20304_v50  ;;  %v10671_v40 = vmul.f32 %v10642_v21, %v20314_v63 }
0x38f8   :  { %11083 = vperm.xlu0 %14752, %v20173_v29  }
0x38f9   :  { %v10647_v56 = vpop.permute.xlu0 %10646  ;;  %v10652_v36 = vpop.permute.xlu1 %10651 }
0x38fa   :  { %11095 = vperm.xlu1 %14751, %v20230_v43   ;;  %v10672_v33 = vmul.f32 %v10647_v56, %v20309_v53  ;;  %v10673_v63 = vmul.f32 %v10652_v36, %v20320_v59 }
0x38fc   :  { %14753 = vset.pattern.permute.xlu0 %v20966_v47 }
0x38fd   :  { %v10657_v15 = vpop.permute.xlu0 %10656  ;;  %v10662_v9 = vpop.permute.xlu1 %10661 }
0x38fe   :  { %11099 = vperm.xlu1 %14751, %v20225_v17  }
0x3901   :  { %v10667_v51 = vpop.permute.xlu0 %10666 }
0x3902   :  { %11103 = vperm.xlu1 %14751, %v20242_v49  }
0x3906   :  { %11107 = vperm.xlu1 %14751, %v20237_v23  }
0x390a   :  { %14754 = vset.pattern.permute.xlu1 %v20966_v47 }
0x3947   :  { %v10864_v37 = vpop.permute.xlu0 %10863 }
0x3948   :  { %v20382_v41 = vadd.f32 %v10864_v37, %v10670_v13 }
0x394b   :  { %v10862_v60 = vpop.permute.xlu1 %10861  ;;  %v10868_v6 = vpop.permute.xlu0 %10867 }
0x394c   :  { %v20380_v25 = vadd.f32 %v10862_v60, %v10669_v31  ;;  %v20393_v50 = vadd.f32 %v10868_v6, %v10672_v33 }
0x394e   :  { %13970 = vmatprep.mubr.msk.f32.mxu0 %vm210_vm1, %v20380_v25 }
0x394f   :  { %v10866_v3 = vpop.permute.xlu1 %10865  ;;  %13971 = vmatmul.mubr.msk.f32.vlgmr.msra.gmra.mrb[152].mxu0 %vm210_vm1, %v20382_v41 }
0x3950   :  { %v20390_v2 = vadd.f32 %v10866_v3, %v10671_v40  ;;  %14621 = vmatpush3.bf16.msra.mxu0 %v20958_v22  ;;  %v10674_v22 = vmul.f32 %v10657_v15, %v20326_v24  ;;  %v10676_v24 = vmul.f32 %v10667_v51, %v20335_v46 }
0x3951   :  { %14623 = vmatprep.subr.bf16.mxu0 %v20962_v20 }
0x3952   :  { %13973 = vmatprep.mubr.msk.f32.mxu0 %vm210_vm1, %v20390_v2 }
0x3953   :  { %v10870_v52 = vpop.permute.xlu1 %10869  ;;  %13974 = vmatmul.mubr.msk.f32.gmra.mrb[154].mxu0 %vm210_vm1, %v20393_v50 }
0x3954   :  { %v20401_v53 = vadd.f32 %v10870_v52, %v10673_v63  ;;  %14625 = vmatpush3.bf16.msra.mxu0 %v20962_v20  ;;  %v10675_v20 = vmul.f32 %v10662_v9, %v20329_v19 }
0x3955   :  { %14627 = vmatprep.subr.bf16.mxu0 %v20963_v12 }
0x3956   :  { %13976 = vmatprep.mubr.msk.f32.mxu0 %vm210_vm1, %v20401_v53 }
0x3957   :  { %v10872_v10 = vpop.permute.xlu0 %10871 }
0x3958   :  { %v20408_v59 = vadd.f32 %v10872_v10, %v10674_v22  ;;  %14629 = vmatpush3.bf16.msra.mxu0 %v20963_v12 }
0x3959   :  { %14631 = vmatprep.subr.bf16.mxu0 %v20964_v55 }
0x395a   :  { %13977 = vmatmul.mubr.msk.f32.gmra.mrb[156].mxu0 %vm210_vm1, %v20408_v59 }
0x395c   :  { %14633 = vmatpush3.bf16.msra.mxu0 %v20964_v55  ;;  %v15598_v55 = vld [vmem:[%s20712_s3 + $0x1] ss:$0 sm:$0xff] }
0x395e   :  { %v10876_v1 = vpop.permute.xlu0 %10875 }
0x395f   :  { %v20419_v32 = vadd.f32 %v10876_v1, %v10676_v24 }
0x3964   :  { %v10874_v11 = vpop.permute.xlu1 %10873 }
0x3965   :  { %v20417_v26 = vadd.f32 %v10874_v11, %v10675_v20 }
0x3967   :  { %13979 = vmatprep.mubr.msk.f32.mxu0 %vm210_vm1, %v20417_v26 }
0x3968   :  { %13980 = vmatmul.mubr.msk.f32.gmra.mrb[158].mxu0 %vm210_vm1, %v20419_v32 }
0x396f   :  { %v20430_v9 = vpop.permute.xlu0 %11091 }
0x3973   :  { %v20440_v3 = vpop.permute.xlu0 %11079 }
0x3975   :  { %v20428_v54 = vpop.permute.xlu1 %11087 }
0x3979   :  { %v20433_v13 = vpop.permute.xlu1 %11095 }
0x397d   :  { %v20438_v6 = vpop.permute.xlu1 %11099 }
0x3a22   :  { %v13972_v12 = vpop.f32.mrb[152].mxu0 }
0x3a23   :  { %v10983_v62 = vpop.f32.mrb[153].mxu0  ;;  %v10989_v51 = vadd.f32 %v15598_v55, %v13972_v12  ;;  %v20447_v12 = vpop.permute.xlu0 %11083 }
0x3a24   :  { %v10984_v21 = vadd.f32 %v15598_v55, %v10983_v62 }
0x3a26   :  { %v13975_v8 = vpop.f32.mrb[154].mxu0 }
0x3a27   :  { %v10999_v19 = vadd.f32 %v15598_v55, %v13975_v8  ;;  %v10993_v46 = vpop.f32.mrb[155].mxu0 }
0x3a28   :  { %v10994_v35 = vadd.f32 %v15598_v55, %v10993_v46  ;;  %v20452_v46 = vpop.permute.xlu1 %11103 }
0x3a29   :  { %15427 = vtanh.f32 %v10999_v19 }
0x3a2a   :  { %15429 = vtanh.f32 %v10994_v35 }
0x3a2d   :  { %v13978_v47 = vpop.f32.mrb[156].mxu0 }
0x3a2e   :  { %v11009_v58 = vadd.f32 %v15598_v55, %v13978_v47  ;;  %v11003_v56 = vpop.f32.mrb[157].mxu0 }
0x3a2f   :  { %v11004_v15 = vadd.f32 %v15598_v55, %v11003_v56 }
0x3a30   :  { %15431 = vtanh.f32 %v11009_v58 }
0x3a31   :  { %15433 = vtanh.f32 %v11004_v15 }
0x3a32   :  { %15435 = vtanh.f32 %v10984_v21 }
0x3a33   :  { %v15428_v36 = vpop.eup %15427  ;;  %15437 = vtanh.f32 %v10989_v51 }
0x3a34   :  { %v15430_v37 = vpop.eup %15429  ;;  %v11137_v31 = vmul.f32 %v15428_v36, %v20430_v9 }
0x3a35   :  { %v11136_v60 = vmul.f32 %v15430_v37, %v20428_v54  ;;  %v20456_v37 = vpop.permute.xlu1 %11107 }
0x3a36   :  { %11156 = vrot.lane.b32.xlu1 %v11137_v31, %s15605_s11  ;;  %v12242_v31 = vmul.f32 -1.442695, %v10999_v19 }
0x3a37   :  { %11154 = vrot.lane.b32.xlu0 %v11136_v60, %s15605_s11  ;;  %v12241_v60 = vmul.f32 -1.442695, %v10994_v35 }
0x3a3a   :  { %v15432_v40 = vpop.eup %15431 }
0x3a3b   :  { %v15434_v33 = vpop.eup %15433  ;;  %v11139_v63 = vmul.f32 %v15432_v40, %v20438_v6  ;;  %v13981_v52 = vpop.f32.mrb[158].mxu0  ;;  %v12244_v40 = vmul.f32 -1.442695, %v11009_v58 }
0x3a3c   :  { %v11013_v22 = vpop.f32.mrb[159].mxu0  ;;  %v11138_v10 = vmul.f32 %v15434_v33, %v20433_v13  ;;  %v15436_v20 = vpop.eup %15435  ;;  %v11019_v62 = vadd.f32 %v15598_v55, %v13981_v52  ;;  %v12243_v33 = vmul.f32 -1.442695, %v11004_v15 }
0x3a3d   :  { %11160 = vrot.lane.b32.xlu1 %v11139_v63, %s15605_s11  ;;  %v11014_v1 = vadd.f32 %v15598_v55, %v11013_v22  ;;  %v11134_v24 = vmul.f32 %v15436_v20, %v20440_v3  ;;  %v15438_v11 = vpop.eup %15437  ;;  %v12239_v63 = vmul.f32 -1.442695, %v10984_v21 }
0x3a3e   :  { %11158 = vrot.lane.b32.xlu0 %v11138_v10, %s15605_s11  ;;  %v11135_v8 = vmul.f32 %v15438_v11, %v20447_v12  ;;  %v12240_v10 = vmul.f32 -1.442695, %v10989_v51  ;;  %v12246_v15 = vmul.f32 -1.442695, %v11019_v62 }
0x3a3f   :  { %15439 = vtanh.f32 %v11014_v1 }
0x3a40   :  { %15441 = vtanh.f32 %v11019_v62 }
0x3a41   :  { %15443 = vpow2.f32 %v12242_v31 }
0x3a42   :  { %11150 = vrot.lane.b32.xlu0 %v11134_v24, %s15605_s11  ;;  %15445 = vpow2.f32 %v12241_v60 }
0x3a43   :  { %15447 = vpow2.f32 %v12244_v40 }
0x3a44   :  { %15449 = vpow2.f32 %v12243_v33 }
0x3a45   :  { %15451 = vpow2.f32 %v12239_v63 }
0x3a46   :  { %11152 = vrot.lane.b32.xlu0 %v11135_v8, %s15605_s11  ;;  %15453 = vpow2.f32 %v12240_v10 }
0x3a49   :  { %v15440_v47 = vpop.eup %15439 }
0x3a4a   :  { %v11140_v56 = vmul.f32 %v15440_v47, %v20452_v46  ;;  %v15442_v36 = vpop.eup %15441 }
0x3a4b   :  { %v11141_v55 = vmul.f32 %v15442_v36, %v20456_v37  ;;  %v15444_v52 = vpop.eup %15443 }
0x3a4c   :  { %11162 = vrot.lane.b32.xlu1 %v11140_v56, %s15605_s11  ;;  %v15446_v22 = vpop.eup %15445  ;;  %v11049_v20 = vadd.f32 1.0, %v15444_v52  ;;  %v12245_v56 = vmul.f32 -1.442695, %v11014_v1 }
0x3a4d   :  { %v11048_v24 = vadd.f32 1.0, %v15446_v22  ;;  %v15448_v11 = vpop.eup %15447 }
0x3a4e   :  { %15455 = vrcp.f32 %v11049_v20  ;;  %v15450_v8 = vpop.eup %15449  ;;  %v11051_v19 = vadd.f32 1.0, %v15448_v11 }
0x3a4f   :  { %15457 = vrcp.f32 %v11048_v24  ;;  %v11050_v35 = vadd.f32 1.0, %v15450_v8  ;;  %v15452_v47 = vpop.eup %15451 }
0x3a50   :  { %11164 = vrot.lane.b32.xlu1 %v11141_v55, %s15605_s11  ;;  %15459 = vrcp.f32 %v11051_v19  ;;  %v11046_v58 = vadd.f32 1.0, %v15452_v47  ;;  %v15454_v21 = vpop.eup %15453 }
0x3a51   :  { %15461 = vrcp.f32 %v11050_v35  ;;  %v11047_v55 = vadd.f32 1.0, %v15454_v21 }
0x3a52   :  { %15463 = vpow2.f32 %v12245_v56 }
0x3a53   :  { %15465 = vrcp.f32 %v11046_v58 }
0x3a54   :  { %15467 = vpow2.f32 %v12246_v15 }
0x3a55   :  { %15469 = vrcp.f32 %v11047_v55 }
0x3a58   :  { %v15456_v36 = vpop.eup %15455 }
0x3a59   :  { %v15458_v51 = vpop.eup %15457  ;;  %v11113_v31 = vmul.f32 %v15456_v36, %v20430_v9 }
0x3a5a   :  { %v11112_v60 = vmul.f32 %v15458_v51, %v20428_v54  ;;  %v15460_v40 = vpop.eup %15459 }
0x3a5b   :  { %v11121_v33 = vmul.f32 %v11113_v31, %v20393_v50  ;;  %v15462_v1 = vpop.eup %15461  ;;  %v11115_v62 = vmul.f32 %v15460_v40, %v20438_v6 }
0x3a5c   :  { %v11120_v63 = vmul.f32 %v11112_v60, %v20390_v2  ;;  %v15464_v52 = vpop.eup %15463  ;;  %v11114_v10 = vmul.f32 %v15462_v1, %v20433_v13 }
0x3a5d   :  { %v11129_v22 = vsub.f32 %v20393_v50, %v11121_v33  ;;  %v15466_v20 = vpop.eup %15465  ;;  %v11052_v24 = vadd.f32 1.0, %v15464_v52  ;;  %v11123_v35 = vmul.f32 %v11115_v62, %v20408_v59 }
0x3a5e   :  { %v11128_v11 = vsub.f32 %v20390_v2, %v11120_v63  ;;  %v15468_v54 = vpop.eup %15467  ;;  %v11110_v56 = vmul.f32 %v15466_v20, %v20440_v3  ;;  %v11122_v58 = vmul.f32 %v11114_v10, %v20401_v53 }
0x3a5f   :  { %v15470_v6 = vpop.eup %15469  ;;  %v11053_v21 = vadd.f32 1.0, %v15468_v54  ;;  %15471 = vrcp.f32 %v11052_v24  ;;  %v11131_v2 = vsub.f32 %v20408_v59, %v11123_v35 }
0x3a60   :  { %v11118_v15 = vmul.f32 %v11110_v56, %v20380_v25  ;;  %v11111_v3 = vmul.f32 %v15470_v6, %v20447_v12  ;;  %v11130_v51 = vsub.f32 %v20401_v53, %v11122_v58 }
0x3a61   :  { %15473 = vrcp.f32 %v11053_v21 }
0x3a62   :  { %v11119_v40 = vmul.f32 %v11111_v3, %v20382_v41  ;;  %v11126_v1 = vsub.f32 %v20380_v25, %v11118_v15 }
0x3a64   :  { %v11127_v62 = vsub.f32 %v20382_v41, %v11119_v40 }
0x3a69   :  { %v15472_v53 = vpop.eup %15471 }
0x3a6a   :  { %v11116_v25 = vmul.f32 %v15472_v53, %v20452_v46 }
0x3a6b   :  { %v15474_v20 = vpop.eup %15473 }
0x3aa8   :  { %v11157_v9 = vpop.permute.xlu1 %11156 }
0x3aa9   :  { %v11177_v8 = vadd.f32 %v11157_v9, %v11129_v22  ;;  %v11155_v19 = vpop.permute.xlu0 %11154  ;;  %v11124_v9 = vmul.f32 %v11116_v25, %v20417_v26 }
0x3aaa   :  { %v11176_v47 = vadd.f32 %v11155_v19, %v11128_v11  ;;  %v11117_v11 = vmul.f32 %v15474_v20, %v20456_v37 }
0x3aab   :  { %v11185_v13 = vsel %vm210_vm1, %v11177_v8, %v20050_v16  ;;  %v11132_v54 = vsub.f32 %v20417_v26, %v11124_v9 }
0x3aac   :  { %v11184_v50 = vsel %vm210_vm1, %v11176_v47, %v20053_v30  ;;  %v11125_v41 = vmul.f32 %v11117_v11, %v20419_v32 }
0x3aad   :  { %14001 = vmatprep.mubr.msk.f32.mxu1 %vm80_vm0, %v11184_v50 }
0x3aae   :  { %14002 = vmatmul.mubr.msk.f32.vlgmr.msra.gmra.mrb[152].mxu1 %vm80_vm0, %v11185_v13  ;;  %v11133_v35 = vsub.f32 %v20419_v32, %v11125_v41  ;;  %v15599_v32 = vld [vmem:[%s20712_s3 + $0x2] ss:$0 sm:$0xff] }
0x3aaf   :  { %v11161_v36 = vpop.permute.xlu1 %11160 }
0x3ab0   :  { %v11179_v55 = vadd.f32 %v11161_v36, %v11131_v2  ;;  %v11159_v31 = vpop.permute.xlu0 %11158 }
0x3ab1   :  { %v11178_v60 = vadd.f32 %v11159_v31, %v11130_v51 }
0x3ab2   :  { %v11187_v12 = vsel %vm210_vm1, %v11179_v55, %v20065_v57 }
0x3ab3   :  { %v11186_v33 = vsel %vm210_vm1, %v11178_v60, %v20067_v7 }
0x3ab4   :  { %14004 = vmatprep.mubr.msk.f32.mxu1 %vm80_vm0, %v11186_v33  ;;  %v11151_v59 = vpop.permute.xlu0 %11150 }
0x3ab5   :  { %v11174_v63 = vadd.f32 %v11151_v59, %v11126_v1  ;;  %14005 = vmatmul.mubr.msk.f32.gmra.mrb[154].mxu1 %vm80_vm0, %v11187_v12 }
0x3ab7   :  { %v11182_v52 = vsel %vm210_vm1, %v11174_v63, %v20041_v45 }
0x3ab8   :  { %13998 = vmatprep.mubr.msk.f32.mxu0 %vm80_vm0, %v11182_v52  ;;  %v11153_v22 = vpop.permute.xlu0 %11152 }
0x3ab9   :  { %v11175_v10 = vadd.f32 %v11153_v22, %v11127_v62 }
0x3abb   :  { %v11183_v24 = vsel %vm210_vm1, %v11175_v10, %v20039_v14 }
0x3abc   :  { %13999 = vmatmul.mubr.msk.f32.vlgmr.msra.gmra.mrb[160].mxu0 %vm80_vm0, %v11183_v24 }
0x3abe   :  { %v11163_v8 = vpop.permute.xlu1 %11162 }
0x3abf   :  { %v11180_v19 = vadd.f32 %v11163_v8, %v11132_v54 }
0x3ac1   :  { %v11188_v46 = vsel %vm210_vm1, %v11180_v19, %v20091_v28 }
0x3ac2   :  { %v11165_v47 = vpop.permute.xlu1 %11164  ;;  %14007 = vmatprep.mubr.msk.f32.mxu1 %vm80_vm0, %v11188_v46 }
0x3ac3   :  { %v11181_v56 = vadd.f32 %v11165_v47, %v11133_v35 }
0x3ac5   :  { %v11189_v58 = vsel %vm210_vm1, %v11181_v56, %v20089_v61 }
0x3ac6   :  { %14008 = vmatmul.mubr.msk.f32.gmra.mrb[156].mxu1 %vm80_vm0, %v11189_v58 }
0x3b81   :  { %v14003_v37 = vpop.f32.mrb[152].mxu1 }
0x3b82   :  { %v11290_v26 = vpop.f32.mrb[153].mxu1  ;;  %v20519_v3 = vadd.f32 %v15599_v32, %v14003_v37 }
0x3b83   :  { %v20521_v36 = vadd.f32 %v15599_v32, %v11290_v26 }
0x3b84   :  { %v12258_v12 = vmul.f32 -1.442695, %v20519_v3 }
0x3b85   :  { %v12257_v63 = vmul.f32 -1.442695, %v20521_v36 }
0x3b88   :  { %v14006_v6 = vpop.f32.mrb[154].mxu1 }
0x3b89   :  { %v11300_v21 = vpop.f32.mrb[155].mxu1  ;;  %v20527_v51 = vadd.f32 %v15599_v32, %v14006_v6 }
0x3b8a   :  { %v20529_v55 = vadd.f32 %v15599_v32, %v11300_v21 }
0x3b8b   :  { %v12260_v53 = vmul.f32 -1.442695, %v20527_v51 }
0x3b8c   :  { %v12259_v52 = vmul.f32 -1.442695, %v20529_v55 }
0x3b8f   :  { %v14000_v50 = vpop.f32.mrb[160].mxu0 }
0x3b90   :  { %v20511_v13 = vadd.f32 %v15599_v32, %v14000_v50  ;;  %v11280_v2 = vpop.f32.mrb[161].mxu0 }
0x3b91   :  { %v20513_v15 = vadd.f32 %v15599_v32, %v11280_v2 }
0x3b92   :  { %11377 = vrot.lane.b32.xlu1 %v20511_v13, %s15607_s14  ;;  %v12256_v1 = vmul.f32 -1.442695, %v20511_v13 }
0x3b93   :  { %11375 = vrot.lane.b32.xlu0 %v20513_v15, %s15607_s14  ;;  %v12255_v59 = vmul.f32 -1.442695, %v20513_v15 }
0x3b94   :  { %15475 = vpow2.f32 %v12256_v1 }
0x3b95   :  { %15477 = vpow2.f32 %v12255_v59 }
0x3b96   :  { %11381 = vrot.lane.b32.xlu1 %v20519_v3, %s15607_s14  ;;  %15479 = vpow2.f32 %v12258_v12 }
0x3b97   :  { %11379 = vrot.lane.b32.xlu0 %v20521_v36, %s15607_s14  ;;  %15481 = vpow2.f32 %v12257_v63 }
0x3b98   :  { %15483 = vpow2.f32 %v12260_v53 }
0x3b99   :  { %v14009_v31 = vpop.f32.mrb[156].mxu1  ;;  %15485 = vpow2.f32 %v12259_v52 }
0x3b9a   :  { %11385 = vrot.lane.b32.xlu1 %v20527_v51, %s15607_s14  ;;  %v20535_v60 = vadd.f32 %v15599_v32, %v14009_v31  ;;  %v11310_v40 = vpop.f32.mrb[157].mxu1 }
0x3b9b   :  { %11383 = vrot.lane.b32.xlu0 %v20529_v55, %s15607_s14  ;;  %v20537_v33 = vadd.f32 %v15599_v32, %v11310_v40 }
0x3b9c   :  { %v12262_v22 = vmul.f32 -1.442695, %v20535_v60 }
0x3b9d   :  { %v12261_v25 = vmul.f32 -1.442695, %v20537_v33 }
0x3b9e   :  { %11389 = vrot.lane.b32.xlu1 %v20535_v60, %s15607_s14  ;;  %v15476_v62 = vpop.eup %15475  ;;  %15487 = vpow2.f32 %v12262_v22 }
0x3b9f   :  { %11387 = vrot.lane.b32.xlu0 %v20537_v33, %s15607_s14  ;;  %v15478_v10 = vpop.eup %15477  ;;  %v11344_v20 = vadd.f32 1.0, %v15476_v62  ;;  %15489 = vpow2.f32 %v12261_v25 }
0x3ba0   :  { %v15480_v24 = vpop.eup %15479  ;;  %v11343_v9 = vadd.f32 1.0, %v15478_v10 }
0x3ba1   :  { %v15482_v11 = vpop.eup %15481  ;;  %v11346_v54 = vadd.f32 1.0, %v15480_v24  ;;  %15491 = vrcp.f32 %v11344_v20 }
0x3ba2   :  { %v15484_v41 = vpop.eup %15483  ;;  %v11345_v8 = vadd.f32 1.0, %v15482_v11  ;;  %15493 = vrcp.f32 %v11343_v9 }
0x3ba3   :  { %v15486_v19 = vpop.eup %15485  ;;  %15495 = vrcp.f32 %v11346_v54  ;;  %v11348_v35 = vadd.f32 1.0, %v15484_v41 }
0x3ba4   :  { %15497 = vrcp.f32 %v11345_v8  ;;  %v11347_v46 = vadd.f32 1.0, %v15486_v19  ;;  %v15600_v8 = vld [vmem:[%s20711_s1 + $0x1c8] sm:$0xff] }
0x3ba5   :  { %15499 = vrcp.f32 %v11348_v35 }
0x3ba6   :  { %15501 = vrcp.f32 %v11347_v46 }
0x3ba8   :  { %v15488_v47 = vpop.eup %15487 }
0x3ba9   :  { %v15490_v56 = vpop.eup %15489  ;;  %v11350_v37 = vadd.f32 1.0, %v15488_v47 }
0x3baa   :  { %v11349_v21 = vadd.f32 1.0, %v15490_v56 }
0x3bab   :  { %v20551_v58 = vpop.eup %15491  ;;  %15503 = vrcp.f32 %v11350_v37 }
0x3bac   :  { %v20553_v6 = vpop.eup %15493  ;;  %15505 = vrcp.f32 %v11349_v21 }
0x3bad   :  { %v20558_v31 = vpop.eup %15495 }
0x3bae   :  { %v20561_v1 = vpop.eup %15497 }
0x3baf   :  { %v20566_v53 = vpop.eup %15499 }
0x3bb0   :  { %v20569_v62 = vpop.eup %15501 }
0x3bb5   :  { %v20575_v20 = vpop.eup %15503 }
0x3bb6   :  { %v20577_v9 = vpop.eup %15505 }
0x3c04   :  { %v11378_v26 = vpop.permute.xlu1 %11377 }
0x3c05   :  { %v11400_v50 = vmul.f32 %v20551_v58, %v11378_v26  ;;  %v11376_v32 = vpop.permute.xlu0 %11375 }
0x3c06   :  { %v11399_v2 = vmul.f32 %v20553_v6, %v11376_v32 }
0x3c07   :  { %11417 = vrot.lane.b32.xlu1 %v11400_v50, %s15609_s15 }
0x3c08   :  { %v11382_v40 = vpop.permute.xlu1 %11381  ;;  %11415 = vrot.lane.b32.xlu0 %v11399_v2, %s15609_s15 }
0x3c09   :  { %v11402_v59 = vmul.f32 %v20558_v31, %v11382_v40  ;;  %v11380_v12 = vpop.permute.xlu0 %11379 }
0x3c0a   :  { %v11401_v63 = vmul.f32 %v20561_v1, %v11380_v12 }
0x3c0b   :  { %11421 = vrot.lane.b32.xlu1 %v11402_v59, %s15609_s15 }
0x3c0c   :  { %v11386_v52 = vpop.permute.xlu1 %11385  ;;  %11419 = vrot.lane.b32.xlu0 %v11401_v63, %s15609_s15 }
0x3c0d   :  { %v11404_v22 = vmul.f32 %v20566_v53, %v11386_v52  ;;  %v11384_v10 = vpop.permute.xlu0 %11383 }
0x3c0e   :  { %v11403_v25 = vmul.f32 %v20569_v62, %v11384_v10 }
0x3c0f   :  { %11425 = vrot.lane.b32.xlu1 %v11404_v22, %s15609_s15  ;;  %v11456_v22 = vsub.f32 1.0, %v20551_v58 }
0x3c10   :  { %11423 = vrot.lane.b32.xlu0 %v11403_v25, %s15609_s15  ;;  %v11390_v24 = vpop.permute.xlu1 %11389  ;;  %v11455_v25 = vsub.f32 1.0, %v20553_v6 }
0x3c11   :  { %v11406_v11 = vmul.f32 %v20575_v20, %v11390_v24  ;;  %v11388_v54 = vpop.permute.xlu0 %11387  ;;  %v11504_v24 = vmul.f32 %v20551_v58, %v20039_v14 }
0x3c12   :  { %v11405_v41 = vmul.f32 %v20577_v9, %v11388_v54 }
0x3c13   :  { %11429 = vrot.lane.b32.xlu1 %v11406_v11, %s15609_s15 }
0x3c14   :  { %11427 = vrot.lane.b32.xlu0 %v11405_v41, %s15609_s15  ;;  %v11503_v41 = vmul.f32 %v20553_v6, %v20041_v45  ;;  %v11505_v6 = vmul.f32 %v20561_v1, %v20053_v30 }
0x3c17   :  { %11524 = vperm.xlu1 %14754, %v15600_v8  }
0x3c18   :  { %11520 = vperm.xlu0 %14753, %v20207_v18  }
0x3c1b   :  { %11528 = vperm.xlu1 %14754, %v20218_v42  }
0x3c1c   :  { %11532 = vperm.xlu0 %14753, %v20213_v44  }
0x3c1f   :  { %11536 = vperm.xlu1 %14754, %v20230_v43  }
0x3c20   :  { %11540 = vperm.xlu0 %14753, %v20225_v17  }
0x3c23   :  { %11544 = vperm.xlu1 %14754, %v20242_v49  }
0x3c24   :  { %11548 = vperm.xlu0 %14753, %v20237_v23  }
0x3c27   :  { %11560 = vperm.xlu1 %14754, %v10677_v48  }
0x3c28   :  { %11564 = vperm.xlu0 %14753, %v10678_v38  }
0x3c2b   :  { %11568 = vperm.xlu1 %14754, %v10679_v5  }
0x3c2c   :  { %11572 = vperm.xlu0 %14753, %v10680_v39  }
0x3c2f   :  { %11576 = vperm.xlu1 %14754, %v10681_v27  }
0x3c30   :  { %11580 = vperm.xlu0 %14753, %v10682_v34  }
0x3c33   :  { %11584 = vperm.xlu1 %14754, %v10683_v4  }
0x3c34   :  { %11588 = vperm.xlu0 %14753, %v10684_v0  }
0x3c79   :  { %v11418_v29 = vpop.permute.xlu1 %11417 }
0x3c7a   :  { %v11440_v18 = vadd.f32 %v11418_v29, %v20511_v13  ;;  %v11416_v42 = vpop.permute.xlu0 %11415 }
0x3c7b   :  { %v11439_v48 = vadd.f32 %v11416_v42, %v20513_v15 }
0x3c7c   :  { %15507 = vtanh.f32 %v11440_v18  ;;  %v11458_v18 = vsub.f32 1.0, %v20558_v31 }
0x3c7d   :  { %15509 = vtanh.f32 %v11439_v48  ;;  %v11422_v44 = vpop.permute.xlu1 %11421 }
0x3c7e   :  { %v11442_v43 = vadd.f32 %v11422_v44, %v20519_v3  ;;  %v11420_v38 = vpop.permute.xlu0 %11419  ;;  %v11457_v44 = vsub.f32 1.0, %v20561_v1 }
0x3c7f   :  { %v11441_v17 = vadd.f32 %v11420_v38, %v20521_v36 }
0x3c80   :  { %15511 = vtanh.f32 %v11442_v43 }
0x3c81   :  { %15513 = vtanh.f32 %v11441_v17  ;;  %v11426_v49 = vpop.permute.xlu1 %11425  ;;  %v11506_v17 = vmul.f32 %v20558_v31, %v20050_v16 }
0x3c82   :  { %v11444_v23 = vadd.f32 %v11426_v49, %v20527_v51  ;;  %v11424_v5 = vpop.permute.xlu0 %11423 }
0x3c83   :  { %v11443_v39 = vadd.f32 %v11424_v5, %v20529_v55 }
0x3c84   :  { %15515 = vtanh.f32 %v11444_v23 }
0x3c85   :  { %15517 = vtanh.f32 %v11443_v39  ;;  %v11430_v4 = vpop.permute.xlu1 %11429 }
0x3c86   :  { %v15508_v27 = vpop.eup %15507  ;;  %v11446_v0 = vadd.f32 %v11430_v4, %v20535_v60  ;;  %v11428_v13 = vpop.permute.xlu0 %11427  ;;  %v11460_v4 = vsub.f32 1.0, %v20566_v53 }
0x3c87   :  { %v15510_v34 = vpop.eup %15509  ;;  %11473 = vrot.lane.b32.xlu0 %v15508_v27, %s15605_s11  ;;  %v11445_v15 = vadd.f32 %v11428_v13, %v20537_v33 }
0x3c88   :  { %11471 = vrot.lane.b32.xlu1 %v15510_v34, %s15605_s11  ;;  %15519 = vtanh.f32 %v11446_v0 }
0x3c89   :  { %15521 = vtanh.f32 %v11445_v15  ;;  %v11459_v15 = vsub.f32 1.0, %v20569_v62 }
0x3c8a   :  { %v15512_v3 = vpop.eup %15511 }
0x3c8b   :  { %v15514_v36 = vpop.eup %15513  ;;  %11477 = vrot.lane.b32.xlu0 %v15512_v3, %s15605_s11 }
0x3c8c   :  { %11475 = vrot.lane.b32.xlu1 %v15514_v36, %s15605_s11 }
0x3c8e   :  { %v15516_v51 = vpop.eup %15515 }
0x3c8f   :  { %v15518_v55 = vpop.eup %15517  ;;  %11481 = vrot.lane.b32.xlu0 %v15516_v51, %s15605_s11 }
0x3c90   :  { %11479 = vrot.lane.b32.xlu1 %v15518_v55, %s15605_s11 }
0x3c92   :  { %v15520_v60 = vpop.eup %15519 }
0x3c93   :  { %v15522_v19 = vpop.eup %15521  ;;  %11485 = vrot.lane.b32.xlu0 %v15520_v60, %s15605_s11  ;;  %v11507_v60 = vmul.f32 %v20569_v62, %v20067_v7  ;;  %v11461_v62 = vsub.f32 1.0, %v20577_v9 }
0x3c94   :  { %11483 = vrot.lane.b32.xlu1 %v15522_v19, %s15605_s11 }
0x3c96   :  { %v11525_v35 = vpop.permute.xlu1 %11524 }
0x3c97   :  { %v11521_v33 = vpop.permute.xlu0 %11520 }
0x3c9a   :  { %v11529_v47 = vpop.permute.xlu1 %11528 }
0x3c9b   :  { %v11533_v46 = vpop.permute.xlu0 %11532 }
0x3c9e   :  { %v11537_v37 = vpop.permute.xlu1 %11536 }
0x3c9f   :  { %v11541_v56 = vpop.permute.xlu0 %11540 }
0x3ca2   :  { %v20627_v21 = vpop.permute.xlu1 %11544 }
0x3ca3   :  { %v20625_v26 = vpop.permute.xlu0 %11548 }
0x3ca6   :  { %v11561_v32 = vpop.permute.xlu1 %11560 }
0x3ca7   :  { %v11565_v50 = vpop.permute.xlu0 %11564  ;;  %v11591_v23 = vmul.f32 %v11561_v32, %v20041_v45  ;;  %v11508_v45 = vmul.f32 %v20566_v53, %v20065_v57  ;;  %v11462_v32 = vsub.f32 1.0, %v20575_v20 }
0x3ca8   :  { %v11592_v43 = vmul.f32 %v11565_v50, %v20039_v14 }
0x3caa   :  { %v11569_v40 = vpop.permute.xlu1 %11568 }
0x3cab   :  { %v11573_v2 = vpop.permute.xlu0 %11572  ;;  %v11593_v1 = vmul.f32 %v11569_v40, %v20053_v30 }
0x3cac   :  { %v11594_v31 = vmul.f32 %v11573_v2, %v20050_v16 }
0x3cae   :  { %v11577_v12 = vpop.permute.xlu1 %11576 }
0x3caf   :  { %v11581_v59 = vpop.permute.xlu0 %11580  ;;  %v11595_v30 = vmul.f32 %v11577_v12, %v20067_v7 }
0x3cb0   :  { %v11596_v50 = vmul.f32 %v11581_v59, %v20065_v57 }
0x3cb2   :  { %v20631_v52 = vpop.permute.xlu1 %11584 }
0x3cb3   :  { %v20629_v63 = vpop.permute.xlu0 %11588 }
0x3cf9   :  { %v11474_v10 = vpop.permute.xlu0 %11473 }
0x3cfa   :  { %v11496_v11 = vmul.f32 %v11474_v10, %v11456_v22  ;;  %v11472_v54 = vpop.permute.xlu1 %11471  ;;  %v11510_v22 = vmul.f32 %v20575_v20, %v20089_v61  ;;  %v11597_v20 = vmul.f32 %v20631_v52, %v20091_v28 }
0x3cfb   :  { %v11495_v8 = vmul.f32 %v11472_v54, %v11455_v25 }
0x3cfc   :  { %v11512_v29 = vadd.f32 %v11504_v24, %v11496_v11 }
0x3cfd   :  { %v11511_v42 = vadd.f32 %v11503_v41, %v11495_v8  ;;  %v11478_v48 = vpop.permute.xlu0 %11477 }
0x3cfe   :  { %v11552_v38 = vmul.f32 %v11525_v35, %v11512_v29  ;;  %v11498_v58 = vmul.f32 %v11478_v48, %v11458_v18  ;;  %v11476_v49 = vpop.permute.xlu1 %11475 }
0x3cff   :  { %v11551_v5 = vmul.f32 %v11521_v33, %v11511_v42  ;;  %v11497_v39 = vmul.f32 %v11476_v49, %v11457_v44 }
0x3d00   :  { %v11600_v27 = vadd.f32 %v11592_v43, %v11552_v38  ;;  %v11514_v34 = vadd.f32 %v11506_v17, %v11498_v58 }
0x3d01   :  { %v11599_v0 = vadd.f32 %v11591_v23, %v11551_v5  ;;  %v11513_v13 = vadd.f32 %v11505_v6, %v11497_v39  ;;  %v11482_v14 = vpop.permute.xlu0 %11481 }
0x3d02   :  { %v11554_v3 = vmul.f32 %v11533_v46, %v11514_v34  ;;  %v11500_v36 = vmul.f32 %v11482_v14, %v11460_v4  ;;  %v11480_v51 = vpop.permute.xlu1 %11479  ;;  %11617 = vrot.lane.b32.xlu0 %v11600_v27, %s15605_s11 }
0x3d03   :  { %v11553_v55 = vmul.f32 %v11529_v47, %v11513_v13  ;;  %v11499_v19 = vmul.f32 %v11480_v51, %v11459_v15  ;;  %11615 = vrot.lane.b32.xlu1 %v11599_v0, %s15605_s11 }
0x3d04   :  { %v11602_v33 = vadd.f32 %v11594_v31, %v11554_v3  ;;  %v11516_v35 = vadd.f32 %v11508_v45, %v11500_v36 }
0x3d05   :  { %v11601_v16 = vadd.f32 %v11593_v1, %v11553_v55  ;;  %v11515_v46 = vadd.f32 %v11507_v60, %v11499_v19  ;;  %v11486_v2 = vpop.permute.xlu0 %11485 }
0x3d06   :  { %v11556_v53 = vmul.f32 %v11541_v56, %v11516_v35  ;;  %11621 = vrot.lane.b32.xlu0 %v11602_v33, %s15605_s11  ;;  %v11502_v10 = vmul.f32 %v11486_v2, %v11462_v32  ;;  %v11484_v25 = vpop.permute.xlu1 %11483  ;;  %v11509_v56 = vmul.f32 %v20577_v9, %v20091_v28 }
0x3d07   :  { %v11555_v47 = vmul.f32 %v11537_v37, %v11515_v46  ;;  %11619 = vrot.lane.b32.xlu1 %v11601_v16, %s15605_s11  ;;  %v11501_v59 = vmul.f32 %v11484_v25, %v11461_v62  ;;  %v11598_v37 = vmul.f32 %v20629_v63, %v20089_v61 }
0x3d08   :  { %v11604_v40 = vadd.f32 %v11596_v50, %v11556_v53  ;;  %v11518_v24 = vadd.f32 %v11510_v22, %v11502_v10 }
0x3d09   :  { %v11603_v57 = vadd.f32 %v11595_v30, %v11555_v47  ;;  %v11517_v7 = vadd.f32 %v11509_v56, %v11501_v59 }
0x3d0a   :  { %11625 = vrot.lane.b32.xlu0 %v11604_v40, %s15605_s11  ;;  %v11558_v12 = vmul.f32 %v20625_v26, %v11518_v24 }
0x3d0b   :  { %11623 = vrot.lane.b32.xlu1 %v11603_v57, %s15605_s11  ;;  %v11557_v11 = vmul.f32 %v20627_v21, %v11517_v7 }
0x3d0c   :  { %v11606_v54 = vadd.f32 %v11598_v37, %v11558_v12 }
0x3d0d   :  { %v11605_v41 = vadd.f32 %v11597_v20, %v11557_v11 }
0x3d0e   :  { %11629 = vrot.lane.b32.xlu0 %v11606_v54, %s15605_s11 }
0x3d0f   :  { %11627 = vrot.lane.b32.xlu1 %v11605_v41, %s15605_s11 }
0x3d74   :  { %v11618_v9 = vpop.permute.xlu0 %11617 }
0x3d75   :  { %12264 = vst.msk [vmem:[%s20713_s4 + $0x1c8] sm:$0xff] %vm210_vm1, %v11618_v9  ;;  %v11616_v61 = vpop.permute.xlu1 %11615 }
0x3d76   :  { %12263 = vst.msk [vmem:[%s20713_s4 + $0x1c0] sm:$0xff] %vm210_vm1, %v11616_v61 }
0x3d78   :  { %v11622_v28 = vpop.permute.xlu0 %11621 }
0x3d79   :  { %12266 = vst.msk [vmem:[%s20713_s4 + $0x1d8] sm:$0xff] %vm210_vm1, %v11622_v28  ;;  %v11620_v26 = vpop.permute.xlu1 %11619 }
0x3d7a   :  { %12265 = vst.msk [vmem:[%s20713_s4 + $0x1d0] sm:$0xff] %vm210_vm1, %v11620_v26 }
0x3d7c   :  { %v11626_v21 = vpop.permute.xlu0 %11625 }
0x3d7d   :  { %12268 = vst.msk [vmem:[%s20713_s4 + $0x1e8] sm:$0xff] %vm210_vm1, %v11626_v21  ;;  %v11624_v63 = vpop.permute.xlu1 %11623 }
0x3d7e   :  { %12267 = vst.msk [vmem:[%s20713_s4 + $0x1e0] sm:$0xff] %vm210_vm1, %v11624_v63 }
0x3d80   :  { %v11630_v52 = vpop.permute.xlu0 %11629 }
0x3d81   :  { %12270 = vst.msk [vmem:[%s20713_s4 + $0x1f8] sm:$0xff] %vm210_vm1, %v11630_v52  ;;  %v11628_v8 = vpop.permute.xlu1 %11627 }
0x3d82   :  { %12269 = vst.msk [vmem:[%s20713_s4 + $0x1f0] sm:$0xff] %vm210_vm1, %v11628_v8 }

</bundles_post_ra>
